<compile_context>
chip_gen: v7x
topology: tpu7x:2x2x1
jax: 0.10.0
libtpu: 0.0.40
codegen_flags: <defaults>
</compile_context>

<pallas_src>
import functools

import numpy as np
import jax
import jax.numpy as jnp
from jax.experimental import pallas as pl
from jax.experimental.pallas import tpu as pltpu

NEG_SLOPE = 0.2
BN_EPS = 1e-4        # KAIR BatchNorm2d eps
LANE = 128
TAIL_START = 5       # conv5.. + classifier are fused into one pallas_call


def _round_up(x, m):
    return ((x + m - 1) // m) * m


def _conv_out(h, k, stride):
    pad = (k - 1) // 2
    return (h + 2 * pad - k) // stride + 1


# ---------------------------------------------------------------------------
# Pallas kernel 1: fused (X @ W' + c) [+ LeakyReLU(0.2)]  -- head conv layers
# (bias / eval-mode BN folded into W', c at init)
# ---------------------------------------------------------------------------
def _fused_matmul_kernel(x_ref, w_ref, c_ref, o_ref, *, apply_act):
    y = jnp.dot(x_ref[...], w_ref[...], preferred_element_type=jnp.float32)
    y = y + c_ref[...]                       # f32 epilogue (v5e: no bf16 VALU)
    if apply_act:
        y = jnp.where(y >= 0.0, y, NEG_SLOPE * y)
    o_ref[...] = y.astype(o_ref.dtype)


def fused_matmul(x, w_bf16, c_f32, *, apply_act, out_dtype=jnp.bfloat16):
    """x: (M, K) ; w: (K, N) bf16 with N % 128 == 0 ; c: (N,) f32 -> (M, N)."""
    M, K = x.shape
    Kw, N = w_bf16.shape
    assert K == Kw and N % LANE == 0, (K, Kw, N)

    if x.dtype != jnp.bfloat16:
        x = x.astype(jnp.bfloat16)

    # bf16 sublane packing -> round M to 16; give the "parallel" M axis >= 2
    # grid steps when there is enough work so v7x's 2nd TensorCore participates.
    m16 = _round_up(max(M, 16), 16)
    if m16 >= 256:
        tile_m = min(1024, _round_up(pl.cdiv(m16, 2), 16))
    else:
        tile_m = m16
    m_pad = _round_up(m16, tile_m)
    if m_pad != M:
        x = jnp.pad(x, ((0, m_pad - M), (0, 0)))

    out = pl.pallas_call(
        functools.partial(_fused_matmul_kernel, apply_act=apply_act),
        out_shape=jax.ShapeDtypeStruct((m_pad, N), out_dtype),
        grid_spec=pltpu.PrefetchScalarGridSpec(
            num_scalar_prefetch=0,
            grid=(m_pad // tile_m,),
            in_specs=[
                pl.BlockSpec((tile_m, K), lambda i: (i, 0)),  # X tile (bf16, real K)
                pl.BlockSpec((K, N), lambda i: (0, 0)),       # folded W (bf16)
                pl.BlockSpec((1, N), lambda i: (0, 0)),       # folded bias (f32)
            ],
            out_specs=pl.BlockSpec((tile_m, N), lambda i: (i, 0)),
        ),
        compiler_params=pltpu.CompilerParams(
            dimension_semantics=("parallel",),   # M tiles independent -> v7x 2 TCs
        ),
    )(x, w_bf16, c_f32.reshape(1, N))
    return out[:M] if m_pad != M else out


# ---------------------------------------------------------------------------
# Pallas kernel 2: fused deep tail -- conv5..conv9 (as dense matrices) + fc0 +
# LeakyReLU + fc1, all weights resident in VMEM, single grid step.
# ---------------------------------------------------------------------------
def _tail_kernel(*refs, acts):
    x_ref = refs[0]
    o_ref = refs[-1]
    wcs = refs[1:-1]
    n_layers = len(acts)
    h = x_ref[...]                                       # bf16 (M, K0)
    for i in range(n_layers):
        w = wcs[2 * i][...]
        c = wcs[2 * i + 1][...]
        y = jnp.dot(h, w, preferred_element_type=jnp.float32) + c
        if acts[i]:
            y = jnp.where(y >= 0.0, y, NEG_SLOPE * y)    # LeakyReLU(0.2) in f32
        h = y.astype(jnp.bfloat16) if i + 1 < n_layers else y
    o_ref[...] = h.astype(o_ref.dtype)


def fused_tail(x, layers):
    """x: (B, K0). layers: list of (W bf16 (K,N), c f32 (N,), act bool) -> (B, 1) f32."""
    M, K0 = x.shape
    if x.dtype != jnp.bfloat16:
        x = x.astype(jnp.bfloat16)
    m_pad = _round_up(max(M, 16), 16)
    if m_pad != M:
        x = jnp.pad(x, ((0, m_pad - M), (0, 0)))

    acts = tuple(bool(a) for _, _, a in layers)
    n_out = layers[-1][0].shape[1]

    in_specs = [pl.BlockSpec((m_pad, K0), lambda i: (0, 0))]
    operands = [x]
    k_prev = K0
    for w, c, _ in layers:
        k, n = w.shape
        assert k == k_prev and n % LANE == 0, (k, k_prev, n)
        in_specs.append(pl.BlockSpec((k, n), lambda i: (0, 0)))
        in_specs.append(pl.BlockSpec((1, n), lambda i: (0, 0)))
        operands.append(w)
        operands.append(c.reshape(1, n))
        k_prev = n

    out = pl.pallas_call(
        functools.partial(_tail_kernel, acts=acts),
        out_shape=jax.ShapeDtypeStruct((m_pad, n_out), jnp.float32),
        grid_spec=pltpu.PrefetchScalarGridSpec(
            num_scalar_prefetch=0,
            grid=(1,),
            in_specs=in_specs,
            out_specs=pl.BlockSpec((m_pad, n_out), lambda i: (0, 0)),
        ),
        compiler_params=pltpu.CompilerParams(
            dimension_semantics=("arbitrary",),
            vmem_limit_bytes=32 * 1024 * 1024,
        ),
    )(*operands)
    return out[:M, :1]


# ---------------------------------------------------------------------------
# Glue: im2col patch extraction on the REAL input channels (pad + strided
# slices, no compute).  TODO(synk): fuse into the kernel at real scale.
# ---------------------------------------------------------------------------
def extract_patches(x, cin, k, stride, pad):
    """x: (N,H,W,C>=cin) -> ((N*Ho*Wo, k*k*cin), (N,Ho,Wo)); K order (kh,kw,c)."""
    xp = jnp.pad(x[..., :cin], ((0, 0), (pad, pad), (pad, pad), (0, 0)))
    n, hp, wp, c = xp.shape
    ho = (hp - k) // stride + 1
    wo = (wp - k) // stride + 1
    cols = []
    for dh in range(k):
        for dw in range(k):
            cols.append(xp[:, dh:dh + stride * (ho - 1) + 1:stride,
                           dw:dw + stride * (wo - 1) + 1:stride, :])
    patches = jnp.concatenate(cols, axis=-1)             # (N, Ho, Wo, k*k*cin)
    return patches.reshape(n * ho * wo, k * k * c), (n, ho, wo)


def conv_layer(x_nhwc, layer):
    """Conv2d (+ folded BN + LeakyReLU) via im2col + fused Pallas matmul."""
    k, stride, cin = layer["k"], layer["stride"], layer["cin"]
    pad = (k - 1) // 2
    patches, (n, ho, wo) = extract_patches(x_nhwc, cin, k, stride, pad)
    y = fused_matmul(patches, layer["w"], layer["c"], apply_act=layer["act"])
    return y.reshape(n, ho, wo, layer["w"].shape[1])


# ---------------------------------------------------------------------------
# Model definition (weights folded / dense-lowered once at init)
# ---------------------------------------------------------------------------
def conv_specs(in_nc, base_nc):
    # (cin, cout, kernel, stride, has_bn_and_act)
    return [
        (in_nc,       base_nc,     3, 1, False),  # conv0: 'C' (no BN, no act)
        (base_nc,     base_nc,     4, 2, True),   # conv1: 'CBL'
        (base_nc,     base_nc * 2, 3, 1, True),   # conv2
        (base_nc * 2, base_nc * 2, 4, 2, True),   # conv3
        (base_nc * 2, base_nc * 4, 3, 1, True),   # conv4
        (base_nc * 4, base_nc * 4, 4, 2, True),   # conv5
        (base_nc * 4, base_nc * 8, 3, 1, True),   # conv6
        (base_nc * 8, base_nc * 8, 4, 2, True),   # conv7
        (base_nc * 8, base_nc * 8, 3, 1, True),   # conv8
        (base_nc * 8, base_nc * 8, 4, 2, True),   # conv9
    ]


def _bn_scale_shift(rc):
    if rc["bn"]:
        scale = rc["gamma"] / jnp.sqrt(rc["var"] + BN_EPS)
        shift = rc["beta"] - rc["mean"] * scale
    else:
        scale = jnp.ones((rc["cout"],), jnp.float32)
        shift = jnp.zeros((rc["cout"],), jnp.float32)
    return scale, shift


def _fold_head_conv(w, b, scale, shift, cout_pad):
    """torch (cout,cin,k,k) + folded BN -> ((k*k*cin, cout_pad) bf16, (cout_pad,) f32)."""
    cout, cin, k, _ = w.shape
    w2 = jnp.transpose(w * scale[:, None, None, None], (2, 3, 1, 0))  # (k,k,cin,cout)
    wp = jnp.zeros((k, k, cin, cout_pad), jnp.float32).at[..., :cout].set(w2)
    c = jnp.zeros((cout_pad,), jnp.float32).at[:cout].set(b * scale + shift)
    return wp.reshape(k * k * cin, cout_pad).astype(jnp.bfloat16), c


def _conv_as_dense(w, b, scale, shift, h_in, stride, pad):
    """Lower a folded conv on an (h_in,h_in) map to a dense NHWC-flat matrix.

    Returns (mat (h*h*cin, ho*wo*cout) f32, bias (ho*wo*cout,) f32, ho).
    Built by applying the conv to an identity basis (init-time only).
    """
    cout, cin, k, _ = w.shape
    wf = jnp.transpose(w * scale[:, None, None, None], (2, 3, 1, 0))  # HWIO
    cf = b * scale + shift
    din = h_in * h_in * cin
    eye = jnp.eye(din, dtype=jnp.float32).reshape(din, h_in, h_in, cin)
    y = jax.lax.conv_general_dilated(
        eye, wf, window_strides=(stride, stride),
        padding=((pad, pad), (pad, pad)),
        dimension_numbers=("NHWC", "HWIO", "NHWC"))
    _, ho, wo, _ = y.shape
    return y.reshape(din, ho * wo * cout), jnp.tile(cf, ho * wo), ho


def _pad_tail_matrix(mat, b, k_pad, n_pad):
    K, N = mat.shape
    assert K <= k_pad and N <= n_pad
    m = jnp.zeros((k_pad, n_pad), jnp.float32).at[:K, :N].set(mat)
    bb = jnp.zeros((n_pad,), jnp.float32).at[:N].set(b)
    return m.astype(jnp.bfloat16), bb


def init_params(key, in_nc=3, base_nc=8, spatial=32, hidden=100):
    specs = conv_specs(in_nc, base_nc)

    # ---- raw (torch-layout) parameters, kept for the f32 reference ----
    raw_convs = []
    for (cin, cout, k, stride, has_bn) in specs:
        key, kw, kb, kg, kbe, km, kv = jax.random.split(key, 7)
        fan_in = cin * k * k
        w = jax.random.normal(kw, (cout, cin, k, k), jnp.float32) * np.sqrt(2.0 / fan_in)
        b = 0.02 * jax.random.normal(kb, (cout,), jnp.float32)
        if has_bn:
            gamma = 1.0 + 0.05 * jax.random.normal(kg, (cout,), jnp.float32)
            beta = 0.02 * jax.random.normal(kbe, (cout,), jnp.float32)
            mean = 0.05 * jax.random.normal(km, (cout,), jnp.float32)
            var = 1.0 + 0.1 * jnp.abs(jax.random.normal(kv, (cout,), jnp.float32))
        else:
            gamma = jnp.ones((cout,), jnp.float32)
            beta = jnp.zeros((cout,), jnp.float32)
            mean = jnp.zeros((cout,), jnp.float32)
            var = jnp.ones((cout,), jnp.float32)
        raw_convs.append(dict(w=w, b=b, gamma=gamma, beta=beta, mean=mean, var=var,
                              k=k, stride=stride, cin=cin, cout=cout, bn=has_bn))

    # final spatial size after all convs
    h_final = spatial
    for rc in raw_convs:
        h_final = _conv_out(h_final, rc["k"], rc["stride"])
    cout_last = base_nc * 8
    flat_dim = cout_last * h_final * h_final

    key, k1, k2, k3, k4 = jax.random.split(key, 5)
    fc0_w = jax.random.normal(k1, (hidden, flat_dim), jnp.float32) * np.sqrt(2.0 / flat_dim)
    fc0_b = 0.02 * jax.random.normal(k2, (hidden,), jnp.float32)
    fc1_w = jax.random.normal(k3, (1, hidden), jnp.float32) * np.sqrt(1.0 / hidden)
    fc1_b = 0.02 * jax.random.normal(k4, (1,), jnp.float32)

    # ---- head layers: folded conv as im2col matmul, real-cin K, N padded ----
    head = []
    h_sp = spatial
    for li in range(TAIL_START):
        rc = raw_convs[li]
        scale, shift = _bn_scale_shift(rc)
        cout_pad = _round_up(rc["cout"], LANE)
        wf, cf = _fold_head_conv(rc["w"], rc["b"], scale, shift, cout_pad)
        head.append(dict(w=wf, c=cf, k=rc["k"], stride=rc["stride"],
                         cin=rc["cin"], act=rc["bn"]))
        h_sp = _conv_out(h_sp, rc["k"], rc["stride"])

    # ---- tail: conv5..conv9 lowered to dense matrices + fc0/fc1, chained with
    #      lane-padded (128) intermediate widths (padding cols/rows are zero) ----
    tail = []
    tail_cin = raw_convs[TAIL_START]["cin"]
    k_pad = h_sp * h_sp * tail_cin            # real flatten dim of the tail input
    for li in range(TAIL_START, len(raw_convs)):
        rc = raw_convs[li]
        scale, shift = _bn_scale_shift(rc)
        pad = (rc["k"] - 1) // 2
        mat, bvec, h_sp = _conv_as_dense(rc["w"], rc["b"], scale, shift,
                                         h_sp, rc["stride"], pad)
        n_pad = _round_up(mat.shape[1], LANE)
        m_p, b_p = _pad_tail_matrix(mat, bvec, k_pad, n_pad)
        tail.append((m_p, b_p, True))
        k_pad = n_pad

    # fc0: permute columns from torch NCHW flatten order to NHWC flatten order
    # used inside the tail kernel, then pad rows/cols to lane multiples.
    w0 = fc0_w.reshape(hidden, cout_last, h_sp, h_sp)
    w0 = jnp.transpose(w0, (2, 3, 1, 0)).reshape(h_sp * h_sp * cout_last, hidden)
    hidden_pad = _round_up(hidden, LANE)
    m0, b0 = _pad_tail_matrix(w0, fc0_b, k_pad, hidden_pad)
    tail.append((m0, b0, True))                                   # Linear -> LReLU
    m1, b1 = _pad_tail_matrix(fc1_w.T, fc1_b, hidden_pad, LANE)
    tail.append((m1, b1, False))                                  # final Linear

    raw = dict(convs=raw_convs, fc0_w=fc0_w, fc0_b=fc0_b, fc1_w=fc1_w, fc1_b=fc1_b)
    return dict(head=head, tail=tail, tail_cin=tail_cin, raw=raw)


def discriminator_forward(x_nchw, params):
    # Accept NCHW (PyTorch convention); compute in NHWC, bf16 end-to-end.
    x = jnp.transpose(x_nchw, (0, 2, 3, 1)).astype(jnp.bfloat16)   # cast once
    for layer in params["head"]:
        x = conv_layer(x, layer)
    n = x.shape[0]
    flat = x[..., :params["tail_cin"]].reshape(n, -1)   # real channels only
    return fused_tail(flat, params["tail"])             # (B, 1) f32


# ---------------------------------------------------------------------------
# Pure-JAX float32 reference (independent path, for correctness assertion)
# ---------------------------------------------------------------------------
def reference_forward(x_nchw, raw):
    x = jnp.transpose(x_nchw, (0, 2, 3, 1)).astype(jnp.float32)
    for rc in raw["convs"]:
        k, s = rc["k"], rc["stride"]
        pad = (k - 1) // 2
        y = jax.lax.conv_general_dilated(
            x, jnp.transpose(rc["w"], (2, 3, 1, 0)), (s, s),
            ((pad, pad), (pad, pad)),
            dimension_numbers=("NHWC", "HWIO", "NHWC")) + rc["b"]
        if rc["bn"]:
            y = (y - rc["mean"]) * rc["gamma"] / jnp.sqrt(rc["var"] + BN_EPS) + rc["beta"]
            y = jnp.where(y >= 0.0, y, NEG_SLOPE * y)
        x = y
    b = x.shape[0]
    flat = jnp.transpose(x, (0, 3, 1, 2)).reshape(b, -1)   # torch NCHW flatten
    h = flat @ raw["fc0_w"].T + raw["fc0_b"]
    h = jnp.where(h >= 0.0, h, NEG_SLOPE * h)
    return h @ raw["fc1_w"].T + raw["fc1_b"]


if __name__ == "__main__":
    key = jax.random.PRNGKey(0)
    kx, kp = jax.random.split(key)

    # Small synthetic config (architecture-faithful): in_nc=3, base_nc=8,
    # 32x32 -> five stride-2 stages -> 1x1 -> Linear(64,100) -> LReLU -> Linear(100,1).
    batch, in_nc, base_nc, spatial = 2, 3, 8, 32
    x = jax.random.normal(kx, (batch, in_nc, spatial, spatial), jnp.float32)
    params = init_params(kp, in_nc=in_nc, base_nc=base_nc, spatial=spatial)

    fwd = jax.jit(lambda xx: discriminator_forward(xx, params))
    out = jax.block_until_ready(fwd(x))
    assert out.shape == (batch, 1), out.shape
    assert bool(jnp.all(jnp.isfinite(out)))

    ref = jax.jit(lambda xx: reference_forward(xx, params["raw"]))(x)
    err = float(jnp.max(jnp.abs(out - ref)))
    scale = float(jnp.max(jnp.abs(ref))) + 1e-3
    assert err <= 0.1 * scale + 0.05, (err, scale)   # bf16 activations vs f32 ref

    print("KERNEL_OK")
</pallas_src>

<mosaic_0001>
module attributes {stable_mosaic.version = 11 : i64} {
  func.func @_fused_matmul_kernel(%arg0: i32, %arg1: memref<1024x27xbf16, #tpu.memory_space<vmem>>, %arg2: memref<27x128xbf16, #tpu.memory_space<vmem>>, %arg3: memref<1x128xf32, #tpu.memory_space<vmem>>, %arg4: memref<1024x128xbf16, #tpu.memory_space<vmem>>) attributes {dimension_semantics = [#tpu.dimension_semantics<parallel>], iteration_bounds = array<i64: 2>, scalar_prefetch = 0 : i64, scratch_operands = 0 : i64, tpu.core_type = #tpu.core_type<tc>, window_params = [{transform_indices = @transform_0, window_bounds = array<i64: 1024, 27>}, {pipeline_mode = #tpu.pipeline_mode<synchronous>, transform_indices = @transform_1, window_bounds = array<i64: 27, 128>}, {pipeline_mode = #tpu.pipeline_mode<synchronous>, transform_indices = @transform_2, window_bounds = array<i64: 1, 128>}, {transform_indices = @transform_3, window_bounds = array<i64: 1024, 128>}]} {
    %c0 = arith.constant 0 : index
    %c0_0 = arith.constant 0 : index
    %0 = vector.load %arg1[%c0, %c0_0] : memref<1024x27xbf16, #tpu.memory_space<vmem>>, vector<1024x27xbf16>
    %c0_1 = arith.constant 0 : index
    %c0_2 = arith.constant 0 : index
    %1 = vector.load %arg2[%c0_1, %c0_2] : memref<27x128xbf16, #tpu.memory_space<vmem>>, vector<27x128xbf16>
    %cst = arith.constant dense<0.000000e+00> : vector<1024x128xf32>
    %2 = tpu.matmul %0, %1, %cst {dimension_numbers = #tpu.dot_dimension_numbers<[1], [0], [0], [1], [0, 0, 1, 1], [], []>} : vector<1024x27xbf16>, vector<27x128xbf16>, vector<1024x128xf32> -> vector<1024x128xf32>
    %c0_3 = arith.constant 0 : index
    %c0_4 = arith.constant 0 : index
    %3 = vector.load %arg3[%c0_3, %c0_4] : memref<1x128xf32, #tpu.memory_space<vmem>>, vector<1x128xf32>
    %4 = vector.broadcast %3 : vector<1x128xf32> to vector<1024x128xf32>
    %5 = arith.addf %2, %4 : vector<1024x128xf32>
    %6 = arith.truncf %5 : vector<1024x128xf32> to vector<1024x128xbf16>
    %c0_5 = arith.constant 0 : index
    %c0_6 = arith.constant 0 : index
    %7 = vector.load %arg4[%c0_5, %c0_6] : memref<1024x128xbf16, #tpu.memory_space<vmem>>, vector<1024x128xbf16>
    tpu.vector_store %arg4[%c0_5, %c0_6], %6 {strides = array<i32>} : memref<1024x128xbf16, #tpu.memory_space<vmem>>, vector<1024x128xbf16>,
    return
  }
  func.func @transform_0(%arg0: i32) -> (i32, i32) {
    %c0_i32 = arith.constant 0 : i32
    %c0_i32_0 = arith.constant 0 : i32
    return %arg0, %c0_i32 : i32, i32
  }
  func.func @transform_1(%arg0: i32) -> (i32, i32) {
    %c0_i32 = arith.constant 0 : i32
    %c0_i32_0 = arith.constant 0 : i32
    %c0_i32_1 = arith.constant 0 : i32
    return %c0_i32, %c0_i32_0 : i32, i32
  }
  func.func @transform_2(%arg0: i32) -> (i32, i32) {
    %c0_i32 = arith.constant 0 : i32
    %c0_i32_0 = arith.constant 0 : i32
    %c0_i32_1 = arith.constant 0 : i32
    return %c0_i32, %c0_i32_0 : i32, i32
  }
  func.func @transform_3(%arg0: i32) -> (i32, i32) {
    %c0_i32 = arith.constant 0 : i32
    %c0_i32_0 = arith.constant 0 : i32
    return %arg0, %c0_i32 : i32, i32
  }
}

module attributes {stable_mosaic.version = 11 : i64} {
  func.func @_fused_matmul_kernel(%arg0: i32, %arg1: memref<256x128xbf16, #tpu.memory_space<vmem>>, %arg2: memref<128x128xbf16, #tpu.memory_space<vmem>>, %arg3: memref<1x128xf32, #tpu.memory_space<vmem>>, %arg4: memref<256x128xbf16, #tpu.memory_space<vmem>>) attributes {dimension_semantics = [#tpu.dimension_semantics<parallel>], iteration_bounds = array<i64: 2>, scalar_prefetch = 0 : i64, scratch_operands = 0 : i64, tpu.core_type = #tpu.core_type<tc>, window_params = [{transform_indices = @transform_0, window_bounds = array<i64: 256, 128>}, {pipeline_mode = #tpu.pipeline_mode<synchronous>, transform_indices = @transform_1, window_bounds = array<i64: 128, 128>}, {pipeline_mode = #tpu.pipeline_mode<synchronous>, transform_indices = @transform_2, window_bounds = array<i64: 1, 128>}, {transform_indices = @transform_3, window_bounds = array<i64: 256, 128>}]} {
    %c0 = arith.constant 0 : index
    %c0_0 = arith.constant 0 : index
    %0 = vector.load %arg1[%c0, %c0_0] : memref<256x128xbf16, #tpu.memory_space<vmem>>, vector<256x128xbf16>
    %c0_1 = arith.constant 0 : index
    %c0_2 = arith.constant 0 : index
    %1 = vector.load %arg2[%c0_1, %c0_2] : memref<128x128xbf16, #tpu.memory_space<vmem>>, vector<128x128xbf16>
    %cst = arith.constant dense<0.000000e+00> : vector<256x128xf32>
    %2 = tpu.matmul %0, %1, %cst {dimension_numbers = #tpu.dot_dimension_numbers<[1], [0], [0], [1], [0, 0, 1, 1], [], []>} : vector<256x128xbf16>, vector<128x128xbf16>, vector<256x128xf32> -> vector<256x128xf32>
    %c0_3 = arith.constant 0 : index
    %c0_4 = arith.constant 0 : index
    %3 = vector.load %arg3[%c0_3, %c0_4] : memref<1x128xf32, #tpu.memory_space<vmem>>, vector<1x128xf32>
    %4 = vector.broadcast %3 : vector<1x128xf32> to vector<256x128xf32>
    %5 = arith.addf %2, %4 : vector<256x128xf32>
    %cst_5 = arith.constant 0.000000e+00 : f32
    %6 = vector.broadcast %cst_5 : f32 to vector<256x128xf32>
    %7 = arith.cmpf oge, %5, %6 : vector<256x128xf32>
    %cst_6 = arith.constant 2.000000e-01 : f32
    %8 = vector.broadcast %cst_6 : f32 to vector<256x128xf32>
    %9 = arith.mulf %8, %5 : vector<256x128xf32>
    %10 = arith.select %7, %5, %9 : vector<256x128xi1>, vector<256x128xf32>
    %11 = arith.truncf %10 : vector<256x128xf32> to vector<256x128xbf16>
    %c0_7 = arith.constant 0 : index
    %c0_8 = arith.constant 0 : index
    %12 = vector.load %arg4[%c0_7, %c0_8] : memref<256x128xbf16, #tpu.memory_space<vmem>>, vector<256x128xbf16>
    tpu.vector_store %arg4[%c0_7, %c0_8], %11 {strides = array<i32>} : memref<256x128xbf16, #tpu.memory_space<vmem>>, vector<256x128xbf16>,
    return
  }
  func.func @transform_0(%arg0: i32) -> (i32, i32) {
    %c0_i32 = arith.constant 0 : i32
    %c0_i32_0 = arith.constant 0 : i32
    return %arg0, %c0_i32 : i32, i32
  }
  func.func @transform_1(%arg0: i32) -> (i32, i32) {
    %c0_i32 = arith.constant 0 : i32
    %c0_i32_0 = arith.constant 0 : i32
    %c0_i32_1 = arith.constant 0 : i32
    return %c0_i32, %c0_i32_0 : i32, i32
  }
  func.func @transform_2(%arg0: i32) -> (i32, i32) {
    %c0_i32 = arith.constant 0 : i32
    %c0_i32_0 = arith.constant 0 : i32
    %c0_i32_1 = arith.constant 0 : i32
    return %c0_i32, %c0_i32_0 : i32, i32
  }
  func.func @transform_3(%arg0: i32) -> (i32, i32) {
    %c0_i32 = arith.constant 0 : i32
    %c0_i32_0 = arith.constant 0 : i32
    return %arg0, %c0_i32 : i32, i32
  }
}

module attributes {stable_mosaic.version = 11 : i64} {
  func.func @_fused_matmul_kernel(%arg0: i32, %arg1: memref<256x72xbf16, #tpu.memory_space<vmem>>, %arg2: memref<72x128xbf16, #tpu.memory_space<vmem>>, %arg3: memref<1x128xf32, #tpu.memory_space<vmem>>, %arg4: memref<256x128xbf16, #tpu.memory_space<vmem>>) attributes {dimension_semantics = [#tpu.dimension_semantics<parallel>], iteration_bounds = array<i64: 2>, scalar_prefetch = 0 : i64, scratch_operands = 0 : i64, tpu.core_type = #tpu.core_type<tc>, window_params = [{transform_indices = @transform_0, window_bounds = array<i64: 256, 72>}, {pipeline_mode = #tpu.pipeline_mode<synchronous>, transform_indices = @transform_1, window_bounds = array<i64: 72, 128>}, {pipeline_mode = #tpu.pipeline_mode<synchronous>, transform_indices = @transform_2, window_bounds = array<i64: 1, 128>}, {transform_indices = @transform_3, window_bounds = array<i64: 256, 128>}]} {
    %c0 = arith.constant 0 : index
    %c0_0 = arith.constant 0 : index
    %0 = vector.load %arg1[%c0, %c0_0] : memref<256x72xbf16, #tpu.memory_space<vmem>>, vector<256x72xbf16>
    %c0_1 = arith.constant 0 : index
    %c0_2 = arith.constant 0 : index
    %1 = vector.load %arg2[%c0_1, %c0_2] : memref<72x128xbf16, #tpu.memory_space<vmem>>, vector<72x128xbf16>
    %cst = arith.constant dense<0.000000e+00> : vector<256x128xf32>
    %2 = tpu.matmul %0, %1, %cst {dimension_numbers = #tpu.dot_dimension_numbers<[1], [0], [0], [1], [0, 0, 1, 1], [], []>} : vector<256x72xbf16>, vector<72x128xbf16>, vector<256x128xf32> -> vector<256x128xf32>
    %c0_3 = arith.constant 0 : index
    %c0_4 = arith.constant 0 : index
    %3 = vector.load %arg3[%c0_3, %c0_4] : memref<1x128xf32, #tpu.memory_space<vmem>>, vector<1x128xf32>
    %4 = vector.broadcast %3 : vector<1x128xf32> to vector<256x128xf32>
    %5 = arith.addf %2, %4 : vector<256x128xf32>
    %cst_5 = arith.constant 0.000000e+00 : f32
    %6 = vector.broadcast %cst_5 : f32 to vector<256x128xf32>
    %7 = arith.cmpf oge, %5, %6 : vector<256x128xf32>
    %cst_6 = arith.constant 2.000000e-01 : f32
    %8 = vector.broadcast %cst_6 : f32 to vector<256x128xf32>
    %9 = arith.mulf %8, %5 : vector<256x128xf32>
    %10 = arith.select %7, %5, %9 : vector<256x128xi1>, vector<256x128xf32>
    %11 = arith.truncf %10 : vector<256x128xf32> to vector<256x128xbf16>
    %c0_7 = arith.constant 0 : index
    %c0_8 = arith.constant 0 : index
    %12 = vector.load %arg4[%c0_7, %c0_8] : memref<256x128xbf16, #tpu.memory_space<vmem>>, vector<256x128xbf16>
    tpu.vector_store %arg4[%c0_7, %c0_8], %11 {strides = array<i32>} : memref<256x128xbf16, #tpu.memory_space<vmem>>, vector<256x128xbf16>,
    return
  }
  func.func @transform_0(%arg0: i32) -> (i32, i32) {
    %c0_i32 = arith.constant 0 : i32
    %c0_i32_0 = arith.constant 0 : i32
    return %arg0, %c0_i32 : i32, i32
  }
  func.func @transform_1(%arg0: i32) -> (i32, i32) {
    %c0_i32 = arith.constant 0 : i32
    %c0_i32_0 = arith.constant 0 : i32
    %c0_i32_1 = arith.constant 0 : i32
    return %c0_i32, %c0_i32_0 : i32, i32
  }
  func.func @transform_2(%arg0: i32) -> (i32, i32) {
    %c0_i32 = arith.constant 0 : i32
    %c0_i32_0 = arith.constant 0 : i32
    %c0_i32_1 = arith.constant 0 : i32
    return %c0_i32, %c0_i32_0 : i32, i32
  }
  func.func @transform_3(%arg0: i32) -> (i32, i32) {
    %c0_i32 = arith.constant 0 : i32
    %c0_i32_0 = arith.constant 0 : i32
    return %arg0, %c0_i32 : i32, i32
  }
}

module attributes {stable_mosaic.version = 11 : i64} {
  func.func @_fused_matmul_kernel(%arg0: i32, %arg1: memref<128x256xbf16, #tpu.memory_space<vmem>>, %arg2: memref<256x128xbf16, #tpu.memory_space<vmem>>, %arg3: memref<1x128xf32, #tpu.memory_space<vmem>>, %arg4: memref<128x128xbf16, #tpu.memory_space<vmem>>) attributes {dimension_semantics = [#tpu.dimension_semantics<parallel>], iteration_bounds = array<i64: 1>, scalar_prefetch = 0 : i64, scratch_operands = 0 : i64, tpu.core_type = #tpu.core_type<tc>, window_params = [{transform_indices = @transform_0, window_bounds = array<i64: 128, 256>}, {pipeline_mode = #tpu.pipeline_mode<synchronous>, transform_indices = @transform_1, window_bounds = array<i64: 256, 128>}, {pipeline_mode = #tpu.pipeline_mode<synchronous>, transform_indices = @transform_2, window_bounds = array<i64: 1, 128>}, {transform_indices = @transform_3, window_bounds = array<i64: 128, 128>}]} {
    %c0 = arith.constant 0 : index
    %c0_0 = arith.constant 0 : index
    %0 = vector.load %arg1[%c0, %c0_0] : memref<128x256xbf16, #tpu.memory_space<vmem>>, vector<128x256xbf16>
    %c0_1 = arith.constant 0 : index
    %c0_2 = arith.constant 0 : index
    %1 = vector.load %arg2[%c0_1, %c0_2] : memref<256x128xbf16, #tpu.memory_space<vmem>>, vector<256x128xbf16>
    %cst = arith.constant dense<0.000000e+00> : vector<128x128xf32>
    %2 = tpu.matmul %0, %1, %cst {dimension_numbers = #tpu.dot_dimension_numbers<[1], [0], [0], [1], [0, 0, 1, 1], [], []>} : vector<128x256xbf16>, vector<256x128xbf16>, vector<128x128xf32> -> vector<128x128xf32>
    %c0_3 = arith.constant 0 : index
    %c0_4 = arith.constant 0 : index
    %3 = vector.load %arg3[%c0_3, %c0_4] : memref<1x128xf32, #tpu.memory_space<vmem>>, vector<1x128xf32>
    %4 = vector.broadcast %3 : vector<1x128xf32> to vector<128x128xf32>
    %5 = arith.addf %2, %4 : vector<128x128xf32>
    %cst_5 = arith.constant 0.000000e+00 : f32
    %6 = vector.broadcast %cst_5 : f32 to vector<128x128xf32>
    %7 = arith.cmpf oge, %5, %6 : vector<128x128xf32>
    %cst_6 = arith.constant 2.000000e-01 : f32
    %8 = vector.broadcast %cst_6 : f32 to vector<128x128xf32>
    %9 = arith.mulf %8, %5 : vector<128x128xf32>
    %10 = arith.select %7, %5, %9 : vector<128x128xi1>, vector<128x128xf32>
    %11 = arith.truncf %10 : vector<128x128xf32> to vector<128x128xbf16>
    %c0_7 = arith.constant 0 : index
    %c0_8 = arith.constant 0 : index
    %12 = vector.load %arg4[%c0_7, %c0_8] : memref<128x128xbf16, #tpu.memory_space<vmem>>, vector<128x128xbf16>
    tpu.vector_store %arg4[%c0_7, %c0_8], %11 {strides = array<i32>} : memref<128x128xbf16, #tpu.memory_space<vmem>>, vector<128x128xbf16>,
    return
  }
  func.func @transform_0(%arg0: i32) -> (i32, i32) {
    %c0_i32 = arith.constant 0 : i32
    %c0_i32_0 = arith.constant 0 : i32
    return %arg0, %c0_i32 : i32, i32
  }
  func.func @transform_1(%arg0: i32) -> (i32, i32) {
    %c0_i32 = arith.constant 0 : i32
    %c0_i32_0 = arith.constant 0 : i32
    %c0_i32_1 = arith.constant 0 : i32
    return %c0_i32, %c0_i32_0 : i32, i32
  }
  func.func @transform_2(%arg0: i32) -> (i32, i32) {
    %c0_i32 = arith.constant 0 : i32
    %c0_i32_0 = arith.constant 0 : i32
    %c0_i32_1 = arith.constant 0 : i32
    return %c0_i32, %c0_i32_0 : i32, i32
  }
  func.func @transform_3(%arg0: i32) -> (i32, i32) {
    %c0_i32 = arith.constant 0 : i32
    %c0_i32_0 = arith.constant 0 : i32
    return %arg0, %c0_i32 : i32, i32
  }
}

module attributes {stable_mosaic.version = 11 : i64} {
  func.func @_fused_matmul_kernel(%arg0: i32, %arg1: memref<128x144xbf16, #tpu.memory_space<vmem>>, %arg2: memref<144x128xbf16, #tpu.memory_space<vmem>>, %arg3: memref<1x128xf32, #tpu.memory_space<vmem>>, %arg4: memref<128x128xbf16, #tpu.memory_space<vmem>>) attributes {dimension_semantics = [#tpu.dimension_semantics<parallel>], iteration_bounds = array<i64: 1>, scalar_prefetch = 0 : i64, scratch_operands = 0 : i64, tpu.core_type = #tpu.core_type<tc>, window_params = [{transform_indices = @transform_0, window_bounds = array<i64: 128, 144>}, {pipeline_mode = #tpu.pipeline_mode<synchronous>, transform_indices = @transform_1, window_bounds = array<i64: 144, 128>}, {pipeline_mode = #tpu.pipeline_mode<synchronous>, transform_indices = @transform_2, window_bounds = array<i64: 1, 128>}, {transform_indices = @transform_3, window_bounds = array<i64: 128, 128>}]} {
    %c0 = arith.constant 0 : index
    %c0_0 = arith.constant 0 : index
    %0 = vector.load %arg1[%c0, %c0_0] : memref<128x144xbf16, #tpu.memory_space<vmem>>, vector<128x144xbf16>
    %c0_1 = arith.constant 0 : index
    %c0_2 = arith.constant 0 : index
    %1 = vector.load %arg2[%c0_1, %c0_2] : memref<144x128xbf16, #tpu.memory_space<vmem>>, vector<144x128xbf16>
    %cst = arith.constant dense<0.000000e+00> : vector<128x128xf32>
    %2 = tpu.matmul %0, %1, %cst {dimension_numbers = #tpu.dot_dimension_numbers<[1], [0], [0], [1], [0, 0, 1, 1], [], []>} : vector<128x144xbf16>, vector<144x128xbf16>, vector<128x128xf32> -> vector<128x128xf32>
    %c0_3 = arith.constant 0 : index
    %c0_4 = arith.constant 0 : index
    %3 = vector.load %arg3[%c0_3, %c0_4] : memref<1x128xf32, #tpu.memory_space<vmem>>, vector<1x128xf32>
    %4 = vector.broadcast %3 : vector<1x128xf32> to vector<128x128xf32>
    %5 = arith.addf %2, %4 : vector<128x128xf32>
    %cst_5 = arith.constant 0.000000e+00 : f32
    %6 = vector.broadcast %cst_5 : f32 to vector<128x128xf32>
    %7 = arith.cmpf oge, %5, %6 : vector<128x128xf32>
    %cst_6 = arith.constant 2.000000e-01 : f32
    %8 = vector.broadcast %cst_6 : f32 to vector<128x128xf32>
    %9 = arith.mulf %8, %5 : vector<128x128xf32>
    %10 = arith.select %7, %5, %9 : vector<128x128xi1>, vector<128x128xf32>
    %11 = arith.truncf %10 : vector<128x128xf32> to vector<128x128xbf16>
    %c0_7 = arith.constant 0 : index
    %c0_8 = arith.constant 0 : index
    %12 = vector.load %arg4[%c0_7, %c0_8] : memref<128x128xbf16, #tpu.memory_space<vmem>>, vector<128x128xbf16>
    tpu.vector_store %arg4[%c0_7, %c0_8], %11 {strides = array<i32>} : memref<128x128xbf16, #tpu.memory_space<vmem>>, vector<128x128xbf16>,
    return
  }
  func.func @transform_0(%arg0: i32) -> (i32, i32) {
    %c0_i32 = arith.constant 0 : i32
    %c0_i32_0 = arith.constant 0 : i32
    return %arg0, %c0_i32 : i32, i32
  }
  func.func @transform_1(%arg0: i32) -> (i32, i32) {
    %c0_i32 = arith.constant 0 : i32
    %c0_i32_0 = arith.constant 0 : i32
    %c0_i32_1 = arith.constant 0 : i32
    return %c0_i32, %c0_i32_0 : i32, i32
  }
  func.func @transform_2(%arg0: i32) -> (i32, i32) {
    %c0_i32 = arith.constant 0 : i32
    %c0_i32_0 = arith.constant 0 : i32
    %c0_i32_1 = arith.constant 0 : i32
    return %c0_i32, %c0_i32_0 : i32, i32
  }
  func.func @transform_3(%arg0: i32) -> (i32, i32) {
    %c0_i32 = arith.constant 0 : i32
    %c0_i32_0 = arith.constant 0 : i32
    return %arg0, %c0_i32 : i32, i32
  }
}

module attributes {stable_mosaic.version = 11 : i64} {
  func.func @_tail_kernel(%arg0: i32, %arg1: memref<16x2048xbf16, #tpu.memory_space<vmem>>, %arg2: memref<2048x512xbf16, #tpu.memory_space<vmem>>, %arg3: memref<1x512xf32, #tpu.memory_space<vmem>>, %arg4: memref<512x1024xbf16, #tpu.memory_space<vmem>>, %arg5: memref<1x1024xf32, #tpu.memory_space<vmem>>, %arg6: memref<1024x256xbf16, #tpu.memory_space<vmem>>, %arg7: memref<1x256xf32, #tpu.memory_space<vmem>>, %arg8: memref<256x256xbf16, #tpu.memory_space<vmem>>, %arg9: memref<1x256xf32, #tpu.memory_space<vmem>>, %arg10: memref<256x128xbf16, #tpu.memory_space<vmem>>, %arg11: memref<1x128xf32, #tpu.memory_space<vmem>>, %arg12: memref<128x128xbf16, #tpu.memory_space<vmem>>, %arg13: memref<1x128xf32, #tpu.memory_space<vmem>>, %arg14: memref<128x128xbf16, #tpu.memory_space<vmem>>, %arg15: memref<1x128xf32, #tpu.memory_space<vmem>>, %arg16: memref<16x128xf32, #tpu.memory_space<vmem>>) attributes {dimension_semantics = [#tpu.dimension_semantics<arbitrary>], iteration_bounds = array<i64: 1>, scalar_prefetch = 0 : i64, scratch_operands = 0 : i64, tpu.core_type = #tpu.core_type<tc>, window_params = [{pipeline_mode = #tpu.pipeline_mode<synchronous>, transform_indices = @transform_0, window_bounds = array<i64: 16, 2048>}, {pipeline_mode = #tpu.pipeline_mode<synchronous>, transform_indices = @transform_1, window_bounds = array<i64: 2048, 512>}, {pipeline_mode = #tpu.pipeline_mode<synchronous>, transform_indices = @transform_2, window_bounds = array<i64: 1, 512>}, {pipeline_mode = #tpu.pipeline_mode<synchronous>, transform_indices = @transform_3, window_bounds = array<i64: 512, 1024>}, {pipeline_mode = #tpu.pipeline_mode<synchronous>, transform_indices = @transform_4, window_bounds = array<i64: 1, 1024>}, {pipeline_mode = #tpu.pipeline_mode<synchronous>, transform_indices = @transform_5, window_bounds = array<i64: 1024, 256>}, {pipeline_mode = #tpu.pipeline_mode<synchronous>, transform_indices = @transform_6, window_bounds = array<i64: 1, 256>}, {pipeline_mode = #tpu.pipeline_mode<synchronous>, transform_indices = @transform_7, window_bounds = array<i64: 256, 256>}, {pipeline_mode = #tpu.pipeline_mode<synchronous>, transform_indices = @transform_8, window_bounds = array<i64: 1, 256>}, {pipeline_mode = #tpu.pipeline_mode<synchronous>, transform_indices = @transform_9, window_bounds = array<i64: 256, 128>}, {pipeline_mode = #tpu.pipeline_mode<synchronous>, transform_indices = @transform_10, window_bounds = array<i64: 1, 128>}, {pipeline_mode = #tpu.pipeline_mode<synchronous>, transform_indices = @transform_11, window_bounds = array<i64: 128, 128>}, {pipeline_mode = #tpu.pipeline_mode<synchronous>, transform_indices = @transform_12, window_bounds = array<i64: 1, 128>}, {pipeline_mode = #tpu.pipeline_mode<synchronous>, transform_indices = @transform_13, window_bounds = array<i64: 128, 128>}, {pipeline_mode = #tpu.pipeline_mode<synchronous>, transform_indices = @transform_14, window_bounds = array<i64: 1, 128>}, {pipeline_mode = #tpu.pipeline_mode<synchronous>, transform_indices = @transform_15, window_bounds = array<i64: 16, 128>}]} {
    %c0 = arith.constant 0 : index
    %c0_0 = arith.constant 0 : index
    %0 = vector.load %arg1[%c0, %c0_0] : memref<16x2048xbf16, #tpu.memory_space<vmem>>, vector<16x2048xbf16>
    %c0_1 = arith.constant 0 : index
    %c0_2 = arith.constant 0 : index
    %1 = vector.load %arg2[%c0_1, %c0_2] : memref<2048x512xbf16, #tpu.memory_space<vmem>>, vector<2048x512xbf16>
    %c0_3 = arith.constant 0 : index
    %c0_4 = arith.constant 0 : index
    %2 = vector.load %arg3[%c0_3, %c0_4] : memref<1x512xf32, #tpu.memory_space<vmem>>, vector<1x512xf32>
    %cst = arith.constant dense<0.000000e+00> : vector<16x512xf32>
    %3 = tpu.matmul %0, %1, %cst {dimension_numbers = #tpu.dot_dimension_numbers<[1], [0], [0], [1], [0, 0, 1, 1], [], []>} : vector<16x2048xbf16>, vector<2048x512xbf16>, vector<16x512xf32> -> vector<16x512xf32>
    %4 = vector.broadcast %2 : vector<1x512xf32> to vector<16x512xf32>
    %5 = arith.addf %3, %4 : vector<16x512xf32>
    %cst_5 = arith.constant 0.000000e+00 : f32
    %6 = vector.broadcast %cst_5 : f32 to vector<16x512xf32>
    %7 = arith.cmpf oge, %5, %6 : vector<16x512xf32>
    %cst_6 = arith.constant 2.000000e-01 : f32
    %8 = vector.broadcast %cst_6 : f32 to vector<16x512xf32>
    %9 = arith.mulf %8, %5 : vector<16x512xf32>
    %10 = arith.select %7, %5, %9 : vector<16x512xi1>, vector<16x512xf32>
    %11 = arith.truncf %10 : vector<16x512xf32> to vector<16x512xbf16>
    %c0_7 = arith.constant 0 : index
    %c0_8 = arith.constant 0 : index
    %12 = vector.load %arg4[%c0_7, %c0_8] : memref<512x1024xbf16, #tpu.memory_space<vmem>>, vector<512x1024xbf16>
    %c0_9 = arith.constant 0 : index
    %c0_10 = arith.constant 0 : index
    %13 = vector.load %arg5[%c0_9, %c0_10] : memref<1x1024xf32, #tpu.memory_space<vmem>>, vector<1x1024xf32>
    %cst_11 = arith.constant dense<0.000000e+00> : vector<16x1024xf32>
    %14 = tpu.matmul %11, %12, %cst_11 {dimension_numbers = #tpu.dot_dimension_numbers<[1], [0], [0], [1], [0, 0, 1, 1], [], []>} : vector<16x512xbf16>, vector<512x1024xbf16>, vector<16x1024xf32> -> vector<16x1024xf32>
    %15 = vector.broadcast %13 : vector<1x1024xf32> to vector<16x1024xf32>
    %16 = arith.addf %14, %15 : vector<16x1024xf32>
    %cst_12 = arith.constant 0.000000e+00 : f32
    %17 = vector.broadcast %cst_12 : f32 to vector<16x1024xf32>
    %18 = arith.cmpf oge, %16, %17 : vector<16x1024xf32>
    %cst_13 = arith.constant 2.000000e-01 : f32
    %19 = vector.broadcast %cst_13 : f32 to vector<16x1024xf32>
    %20 = arith.mulf %19, %16 : vector<16x1024xf32>
    %21 = arith.select %18, %16, %20 : vector<16x1024xi1>, vector<16x1024xf32>
    %22 = arith.truncf %21 : vector<16x1024xf32> to vector<16x1024xbf16>
    %c0_14 = arith.constant 0 : index
    %c0_15 = arith.constant 0 : index
    %23 = vector.load %arg6[%c0_14, %c0_15] : memref<1024x256xbf16, #tpu.memory_space<vmem>>, vector<1024x256xbf16>
    %c0_16 = arith.constant 0 : index
    %c0_17 = arith.constant 0 : index
    %24 = vector.load %arg7[%c0_16, %c0_17] : memref<1x256xf32, #tpu.memory_space<vmem>>, vector<1x256xf32>
    %cst_18 = arith.constant dense<0.000000e+00> : vector<16x256xf32>
    %25 = tpu.matmul %22, %23, %cst_18 {dimension_numbers = #tpu.dot_dimension_numbers<[1], [0], [0], [1], [0, 0, 1, 1], [], []>} : vector<16x1024xbf16>, vector<1024x256xbf16>, vector<16x256xf32> -> vector<16x256xf32>
    %26 = vector.broadcast %24 : vector<1x256xf32> to vector<16x256xf32>
    %27 = arith.addf %25, %26 : vector<16x256xf32>
    %cst_19 = arith.constant 0.000000e+00 : f32
    %28 = vector.broadcast %cst_19 : f32 to vector<16x256xf32>
    %29 = arith.cmpf oge, %27, %28 : vector<16x256xf32>
    %cst_20 = arith.constant 2.000000e-01 : f32
    %30 = vector.broadcast %cst_20 : f32 to vector<16x256xf32>
    %31 = arith.mulf %30, %27 : vector<16x256xf32>
    %32 = arith.select %29, %27, %31 : vector<16x256xi1>, vector<16x256xf32>
    %33 = arith.truncf %32 : vector<16x256xf32> to vector<16x256xbf16>
    %c0_21 = arith.constant 0 : index
    %c0_22 = arith.constant 0 : index
    %34 = vector.load %arg8[%c0_21, %c0_22] : memref<256x256xbf16, #tpu.memory_space<vmem>>, vector<256x256xbf16>
    %c0_23 = arith.constant 0 : index
    %c0_24 = arith.constant 0 : index
    %35 = vector.load %arg9[%c0_23, %c0_24] : memref<1x256xf32, #tpu.memory_space<vmem>>, vector<1x256xf32>
    %cst_25 = arith.constant dense<0.000000e+00> : vector<16x256xf32>
    %36 = tpu.matmul %33, %34, %cst_25 {dimension_numbers = #tpu.dot_dimension_numbers<[1], [0], [0], [1], [0, 0, 1, 1], [], []>} : vector<16x256xbf16>, vector<256x256xbf16>, vector<16x256xf32> -> vector<16x256xf32>
    %37 = vector.broadcast %35 : vector<1x256xf32> to vector<16x256xf32>
    %38 = arith.addf %36, %37 : vector<16x256xf32>
    %cst_26 = arith.constant 0.000000e+00 : f32
    %39 = vector.broadcast %cst_26 : f32 to vector<16x256xf32>
    %40 = arith.cmpf oge, %38, %39 : vector<16x256xf32>
    %cst_27 = arith.constant 2.000000e-01 : f32
    %41 = vector.broadcast %cst_27 : f32 to vector<16x256xf32>
    %42 = arith.mulf %41, %38 : vector<16x256xf32>
    %43 = arith.select %40, %38, %42 : vector<16x256xi1>, vector<16x256xf32>
    %44 = arith.truncf %43 : vector<16x256xf32> to vector<16x256xbf16>
    %c0_28 = arith.constant 0 : index
    %c0_29 = arith.constant 0 : index
    %45 = vector.load %arg10[%c0_28, %c0_29] : memref<256x128xbf16, #tpu.memory_space<vmem>>, vector<256x128xbf16>
    %c0_30 = arith.constant 0 : index
    %c0_31 = arith.constant 0 : index
    %46 = vector.load %arg11[%c0_30, %c0_31] : memref<1x128xf32, #tpu.memory_space<vmem>>, vector<1x128xf32>
    %cst_32 = arith.constant dense<0.000000e+00> : vector<16x128xf32>
    %47 = tpu.matmul %44, %45, %cst_32 {dimension_numbers = #tpu.dot_dimension_numbers<[1], [0], [0], [1], [0, 0, 1, 1], [], []>} : vector<16x256xbf16>, vector<256x128xbf16>, vector<16x128xf32> -> vector<16x128xf32>
    %48 = vector.broadcast %46 : vector<1x128xf32> to vector<16x128xf32>
    %49 = arith.addf %47, %48 : vector<16x128xf32>
    %cst_33 = arith.constant 0.000000e+00 : f32
    %50 = vector.broadcast %cst_33 : f32 to vector<16x128xf32>
    %51 = arith.cmpf oge, %49, %50 : vector<16x128xf32>
    %cst_34 = arith.constant 2.000000e-01 : f32
    %52 = vector.broadcast %cst_34 : f32 to vector<16x128xf32>
    %53 = arith.mulf %52, %49 : vector<16x128xf32>
    %54 = arith.select %51, %49, %53 : vector<16x128xi1>, vector<16x128xf32>
    %55 = arith.truncf %54 : vector<16x128xf32> to vector<16x128xbf16>
    %c0_35 = arith.constant 0 : index
    %c0_36 = arith.constant 0 : index
    %56 = vector.load %arg12[%c0_35, %c0_36] : memref<128x128xbf16, #tpu.memory_space<vmem>>, vector<128x128xbf16>
    %c0_37 = arith.constant 0 : index
    %c0_38 = arith.constant 0 : index
    %57 = vector.load %arg13[%c0_37, %c0_38] : memref<1x128xf32, #tpu.memory_space<vmem>>, vector<1x128xf32>
    %cst_39 = arith.constant dense<0.000000e+00> : vector<16x128xf32>
    %58 = tpu.matmul %55, %56, %cst_39 {dimension_numbers = #tpu.dot_dimension_numbers<[1], [0], [0], [1], [0, 0, 1, 1], [], []>} : vector<16x128xbf16>, vector<128x128xbf16>, vector<16x128xf32> -> vector<16x128xf32>
    %59 = vector.broadcast %57 : vector<1x128xf32> to vector<16x128xf32>
    %60 = arith.addf %58, %59 : vector<16x128xf32>
    %cst_40 = arith.constant 0.000000e+00 : f32
    %61 = vector.broadcast %cst_40 : f32 to vector<16x128xf32>
    %62 = arith.cmpf oge, %60, %61 : vector<16x128xf32>
    %cst_41 = arith.constant 2.000000e-01 : f32
    %63 = vector.broadcast %cst_41 : f32 to vector<16x128xf32>
    %64 = arith.mulf %63, %60 : vector<16x128xf32>
    %65 = arith.select %62, %60, %64 : vector<16x128xi1>, vector<16x128xf32>
    %66 = arith.truncf %65 : vector<16x128xf32> to vector<16x128xbf16>
    %c0_42 = arith.constant 0 : index
    %c0_43 = arith.constant 0 : index
    %67 = vector.load %arg14[%c0_42, %c0_43] : memref<128x128xbf16, #tpu.memory_space<vmem>>, vector<128x128xbf16>
    %c0_44 = arith.constant 0 : index
    %c0_45 = arith.constant 0 : index
    %68 = vector.load %arg15[%c0_44, %c0_45] : memref<1x128xf32, #tpu.memory_space<vmem>>, vector<1x128xf32>
    %cst_46 = arith.constant dense<0.000000e+00> : vector<16x128xf32>
    %69 = tpu.matmul %66, %67, %cst_46 {dimension_numbers = #tpu.dot_dimension_numbers<[1], [0], [0], [1], [0, 0, 1, 1], [], []>} : vector<16x128xbf16>, vector<128x128xbf16>, vector<16x128xf32> -> vector<16x128xf32>
    %70 = vector.broadcast %68 : vector<1x128xf32> to vector<16x128xf32>
    %71 = arith.addf %69, %70 : vector<16x128xf32>
    %c0_47 = arith.constant 0 : index
    %c0_48 = arith.constant 0 : index
    %72 = vector.load %arg16[%c0_47, %c0_48] : memref<16x128xf32, #tpu.memory_space<vmem>>, vector<16x128xf32>
    tpu.vector_store %arg16[%c0_47, %c0_48], %71 {strides = array<i32>} : memref<16x128xf32, #tpu.memory_space<vmem>>, vector<16x128xf32>,
    return
  }
  func.func @transform_0(%arg0: i32) -> (i32, i32) {
    %c0_i32 = arith.constant 0 : i32
    %c0_i32_0 = arith.constant 0 : i32
    %c0_i32_1 = arith.constant 0 : i32
    return %c0_i32, %c0_i32_0 : i32, i32
  }
  func.func @transform_1(%arg0: i32) -> (i32, i32) {
    %c0_i32 = arith.constant 0 : i32
    %c0_i32_0 = arith.constant 0 : i32
    %c0_i32_1 = arith.constant 0 : i32
    return %c0_i32, %c0_i32_0 : i32, i32
  }
  func.func @transform_2(%arg0: i32) -> (i32, i32) {
    %c0_i32 = arith.constant 0 : i32
    %c0_i32_0 = arith.constant 0 : i32
    %c0_i32_1 = arith.constant 0 : i32
    return %c0_i32, %c0_i32_0 : i32, i32
  }
  func.func @transform_3(%arg0: i32) -> (i32, i32) {
    %c0_i32 = arith.constant 0 : i32
    %c0_i32_0 = arith.constant 0 : i32
    %c0_i32_1 = arith.constant 0 : i32
    return %c0_i32, %c0_i32_0 : i32, i32
  }
  func.func @transform_4(%arg0: i32) -> (i32, i32) {
    %c0_i32 = arith.constant 0 : i32
    %c0_i32_0 = arith.constant 0 : i32
    %c0_i32_1 = arith.constant 0 : i32
    return %c0_i32, %c0_i32_0 : i32, i32
  }
  func.func @transform_5(%arg0: i32) -> (i32, i32) {
    %c0_i32 = arith.constant 0 : i32
    %c0_i32_0 = arith.constant 0 : i32
    %c0_i32_1 = arith.constant 0 : i32
    return %c0_i32, %c0_i32_0 : i32, i32
  }
  func.func @transform_6(%arg0: i32) -> (i32, i32) {
    %c0_i32 = arith.constant 0 : i32
    %c0_i32_0 = arith.constant 0 : i32
    %c0_i32_1 = arith.constant 0 : i32
    return %c0_i32, %c0_i32_0 : i32, i32
  }
  func.func @transform_7(%arg0: i32) -> (i32, i32) {
    %c0_i32 = arith.constant 0 : i32
    %c0_i32_0 = arith.constant 0 : i32
    %c0_i32_1 = arith.constant 0 : i32
    return %c0_i32, %c0_i32_0 : i32, i32
  }
  func.func @transform_8(%arg0: i32) -> (i32, i32) {
    %c0_i32 = arith.constant 0 : i32
    %c0_i32_0 = arith.constant 0 : i32
    %c0_i32_1 = arith.constant 0 : i32
    return %c0_i32, %c0_i32_0 : i32, i32
  }
  func.func @transform_9(%arg0: i32) -> (i32, i32) {
    %c0_i32 = arith.constant 0 : i32
    %c0_i32_0 = arith.constant 0 : i32
    %c0_i32_1 = arith.constant 0 : i32
    return %c0_i32, %c0_i32_0 : i32, i32
  }
  func.func @transform_10(%arg0: i32) -> (i32, i32) {
    %c0_i32 = arith.constant 0 : i32
    %c0_i32_0 = arith.constant 0 : i32
    %c0_i32_1 = arith.constant 0 : i32
    return %c0_i32, %c0_i32_0 : i32, i32
  }
  func.func @transform_11(%arg0: i32) -> (i32, i32) {
    %c0_i32 = arith.constant 0 : i32
    %c0_i32_0 = arith.constant 0 : i32
    %c0_i32_1 = arith.constant 0 : i32
    return %c0_i32, %c0_i32_0 : i32, i32
  }
  func.func @transform_12(%arg0: i32) -> (i32, i32) {
    %c0_i32 = arith.constant 0 : i32
    %c0_i32_0 = arith.constant 0 : i32
    %c0_i32_1 = arith.constant 0 : i32
    return %c0_i32, %c0_i32_0 : i32, i32
  }
  func.func @transform_13(%arg0: i32) -> (i32, i32) {
    %c0_i32 = arith.constant 0 : i32
    %c0_i32_0 = arith.constant 0 : i32
    %c0_i32_1 = arith.constant 0 : i32
    return %c0_i32, %c0_i32_0 : i32, i32
  }
  func.func @transform_14(%arg0: i32) -> (i32, i32) {
    %c0_i32 = arith.constant 0 : i32
    %c0_i32_0 = arith.constant 0 : i32
    %c0_i32_1 = arith.constant 0 : i32
    return %c0_i32, %c0_i32_0 : i32, i32
  }
  func.func @transform_15(%arg0: i32) -> (i32, i32) {
    %c0_i32 = arith.constant 0 : i32
    %c0_i32_0 = arith.constant 0 : i32
    %c0_i32_1 = arith.constant 0 : i32
    return %c0_i32, %c0_i32_0 : i32, i32
  }
}

</mosaic_0001>

<bundles_post_ra>
// kernel: _lambda_.6
= control target key start
LH: loop header
LB: loop body
LE: loop exit
PB: predicated region body
PF: predicated region fallthrough
CT: control target
= control target key end

     0   :  { %s3173_s12 = smov 0   ;;  %s3532_s0 = inlined_call_operand.vmem [shape: bf16[2048,27], index: 0, kind: input, shape index: {}]   ;;  %s3533_s1 = inlined_call_operand.vmem [shape: bf16[27,128], index: 1, kind: input, shape index: {}]   ;;  %s3534_s2 = inlined_call_operand.vmem [shape: f32[1,128], index: 2, kind: input, shape index: {}]   ;;  %s3535_s3 = inlined_call_operand.vmem [shape: bf16[2048,128], index: 3, kind: output, shape index: {}]  }
   0x1 LB: > { %s2086_s13 = sadd.s32 4294967295, %s3150_s12   ;;  %p2090_p0 = scmp.ge.s32.totalorder %s3150_s12, 1  ;;  %s3150_s12 = sphi %s3173_s12, %s13_s12  }
   0x2   : > { %p138_p1 = scmp.lt.s32.totalorder %s3150_s12, 3 }
   0x4   : > { %p139_p2 = pnand %p2090_p0, %p138_p1 }
   0x5   : > { %v3078_v0 = vld [vmem:[%s3533_s1] sm:$0xff] (!%p139_p2)   ;;  %vm838_vm0 = vcmask (!%p139_p2), 1044480   ;;  %v3079_v1 = vld [vmem:[%s3533_s1 + $0x8] sm:$0x3f] (!%p139_p2)   ;;  %vm839_vm1 = vcmask (!%p139_p2), 1045504   ;;  %s2091_s18 = sshll.u32 (!%p139_p2), %s2086_s13, 7 }
   0x6   : > { %142 = sbr.rel (%p139_p2) target bundleno = 359 (0x167), region = 32  ;;  %2933 = vmatprep.subr.bf16.mxu0 (!%p139_p2), %v3078_v0  ;;  %3065 = vmatprep.subr.bf16.mxu1 (!%p139_p2), %v3078_v0  ;;  %v3152_v2 = vmov (!%p139_p2), 65535   ;;  %p163_p3 = scmp.lt.s32.totalorder (!%p139_p2), %s2091_s18, 255  ;;  %vm645_vm2 = vcmask (!%p139_p2), 220160  }
   0x7   : > { %2934 = vmatpush3.bf16.msra.mxu0 (!%p139_p2), %v3078_v0  ;;  %3067 = vmatpush3.bf16.msra.mxu1 (!%p139_p2), %v3078_v0  ;;  %v840_v3 = vsel (!%p139_p2), %vm838_vm0, 4294967295, %v3152_v2 }
   0x8   : > { %v841_v4 = vsel (!%p139_p2), %vm839_vm1, %v840_v3, 0 }
   0x9   : > { %v843_v5 = vand.u32 (!%p139_p2), %v3079_v1, %v841_v4 }
   0xb   : > { %2935 = vmatprep.subr.bf16.mxu0 (!%p139_p2), %v843_v5  ;;  %3066 = vmatprep.subr.bf16.mxu1 (!%p139_p2), %v843_v5 }
   0xc   : > { %2936 = vmatpush3.bf16.msra.mxu0 (!%p139_p2), %v843_v5  ;;  %3068 = vmatpush3.bf16.msra.mxu1 (!%p139_p2), %v843_v5 }
   0xd   : > { %s3537_s18 = smov (!%p163_p3, %s2091_s18), 255 }
   0xe   : > { %s2092_s19 = sshll.u32 %s3537_s18, 2 }
   0xf   : > { %s3195_s22 = scalar_lea.vmem %s3532_s0, %s2092_s19  ;;  %s3339_s27 = scalar_lea.vmem %s3535_s3, %s2092_s19 }
  0x10   : > { %v3080_v6 = vld [vmem:[%s3195_s22] sm:$0xff]   ;;  %v3082_v8 = vld [vmem:[%s3195_s22 + $0x8] sm:$0xff]   ;;  %v3084_v10 = vld [vmem:[%s3195_s22 + $0x10] sm:$0xff]  }
  0x11   : > { %v3081_v7 = vld [vmem:[%s3195_s22 + $0x100] sm:$0xff]   ;;  %2937 = vmatprep.mubr.msk.bf16.mxu0 %vm645_vm2, %v3080_v6  ;;  %v3083_v9 = vld [vmem:[%s3195_s22 + $0x108] sm:$0xff]   ;;  %v3085_v11 = vld [vmem:[%s3195_s22 + $0x110] sm:$0xff]  }
  0x12   : > { %3001 = vmatprep.mubr.msk.bf16.mxu1 %vm645_vm2, %v3081_v7  ;;  %2938 = vmatmul.mubr.msk.bf16.vlgmr.msra.gmra.mrb[0].mxu0 %vm645_vm2, %v3082_v8  ;;  %v3086_v12 = vld [vmem:[%s3195_s22 + $0x18] sm:$0xff]   ;;  %v3088_v14 = vld [vmem:[%s3195_s22 + $0x20] sm:$0xff]   ;;  %v3090_v16 = vld [vmem:[%s3195_s22 + $0x28] sm:$0xff]  }
  0x13   : > { %3002 = vmatmul.mubr.msk.bf16.vlgmr.msra.gmra.mrb[0].mxu1 %vm645_vm2, %v3083_v9  ;;  %2941 = vmatprep.mubr.msk.bf16.mxu0 %vm645_vm2, %v3084_v10  ;;  %v3087_v13 = vld [vmem:[%s3195_s22 + $0x118] sm:$0xff]   ;;  %v3089_v15 = vld [vmem:[%s3195_s22 + $0x120] sm:$0xff]   ;;  %v3091_v17 = vld [vmem:[%s3195_s22 + $0x128] sm:$0xff]  }
  0x14   : > { %3005 = vmatprep.mubr.msk.bf16.mxu1 %vm645_vm2, %v3085_v11  ;;  %v3092_v18 = vld [vmem:[%s3195_s22 + $0x30] sm:$0xff]   ;;  %v3094_v20 = vld [vmem:[%s3195_s22 + $0x38] sm:$0xff]   ;;  %v3096_v22 = vld [vmem:[%s3195_s22 + $0x40] sm:$0xff]  }
  0x15   : > { %v3093_v19 = vld [vmem:[%s3195_s22 + $0x130] sm:$0xff]   ;;  %v3095_v21 = vld [vmem:[%s3195_s22 + $0x138] sm:$0xff]   ;;  %v3097_v23 = vld [vmem:[%s3195_s22 + $0x140] sm:$0xff]  }
  0x16   : > { %v3098_v24 = vld [vmem:[%s3195_s22 + $0x48] sm:$0xff]   ;;  %v3100_v26 = vld [vmem:[%s3195_s22 + $0x50] sm:$0xff]   ;;  %v3102_v28 = vld [vmem:[%s3195_s22 + $0x58] sm:$0xff]  }
  0x17   : > { %v3099_v25 = vld [vmem:[%s3195_s22 + $0x148] sm:$0xff]   ;;  %v3101_v27 = vld [vmem:[%s3195_s22 + $0x150] sm:$0xff]   ;;  %v3103_v29 = vld [vmem:[%s3195_s22 + $0x158] sm:$0xff]  }
  0x18   : > { %v3104_v30 = vld [vmem:[%s3195_s22 + $0x60] sm:$0xff]   ;;  %v3106_v32 = vld [vmem:[%s3195_s22 + $0x68] sm:$0xff]   ;;  %v3108_v34 = vld [vmem:[%s3195_s22 + $0x70] sm:$0xff]  }
  0x19   : > { %v3105_v31 = vld [vmem:[%s3195_s22 + $0x160] sm:$0xff]   ;;  %v3107_v33 = vld [vmem:[%s3195_s22 + $0x168] sm:$0xff]   ;;  %v3109_v35 = vld [vmem:[%s3195_s22 + $0x170] sm:$0xff]  }
  0x1a   : > { %2942 = vmatmul.mubr.msk.bf16.gmra.mrb[4].mxu0 %vm645_vm2, %v3086_v12  ;;  %v3110_v36 = vld [vmem:[%s3195_s22 + $0x78] sm:$0xff]   ;;  %v3112_v38 = vld [vmem:[%s3195_s22 + $0x80] sm:$0xff]   ;;  %v3114_v40 = vld [vmem:[%s3195_s22 + $0x88] sm:$0xff]  }
  0x1b   : > { %3006 = vmatmul.mubr.msk.bf16.gmra.mrb[4].mxu1 %vm645_vm2, %v3087_v13  ;;  %2945 = vmatprep.mubr.msk.bf16.mxu0 %vm645_vm2, %v3088_v14  ;;  %v3111_v37 = vld [vmem:[%s3195_s22 + $0x178] sm:$0xff]   ;;  %v3113_v39 = vld [vmem:[%s3195_s22 + $0x180] sm:$0xff]   ;;  %v3115_v41 = vld [vmem:[%s3195_s22 + $0x188] sm:$0xff]  }
  0x1c   : > { %3009 = vmatprep.mubr.msk.bf16.mxu1 %vm645_vm2, %v3089_v15  ;;  %v3116_v42 = vld [vmem:[%s3195_s22 + $0x90] sm:$0xff]   ;;  %v3118_v44 = vld [vmem:[%s3195_s22 + $0x98] sm:$0xff]   ;;  %v3120_v46 = vld [vmem:[%s3195_s22 + $0xa0] sm:$0xff]  }
  0x1d   : > { %v3117_v43 = vld [vmem:[%s3195_s22 + $0x190] sm:$0xff]   ;;  %v3119_v45 = vld [vmem:[%s3195_s22 + $0x198] sm:$0xff]   ;;  %v3121_v47 = vld [vmem:[%s3195_s22 + $0x1a0] sm:$0xff]  }
  0x1e   : > { %v3122_v48 = vld [vmem:[%s3195_s22 + $0xa8] sm:$0xff]   ;;  %v3124_v50 = vld [vmem:[%s3195_s22 + $0xb0] sm:$0xff]   ;;  %v3126_v52 = vld [vmem:[%s3195_s22 + $0xb8] sm:$0xff]  }
  0x1f   : > { %v3123_v49 = vld [vmem:[%s3195_s22 + $0x1a8] sm:$0xff]   ;;  %v3125_v51 = vld [vmem:[%s3195_s22 + $0x1b0] sm:$0xff]   ;;  %v3127_v53 = vld [vmem:[%s3195_s22 + $0x1b8] sm:$0xff]  }
  0x20   : > { %v3128_v54 = vld [vmem:[%s3195_s22 + $0xc0] sm:$0xff]   ;;  %v3130_v56 = vld [vmem:[%s3195_s22 + $0xc8] sm:$0xff]   ;;  %v3132_v58 = vld [vmem:[%s3195_s22 + $0xd0] sm:$0xff]  }
  0x21   : > { %v3129_v55 = vld [vmem:[%s3195_s22 + $0x1c0] sm:$0xff]   ;;  %v3131_v57 = vld [vmem:[%s3195_s22 + $0x1c8] sm:$0xff]   ;;  %v3133_v59 = vld [vmem:[%s3195_s22 + $0x1d0] sm:$0xff]  }
  0x22   : > { %2946 = vmatmul.mubr.msk.bf16.gmra.mrb[8].mxu0 %vm645_vm2, %v3090_v16  ;;  %v3134_v60 = vld [vmem:[%s3195_s22 + $0xd8] sm:$0xff]   ;;  %v3136_v62 = vld [vmem:[%s3195_s22 + $0xe0] sm:$0xff]   ;;  %v3138_v0 = vld [vmem:[%s3195_s22 + $0xe8] sm:$0xff]  }
  0x23   : > { %3010 = vmatmul.mubr.msk.bf16.gmra.mrb[8].mxu1 %vm645_vm2, %v3091_v17  ;;  %2949 = vmatprep.mubr.msk.bf16.mxu0 %vm645_vm2, %v3092_v18  ;;  %v3135_v61 = vld [vmem:[%s3195_s22 + $0x1d8] sm:$0xff]   ;;  %v3137_v63 = vld [vmem:[%s3195_s22 + $0x1e0] sm:$0xff]   ;;  %v3139_v1 = vld [vmem:[%s3195_s22 + $0x1e8] sm:$0xff]  }
  0x24   : > { %3013 = vmatprep.mubr.msk.bf16.mxu1 %vm645_vm2, %v3093_v19  ;;  %v3140_v2 = vld [vmem:[%s3195_s22 + $0xf0] sm:$0xff]   ;;  %v3142_v4 = vld [vmem:[%s3195_s22 + $0xf8] sm:$0xff]   ;;  %v3328_v7 = vld [vmem:[%s3534_s2] ss:$0 sm:$0xff] }
  0x25   : > { %v3141_v3 = vld [vmem:[%s3195_s22 + $0x1f0] sm:$0xff]   ;;  %v3143_v5 = vld [vmem:[%s3195_s22 + $0x1f8] sm:$0xff]  }
  0x2a   : > { %2950 = vmatmul.mubr.msk.bf16.gmra.mrb[12].mxu0 %vm645_vm2, %v3094_v20 }
  0x2b   : > { %3014 = vmatmul.mubr.msk.bf16.gmra.mrb[12].mxu1 %vm645_vm2, %v3095_v21  ;;  %2953 = vmatprep.mubr.msk.bf16.mxu0 %vm645_vm2, %v3096_v22 }
  0x2c   : > { %3017 = vmatprep.mubr.msk.bf16.mxu1 %vm645_vm2, %v3097_v23 }
  0x32   : > { %2954 = vmatmul.mubr.msk.bf16.gmra.mrb[16].mxu0 %vm645_vm2, %v3098_v24 }
  0x33   : > { %3018 = vmatmul.mubr.msk.bf16.gmra.mrb[16].mxu1 %vm645_vm2, %v3099_v25  ;;  %2957 = vmatprep.mubr.msk.bf16.mxu0 %vm645_vm2, %v3100_v26 }
  0x34   : > { %3021 = vmatprep.mubr.msk.bf16.mxu1 %vm645_vm2, %v3101_v27 }
  0x3a   : > { %2958 = vmatmul.mubr.msk.bf16.gmra.mrb[20].mxu0 %vm645_vm2, %v3102_v28 }
  0x3b   : > { %3022 = vmatmul.mubr.msk.bf16.gmra.mrb[20].mxu1 %vm645_vm2, %v3103_v29  ;;  %2961 = vmatprep.mubr.msk.bf16.mxu0 %vm645_vm2, %v3104_v30 }
  0x3c   : > { %3025 = vmatprep.mubr.msk.bf16.mxu1 %vm645_vm2, %v3105_v31 }
  0x42   : > { %2962 = vmatmul.mubr.msk.bf16.gmra.mrb[24].mxu0 %vm645_vm2, %v3106_v32 }
  0x43   : > { %3026 = vmatmul.mubr.msk.bf16.gmra.mrb[24].mxu1 %vm645_vm2, %v3107_v33  ;;  %2965 = vmatprep.mubr.msk.bf16.mxu0 %vm645_vm2, %v3108_v34 }
  0x44   : > { %3029 = vmatprep.mubr.msk.bf16.mxu1 %vm645_vm2, %v3109_v35 }
  0x4a   : > { %2966 = vmatmul.mubr.msk.bf16.gmra.mrb[28].mxu0 %vm645_vm2, %v3110_v36 }
  0x4b   : > { %3030 = vmatmul.mubr.msk.bf16.gmra.mrb[28].mxu1 %vm645_vm2, %v3111_v37  ;;  %2969 = vmatprep.mubr.msk.bf16.mxu0 %vm645_vm2, %v3112_v38 }
  0x4c   : > { %3033 = vmatprep.mubr.msk.bf16.mxu1 %vm645_vm2, %v3113_v39 }
  0x52   : > { %2970 = vmatmul.mubr.msk.bf16.gmra.mrb[32].mxu0 %vm645_vm2, %v3114_v40 }
  0x53   : > { %3034 = vmatmul.mubr.msk.bf16.gmra.mrb[32].mxu1 %vm645_vm2, %v3115_v41  ;;  %2973 = vmatprep.mubr.msk.bf16.mxu0 %vm645_vm2, %v3116_v42 }
  0x54   : > { %3037 = vmatprep.mubr.msk.bf16.mxu1 %vm645_vm2, %v3117_v43 }
  0x5a   : > { %2974 = vmatmul.mubr.msk.bf16.gmra.mrb[36].mxu0 %vm645_vm2, %v3118_v44 }
  0x5b   : > { %3038 = vmatmul.mubr.msk.bf16.gmra.mrb[36].mxu1 %vm645_vm2, %v3119_v45  ;;  %2977 = vmatprep.mubr.msk.bf16.mxu0 %vm645_vm2, %v3120_v46 }
  0x5c   : > { %3041 = vmatprep.mubr.msk.bf16.mxu1 %vm645_vm2, %v3121_v47 }
  0x62   : > { %2978 = vmatmul.mubr.msk.bf16.gmra.mrb[40].mxu0 %vm645_vm2, %v3122_v48 }
  0x63   : > { %3042 = vmatmul.mubr.msk.bf16.gmra.mrb[40].mxu1 %vm645_vm2, %v3123_v49  ;;  %2981 = vmatprep.mubr.msk.bf16.mxu0 %vm645_vm2, %v3124_v50 }
  0x64   : > { %3045 = vmatprep.mubr.msk.bf16.mxu1 %vm645_vm2, %v3125_v51 }
  0x6a   : > { %2982 = vmatmul.mubr.msk.bf16.gmra.mrb[44].mxu0 %vm645_vm2, %v3126_v52 }
  0x6b   : > { %3046 = vmatmul.mubr.msk.bf16.gmra.mrb[44].mxu1 %vm645_vm2, %v3127_v53  ;;  %2985 = vmatprep.mubr.msk.bf16.mxu0 %vm645_vm2, %v3128_v54 }
  0x6c   : > { %3049 = vmatprep.mubr.msk.bf16.mxu1 %vm645_vm2, %v3129_v55 }
  0x72   : > { %2986 = vmatmul.mubr.msk.bf16.gmra.mrb[48].mxu0 %vm645_vm2, %v3130_v56 }
  0x73   : > { %3050 = vmatmul.mubr.msk.bf16.gmra.mrb[48].mxu1 %vm645_vm2, %v3131_v57  ;;  %2989 = vmatprep.mubr.msk.bf16.mxu0 %vm645_vm2, %v3132_v58 }
  0x74   : > { %3053 = vmatprep.mubr.msk.bf16.mxu1 %vm645_vm2, %v3133_v59 }
  0x7a   : > { %2990 = vmatmul.mubr.msk.bf16.gmra.mrb[52].mxu0 %vm645_vm2, %v3134_v60 }
  0x7b   : > { %3054 = vmatmul.mubr.msk.bf16.gmra.mrb[52].mxu1 %vm645_vm2, %v3135_v61  ;;  %2993 = vmatprep.mubr.msk.bf16.mxu0 %vm645_vm2, %v3136_v62 }
  0x7c   : > { %3057 = vmatprep.mubr.msk.bf16.mxu1 %vm645_vm2, %v3137_v63 }
  0x82   : > { %2994 = vmatmul.mubr.msk.bf16.gmra.mrb[56].mxu0 %vm645_vm2, %v3138_v0 }
  0x83   : > { %3058 = vmatmul.mubr.msk.bf16.gmra.mrb[56].mxu1 %vm645_vm2, %v3139_v1  ;;  %2997 = vmatprep.mubr.msk.bf16.mxu0 %vm645_vm2, %v3140_v2 }
  0x84   : > { %3061 = vmatprep.mubr.msk.bf16.mxu1 %vm645_vm2, %v3141_v3 }
  0x8a   : > { %2998 = vmatmul.mubr.msk.bf16.gmra.mrb[60].mxu0 %vm645_vm2, %v3142_v4 }
  0x8b   : > { %3062 = vmatmul.mubr.msk.bf16.gmra.mrb[60].mxu1 %vm645_vm2, %v3143_v5 }
  0xe5   : > { %v2939_v6 = vpop.f32.mrb[0].mxu0 }
  0xe6   : > { %v3003_v8 = vpop.f32.mrb[0].mxu1  ;;  %v879_v9 = vpop.f32.mrb[1].mxu0  ;;  %v888_v12 = vadd.f32 %v2939_v6, %v3328_v7 }
  0xe7   : > { %v1135_v10 = vpop.f32.mrb[1].mxu1  ;;  %v2940_v11 = vpop.f32.mrb[2].mxu0  ;;  %v1144_v16 = vadd.f32 %v3003_v8, %v3328_v7  ;;  %v880_v17 = vadd.f32 %v3328_v7, %v879_v9 }
  0xe8   : > { %v891_v13 = vadd.f32 %v2940_v11, %v3328_v7  ;;  %v3004_v14 = vpop.f32.mrb[2].mxu1  ;;  %v882_v15 = vpop.f32.mrb[3].mxu0  ;;  %v1136_v21 = vadd.f32 %v3328_v7, %v1135_v10 }
  0xe9   : > { %v1147_v18 = vadd.f32 %v3004_v14, %v3328_v7  ;;  %v883_v19 = vadd.f32 %v3328_v7, %v882_v15  ;;  %v1138_v20 = vpop.f32.mrb[3].mxu1 }
  0xea   : > { %v2492_v22 = vpack.c.bf16 %v891_v13, %v888_v12  ;;  %v1139_v23 = vadd.f32 %v3328_v7, %v1138_v20 }
  0xeb   : > { %v2652_v24 = vpack.c.bf16 %v1147_v18, %v1144_v16  ;;  %v2487_v25 = vpack.c.bf16 %v883_v19, %v880_v17 }
  0xec   : > { %2804 = vst [vmem:[%s3339_s27 + $0x8] sm:$0xff] %v2492_v22   ;;  %v2647_v26 = vpack.c.bf16 %v1139_v23, %v1136_v21 }
  0xed   : > { %2836 = vst [vmem:[%s3339_s27 + $0x108] sm:$0xff] %v2652_v24   ;;  %2488 = vst [vmem:[%s3339_s27] sm:$0xff] %v2487_v25   ;;  %v2943_v27 = vpop.f32.mrb[4].mxu0 }
  0xee   : > { %2835 = vst [vmem:[%s3339_s27 + $0x100] sm:$0xff] %v2647_v26   ;;  %v3007_v28 = vpop.f32.mrb[4].mxu1  ;;  %v895_v29 = vpop.f32.mrb[5].mxu0  ;;  %v904_v32 = vadd.f32 %v2943_v27, %v3328_v7 }
  0xef   : > { %v1151_v30 = vpop.f32.mrb[5].mxu1  ;;  %v2944_v31 = vpop.f32.mrb[6].mxu0  ;;  %v1160_v36 = vadd.f32 %v3007_v28, %v3328_v7  ;;  %v896_v37 = vadd.f32 %v3328_v7, %v895_v29 }
  0xf0   : > { %v907_v33 = vadd.f32 %v2944_v31, %v3328_v7  ;;  %v3008_v34 = vpop.f32.mrb[6].mxu1  ;;  %v898_v35 = vpop.f32.mrb[7].mxu0  ;;  %v1152_v41 = vadd.f32 %v3328_v7, %v1151_v30 }
  0xf1   : > { %v1163_v38 = vadd.f32 %v3008_v34, %v3328_v7  ;;  %v899_v39 = vadd.f32 %v3328_v7, %v898_v35  ;;  %v1154_v40 = vpop.f32.mrb[7].mxu1 }
  0xf2   : > { %v2502_v42 = vpack.c.bf16 %v907_v33, %v904_v32  ;;  %v1155_v43 = vadd.f32 %v3328_v7, %v1154_v40 }
  0xf3   : > { %v2662_v44 = vpack.c.bf16 %v1163_v38, %v1160_v36  ;;  %v2497_v45 = vpack.c.bf16 %v899_v39, %v896_v37 }
  0xf4   : > { %2806 = vst [vmem:[%s3339_s27 + $0x18] sm:$0xff] %v2502_v42   ;;  %v2657_v46 = vpack.c.bf16 %v1155_v43, %v1152_v41 }
  0xf5   : > { %2838 = vst [vmem:[%s3339_s27 + $0x118] sm:$0xff] %v2662_v44   ;;  %2805 = vst [vmem:[%s3339_s27 + $0x10] sm:$0xff] %v2497_v45   ;;  %v2947_v47 = vpop.f32.mrb[8].mxu0 }
  0xf6   : > { %2837 = vst [vmem:[%s3339_s27 + $0x110] sm:$0xff] %v2657_v46   ;;  %v3011_v48 = vpop.f32.mrb[8].mxu1  ;;  %v911_v49 = vpop.f32.mrb[9].mxu0  ;;  %v920_v52 = vadd.f32 %v2947_v47, %v3328_v7 }
  0xf7   : > { %v1167_v50 = vpop.f32.mrb[9].mxu1  ;;  %v2948_v51 = vpop.f32.mrb[10].mxu0  ;;  %v1176_v56 = vadd.f32 %v3011_v48, %v3328_v7  ;;  %v912_v57 = vadd.f32 %v3328_v7, %v911_v49 }
  0xf8   : > { %v923_v53 = vadd.f32 %v2948_v51, %v3328_v7  ;;  %v3012_v54 = vpop.f32.mrb[10].mxu1  ;;  %v914_v55 = vpop.f32.mrb[11].mxu0  ;;  %v1168_v61 = vadd.f32 %v3328_v7, %v1167_v50 }
  0xf9   : > { %v1179_v58 = vadd.f32 %v3012_v54, %v3328_v7  ;;  %v915_v59 = vadd.f32 %v3328_v7, %v914_v55  ;;  %v1170_v60 = vpop.f32.mrb[11].mxu1 }
  0xfa   : > { %v2512_v62 = vpack.c.bf16 %v923_v53, %v920_v52  ;;  %v1171_v63 = vadd.f32 %v3328_v7, %v1170_v60 }
  0xfb   : > { %v2672_v0 = vpack.c.bf16 %v1179_v58, %v1176_v56  ;;  %v2507_v1 = vpack.c.bf16 %v915_v59, %v912_v57 }
  0xfc   : > { %2808 = vst [vmem:[%s3339_s27 + $0x28] sm:$0xff] %v2512_v62   ;;  %v2667_v2 = vpack.c.bf16 %v1171_v63, %v1168_v61 }
  0xfd   : > { %2840 = vst [vmem:[%s3339_s27 + $0x128] sm:$0xff] %v2672_v0   ;;  %2807 = vst [vmem:[%s3339_s27 + $0x20] sm:$0xff] %v2507_v1   ;;  %v2951_v3 = vpop.f32.mrb[12].mxu0 }
  0xfe   : > { %2839 = vst [vmem:[%s3339_s27 + $0x120] sm:$0xff] %v2667_v2   ;;  %v3015_v4 = vpop.f32.mrb[12].mxu1  ;;  %v927_v5 = vpop.f32.mrb[13].mxu0  ;;  %v936_v9 = vadd.f32 %v2951_v3, %v3328_v7 }
  0xff   : > { %v1183_v6 = vpop.f32.mrb[13].mxu1  ;;  %v2952_v8 = vpop.f32.mrb[14].mxu0  ;;  %v1192_v13 = vadd.f32 %v3015_v4, %v3328_v7  ;;  %v928_v14 = vadd.f32 %v3328_v7, %v927_v5 }
 0x100   : > { %v939_v10 = vadd.f32 %v2952_v8, %v3328_v7  ;;  %v3016_v11 = vpop.f32.mrb[14].mxu1  ;;  %v930_v12 = vpop.f32.mrb[15].mxu0  ;;  %v1184_v18 = vadd.f32 %v3328_v7, %v1183_v6 }
 0x101   : > { %v1195_v15 = vadd.f32 %v3016_v11, %v3328_v7  ;;  %v931_v16 = vadd.f32 %v3328_v7, %v930_v12  ;;  %v1186_v17 = vpop.f32.mrb[15].mxu1 }
 0x102   : > { %v2522_v19 = vpack.c.bf16 %v939_v10, %v936_v9  ;;  %v1187_v20 = vadd.f32 %v3328_v7, %v1186_v17 }
 0x103   : > { %v2682_v21 = vpack.c.bf16 %v1195_v15, %v1192_v13  ;;  %v2517_v22 = vpack.c.bf16 %v931_v16, %v928_v14 }
 0x104   : > { %2810 = vst [vmem:[%s3339_s27 + $0x38] sm:$0xff] %v2522_v19   ;;  %v2677_v23 = vpack.c.bf16 %v1187_v20, %v1184_v18 }
 0x105   : > { %2842 = vst [vmem:[%s3339_s27 + $0x138] sm:$0xff] %v2682_v21   ;;  %2809 = vst [vmem:[%s3339_s27 + $0x30] sm:$0xff] %v2517_v22   ;;  %v2955_v24 = vpop.f32.mrb[16].mxu0 }
 0x106   : > { %2841 = vst [vmem:[%s3339_s27 + $0x130] sm:$0xff] %v2677_v23   ;;  %v3019_v25 = vpop.f32.mrb[16].mxu1  ;;  %v943_v26 = vpop.f32.mrb[17].mxu0  ;;  %v952_v29 = vadd.f32 %v2955_v24, %v3328_v7 }
 0x107   : > { %v1199_v27 = vpop.f32.mrb[17].mxu1  ;;  %v2956_v28 = vpop.f32.mrb[18].mxu0  ;;  %v1208_v33 = vadd.f32 %v3019_v25, %v3328_v7  ;;  %v944_v34 = vadd.f32 %v3328_v7, %v943_v26 }
 0x108   : > { %v955_v30 = vadd.f32 %v2956_v28, %v3328_v7  ;;  %v3020_v31 = vpop.f32.mrb[18].mxu1  ;;  %v946_v32 = vpop.f32.mrb[19].mxu0  ;;  %v1200_v38 = vadd.f32 %v3328_v7, %v1199_v27 }
 0x109   : > { %v1211_v35 = vadd.f32 %v3020_v31, %v3328_v7  ;;  %v947_v36 = vadd.f32 %v3328_v7, %v946_v32  ;;  %v1202_v37 = vpop.f32.mrb[19].mxu1 }
 0x10a   : > { %v2532_v39 = vpack.c.bf16 %v955_v30, %v952_v29  ;;  %v1203_v40 = vadd.f32 %v3328_v7, %v1202_v37 }
 0x10b   : > { %v2692_v41 = vpack.c.bf16 %v1211_v35, %v1208_v33  ;;  %v2527_v42 = vpack.c.bf16 %v947_v36, %v944_v34 }
 0x10c   : > { %2812 = vst [vmem:[%s3339_s27 + $0x48] sm:$0xff] %v2532_v39   ;;  %v2687_v43 = vpack.c.bf16 %v1203_v40, %v1200_v38 }
 0x10d   : > { %2844 = vst [vmem:[%s3339_s27 + $0x148] sm:$0xff] %v2692_v41   ;;  %2811 = vst [vmem:[%s3339_s27 + $0x40] sm:$0xff] %v2527_v42   ;;  %v2959_v44 = vpop.f32.mrb[20].mxu0 }
 0x10e   : > { %2843 = vst [vmem:[%s3339_s27 + $0x140] sm:$0xff] %v2687_v43   ;;  %v3023_v45 = vpop.f32.mrb[20].mxu1  ;;  %v959_v46 = vpop.f32.mrb[21].mxu0  ;;  %v968_v49 = vadd.f32 %v2959_v44, %v3328_v7 }
 0x10f   : > { %v1215_v47 = vpop.f32.mrb[21].mxu1  ;;  %v2960_v48 = vpop.f32.mrb[22].mxu0  ;;  %v1224_v53 = vadd.f32 %v3023_v45, %v3328_v7  ;;  %v960_v54 = vadd.f32 %v3328_v7, %v959_v46 }
 0x110   : > { %v971_v50 = vadd.f32 %v2960_v48, %v3328_v7  ;;  %v3024_v51 = vpop.f32.mrb[22].mxu1  ;;  %v962_v52 = vpop.f32.mrb[23].mxu0  ;;  %v1216_v58 = vadd.f32 %v3328_v7, %v1215_v47 }
 0x111   : > { %v1227_v55 = vadd.f32 %v3024_v51, %v3328_v7  ;;  %v963_v56 = vadd.f32 %v3328_v7, %v962_v52  ;;  %v1218_v57 = vpop.f32.mrb[23].mxu1 }
 0x112   : > { %v2542_v59 = vpack.c.bf16 %v971_v50, %v968_v49  ;;  %v1219_v60 = vadd.f32 %v3328_v7, %v1218_v57 }
 0x113   : > { %v2702_v61 = vpack.c.bf16 %v1227_v55, %v1224_v53  ;;  %v2537_v62 = vpack.c.bf16 %v963_v56, %v960_v54 }
 0x114   : > { %2814 = vst [vmem:[%s3339_s27 + $0x58] sm:$0xff] %v2542_v59   ;;  %v2697_v63 = vpack.c.bf16 %v1219_v60, %v1216_v58 }
 0x115   : > { %2846 = vst [vmem:[%s3339_s27 + $0x158] sm:$0xff] %v2702_v61   ;;  %2813 = vst [vmem:[%s3339_s27 + $0x50] sm:$0xff] %v2537_v62   ;;  %v2963_v0 = vpop.f32.mrb[24].mxu0 }
 0x116   : > { %2845 = vst [vmem:[%s3339_s27 + $0x150] sm:$0xff] %v2697_v63   ;;  %v3027_v1 = vpop.f32.mrb[24].mxu1  ;;  %v975_v2 = vpop.f32.mrb[25].mxu0  ;;  %v984_v5 = vadd.f32 %v2963_v0, %v3328_v7 }
 0x117   : > { %v1231_v3 = vpop.f32.mrb[25].mxu1  ;;  %v2964_v4 = vpop.f32.mrb[26].mxu0  ;;  %v1240_v10 = vadd.f32 %v3027_v1, %v3328_v7  ;;  %v976_v11 = vadd.f32 %v3328_v7, %v975_v2 }
 0x118   : > { %v987_v6 = vadd.f32 %v2964_v4, %v3328_v7  ;;  %v3028_v8 = vpop.f32.mrb[26].mxu1  ;;  %v978_v9 = vpop.f32.mrb[27].mxu0  ;;  %v1232_v15 = vadd.f32 %v3328_v7, %v1231_v3 }
 0x119   : > { %v1243_v12 = vadd.f32 %v3028_v8, %v3328_v7  ;;  %v979_v13 = vadd.f32 %v3328_v7, %v978_v9  ;;  %v1234_v14 = vpop.f32.mrb[27].mxu1 }
 0x11a   : > { %v2552_v16 = vpack.c.bf16 %v987_v6, %v984_v5  ;;  %v1235_v17 = vadd.f32 %v3328_v7, %v1234_v14 }
 0x11b   : > { %v2712_v18 = vpack.c.bf16 %v1243_v12, %v1240_v10  ;;  %v2547_v19 = vpack.c.bf16 %v979_v13, %v976_v11 }
 0x11c   : > { %2816 = vst [vmem:[%s3339_s27 + $0x68] sm:$0xff] %v2552_v16   ;;  %v2707_v20 = vpack.c.bf16 %v1235_v17, %v1232_v15 }
 0x11d   : > { %2848 = vst [vmem:[%s3339_s27 + $0x168] sm:$0xff] %v2712_v18   ;;  %2815 = vst [vmem:[%s3339_s27 + $0x60] sm:$0xff] %v2547_v19   ;;  %v2967_v21 = vpop.f32.mrb[28].mxu0 }
 0x11e   : > { %2847 = vst [vmem:[%s3339_s27 + $0x160] sm:$0xff] %v2707_v20   ;;  %v3031_v22 = vpop.f32.mrb[28].mxu1  ;;  %v991_v23 = vpop.f32.mrb[29].mxu0  ;;  %v1000_v26 = vadd.f32 %v2967_v21, %v3328_v7 }
 0x11f   : > { %v1247_v24 = vpop.f32.mrb[29].mxu1  ;;  %v2968_v25 = vpop.f32.mrb[30].mxu0  ;;  %v1256_v30 = vadd.f32 %v3031_v22, %v3328_v7  ;;  %v992_v31 = vadd.f32 %v3328_v7, %v991_v23 }
 0x120   : > { %v1003_v27 = vadd.f32 %v2968_v25, %v3328_v7  ;;  %v3032_v28 = vpop.f32.mrb[30].mxu1  ;;  %v994_v29 = vpop.f32.mrb[31].mxu0  ;;  %v1248_v35 = vadd.f32 %v3328_v7, %v1247_v24 }
 0x121   : > { %v1259_v32 = vadd.f32 %v3032_v28, %v3328_v7  ;;  %v995_v33 = vadd.f32 %v3328_v7, %v994_v29  ;;  %v1250_v34 = vpop.f32.mrb[31].mxu1 }
 0x122   : > { %v2562_v36 = vpack.c.bf16 %v1003_v27, %v1000_v26  ;;  %v1251_v37 = vadd.f32 %v3328_v7, %v1250_v34 }
 0x123   : > { %v2722_v38 = vpack.c.bf16 %v1259_v32, %v1256_v30  ;;  %v2557_v39 = vpack.c.bf16 %v995_v33, %v992_v31 }
 0x124   : > { %2818 = vst [vmem:[%s3339_s27 + $0x78] sm:$0xff] %v2562_v36   ;;  %v2717_v40 = vpack.c.bf16 %v1251_v37, %v1248_v35 }
 0x125   : > { %2850 = vst [vmem:[%s3339_s27 + $0x178] sm:$0xff] %v2722_v38   ;;  %2817 = vst [vmem:[%s3339_s27 + $0x70] sm:$0xff] %v2557_v39   ;;  %v2971_v41 = vpop.f32.mrb[32].mxu0 }
 0x126   : > { %2849 = vst [vmem:[%s3339_s27 + $0x170] sm:$0xff] %v2717_v40   ;;  %v3035_v42 = vpop.f32.mrb[32].mxu1  ;;  %v1007_v43 = vpop.f32.mrb[33].mxu0  ;;  %v1016_v46 = vadd.f32 %v2971_v41, %v3328_v7 }
 0x127   : > { %v1263_v44 = vpop.f32.mrb[33].mxu1  ;;  %v2972_v45 = vpop.f32.mrb[34].mxu0  ;;  %v1272_v50 = vadd.f32 %v3035_v42, %v3328_v7  ;;  %v1008_v51 = vadd.f32 %v3328_v7, %v1007_v43 }
 0x128   : > { %v1019_v47 = vadd.f32 %v2972_v45, %v3328_v7  ;;  %v3036_v48 = vpop.f32.mrb[34].mxu1  ;;  %v1010_v49 = vpop.f32.mrb[35].mxu0  ;;  %v1264_v55 = vadd.f32 %v3328_v7, %v1263_v44 }
 0x129   : > { %v1275_v52 = vadd.f32 %v3036_v48, %v3328_v7  ;;  %v1011_v53 = vadd.f32 %v3328_v7, %v1010_v49  ;;  %v1266_v54 = vpop.f32.mrb[35].mxu1 }
 0x12a   : > { %v2572_v56 = vpack.c.bf16 %v1019_v47, %v1016_v46  ;;  %v1267_v57 = vadd.f32 %v3328_v7, %v1266_v54 }
 0x12b   : > { %v2732_v58 = vpack.c.bf16 %v1275_v52, %v1272_v50  ;;  %v2567_v59 = vpack.c.bf16 %v1011_v53, %v1008_v51 }
 0x12c   : > { %2820 = vst [vmem:[%s3339_s27 + $0x88] sm:$0xff] %v2572_v56   ;;  %v2727_v60 = vpack.c.bf16 %v1267_v57, %v1264_v55 }
 0x12d   : > { %2852 = vst [vmem:[%s3339_s27 + $0x188] sm:$0xff] %v2732_v58   ;;  %2819 = vst [vmem:[%s3339_s27 + $0x80] sm:$0xff] %v2567_v59   ;;  %v2975_v61 = vpop.f32.mrb[36].mxu0 }
 0x12e   : > { %2851 = vst [vmem:[%s3339_s27 + $0x180] sm:$0xff] %v2727_v60   ;;  %v3039_v62 = vpop.f32.mrb[36].mxu1  ;;  %v1023_v63 = vpop.f32.mrb[37].mxu0  ;;  %v1032_v2 = vadd.f32 %v2975_v61, %v3328_v7 }
 0x12f   : > { %v1279_v0 = vpop.f32.mrb[37].mxu1  ;;  %v2976_v1 = vpop.f32.mrb[38].mxu0  ;;  %v1288_v6 = vadd.f32 %v3039_v62, %v3328_v7  ;;  %v1024_v8 = vadd.f32 %v3328_v7, %v1023_v63 }
 0x130   : > { %v1035_v3 = vadd.f32 %v2976_v1, %v3328_v7  ;;  %v3040_v4 = vpop.f32.mrb[38].mxu1  ;;  %v1026_v5 = vpop.f32.mrb[39].mxu0  ;;  %v1280_v12 = vadd.f32 %v3328_v7, %v1279_v0 }
 0x131   : > { %v1291_v9 = vadd.f32 %v3040_v4, %v3328_v7  ;;  %v1027_v10 = vadd.f32 %v3328_v7, %v1026_v5  ;;  %v1282_v11 = vpop.f32.mrb[39].mxu1 }
 0x132   : > { %v2582_v13 = vpack.c.bf16 %v1035_v3, %v1032_v2  ;;  %v1283_v14 = vadd.f32 %v3328_v7, %v1282_v11 }
 0x133   : > { %v2742_v15 = vpack.c.bf16 %v1291_v9, %v1288_v6  ;;  %v2577_v16 = vpack.c.bf16 %v1027_v10, %v1024_v8 }
 0x134   : > { %2822 = vst [vmem:[%s3339_s27 + $0x98] sm:$0xff] %v2582_v13   ;;  %v2737_v17 = vpack.c.bf16 %v1283_v14, %v1280_v12 }
 0x135   : > { %2854 = vst [vmem:[%s3339_s27 + $0x198] sm:$0xff] %v2742_v15   ;;  %2821 = vst [vmem:[%s3339_s27 + $0x90] sm:$0xff] %v2577_v16   ;;  %v2979_v18 = vpop.f32.mrb[40].mxu0 }
 0x136   : > { %2853 = vst [vmem:[%s3339_s27 + $0x190] sm:$0xff] %v2737_v17   ;;  %v3043_v19 = vpop.f32.mrb[40].mxu1  ;;  %v1039_v20 = vpop.f32.mrb[41].mxu0  ;;  %v1048_v23 = vadd.f32 %v2979_v18, %v3328_v7 }
 0x137   : > { %v1295_v21 = vpop.f32.mrb[41].mxu1  ;;  %v2980_v22 = vpop.f32.mrb[42].mxu0  ;;  %v1304_v27 = vadd.f32 %v3043_v19, %v3328_v7  ;;  %v1040_v28 = vadd.f32 %v3328_v7, %v1039_v20 }
 0x138   : > { %v1051_v24 = vadd.f32 %v2980_v22, %v3328_v7  ;;  %v3044_v25 = vpop.f32.mrb[42].mxu1  ;;  %v1042_v26 = vpop.f32.mrb[43].mxu0  ;;  %v1296_v32 = vadd.f32 %v3328_v7, %v1295_v21 }
 0x139   : > { %v1307_v29 = vadd.f32 %v3044_v25, %v3328_v7  ;;  %v1043_v30 = vadd.f32 %v3328_v7, %v1042_v26  ;;  %v1298_v31 = vpop.f32.mrb[43].mxu1 }
 0x13a   : > { %v2592_v33 = vpack.c.bf16 %v1051_v24, %v1048_v23  ;;  %v1299_v34 = vadd.f32 %v3328_v7, %v1298_v31 }
 0x13b   : > { %v2752_v35 = vpack.c.bf16 %v1307_v29, %v1304_v27  ;;  %v2587_v36 = vpack.c.bf16 %v1043_v30, %v1040_v28 }
 0x13c   : > { %2824 = vst [vmem:[%s3339_s27 + $0xa8] sm:$0xff] %v2592_v33   ;;  %v2747_v37 = vpack.c.bf16 %v1299_v34, %v1296_v32 }
 0x13d   : > { %2856 = vst [vmem:[%s3339_s27 + $0x1a8] sm:$0xff] %v2752_v35   ;;  %2823 = vst [vmem:[%s3339_s27 + $0xa0] sm:$0xff] %v2587_v36   ;;  %v2983_v38 = vpop.f32.mrb[44].mxu0 }
 0x13e   : > { %2855 = vst [vmem:[%s3339_s27 + $0x1a0] sm:$0xff] %v2747_v37   ;;  %v3047_v39 = vpop.f32.mrb[44].mxu1  ;;  %v1055_v40 = vpop.f32.mrb[45].mxu0  ;;  %v1064_v43 = vadd.f32 %v2983_v38, %v3328_v7 }
 0x13f   : > { %v1311_v41 = vpop.f32.mrb[45].mxu1  ;;  %v2984_v42 = vpop.f32.mrb[46].mxu0  ;;  %v1320_v47 = vadd.f32 %v3047_v39, %v3328_v7  ;;  %v1056_v48 = vadd.f32 %v3328_v7, %v1055_v40 }
 0x140   : > { %v1067_v44 = vadd.f32 %v2984_v42, %v3328_v7  ;;  %v3048_v45 = vpop.f32.mrb[46].mxu1  ;;  %v1058_v46 = vpop.f32.mrb[47].mxu0  ;;  %v1312_v52 = vadd.f32 %v3328_v7, %v1311_v41 }
 0x141   : > { %v1323_v49 = vadd.f32 %v3048_v45, %v3328_v7  ;;  %v1059_v50 = vadd.f32 %v3328_v7, %v1058_v46  ;;  %v1314_v51 = vpop.f32.mrb[47].mxu1 }
 0x142   : > { %v2602_v53 = vpack.c.bf16 %v1067_v44, %v1064_v43  ;;  %v1315_v54 = vadd.f32 %v3328_v7, %v1314_v51 }
 0x143   : > { %v2762_v55 = vpack.c.bf16 %v1323_v49, %v1320_v47  ;;  %v2597_v56 = vpack.c.bf16 %v1059_v50, %v1056_v48 }
 0x144   : > { %2826 = vst [vmem:[%s3339_s27 + $0xb8] sm:$0xff] %v2602_v53   ;;  %v2757_v57 = vpack.c.bf16 %v1315_v54, %v1312_v52 }
 0x145   : > { %2858 = vst [vmem:[%s3339_s27 + $0x1b8] sm:$0xff] %v2762_v55   ;;  %2825 = vst [vmem:[%s3339_s27 + $0xb0] sm:$0xff] %v2597_v56   ;;  %v2987_v58 = vpop.f32.mrb[48].mxu0 }
 0x146   : > { %2857 = vst [vmem:[%s3339_s27 + $0x1b0] sm:$0xff] %v2757_v57   ;;  %v3051_v59 = vpop.f32.mrb[48].mxu1  ;;  %v1071_v60 = vpop.f32.mrb[49].mxu0  ;;  %v1080_v63 = vadd.f32 %v2987_v58, %v3328_v7 }
 0x147   : > { %v1327_v61 = vpop.f32.mrb[49].mxu1  ;;  %v2988_v62 = vpop.f32.mrb[50].mxu0  ;;  %v1336_v3 = vadd.f32 %v3051_v59, %v3328_v7  ;;  %v1072_v4 = vadd.f32 %v3328_v7, %v1071_v60 }
 0x148   : > { %v1083_v0 = vadd.f32 %v2988_v62, %v3328_v7  ;;  %v3052_v1 = vpop.f32.mrb[50].mxu1  ;;  %v1074_v2 = vpop.f32.mrb[51].mxu0  ;;  %v1328_v9 = vadd.f32 %v3328_v7, %v1327_v61 }
 0x149   : > { %v1339_v5 = vadd.f32 %v3052_v1, %v3328_v7  ;;  %v1075_v6 = vadd.f32 %v3328_v7, %v1074_v2  ;;  %v1330_v8 = vpop.f32.mrb[51].mxu1 }
 0x14a   : > { %v2612_v10 = vpack.c.bf16 %v1083_v0, %v1080_v63  ;;  %v1331_v11 = vadd.f32 %v3328_v7, %v1330_v8 }
 0x14b   : > { %v2772_v12 = vpack.c.bf16 %v1339_v5, %v1336_v3  ;;  %v2607_v13 = vpack.c.bf16 %v1075_v6, %v1072_v4 }
 0x14c   : > { %2828 = vst [vmem:[%s3339_s27 + $0xc8] sm:$0xff] %v2612_v10   ;;  %v2767_v14 = vpack.c.bf16 %v1331_v11, %v1328_v9 }
 0x14d   : > { %2860 = vst [vmem:[%s3339_s27 + $0x1c8] sm:$0xff] %v2772_v12   ;;  %2827 = vst [vmem:[%s3339_s27 + $0xc0] sm:$0xff] %v2607_v13   ;;  %v2991_v15 = vpop.f32.mrb[52].mxu0 }
 0x14e   : > { %2859 = vst [vmem:[%s3339_s27 + $0x1c0] sm:$0xff] %v2767_v14   ;;  %v3055_v16 = vpop.f32.mrb[52].mxu1  ;;  %v1087_v17 = vpop.f32.mrb[53].mxu0  ;;  %v1096_v20 = vadd.f32 %v2991_v15, %v3328_v7 }
 0x14f   : > { %v1343_v18 = vpop.f32.mrb[53].mxu1  ;;  %v2992_v19 = vpop.f32.mrb[54].mxu0  ;;  %v1352_v24 = vadd.f32 %v3055_v16, %v3328_v7  ;;  %v1088_v25 = vadd.f32 %v3328_v7, %v1087_v17 }
 0x150   : > { %v1099_v21 = vadd.f32 %v2992_v19, %v3328_v7  ;;  %v3056_v22 = vpop.f32.mrb[54].mxu1  ;;  %v1090_v23 = vpop.f32.mrb[55].mxu0  ;;  %v1344_v29 = vadd.f32 %v3328_v7, %v1343_v18 }
 0x151   : > { %v1355_v26 = vadd.f32 %v3056_v22, %v3328_v7  ;;  %v1091_v27 = vadd.f32 %v3328_v7, %v1090_v23  ;;  %v1346_v28 = vpop.f32.mrb[55].mxu1 }
 0x152   : > { %v2622_v30 = vpack.c.bf16 %v1099_v21, %v1096_v20  ;;  %v1347_v31 = vadd.f32 %v3328_v7, %v1346_v28 }
 0x153   : > { %v2782_v32 = vpack.c.bf16 %v1355_v26, %v1352_v24  ;;  %v2617_v33 = vpack.c.bf16 %v1091_v27, %v1088_v25 }
 0x154   : > { %2830 = vst [vmem:[%s3339_s27 + $0xd8] sm:$0xff] %v2622_v30   ;;  %v2777_v34 = vpack.c.bf16 %v1347_v31, %v1344_v29 }
 0x155   : > { %2862 = vst [vmem:[%s3339_s27 + $0x1d8] sm:$0xff] %v2782_v32   ;;  %2829 = vst [vmem:[%s3339_s27 + $0xd0] sm:$0xff] %v2617_v33   ;;  %v2995_v35 = vpop.f32.mrb[56].mxu0 }
 0x156   : > { %2861 = vst [vmem:[%s3339_s27 + $0x1d0] sm:$0xff] %v2777_v34   ;;  %v3059_v36 = vpop.f32.mrb[56].mxu1  ;;  %v1103_v37 = vpop.f32.mrb[57].mxu0  ;;  %v1112_v40 = vadd.f32 %v2995_v35, %v3328_v7 }
 0x157   : > { %v1359_v38 = vpop.f32.mrb[57].mxu1  ;;  %v2996_v39 = vpop.f32.mrb[58].mxu0  ;;  %v1368_v44 = vadd.f32 %v3059_v36, %v3328_v7  ;;  %v1104_v45 = vadd.f32 %v3328_v7, %v1103_v37 }
 0x158   : > { %v1115_v41 = vadd.f32 %v2996_v39, %v3328_v7  ;;  %v3060_v42 = vpop.f32.mrb[58].mxu1  ;;  %v1106_v43 = vpop.f32.mrb[59].mxu0  ;;  %v1360_v49 = vadd.f32 %v3328_v7, %v1359_v38 }
 0x159   : > { %v1371_v46 = vadd.f32 %v3060_v42, %v3328_v7  ;;  %v1107_v47 = vadd.f32 %v3328_v7, %v1106_v43  ;;  %v1362_v48 = vpop.f32.mrb[59].mxu1 }
 0x15a   : > { %v2632_v50 = vpack.c.bf16 %v1115_v41, %v1112_v40  ;;  %v1363_v51 = vadd.f32 %v3328_v7, %v1362_v48 }
 0x15b   : > { %v2792_v52 = vpack.c.bf16 %v1371_v46, %v1368_v44  ;;  %v2627_v53 = vpack.c.bf16 %v1107_v47, %v1104_v45 }
 0x15c   : > { %2832 = vst [vmem:[%s3339_s27 + $0xe8] sm:$0xff] %v2632_v50   ;;  %v2787_v54 = vpack.c.bf16 %v1363_v51, %v1360_v49 }
 0x15d   : > { %2864 = vst [vmem:[%s3339_s27 + $0x1e8] sm:$0xff] %v2792_v52   ;;  %2831 = vst [vmem:[%s3339_s27 + $0xe0] sm:$0xff] %v2627_v53   ;;  %v2999_v55 = vpop.f32.mrb[60].mxu0 }
 0x15e   : > { %2863 = vst [vmem:[%s3339_s27 + $0x1e0] sm:$0xff] %v2787_v54   ;;  %v3063_v56 = vpop.f32.mrb[60].mxu1  ;;  %v1119_v57 = vpop.f32.mrb[61].mxu0  ;;  %v1128_v60 = vadd.f32 %v2999_v55, %v3328_v7 }
 0x15f   : > { %v1375_v58 = vpop.f32.mrb[61].mxu1  ;;  %v3000_v59 = vpop.f32.mrb[62].mxu0  ;;  %v1384_v0 = vadd.f32 %v3063_v56, %v3328_v7  ;;  %v1120_v1 = vadd.f32 %v3328_v7, %v1119_v57 }
 0x160   : > { %v1131_v61 = vadd.f32 %v3000_v59, %v3328_v7  ;;  %v3064_v62 = vpop.f32.mrb[62].mxu1  ;;  %v1122_v63 = vpop.f32.mrb[63].mxu0  ;;  %v1376_v5 = vadd.f32 %v3328_v7, %v1375_v58 }
 0x161   : > { %v1387_v2 = vadd.f32 %v3064_v62, %v3328_v7  ;;  %v1123_v3 = vadd.f32 %v3328_v7, %v1122_v63  ;;  %v1378_v4 = vpop.f32.mrb[63].mxu1 }
 0x162   : > { %v2642_v6 = vpack.c.bf16 %v1131_v61, %v1128_v60  ;;  %v1379_v8 = vadd.f32 %v3328_v7, %v1378_v4 }
 0x163   : > { %v2802_v9 = vpack.c.bf16 %v1387_v2, %v1384_v0  ;;  %v2637_v10 = vpack.c.bf16 %v1123_v3, %v1120_v1 }
 0x164   : > { %2834 = vst [vmem:[%s3339_s27 + $0xf8] sm:$0xff] %v2642_v6   ;;  %v2797_v11 = vpack.c.bf16 %v1379_v8, %v1376_v5 }
 0x165   : > { %2866 = vst [vmem:[%s3339_s27 + $0x1f8] sm:$0xff] %v2802_v9   ;;  %2833 = vst [vmem:[%s3339_s27 + $0xf0] sm:$0xff] %v2637_v10  }
 0x166   : > { %2865 = vst [vmem:[%s3339_s27 + $0x1f0] sm:$0xff] %v2797_v11  }
 0x167 PF: > { %s13_s12 = sadd.s32 1, %s3150_s12  }
 0x168   : > { %p10_p4 = scmp.ge.s32.totalorder %s13_s12, 4  }
 0x16a   :  { %12 = sbr.rel (!%p10_p4) target bundleno = 1 (0x1), region = 62 }

// kernel: _lambda_.7
= control target key start
LH: loop header
LB: loop body
LE: loop exit
PB: predicated region body
PF: predicated region fallthrough
CT: control target
= control target key end

     0   :  { %s1190_s12 = smov 0   ;;  %s1317_s0 = inlined_call_operand.vmem [shape: bf16[512,128], index: 0, kind: input, shape index: {}]   ;;  %s1318_s1 = inlined_call_operand.vmem [shape: bf16[128,128], index: 1, kind: input, shape index: {}]   ;;  %s1319_s2 = inlined_call_operand.vmem [shape: f32[1,128], index: 2, kind: input, shape index: {}]   ;;  %s1320_s3 = inlined_call_operand.vmem [shape: bf16[512,128], index: 3, kind: output, shape index: {}]  }
   0x1 LB: > { %s847_s13 = sadd.s32 4294967295, %s1168_s12   ;;  %p851_p0 = scmp.ge.s32.totalorder %s1168_s12, 1  ;;  %s1168_s12 = sphi %s1190_s12, %s13_s12  }
   0x2   : > { %p138_p1 = scmp.lt.s32.totalorder %s1168_s12, 3 }
   0x4   : > { %p139_p2 = pnand %p851_p0, %p138_p1 }
   0x5   : > { %v1138_v0 = vld [vmem:[%s1318_s1] sm:$0xff] (!%p139_p2)   ;;  %s852_s16 = sshll.u32 (!%p139_p2), %s847_s13, 5  ;;  %v1139_v1 = vld [vmem:[%s1318_s1 + $0x8] sm:$0xff] (!%p139_p2)   ;;  %v1140_v2 = vld [vmem:[%s1318_s1 + $0x10] sm:$0xff] (!%p139_p2)  }
   0x6   : > { %142 = sbr.rel (%p139_p2) target bundleno = 293 (0x125), region = 32  ;;  %p163_p3 = scmp.lt.s32.totalorder (!%p139_p2), %s852_s16, 63  ;;  %1066 = vmatprep.subr.bf16.mxu0 (!%p139_p2), %v1138_v0  ;;  %1114 = vmatprep.subr.bf16.mxu1 (!%p139_p2), %v1138_v0  ;;  %v1141_v3 = vld [vmem:[%s1318_s1 + $0x18] sm:$0xff] (!%p139_p2)   ;;  %v1142_v6 = vld [vmem:[%s1318_s1 + $0x20] sm:$0xff] (!%p139_p2)   ;;  %v1143_v7 = vld [vmem:[%s1318_s1 + $0x28] sm:$0xff] (!%p139_p2)  }
   0x7   : > { %1067 = vmatpush3.bf16.msra.mxu0 (!%p139_p2), %v1138_v0  ;;  %1122 = vmatpush3.bf16.msra.mxu1 (!%p139_p2), %v1138_v0  ;;  %v1144_v8 = vld [vmem:[%s1318_s1 + $0x30] sm:$0xff] (!%p139_p2)   ;;  %v1145_v9 = vld [vmem:[%s1318_s1 + $0x38] sm:$0xff] (!%p139_p2)   ;;  %v1251_v24 = vld [vmem:[%s1319_s2] ss:$0 sm:$0xff] (!%p139_p2) }
   0x8   : > { %1068 = vmatprep.subr.bf16.mxu0 (!%p139_p2), %v1139_v1  ;;  %1115 = vmatprep.subr.bf16.mxu1 (!%p139_p2), %v1139_v1 }
   0xb   : > { %1069 = vmatpush3.bf16.msra.mxu0 (!%p139_p2), %v1139_v1  ;;  %1123 = vmatpush3.bf16.msra.mxu1 (!%p139_p2), %v1139_v1 }
   0xc   : > { %1070 = vmatprep.subr.bf16.mxu0 (!%p139_p2), %v1140_v2  ;;  %1116 = vmatprep.subr.bf16.mxu1 (!%p139_p2), %v1140_v2 }
   0xd   : > { %s1322_s16 = smov (!%p163_p3, %s852_s16), 63 }
   0xe   : > { %s853_s21 = sshll.u32 %s1322_s16, 2 }
   0xf   : > { %s1215_s24 = scalar_lea.vmem %s1317_s0, %s853_s21  ;;  %1071 = vmatpush3.bf16.msra.mxu0 %v1140_v2  ;;  %1124 = vmatpush3.bf16.msra.mxu1 %v1140_v2  ;;  %s1268_s13 = scalar_lea.vmem %s1320_s3, %s853_s21 }
  0x10   : > { %v1146_v4 = vld [vmem:[%s1215_s24] sm:$0xff]   ;;  %1072 = vmatprep.subr.bf16.mxu0 %v1141_v3  ;;  %1117 = vmatprep.subr.bf16.mxu1 %v1141_v3  ;;  %v1148_v10 = vld [vmem:[%s1215_s24 + $0x8] sm:$0xff]   ;;  %v1150_v12 = vld [vmem:[%s1215_s24 + $0x10] sm:$0xff]  }
  0x11   : > { %v1147_v5 = vld [vmem:[%s1215_s24 + $0x40] sm:$0xff]   ;;  %1082 = vmatprep.mubr.bf16.mxu0 %v1146_v4  ;;  %v1149_v11 = vld [vmem:[%s1215_s24 + $0x48] sm:$0xff]   ;;  %v1151_v13 = vld [vmem:[%s1215_s24 + $0x50] sm:$0xff]  }
  0x12   : > { %1098 = vmatprep.mubr.bf16.mxu1 %v1147_v5  ;;  %v1152_v14 = vld [vmem:[%s1215_s24 + $0x18] sm:$0xff]   ;;  %v1154_v16 = vld [vmem:[%s1215_s24 + $0x20] sm:$0xff]   ;;  %v1156_v18 = vld [vmem:[%s1215_s24 + $0x28] sm:$0xff]  }
  0x13   : > { %1073 = vmatpush3.bf16.msra.mxu0 %v1141_v3  ;;  %1125 = vmatpush3.bf16.msra.mxu1 %v1141_v3  ;;  %v1153_v15 = vld [vmem:[%s1215_s24 + $0x58] sm:$0xff]   ;;  %v1155_v17 = vld [vmem:[%s1215_s24 + $0x60] sm:$0xff]   ;;  %v1157_v19 = vld [vmem:[%s1215_s24 + $0x68] sm:$0xff]  }
  0x14   : > { %1074 = vmatprep.subr.bf16.mxu0 %v1142_v6  ;;  %1118 = vmatprep.subr.bf16.mxu1 %v1142_v6  ;;  %v1158_v20 = vld [vmem:[%s1215_s24 + $0x30] sm:$0xff]   ;;  %v1160_v22 = vld [vmem:[%s1215_s24 + $0x38] sm:$0xff]  }
  0x15   : > { %v1159_v21 = vld [vmem:[%s1215_s24 + $0x70] sm:$0xff]   ;;  %v1161_v23 = vld [vmem:[%s1215_s24 + $0x78] sm:$0xff]  }
  0x17   : > { %1075 = vmatpush3.bf16.msra.mxu0 %v1142_v6  ;;  %1126 = vmatpush3.bf16.msra.mxu1 %v1142_v6 }
  0x18   : > { %1076 = vmatprep.subr.bf16.mxu0 %v1143_v7  ;;  %1119 = vmatprep.subr.bf16.mxu1 %v1143_v7 }
  0x1b   : > { %1077 = vmatpush3.bf16.msra.mxu0 %v1143_v7  ;;  %1127 = vmatpush3.bf16.msra.mxu1 %v1143_v7 }
  0x1c   : > { %1078 = vmatprep.subr.bf16.mxu0 %v1144_v8  ;;  %1120 = vmatprep.subr.bf16.mxu1 %v1144_v8 }
  0x1f   : > { %1079 = vmatpush3.bf16.msra.mxu0 %v1144_v8  ;;  %1128 = vmatpush3.bf16.msra.mxu1 %v1144_v8 }
  0x20   : > { %1080 = vmatprep.subr.bf16.mxu0 %v1145_v9  ;;  %1121 = vmatprep.subr.bf16.mxu1 %v1145_v9 }
  0x23   : > { %1081 = vmatpush3.bf16.msra.mxu0 %v1145_v9  ;;  %1129 = vmatpush3.bf16.msra.mxu1 %v1145_v9 }
  0x26   : > { %1083 = vmatmul.mubr.bf16.vlgmr.msra.gmra.mrb[0].mxu0 %v1148_v10  ;;  %1099 = vmatmul.mubr.bf16.vlgmr.msra.gmra.mrb[0].mxu1 %v1149_v11 }
  0x27   : > { %1086 = vmatprep.mubr.bf16.mxu0 %v1150_v12  ;;  %1102 = vmatprep.mubr.bf16.mxu1 %v1151_v13 }
  0x2e   : > { %1087 = vmatmul.mubr.bf16.gmra.mrb[4].mxu0 %v1152_v14  ;;  %1103 = vmatmul.mubr.bf16.gmra.mrb[4].mxu1 %v1153_v15 }
  0x2f   : > { %1090 = vmatprep.mubr.bf16.mxu0 %v1154_v16  ;;  %1106 = vmatprep.mubr.bf16.mxu1 %v1155_v17 }
  0x36   : > { %1091 = vmatmul.mubr.bf16.gmra.mrb[8].mxu0 %v1156_v18  ;;  %1107 = vmatmul.mubr.bf16.gmra.mrb[8].mxu1 %v1157_v19 }
  0x37   : > { %1094 = vmatprep.mubr.bf16.mxu0 %v1158_v20  ;;  %1110 = vmatprep.mubr.bf16.mxu1 %v1159_v21 }
  0x3e   : > { %1095 = vmatmul.mubr.bf16.gmra.mrb[12].mxu0 %v1160_v22  ;;  %1111 = vmatmul.mubr.bf16.gmra.mrb[12].mxu1 %v1161_v23 }
  0xf9   : > { %v1084_v25 = vpop.f32.mrb[0].mxu0  ;;  %v1100_v26 = vpop.f32.mrb[0].mxu1 }
  0xfa   : > { %v417_v27 = vadd.f32 %v1084_v25, %v1251_v24  ;;  %v481_v28 = vadd.f32 %v1100_v26, %v1251_v24  ;;  %v408_v29 = vpop.f32.mrb[1].mxu0  ;;  %v472_v30 = vpop.f32.mrb[1].mxu1 }
  0xfb   : > { %v409_v31 = vadd.f32 %v1251_v24, %v408_v29  ;;  %v473_v32 = vadd.f32 %v1251_v24, %v472_v30  ;;  %v1085_v33 = vpop.f32.mrb[2].mxu0  ;;  %v1101_v34 = vpop.f32.mrb[2].mxu1 }
  0xfc   : > { %vm537_vm0 = vcmp.ge.f32.partialorder %v417_v27, 0.0  ;;  %v569_v35 = vmul.f32 0.2, %v417_v27  ;;  %vm553_vm1 = vcmp.ge.f32.partialorder %v481_v28, 0.0  ;;  %v585_v36 = vmul.f32 0.2, %v481_v28 }
  0xfd   : > { %vm535_vm2 = vcmp.ge.f32.partialorder %v409_v31, 0.0  ;;  %v567_v37 = vmul.f32 0.2, %v409_v31  ;;  %vm551_vm3 = vcmp.ge.f32.partialorder %v473_v32, 0.0  ;;  %v583_v38 = vmul.f32 0.2, %v473_v32 }
  0xfe   : > { %v420_v39 = vadd.f32 %v1085_v33, %v1251_v24  ;;  %v484_v40 = vadd.f32 %v1101_v34, %v1251_v24  ;;  %v411_v41 = vpop.f32.mrb[3].mxu0  ;;  %v475_v42 = vpop.f32.mrb[3].mxu1  ;;  %v601_v43 = vsel %vm537_vm0, %v417_v27, %v569_v35  ;;  %v617_v44 = vsel %vm553_vm1, %v481_v28, %v585_v36 }
  0xff   : > { %v412_v45 = vadd.f32 %v1251_v24, %v411_v41  ;;  %v476_v46 = vadd.f32 %v1251_v24, %v475_v42  ;;  %v599_v51 = vsel %vm535_vm2, %v409_v31, %v567_v37  ;;  %v615_v52 = vsel %vm551_vm3, %v473_v32, %v583_v38 }
 0x100   : > { %vm538_vm4 = vcmp.ge.f32.partialorder %v420_v39, 0.0  ;;  %v570_v47 = vmul.f32 0.2, %v420_v39  ;;  %vm554_vm5 = vcmp.ge.f32.partialorder %v484_v40, 0.0  ;;  %v586_v48 = vmul.f32 0.2, %v484_v40 }
 0x101   : > { %vm536_vm6 = vcmp.ge.f32.partialorder %v412_v45, 0.0  ;;  %v568_v49 = vmul.f32 0.2, %v412_v45  ;;  %vm552_vm7 = vcmp.ge.f32.partialorder %v476_v46, 0.0  ;;  %v584_v50 = vmul.f32 0.2, %v476_v46 }
 0x102   : > { %v602_v53 = vsel %vm538_vm4, %v420_v39, %v570_v47  ;;  %v618_v54 = vsel %vm554_vm5, %v484_v40, %v586_v48  ;;  %v1088_v55 = vpop.f32.mrb[4].mxu0  ;;  %v1104_v56 = vpop.f32.mrb[4].mxu1 }
 0x103   : > { %v955_v57 = vpack.c.bf16 %v602_v53, %v601_v43  ;;  %v995_v58 = vpack.c.bf16 %v618_v54, %v617_v44  ;;  %v600_v59 = vsel %vm536_vm6, %v412_v45, %v568_v49  ;;  %v616_v60 = vsel %vm552_vm7, %v476_v46, %v584_v50  ;;  %v424_v61 = vpop.f32.mrb[5].mxu0  ;;  %v488_v62 = vpop.f32.mrb[5].mxu1 }
 0x104   : > { %v950_v63 = vpack.c.bf16 %v600_v59, %v599_v51  ;;  %v990_v0 = vpack.c.bf16 %v616_v60, %v615_v52  ;;  %v433_v1 = vadd.f32 %v1088_v55, %v1251_v24  ;;  %v497_v2 = vadd.f32 %v1104_v56, %v1251_v24  ;;  %v1089_v3 = vpop.f32.mrb[6].mxu0  ;;  %v1105_v4 = vpop.f32.mrb[6].mxu1 }
 0x105   : > { %1027 = vst [vmem:[%s1268_s13 + $0x8] sm:$0xff] %v955_v57   ;;  %1035 = vst [vmem:[%s1268_s13 + $0x48] sm:$0xff] %v995_v58   ;;  %v425_v5 = vadd.f32 %v1251_v24, %v424_v61  ;;  %v489_v6 = vadd.f32 %v1251_v24, %v488_v62  ;;  %v436_v7 = vadd.f32 %v1089_v3, %v1251_v24  ;;  %v427_v9 = vpop.f32.mrb[7].mxu0  ;;  %v491_v10 = vpop.f32.mrb[7].mxu1 }
 0x106   : > { %v500_v8 = vadd.f32 %v1105_v4, %v1251_v24  ;;  %951 = vst [vmem:[%s1268_s13] sm:$0xff] %v950_v63   ;;  %1034 = vst [vmem:[%s1268_s13 + $0x40] sm:$0xff] %v990_v0   ;;  %vm541_vm8 = vcmp.ge.f32.partialorder %v433_v1, 0.0  ;;  %v573_v11 = vmul.f32 0.2, %v433_v1  ;;  %vm557_vm9 = vcmp.ge.f32.partialorder %v497_v2, 0.0 }
 0x107   : > { %v589_v12 = vmul.f32 0.2, %v497_v2  ;;  %vm539_vm10 = vcmp.ge.f32.partialorder %v425_v5, 0.0  ;;  %v571_v13 = vmul.f32 0.2, %v425_v5  ;;  %vm555_vm11 = vcmp.ge.f32.partialorder %v489_v6, 0.0 }
 0x108   : > { %v605_v14 = vsel %vm541_vm8, %v433_v1, %v573_v11  ;;  %v587_v15 = vmul.f32 0.2, %v489_v6  ;;  %vm542_vm12 = vcmp.ge.f32.partialorder %v436_v7, 0.0  ;;  %v574_v16 = vmul.f32 0.2, %v436_v7 }
 0x109   : > { %v621_v17 = vsel %vm557_vm9, %v497_v2, %v589_v12  ;;  %v603_v18 = vsel %vm539_vm10, %v425_v5, %v571_v13  ;;  %vm558_vm13 = vcmp.ge.f32.partialorder %v500_v8, 0.0  ;;  %v590_v19 = vmul.f32 0.2, %v500_v8  ;;  %v1092_v20 = vpop.f32.mrb[8].mxu0  ;;  %v1108_v21 = vpop.f32.mrb[8].mxu1 }
 0x10a   : > { %v606_v22 = vsel %vm542_vm12, %v436_v7, %v574_v16  ;;  %v428_v23 = vadd.f32 %v1251_v24, %v427_v9  ;;  %v492_v25 = vadd.f32 %v1251_v24, %v491_v10  ;;  %v449_v26 = vadd.f32 %v1092_v20, %v1251_v24  ;;  %v440_v27 = vpop.f32.mrb[9].mxu0  ;;  %v504_v28 = vpop.f32.mrb[9].mxu1 }
 0x10b   : > { %v965_v29 = vpack.c.bf16 %v606_v22, %v605_v14  ;;  %v622_v30 = vsel %vm558_vm13, %v500_v8, %v590_v19  ;;  %v513_v31 = vadd.f32 %v1108_v21, %v1251_v24  ;;  %v441_v32 = vadd.f32 %v1251_v24, %v440_v27  ;;  %v1093_v33 = vpop.f32.mrb[10].mxu0  ;;  %v1109_v34 = vpop.f32.mrb[10].mxu1 }
 0x10c   : > { %v1005_v35 = vpack.c.bf16 %v622_v30, %v621_v17  ;;  %vm540_vm14 = vcmp.ge.f32.partialorder %v428_v23, 0.0  ;;  %v572_v36 = vmul.f32 0.2, %v428_v23  ;;  %vm556_vm15 = vcmp.ge.f32.partialorder %v492_v25, 0.0  ;;  %v443_v37 = vpop.f32.mrb[11].mxu0  ;;  %v507_v38 = vpop.f32.mrb[11].mxu1 }
 0x10d   : > { %1029 = vst [vmem:[%s1268_s13 + $0x18] sm:$0xff] %v965_v29   ;;  %v588_v39 = vmul.f32 0.2, %v492_v25  ;;  %vm545_vm0 = vcmp.ge.f32.partialorder %v449_v26, 0.0  ;;  %v577_v40 = vmul.f32 0.2, %v449_v26  ;;  %v619_v41 = vsel %vm555_vm11, %v489_v6, %v587_v15 }
 0x10e   : > { %vm561_vm1 = vcmp.ge.f32.partialorder %v513_v31, 0.0  ;;  %1037 = vst [vmem:[%s1268_s13 + $0x58] sm:$0xff] %v1005_v35   ;;  %v604_v42 = vsel %vm540_vm14, %v428_v23, %v572_v36  ;;  %v593_v43 = vmul.f32 0.2, %v513_v31  ;;  %vm543_vm2 = vcmp.ge.f32.partialorder %v441_v32, 0.0 }
 0x10f   : > { %v960_v44 = vpack.c.bf16 %v604_v42, %v603_v18  ;;  %v620_v45 = vsel %vm556_vm15, %v492_v25, %v588_v39  ;;  %v575_v46 = vmul.f32 0.2, %v441_v32  ;;  %v505_v47 = vadd.f32 %v1251_v24, %v504_v28 }
 0x110   : > { %v1000_v48 = vpack.c.bf16 %v620_v45, %v619_v41  ;;  %v609_v49 = vsel %vm545_vm0, %v449_v26, %v577_v40  ;;  %v625_v50 = vsel %vm561_vm1, %v513_v31, %v593_v43  ;;  %v452_v51 = vadd.f32 %v1093_v33, %v1251_v24 }
 0x111   : > { %1028 = vst [vmem:[%s1268_s13 + $0x10] sm:$0xff] %v960_v44   ;;  %vm559_vm3 = vcmp.ge.f32.partialorder %v505_v47, 0.0  ;;  %v591_v52 = vmul.f32 0.2, %v505_v47  ;;  %v516_v53 = vadd.f32 %v1109_v34, %v1251_v24  ;;  %v444_v54 = vadd.f32 %v1251_v24, %v443_v37  ;;  %v1096_v55 = vpop.f32.mrb[12].mxu0  ;;  %v1112_v56 = vpop.f32.mrb[12].mxu1 }
 0x112   : > { %1036 = vst [vmem:[%s1268_s13 + $0x50] sm:$0xff] %v1000_v48   ;;  %vm546_vm4 = vcmp.ge.f32.partialorder %v452_v51, 0.0  ;;  %v578_v57 = vmul.f32 0.2, %v452_v51  ;;  %v508_v58 = vadd.f32 %v1251_v24, %v507_v38  ;;  %v465_v59 = vadd.f32 %v1096_v55, %v1251_v24  ;;  %v456_v60 = vpop.f32.mrb[13].mxu0  ;;  %v520_v61 = vpop.f32.mrb[13].mxu1 }
 0x113   : > { %v607_v62 = vsel %vm543_vm2, %v441_v32, %v575_v46  ;;  %vm562_vm5 = vcmp.ge.f32.partialorder %v516_v53, 0.0  ;;  %v594_v63 = vmul.f32 0.2, %v516_v53  ;;  %vm544_vm6 = vcmp.ge.f32.partialorder %v444_v54, 0.0  ;;  %v1097_v0 = vpop.f32.mrb[14].mxu0  ;;  %v1113_v1 = vpop.f32.mrb[14].mxu1 }
 0x114   : > { %v610_v2 = vsel %vm546_vm4, %v452_v51, %v578_v57  ;;  %v576_v3 = vmul.f32 0.2, %v444_v54  ;;  %vm560_vm7 = vcmp.ge.f32.partialorder %v508_v58, 0.0  ;;  %v592_v4 = vmul.f32 0.2, %v508_v58  ;;  %v459_v5 = vpop.f32.mrb[15].mxu0 }
 0x115   : > { %v623_v6 = vsel %vm559_vm3, %v505_v47, %v591_v52  ;;  %v975_v7 = vpack.c.bf16 %v610_v2, %v609_v49  ;;  %v626_v8 = vsel %vm562_vm5, %v516_v53, %v594_v63  ;;  %v581_v9 = vmul.f32 0.2, %v465_v59  ;;  %v523_v10 = vpop.f32.mrb[15].mxu1 }
 0x116   : > { %v1015_v11 = vpack.c.bf16 %v626_v8, %v625_v50  ;;  %v608_v12 = vsel %vm544_vm6, %v444_v54, %v576_v3  ;;  %v624_v13 = vsel %vm560_vm7, %v508_v58, %v592_v4  ;;  %v529_v14 = vadd.f32 %v1112_v56, %v1251_v24 }
 0x117   : > { %1031 = vst [vmem:[%s1268_s13 + $0x28] sm:$0xff] %v975_v7   ;;  %v970_v15 = vpack.c.bf16 %v608_v12, %v607_v62  ;;  %v1010_v16 = vpack.c.bf16 %v624_v13, %v623_v6  ;;  %vm549_vm8 = vcmp.ge.f32.partialorder %v465_v59, 0.0  ;;  %v457_v17 = vadd.f32 %v1251_v24, %v456_v60 }
 0x118   : > { %1039 = vst [vmem:[%s1268_s13 + $0x68] sm:$0xff] %v1015_v11   ;;  %vm565_vm9 = vcmp.ge.f32.partialorder %v529_v14, 0.0  ;;  %v597_v18 = vmul.f32 0.2, %v529_v14  ;;  %v521_v19 = vadd.f32 %v1251_v24, %v520_v61  ;;  %v468_v20 = vadd.f32 %v1097_v0, %v1251_v24 }
 0x119   : > { %1030 = vst [vmem:[%s1268_s13 + $0x20] sm:$0xff] %v970_v15   ;;  %1038 = vst [vmem:[%s1268_s13 + $0x60] sm:$0xff] %v1010_v16   ;;  %v579_v21 = vmul.f32 0.2, %v457_v17  ;;  %v532_v22 = vadd.f32 %v1113_v1, %v1251_v24  ;;  %v460_v23 = vadd.f32 %v1251_v24, %v459_v5  ;;  %v613_v25 = vsel %vm549_vm8, %v465_v59, %v581_v9 }
 0x11a   : > { %vm547_vm10 = vcmp.ge.f32.partialorder %v457_v17, 0.0  ;;  %vm550_vm11 = vcmp.ge.f32.partialorder %v468_v20, 0.0  ;;  %v629_v26 = vsel %vm565_vm9, %v529_v14, %v597_v18  ;;  %v582_v27 = vmul.f32 0.2, %v468_v20 }
 0x11b   : > { %vm566_vm12 = vcmp.ge.f32.partialorder %v532_v22, 0.0  ;;  %v598_v28 = vmul.f32 0.2, %v532_v22  ;;  %vm563_vm13 = vcmp.ge.f32.partialorder %v521_v19, 0.0  ;;  %vm548_vm14 = vcmp.ge.f32.partialorder %v460_v23, 0.0 }
 0x11c   : > { %v580_v29 = vmul.f32 0.2, %v460_v23  ;;  %v524_v30 = vadd.f32 %v1251_v24, %v523_v10  ;;  %v611_v31 = vsel %vm547_vm10, %v457_v17, %v579_v21  ;;  %v595_v32 = vmul.f32 0.2, %v521_v19 }
 0x11d   : > { %v614_v33 = vsel %vm550_vm11, %v468_v20, %v582_v27  ;;  %v630_v34 = vsel %vm566_vm12, %v532_v22, %v598_v28 }
 0x11e   : > { %v985_v35 = vpack.c.bf16 %v614_v33, %v613_v25  ;;  %v1025_v36 = vpack.c.bf16 %v630_v34, %v629_v26  ;;  %v612_v37 = vsel %vm548_vm14, %v460_v23, %v580_v29  ;;  %vm564_vm15 = vcmp.ge.f32.partialorder %v524_v30, 0.0 }
 0x11f   : > { %v980_v38 = vpack.c.bf16 %v612_v37, %v611_v31  ;;  %v596_v39 = vmul.f32 0.2, %v524_v30  ;;  %v627_v40 = vsel %vm563_vm13, %v521_v19, %v595_v32 }
 0x120   : > { %1033 = vst [vmem:[%s1268_s13 + $0x38] sm:$0xff] %v985_v35   ;;  %1041 = vst [vmem:[%s1268_s13 + $0x78] sm:$0xff] %v1025_v36  }
 0x121   : > { %1032 = vst [vmem:[%s1268_s13 + $0x30] sm:$0xff] %v980_v38   ;;  %v628_v41 = vsel %vm564_vm15, %v524_v30, %v596_v39 }
 0x122   : > { %v1020_v42 = vpack.c.bf16 %v628_v41, %v627_v40 }
 0x124   : > { %1040 = vst [vmem:[%s1268_s13 + $0x70] sm:$0xff] %v1020_v42  }
 0x125 PF: > { %s13_s12 = sadd.s32 1, %s1168_s12  }
 0x126   : > { %p10_p4 = scmp.ge.s32.totalorder %s13_s12, 4  }
 0x128   :  { %12 = sbr.rel (!%p10_p4) target bundleno = 1 (0x1), region = 62 }

// kernel: _lambda_.8
= control target key start
LH: loop header
LB: loop body
LE: loop exit
PB: predicated region body
PF: predicated region fallthrough
CT: control target
= control target key end

     0   :  { %s1196_s12 = smov 0   ;;  %s1330_s0 = inlined_call_operand.vmem [shape: bf16[512,72], index: 0, kind: input, shape index: {}]   ;;  %s1331_s1 = inlined_call_operand.vmem [shape: bf16[72,128], index: 1, kind: input, shape index: {}]   ;;  %s1332_s2 = inlined_call_operand.vmem [shape: f32[1,128], index: 2, kind: input, shape index: {}]   ;;  %s1333_s3 = inlined_call_operand.vmem [shape: bf16[512,128], index: 3, kind: output, shape index: {}]  }
   0x1 LB: > { %s856_s13 = sadd.s32 4294967295, %s1174_s12   ;;  %p860_p0 = scmp.ge.s32.totalorder %s1174_s12, 1  ;;  %s1174_s12 = sphi %s1196_s12, %s13_s12  }
   0x2   : > { %p138_p1 = scmp.lt.s32.totalorder %s1174_s12, 3 }
   0x4   : > { %p139_p2 = pnand %p860_p0, %p138_p1 }
   0x5   : > { %v1147_v0 = vld [vmem:[%s1331_s1] sm:$0xff] (!%p139_p2)   ;;  %v1148_v1 = vld [vmem:[%s1331_s1 + $0x8] sm:$0xff] (!%p139_p2)   ;;  %s861_s18 = sshll.u32 (!%p139_p2), %s856_s13, 5  ;;  %v1149_v2 = vld [vmem:[%s1331_s1 + $0x10] sm:$0xff] (!%p139_p2)   ;;  %vm330_vm0 = vcmask (!%p139_p2), 588800   ;;  %vm379_vm1 = vcmask (!%p139_p2), 1043456  }
   0x6   : > { %142 = sbr.rel (%p139_p2) target bundleno = 281 (0x119), region = 32  ;;  %1085 = vmatprep.subr.bf16.mxu0 (!%p139_p2), %v1147_v0  ;;  %1127 = vmatprep.subr.bf16.mxu1 (!%p139_p2), %v1147_v0  ;;  %p163_p3 = scmp.lt.s32.totalorder (!%p139_p2), %s861_s18, 63  ;;  %v1150_v3 = vld [vmem:[%s1331_s1 + $0x18] sm:$0xff] (!%p139_p2)   ;;  %v1151_v6 = vld [vmem:[%s1331_s1 + $0x20] ss:$0 sps:$4 sm:$0xff] (!%p139_p2)  }
   0x7   : > { %1086 = vmatpush3.bf16.msra.mxu0 (!%p139_p2), %v1147_v0  ;;  %1132 = vmatpush3.bf16.msra.mxu1 (!%p139_p2), %v1147_v0  ;;  %v381_v7 = vsel (!%p139_p2), %vm379_vm1, %v1151_v6, 0  ;;  %v1264_v22 = vld [vmem:[%s1332_s2] ss:$0 sm:$0xff] (!%p139_p2) }
   0x8   : > { %1087 = vmatprep.subr.bf16.mxu0 (!%p139_p2), %v1148_v1  ;;  %1128 = vmatprep.subr.bf16.mxu1 (!%p139_p2), %v1148_v1 }
   0xb   : > { %1088 = vmatpush3.bf16.msra.mxu0 (!%p139_p2), %v1148_v1  ;;  %1133 = vmatpush3.bf16.msra.mxu1 (!%p139_p2), %v1148_v1 }
   0xc   : > { %1089 = vmatprep.subr.bf16.mxu0 (!%p139_p2), %v1149_v2  ;;  %1129 = vmatprep.subr.bf16.mxu1 (!%p139_p2), %v1149_v2 }
   0xd   : > { %s1335_s18 = smov (!%p163_p3, %s861_s18), 63 }
   0xe   : > { %s862_s21 = sshll.u32 %s1335_s18, 2 }
   0xf   : > { %s1224_s26 = scalar_lea.vmem %s1330_s0, %s862_s21  ;;  %1090 = vmatpush3.bf16.msra.mxu0 %v1149_v2  ;;  %1134 = vmatpush3.bf16.msra.mxu1 %v1149_v2  ;;  %s1281_s6 = scalar_lea.vmem %s1333_s3, %s862_s21 }
  0x10   : > { %v1152_v4 = vld [vmem:[%s1224_s26] sm:$0xff]   ;;  %1091 = vmatprep.subr.bf16.mxu0 %v1150_v3  ;;  %1130 = vmatprep.subr.bf16.mxu1 %v1150_v3  ;;  %v1154_v8 = vld [vmem:[%s1224_s26 + $0x8] sm:$0xff]   ;;  %v1156_v10 = vld [vmem:[%s1224_s26 + $0x10] sm:$0xff]  }
  0x11   : > { %v1153_v5 = vld [vmem:[%s1224_s26 + $0x40] sm:$0xff]   ;;  %1095 = vmatprep.mubr.msk.bf16.mxu0 %vm330_vm0, %v1152_v4  ;;  %v1155_v9 = vld [vmem:[%s1224_s26 + $0x48] sm:$0xff]   ;;  %v1157_v11 = vld [vmem:[%s1224_s26 + $0x50] sm:$0xff]  }
  0x12   : > { %1111 = vmatprep.mubr.msk.bf16.mxu1 %vm330_vm0, %v1153_v5  ;;  %v1158_v12 = vld [vmem:[%s1224_s26 + $0x18] sm:$0xff]   ;;  %v1160_v14 = vld [vmem:[%s1224_s26 + $0x20] sm:$0xff]   ;;  %v1162_v16 = vld [vmem:[%s1224_s26 + $0x28] sm:$0xff]  }
  0x13   : > { %1092 = vmatpush3.bf16.msra.mxu0 %v1150_v3  ;;  %1135 = vmatpush3.bf16.msra.mxu1 %v1150_v3  ;;  %v1159_v13 = vld [vmem:[%s1224_s26 + $0x58] sm:$0xff]   ;;  %v1161_v15 = vld [vmem:[%s1224_s26 + $0x60] sm:$0xff]   ;;  %v1163_v17 = vld [vmem:[%s1224_s26 + $0x68] sm:$0xff]  }
  0x14   : > { %1137 = vmatprep.subr.msk.bf16.mxu0 %vm379_vm1, %v1151_v6  ;;  %1138 = vmatprep.subr.msk.bf16.mxu1 %vm379_vm1, %v1151_v6  ;;  %v1164_v18 = vld [vmem:[%s1224_s26 + $0x30] sm:$0xff]   ;;  %v1166_v20 = vld [vmem:[%s1224_s26 + $0x38] sm:$0xff]  }
  0x15   : > { %v1165_v19 = vld [vmem:[%s1224_s26 + $0x70] sm:$0xff]   ;;  %v1167_v21 = vld [vmem:[%s1224_s26 + $0x78] sm:$0xff]  }
  0x17   : > { %1094 = vmatpush3.bf16.msra.mxu0 %v381_v7  ;;  %1136 = vmatpush3.bf16.msra.mxu1 %v381_v7 }
  0x1a   : > { %1096 = vmatmul.mubr.msk.bf16.vlgmr.msra.gmra.mrb[0].mxu0 %vm330_vm0, %v1154_v8  ;;  %1112 = vmatmul.mubr.msk.bf16.vlgmr.msra.gmra.mrb[0].mxu1 %vm330_vm0, %v1155_v9 }
  0x1b   : > { %1099 = vmatprep.mubr.msk.bf16.mxu0 %vm330_vm0, %v1156_v10  ;;  %1115 = vmatprep.mubr.msk.bf16.mxu1 %vm330_vm0, %v1157_v11 }
  0x22   : > { %1100 = vmatmul.mubr.msk.bf16.gmra.mrb[4].mxu0 %vm330_vm0, %v1158_v12  ;;  %1116 = vmatmul.mubr.msk.bf16.gmra.mrb[4].mxu1 %vm330_vm0, %v1159_v13 }
  0x23   : > { %1103 = vmatprep.mubr.msk.bf16.mxu0 %vm330_vm0, %v1160_v14  ;;  %1119 = vmatprep.mubr.msk.bf16.mxu1 %vm330_vm0, %v1161_v15 }
  0x2a   : > { %1104 = vmatmul.mubr.msk.bf16.gmra.mrb[8].mxu0 %vm330_vm0, %v1162_v16  ;;  %1120 = vmatmul.mubr.msk.bf16.gmra.mrb[8].mxu1 %vm330_vm0, %v1163_v17 }
  0x2b   : > { %1107 = vmatprep.mubr.msk.bf16.mxu0 %vm330_vm0, %v1164_v18  ;;  %1123 = vmatprep.mubr.msk.bf16.mxu1 %vm330_vm0, %v1165_v19 }
  0x32   : > { %1108 = vmatmul.mubr.msk.bf16.gmra.mrb[12].mxu0 %vm330_vm0, %v1166_v20  ;;  %1124 = vmatmul.mubr.msk.bf16.gmra.mrb[12].mxu1 %vm330_vm0, %v1167_v21 }
  0xed   : > { %v1097_v23 = vpop.f32.mrb[0].mxu0  ;;  %v1113_v24 = vpop.f32.mrb[0].mxu1 }
  0xee   : > { %v426_v25 = vadd.f32 %v1097_v23, %v1264_v22  ;;  %v490_v26 = vadd.f32 %v1113_v24, %v1264_v22  ;;  %v417_v27 = vpop.f32.mrb[1].mxu0  ;;  %v481_v28 = vpop.f32.mrb[1].mxu1 }
  0xef   : > { %v418_v29 = vadd.f32 %v1264_v22, %v417_v27  ;;  %v482_v30 = vadd.f32 %v1264_v22, %v481_v28  ;;  %v1098_v31 = vpop.f32.mrb[2].mxu0  ;;  %v1114_v32 = vpop.f32.mrb[2].mxu1 }
  0xf0   : > { %vm546_vm2 = vcmp.ge.f32.partialorder %v426_v25, 0.0  ;;  %v578_v33 = vmul.f32 0.2, %v426_v25  ;;  %vm562_vm3 = vcmp.ge.f32.partialorder %v490_v26, 0.0  ;;  %v594_v34 = vmul.f32 0.2, %v490_v26 }
  0xf1   : > { %vm544_vm4 = vcmp.ge.f32.partialorder %v418_v29, 0.0  ;;  %v576_v35 = vmul.f32 0.2, %v418_v29  ;;  %vm560_vm5 = vcmp.ge.f32.partialorder %v482_v30, 0.0  ;;  %v592_v36 = vmul.f32 0.2, %v482_v30 }
  0xf2   : > { %v429_v37 = vadd.f32 %v1098_v31, %v1264_v22  ;;  %v493_v38 = vadd.f32 %v1114_v32, %v1264_v22  ;;  %v420_v39 = vpop.f32.mrb[3].mxu0  ;;  %v484_v40 = vpop.f32.mrb[3].mxu1  ;;  %v610_v41 = vsel %vm546_vm2, %v426_v25, %v578_v33  ;;  %v626_v42 = vsel %vm562_vm3, %v490_v26, %v594_v34 }
  0xf3   : > { %v421_v43 = vadd.f32 %v1264_v22, %v420_v39  ;;  %v485_v44 = vadd.f32 %v1264_v22, %v484_v40  ;;  %v608_v49 = vsel %vm544_vm4, %v418_v29, %v576_v35  ;;  %v624_v50 = vsel %vm560_vm5, %v482_v30, %v592_v36 }
  0xf4   : > { %vm547_vm6 = vcmp.ge.f32.partialorder %v429_v37, 0.0  ;;  %v579_v45 = vmul.f32 0.2, %v429_v37  ;;  %vm563_vm7 = vcmp.ge.f32.partialorder %v493_v38, 0.0  ;;  %v595_v46 = vmul.f32 0.2, %v493_v38 }
  0xf5   : > { %vm545_vm8 = vcmp.ge.f32.partialorder %v421_v43, 0.0  ;;  %v577_v47 = vmul.f32 0.2, %v421_v43  ;;  %vm561_vm9 = vcmp.ge.f32.partialorder %v485_v44, 0.0  ;;  %v593_v48 = vmul.f32 0.2, %v485_v44 }
  0xf6   : > { %v611_v51 = vsel %vm547_vm6, %v429_v37, %v579_v45  ;;  %v627_v52 = vsel %vm563_vm7, %v493_v38, %v595_v46  ;;  %v1101_v53 = vpop.f32.mrb[4].mxu0  ;;  %v1117_v54 = vpop.f32.mrb[4].mxu1 }
  0xf7   : > { %v977_v55 = vpack.c.bf16 %v611_v51, %v610_v41  ;;  %v1017_v56 = vpack.c.bf16 %v627_v52, %v626_v42  ;;  %v609_v57 = vsel %vm545_vm8, %v421_v43, %v577_v47  ;;  %v625_v58 = vsel %vm561_vm9, %v485_v44, %v593_v48  ;;  %v433_v59 = vpop.f32.mrb[5].mxu0  ;;  %v497_v60 = vpop.f32.mrb[5].mxu1 }
  0xf8   : > { %v972_v61 = vpack.c.bf16 %v609_v57, %v608_v49  ;;  %v1012_v62 = vpack.c.bf16 %v625_v58, %v624_v50  ;;  %v442_v63 = vadd.f32 %v1101_v53, %v1264_v22  ;;  %v506_v0 = vadd.f32 %v1117_v54, %v1264_v22  ;;  %v1102_v1 = vpop.f32.mrb[6].mxu0  ;;  %v1118_v2 = vpop.f32.mrb[6].mxu1 }
  0xf9   : > { %1049 = vst [vmem:[%s1281_s6 + $0x8] sm:$0xff] %v977_v55   ;;  %1057 = vst [vmem:[%s1281_s6 + $0x48] sm:$0xff] %v1017_v56   ;;  %v434_v3 = vadd.f32 %v1264_v22, %v433_v59  ;;  %v498_v4 = vadd.f32 %v1264_v22, %v497_v60  ;;  %v445_v5 = vadd.f32 %v1102_v1, %v1264_v22  ;;  %v436_v7 = vpop.f32.mrb[7].mxu0  ;;  %v500_v8 = vpop.f32.mrb[7].mxu1 }
  0xfa   : > { %v509_v6 = vadd.f32 %v1118_v2, %v1264_v22  ;;  %973 = vst [vmem:[%s1281_s6] sm:$0xff] %v972_v61   ;;  %1056 = vst [vmem:[%s1281_s6 + $0x40] sm:$0xff] %v1012_v62   ;;  %vm550_vm10 = vcmp.ge.f32.partialorder %v442_v63, 0.0  ;;  %v582_v9 = vmul.f32 0.2, %v442_v63  ;;  %vm566_vm11 = vcmp.ge.f32.partialorder %v506_v0, 0.0 }
  0xfb   : > { %v598_v10 = vmul.f32 0.2, %v506_v0  ;;  %vm548_vm12 = vcmp.ge.f32.partialorder %v434_v3, 0.0  ;;  %v580_v11 = vmul.f32 0.2, %v434_v3  ;;  %vm564_vm13 = vcmp.ge.f32.partialorder %v498_v4, 0.0 }
  0xfc   : > { %v614_v12 = vsel %vm550_vm10, %v442_v63, %v582_v9  ;;  %v596_v13 = vmul.f32 0.2, %v498_v4  ;;  %vm551_vm14 = vcmp.ge.f32.partialorder %v445_v5, 0.0  ;;  %v583_v14 = vmul.f32 0.2, %v445_v5 }
  0xfd   : > { %v630_v15 = vsel %vm566_vm11, %v506_v0, %v598_v10  ;;  %v612_v16 = vsel %vm548_vm12, %v434_v3, %v580_v11  ;;  %vm567_vm15 = vcmp.ge.f32.partialorder %v509_v6, 0.0  ;;  %v599_v17 = vmul.f32 0.2, %v509_v6  ;;  %v1105_v18 = vpop.f32.mrb[8].mxu0  ;;  %v1121_v19 = vpop.f32.mrb[8].mxu1 }
  0xfe   : > { %v615_v20 = vsel %vm551_vm14, %v445_v5, %v583_v14  ;;  %v437_v21 = vadd.f32 %v1264_v22, %v436_v7  ;;  %v501_v23 = vadd.f32 %v1264_v22, %v500_v8  ;;  %v458_v24 = vadd.f32 %v1105_v18, %v1264_v22  ;;  %v449_v25 = vpop.f32.mrb[9].mxu0  ;;  %v513_v26 = vpop.f32.mrb[9].mxu1 }
  0xff   : > { %v987_v27 = vpack.c.bf16 %v615_v20, %v614_v12  ;;  %v631_v28 = vsel %vm567_vm15, %v509_v6, %v599_v17  ;;  %v522_v29 = vadd.f32 %v1121_v19, %v1264_v22  ;;  %v450_v30 = vadd.f32 %v1264_v22, %v449_v25  ;;  %v1106_v31 = vpop.f32.mrb[10].mxu0  ;;  %v1122_v32 = vpop.f32.mrb[10].mxu1 }
 0x100   : > { %v1027_v33 = vpack.c.bf16 %v631_v28, %v630_v15  ;;  %vm549_vm0 = vcmp.ge.f32.partialorder %v437_v21, 0.0  ;;  %v581_v34 = vmul.f32 0.2, %v437_v21  ;;  %vm565_vm1 = vcmp.ge.f32.partialorder %v501_v23, 0.0  ;;  %v452_v35 = vpop.f32.mrb[11].mxu0  ;;  %v516_v36 = vpop.f32.mrb[11].mxu1 }
 0x101   : > { %1051 = vst [vmem:[%s1281_s6 + $0x18] sm:$0xff] %v987_v27   ;;  %v597_v37 = vmul.f32 0.2, %v501_v23  ;;  %vm554_vm2 = vcmp.ge.f32.partialorder %v458_v24, 0.0  ;;  %v586_v38 = vmul.f32 0.2, %v458_v24  ;;  %v628_v39 = vsel %vm564_vm13, %v498_v4, %v596_v13 }
 0x102   : > { %vm570_vm3 = vcmp.ge.f32.partialorder %v522_v29, 0.0  ;;  %1059 = vst [vmem:[%s1281_s6 + $0x58] sm:$0xff] %v1027_v33   ;;  %v613_v40 = vsel %vm549_vm0, %v437_v21, %v581_v34  ;;  %v602_v41 = vmul.f32 0.2, %v522_v29  ;;  %vm552_vm4 = vcmp.ge.f32.partialorder %v450_v30, 0.0 }
 0x103   : > { %v982_v42 = vpack.c.bf16 %v613_v40, %v612_v16  ;;  %v629_v43 = vsel %vm565_vm1, %v501_v23, %v597_v37  ;;  %v584_v44 = vmul.f32 0.2, %v450_v30  ;;  %v514_v45 = vadd.f32 %v1264_v22, %v513_v26 }
 0x104   : > { %v1022_v46 = vpack.c.bf16 %v629_v43, %v628_v39  ;;  %v618_v47 = vsel %vm554_vm2, %v458_v24, %v586_v38  ;;  %v634_v48 = vsel %vm570_vm3, %v522_v29, %v602_v41  ;;  %v461_v49 = vadd.f32 %v1106_v31, %v1264_v22 }
 0x105   : > { %1050 = vst [vmem:[%s1281_s6 + $0x10] sm:$0xff] %v982_v42   ;;  %vm568_vm5 = vcmp.ge.f32.partialorder %v514_v45, 0.0  ;;  %v600_v50 = vmul.f32 0.2, %v514_v45  ;;  %v525_v51 = vadd.f32 %v1122_v32, %v1264_v22  ;;  %v453_v52 = vadd.f32 %v1264_v22, %v452_v35  ;;  %v1109_v53 = vpop.f32.mrb[12].mxu0  ;;  %v1125_v54 = vpop.f32.mrb[12].mxu1 }
 0x106   : > { %1058 = vst [vmem:[%s1281_s6 + $0x50] sm:$0xff] %v1022_v46   ;;  %vm555_vm6 = vcmp.ge.f32.partialorder %v461_v49, 0.0  ;;  %v587_v55 = vmul.f32 0.2, %v461_v49  ;;  %v517_v56 = vadd.f32 %v1264_v22, %v516_v36  ;;  %v474_v57 = vadd.f32 %v1109_v53, %v1264_v22  ;;  %v465_v58 = vpop.f32.mrb[13].mxu0  ;;  %v529_v59 = vpop.f32.mrb[13].mxu1 }
 0x107   : > { %v616_v60 = vsel %vm552_vm4, %v450_v30, %v584_v44  ;;  %vm571_vm7 = vcmp.ge.f32.partialorder %v525_v51, 0.0  ;;  %v603_v61 = vmul.f32 0.2, %v525_v51  ;;  %vm553_vm8 = vcmp.ge.f32.partialorder %v453_v52, 0.0  ;;  %v1110_v62 = vpop.f32.mrb[14].mxu0  ;;  %v1126_v63 = vpop.f32.mrb[14].mxu1 }
 0x108   : > { %v619_v0 = vsel %vm555_vm6, %v461_v49, %v587_v55  ;;  %v585_v1 = vmul.f32 0.2, %v453_v52  ;;  %vm569_vm9 = vcmp.ge.f32.partialorder %v517_v56, 0.0  ;;  %v601_v2 = vmul.f32 0.2, %v517_v56  ;;  %v468_v3 = vpop.f32.mrb[15].mxu0 }
 0x109   : > { %v632_v4 = vsel %vm568_vm5, %v514_v45, %v600_v50  ;;  %v997_v5 = vpack.c.bf16 %v619_v0, %v618_v47  ;;  %v635_v6 = vsel %vm571_vm7, %v525_v51, %v603_v61  ;;  %v590_v7 = vmul.f32 0.2, %v474_v57  ;;  %v532_v8 = vpop.f32.mrb[15].mxu1 }
 0x10a   : > { %v1037_v9 = vpack.c.bf16 %v635_v6, %v634_v48  ;;  %v617_v10 = vsel %vm553_vm8, %v453_v52, %v585_v1  ;;  %v633_v11 = vsel %vm569_vm9, %v517_v56, %v601_v2  ;;  %v538_v12 = vadd.f32 %v1125_v54, %v1264_v22 }
 0x10b   : > { %1053 = vst [vmem:[%s1281_s6 + $0x28] sm:$0xff] %v997_v5   ;;  %v992_v13 = vpack.c.bf16 %v617_v10, %v616_v60  ;;  %v1032_v14 = vpack.c.bf16 %v633_v11, %v632_v4  ;;  %vm558_vm10 = vcmp.ge.f32.partialorder %v474_v57, 0.0  ;;  %v466_v15 = vadd.f32 %v1264_v22, %v465_v58 }
 0x10c   : > { %1061 = vst [vmem:[%s1281_s6 + $0x68] sm:$0xff] %v1037_v9   ;;  %vm574_vm11 = vcmp.ge.f32.partialorder %v538_v12, 0.0  ;;  %v606_v16 = vmul.f32 0.2, %v538_v12  ;;  %v530_v17 = vadd.f32 %v1264_v22, %v529_v59  ;;  %v477_v18 = vadd.f32 %v1110_v62, %v1264_v22 }
 0x10d   : > { %1052 = vst [vmem:[%s1281_s6 + $0x20] sm:$0xff] %v992_v13   ;;  %1060 = vst [vmem:[%s1281_s6 + $0x60] sm:$0xff] %v1032_v14   ;;  %v588_v19 = vmul.f32 0.2, %v466_v15  ;;  %v541_v20 = vadd.f32 %v1126_v63, %v1264_v22  ;;  %v469_v21 = vadd.f32 %v1264_v22, %v468_v3  ;;  %v622_v23 = vsel %vm558_vm10, %v474_v57, %v590_v7 }
 0x10e   : > { %vm556_vm12 = vcmp.ge.f32.partialorder %v466_v15, 0.0  ;;  %vm559_vm13 = vcmp.ge.f32.partialorder %v477_v18, 0.0  ;;  %v638_v24 = vsel %vm574_vm11, %v538_v12, %v606_v16  ;;  %v591_v25 = vmul.f32 0.2, %v477_v18 }
 0x10f   : > { %vm575_vm14 = vcmp.ge.f32.partialorder %v541_v20, 0.0  ;;  %v607_v26 = vmul.f32 0.2, %v541_v20  ;;  %vm572_vm15 = vcmp.ge.f32.partialorder %v530_v17, 0.0  ;;  %vm557_vm0 = vcmp.ge.f32.partialorder %v469_v21, 0.0 }
 0x110   : > { %v589_v27 = vmul.f32 0.2, %v469_v21  ;;  %v533_v28 = vadd.f32 %v1264_v22, %v532_v8  ;;  %v620_v29 = vsel %vm556_vm12, %v466_v15, %v588_v19  ;;  %v604_v30 = vmul.f32 0.2, %v530_v17 }
 0x111   : > { %v623_v31 = vsel %vm559_vm13, %v477_v18, %v591_v25  ;;  %v639_v32 = vsel %vm575_vm14, %v541_v20, %v607_v26 }
 0x112   : > { %v1007_v33 = vpack.c.bf16 %v623_v31, %v622_v23  ;;  %v1047_v34 = vpack.c.bf16 %v639_v32, %v638_v24  ;;  %v621_v35 = vsel %vm557_vm0, %v469_v21, %v589_v27  ;;  %vm573_vm1 = vcmp.ge.f32.partialorder %v533_v28, 0.0 }
 0x113   : > { %v1002_v36 = vpack.c.bf16 %v621_v35, %v620_v29  ;;  %v605_v37 = vmul.f32 0.2, %v533_v28  ;;  %v636_v38 = vsel %vm572_vm15, %v530_v17, %v604_v30 }
 0x114   : > { %1055 = vst [vmem:[%s1281_s6 + $0x38] sm:$0xff] %v1007_v33   ;;  %1063 = vst [vmem:[%s1281_s6 + $0x78] sm:$0xff] %v1047_v34  }
 0x115   : > { %1054 = vst [vmem:[%s1281_s6 + $0x30] sm:$0xff] %v1002_v36   ;;  %v637_v39 = vsel %vm573_vm1, %v533_v28, %v605_v37 }
 0x116   : > { %v1042_v40 = vpack.c.bf16 %v637_v39, %v636_v38 }
 0x118   : > { %1062 = vst [vmem:[%s1281_s6 + $0x70] sm:$0xff] %v1042_v40  }
 0x119 PF: > { %s13_s12 = sadd.s32 1, %s1174_s12  }
 0x11a   : > { %p10_p4 = scmp.ge.s32.totalorder %s13_s12, 4  }
 0x11c   :  { %12 = sbr.rel (!%p10_p4) target bundleno = 1 (0x1), region = 62 }

// kernel: _lambda_.9
= control target key start
LH: loop header
LB: loop body
LE: loop exit
PB: predicated region body
PF: predicated region fallthrough
CT: control target
= control target key end

     0   :  { %s868_s1 = inlined_call_operand.vmem [shape: bf16[256,128], index: 1, kind: input, shape index: {}]   ;;  %s869_s0 = inlined_call_operand.vmem [shape: bf16[128,256], index: 0, kind: input, shape index: {}]   ;;  %s870_s2 = inlined_call_operand.vmem [shape: f32[1,128], index: 2, kind: input, shape index: {}]   ;;  %s871_s3 = inlined_call_operand.vmem [shape: bf16[128,128], index: 3, kind: output, shape index: {}]  }
   0x1   :  { %v667_v0 = vld [vmem:[%s868_s1 + $0x40] sm:$0xff]   ;;  %v669_v2 = vld [vmem:[%s868_s1 + $0x48] sm:$0xff]   ;;  %v671_v4 = vld [vmem:[%s868_s1 + $0x50] sm:$0xff]  }
   0x2   :  { %v668_v1 = vld [vmem:[%s868_s1] sm:$0xff]   ;;  %587 = vmatprep.subr.bf16.mxu0 %v667_v0  ;;  %651 = vmatprep.subr.bf16.mxu1 %v667_v0  ;;  %v670_v3 = vld [vmem:[%s868_s1 + $0x8] sm:$0xff]   ;;  %v672_v5 = vld [vmem:[%s868_s1 + $0x10] sm:$0xff]  }
   0x3   :  { %588 = vmatpush3.bf16.msra.mxu0 %v668_v1  ;;  %659 = vmatpush3.bf16.msra.mxu1 %v668_v1  ;;  %v673_v6 = vld [vmem:[%s868_s1 + $0x58] sm:$0xff]   ;;  %v675_v8 = vld [vmem:[%s868_s1 + $0x60] sm:$0xff]   ;;  %v677_v10 = vld [vmem:[%s868_s1 + $0x68] sm:$0xff]  }
   0x4   :  { %589 = vmatprep.subr.bf16.mxu0 %v669_v2  ;;  %652 = vmatprep.subr.bf16.mxu1 %v669_v2  ;;  %v674_v7 = vld [vmem:[%s868_s1 + $0x18] sm:$0xff]   ;;  %v676_v9 = vld [vmem:[%s868_s1 + $0x20] sm:$0xff]   ;;  %v678_v13 = vld [vmem:[%s868_s1 + $0x28] sm:$0xff]  }
   0x5   :  { %v685_v11 = vld [vmem:[%s869_s0 + $0x4] ss:$8 sps:$4 sm:$0xff]   ;;  %v679_v14 = vld [vmem:[%s868_s1 + $0x70] sm:$0xff]   ;;  %v681_v16 = vld [vmem:[%s868_s1 + $0x78] sm:$0xff]  }
   0x6   :  { %v688_v12 = vld [vmem:[%s869_s0 + $0x44] ss:$8 sps:$4 sm:$0xff]   ;;  %278 = vmatprep.mubr.bf16.mxu0 %v685_v11  ;;  %v680_v15 = vld [vmem:[%s868_s1 + $0x30] sm:$0xff]   ;;  %v682_v17 = vld [vmem:[%s868_s1 + $0x38] sm:$0xff]  }
   0x7   :  { %590 = vmatpush3.bf16.msra.mxu0 %v670_v3  ;;  %660 = vmatpush3.bf16.msra.mxu1 %v670_v3  ;;  %v683_v18 = vld [vmem:[%s869_s0] ss:$8 sps:$4 sm:$0xff]   ;;  %v689_v20 = vld [vmem:[%s869_s0 + $0x14] ss:$8 sps:$4 sm:$0xff]   ;;  %v693_v22 = vld [vmem:[%s869_s0 + $0x10] ss:$8 sps:$4 sm:$0xff]  }
   0x8   :  { %591 = vmatprep.subr.bf16.mxu0 %v671_v4  ;;  %653 = vmatprep.subr.bf16.mxu1 %v671_v4  ;;  %v686_v19 = vld [vmem:[%s869_s0 + $0x40] ss:$8 sps:$4 sm:$0xff]   ;;  %v691_v21 = vld [vmem:[%s869_s0 + $0x54] ss:$8 sps:$4 sm:$0xff]   ;;  %v694_v23 = vld [vmem:[%s869_s0 + $0x50] ss:$8 sps:$4 sm:$0xff]  }
   0x9   :  { %310 = vmatprep.mubr.bf16.mxu1 %v688_v12  ;;  %v695_v24 = vld [vmem:[%s869_s0 + $0x24] ss:$8 sps:$4 sm:$0xff]   ;;  %v699_v26 = vld [vmem:[%s869_s0 + $0x20] ss:$8 sps:$4 sm:$0xff]   ;;  %v701_v28 = vld [vmem:[%s869_s0 + $0x34] ss:$8 sps:$4 sm:$0xff]  }
   0xa   :  { %v697_v25 = vld [vmem:[%s869_s0 + $0x64] ss:$8 sps:$4 sm:$0xff]   ;;  %v700_v27 = vld [vmem:[%s869_s0 + $0x60] ss:$8 sps:$4 sm:$0xff]   ;;  %v703_v29 = vld [vmem:[%s869_s0 + $0x74] ss:$8 sps:$4 sm:$0xff]  }
   0xb   :  { %592 = vmatpush3.bf16.msra.mxu0 %v672_v5  ;;  %661 = vmatpush3.bf16.msra.mxu1 %v672_v5  ;;  %v705_v30 = vld [vmem:[%s869_s0 + $0x30] ss:$8 sps:$4 sm:$0xff]   ;;  %v826_v34 = vld [vmem:[%s870_s2] ss:$0 sm:$0xff] }
   0xc   :  { %593 = vmatprep.subr.bf16.mxu0 %v673_v6  ;;  %654 = vmatprep.subr.bf16.mxu1 %v673_v6  ;;  %v706_v31 = vld [vmem:[%s869_s0 + $0x70] ss:$8 sps:$4 sm:$0xff]  }
   0xf   :  { %594 = vmatpush3.bf16.msra.mxu0 %v674_v7  ;;  %662 = vmatpush3.bf16.msra.mxu1 %v674_v7 }
  0x10   :  { %595 = vmatprep.subr.bf16.mxu0 %v675_v8  ;;  %655 = vmatprep.subr.bf16.mxu1 %v675_v8 }
  0x13   :  { %596 = vmatpush3.bf16.msra.mxu0 %v676_v9  ;;  %663 = vmatpush3.bf16.msra.mxu1 %v676_v9 }
  0x14   :  { %597 = vmatprep.subr.bf16.mxu0 %v677_v10  ;;  %656 = vmatprep.subr.bf16.mxu1 %v677_v10 }
  0x17   :  { %598 = vmatpush3.bf16.msra.mxu0 %v678_v13  ;;  %664 = vmatpush3.bf16.msra.mxu1 %v678_v13 }
  0x18   :  { %599 = vmatprep.subr.bf16.mxu0 %v679_v14  ;;  %657 = vmatprep.subr.bf16.mxu1 %v679_v14 }
  0x1b   :  { %600 = vmatpush3.bf16.msra.mxu0 %v680_v15  ;;  %665 = vmatpush3.bf16.msra.mxu1 %v680_v15 }
  0x1c   :  { %601 = vmatprep.subr.bf16.mxu0 %v681_v16  ;;  %658 = vmatprep.subr.bf16.mxu1 %v681_v16 }
  0x1f   :  { %602 = vmatpush3.bf16.msra.mxu0 %v682_v17  ;;  %666 = vmatpush3.bf16.msra.mxu1 %v682_v17 }
  0x22   :  { %279 = vmatmul.mubr.bf16.vlgmr.msra.gmra.mrb[0].mxu0 %v683_v18  ;;  %311 = vmatmul.mubr.bf16.vlgmr.msra.gmra.mrb[0].mxu1 %v686_v19 }
  0x23   :  { %286 = vmatprep.mubr.bf16.mxu0 %v689_v20  ;;  %318 = vmatprep.mubr.bf16.mxu1 %v691_v21 }
  0x2a   :  { %287 = vmatmul.mubr.bf16.gmra.mrb[4].mxu0 %v693_v22  ;;  %319 = vmatmul.mubr.bf16.gmra.mrb[4].mxu1 %v694_v23 }
  0x2b   :  { %294 = vmatprep.mubr.bf16.mxu0 %v695_v24  ;;  %326 = vmatprep.mubr.bf16.mxu1 %v697_v25 }
  0x32   :  { %295 = vmatmul.mubr.bf16.gmra.mrb[8].mxu0 %v699_v26  ;;  %327 = vmatmul.mubr.bf16.gmra.mrb[8].mxu1 %v700_v27 }
  0x33   :  { %302 = vmatprep.mubr.bf16.mxu0 %v701_v28  ;;  %334 = vmatprep.mubr.bf16.mxu1 %v703_v29 }
  0x3a   :  { %303 = vmatmul.mubr.bf16.gmra.mrb[12].mxu0 %v705_v30  ;;  %335 = vmatmul.mubr.bf16.gmra.mrb[12].mxu1 %v706_v31 }
  0xf5   :  { %v603_v32 = vpop.f32.mrb[0].mxu0  ;;  %v627_v33 = vpop.f32.mrb[0].mxu1 }
  0xf6   :  { %v604_v35 = vpop.f32.mrb[1].mxu0  ;;  %v628_v36 = vpop.f32.mrb[1].mxu1 }
  0xf7   :  { %v605_v37 = vadd.f32 %v604_v35, %v603_v32  ;;  %v629_v38 = vadd.f32 %v628_v36, %v627_v33  ;;  %v606_v39 = vpop.f32.mrb[2].mxu0  ;;  %v630_v40 = vpop.f32.mrb[2].mxu1 }
  0xf8   :  { %v607_v41 = vpop.f32.mrb[3].mxu0  ;;  %v631_v42 = vpop.f32.mrb[3].mxu1 }
  0xf9   :  { %v281_v43 = vadd.f32 %v605_v37, %v826_v34  ;;  %v313_v44 = vadd.f32 %v629_v38, %v826_v34  ;;  %v608_v45 = vadd.f32 %v607_v41, %v606_v39  ;;  %v632_v46 = vadd.f32 %v631_v42, %v630_v40 }
  0xfb   :  { %v359_v47 = vmul.f32 0.2, %v281_v43  ;;  %v367_v48 = vmul.f32 0.2, %v313_v44  ;;  %vm343_vm0 = vcmp.ge.f32.partialorder %v281_v43, 0.0  ;;  %vm351_vm1 = vcmp.ge.f32.partialorder %v313_v44, 0.0 }
  0xfc   :  { %v284_v49 = vadd.f32 %v608_v45, %v826_v34  ;;  %v316_v50 = vadd.f32 %v632_v46, %v826_v34 }
  0xfd   :  { %v609_v51 = vpop.f32.mrb[4].mxu0  ;;  %v633_v52 = vpop.f32.mrb[4].mxu1  ;;  %v375_v55 = vsel %vm343_vm0, %v281_v43, %v359_v47  ;;  %v383_v56 = vsel %vm351_vm1, %v313_v44, %v367_v48 }
  0xfe   :  { %vm344_vm2 = vcmp.ge.f32.partialorder %v284_v49, 0.0  ;;  %v360_v53 = vmul.f32 0.2, %v284_v49  ;;  %vm352_vm3 = vcmp.ge.f32.partialorder %v316_v50, 0.0  ;;  %v368_v54 = vmul.f32 0.2, %v316_v50 }
  0xff   :  { %v610_v57 = vpop.f32.mrb[5].mxu0  ;;  %v634_v58 = vpop.f32.mrb[5].mxu1 }
 0x100   :  { %v376_v59 = vsel %vm344_vm2, %v284_v49, %v360_v53  ;;  %v384_v60 = vsel %vm352_vm3, %v316_v50, %v368_v54  ;;  %v611_v61 = vadd.f32 %v610_v57, %v609_v51  ;;  %v635_v62 = vadd.f32 %v634_v58, %v633_v52  ;;  %v612_v63 = vpop.f32.mrb[6].mxu0  ;;  %v636_v0 = vpop.f32.mrb[6].mxu1 }
 0x101   :  { %v543_v1 = vpack.c.bf16 %v376_v59, %v375_v55  ;;  %v563_v2 = vpack.c.bf16 %v384_v60, %v383_v56  ;;  %v613_v3 = vpop.f32.mrb[7].mxu0  ;;  %v637_v4 = vpop.f32.mrb[7].mxu1 }
 0x102   :  { %v289_v5 = vadd.f32 %v611_v61, %v826_v34  ;;  %v321_v6 = vadd.f32 %v635_v62, %v826_v34  ;;  %v614_v7 = vadd.f32 %v613_v3, %v612_v63  ;;  %v638_v8 = vadd.f32 %v637_v4, %v636_v0 }
 0x103   :  { %544 = vst [vmem:[%s871_s3] sm:$0xff] %v543_v1   ;;  %583 = vst [vmem:[%s871_s3 + $0x20] sm:$0xff] %v563_v2  }
 0x104   :  { %v361_v9 = vmul.f32 0.2, %v289_v5  ;;  %v369_v10 = vmul.f32 0.2, %v321_v6  ;;  %v292_v11 = vadd.f32 %v614_v7, %v826_v34  ;;  %v324_v12 = vadd.f32 %v638_v8, %v826_v34 }
 0x105   :  { %v615_v13 = vpop.f32.mrb[8].mxu0  ;;  %v639_v14 = vpop.f32.mrb[8].mxu1  ;;  %vm345_vm4 = vcmp.ge.f32.partialorder %v289_v5, 0.0  ;;  %vm353_vm5 = vcmp.ge.f32.partialorder %v321_v6, 0.0 }
 0x106   :  { %v616_v15 = vpop.f32.mrb[9].mxu0  ;;  %v640_v16 = vpop.f32.mrb[9].mxu1  ;;  %vm346_vm6 = vcmp.ge.f32.partialorder %v292_v11, 0.0  ;;  %v362_v17 = vmul.f32 0.2, %v292_v11  ;;  %vm354_vm7 = vcmp.ge.f32.partialorder %v324_v12, 0.0  ;;  %v377_v23 = vsel %vm345_vm4, %v289_v5, %v361_v9 }
 0x107   :  { %v370_v18 = vmul.f32 0.2, %v324_v12  ;;  %v617_v19 = vadd.f32 %v616_v15, %v615_v13  ;;  %v641_v20 = vadd.f32 %v640_v16, %v639_v14  ;;  %v618_v21 = vpop.f32.mrb[10].mxu0  ;;  %v642_v22 = vpop.f32.mrb[10].mxu1  ;;  %v385_v24 = vsel %vm353_vm5, %v321_v6, %v369_v10 }
 0x108   :  { %v378_v25 = vsel %vm346_vm6, %v292_v11, %v362_v17  ;;  %v619_v27 = vpop.f32.mrb[11].mxu0  ;;  %v643_v28 = vpop.f32.mrb[11].mxu1 }
 0x109   :  { %v386_v26 = vsel %vm354_vm7, %v324_v12, %v370_v18  ;;  %v548_v29 = vpack.c.bf16 %v378_v25, %v377_v23  ;;  %v297_v31 = vadd.f32 %v617_v19, %v826_v34  ;;  %v329_v32 = vadd.f32 %v641_v20, %v826_v34 }
 0x10a   :  { %v568_v30 = vpack.c.bf16 %v386_v26, %v385_v24  ;;  %v620_v33 = vadd.f32 %v619_v27, %v618_v21  ;;  %v644_v35 = vadd.f32 %v643_v28, %v642_v22 }
 0x10b   :  { %580 = vst [vmem:[%s871_s3 + $0x8] sm:$0xff] %v548_v29   ;;  %v363_v36 = vmul.f32 0.2, %v297_v31  ;;  %v371_v37 = vmul.f32 0.2, %v329_v32  ;;  %vm347_vm8 = vcmp.ge.f32.partialorder %v297_v31, 0.0 }
 0x10c   :  { %584 = vst [vmem:[%s871_s3 + $0x28] sm:$0xff] %v568_v30   ;;  %v300_v38 = vadd.f32 %v620_v33, %v826_v34  ;;  %v332_v39 = vadd.f32 %v644_v35, %v826_v34  ;;  %vm355_vm9 = vcmp.ge.f32.partialorder %v329_v32, 0.0 }
 0x10d   :  { %v621_v40 = vpop.f32.mrb[12].mxu0  ;;  %v645_v41 = vpop.f32.mrb[12].mxu1  ;;  %v379_v50 = vsel %vm347_vm8, %v297_v31, %v363_v36  ;;  %v387_v51 = vsel %vm355_vm9, %v329_v32, %v371_v37 }
 0x10e   :  { %v622_v42 = vpop.f32.mrb[13].mxu0  ;;  %v646_v43 = vpop.f32.mrb[13].mxu1  ;;  %vm348_vm10 = vcmp.ge.f32.partialorder %v300_v38, 0.0  ;;  %v364_v44 = vmul.f32 0.2, %v300_v38  ;;  %vm356_vm11 = vcmp.ge.f32.partialorder %v332_v39, 0.0 }
 0x10f   :  { %v372_v45 = vmul.f32 0.2, %v332_v39  ;;  %v623_v46 = vadd.f32 %v622_v42, %v621_v40  ;;  %v647_v47 = vadd.f32 %v646_v43, %v645_v41  ;;  %v624_v48 = vpop.f32.mrb[14].mxu0  ;;  %v648_v49 = vpop.f32.mrb[14].mxu1 }
 0x110   :  { %v380_v52 = vsel %vm348_vm10, %v300_v38, %v364_v44  ;;  %v625_v54 = vpop.f32.mrb[15].mxu0  ;;  %v649_v55 = vpop.f32.mrb[15].mxu1 }
 0x111   :  { %v388_v53 = vsel %vm356_vm11, %v332_v39, %v372_v45  ;;  %v553_v56 = vpack.c.bf16 %v380_v52, %v379_v50  ;;  %v305_v58 = vadd.f32 %v623_v46, %v826_v34  ;;  %v337_v59 = vadd.f32 %v647_v47, %v826_v34 }
 0x112   :  { %v573_v57 = vpack.c.bf16 %v388_v53, %v387_v51  ;;  %v626_v60 = vadd.f32 %v625_v54, %v624_v48  ;;  %v650_v61 = vadd.f32 %v649_v55, %v648_v49 }
 0x113   :  { %581 = vst [vmem:[%s871_s3 + $0x10] sm:$0xff] %v553_v56   ;;  %v365_v62 = vmul.f32 0.2, %v305_v58  ;;  %v373_v63 = vmul.f32 0.2, %v337_v59  ;;  %vm349_vm12 = vcmp.ge.f32.partialorder %v305_v58, 0.0 }
 0x114   :  { %585 = vst [vmem:[%s871_s3 + $0x30] sm:$0xff] %v573_v57   ;;  %v308_v0 = vadd.f32 %v626_v60, %v826_v34  ;;  %v340_v1 = vadd.f32 %v650_v61, %v826_v34  ;;  %vm357_vm13 = vcmp.ge.f32.partialorder %v337_v59, 0.0 }
 0x115   :  { %v381_v4 = vsel %vm349_vm12, %v305_v58, %v365_v62  ;;  %v389_v5 = vsel %vm357_vm13, %v337_v59, %v373_v63 }
 0x116   :  { %vm350_vm14 = vcmp.ge.f32.partialorder %v308_v0, 0.0  ;;  %v366_v2 = vmul.f32 0.2, %v308_v0  ;;  %vm358_vm15 = vcmp.ge.f32.partialorder %v340_v1, 0.0  ;;  %v374_v3 = vmul.f32 0.2, %v340_v1 }
 0x118   :  { %v382_v6 = vsel %vm350_vm14, %v308_v0, %v366_v2  ;;  %v390_v7 = vsel %vm358_vm15, %v340_v1, %v374_v3 }
 0x119   :  { %v558_v8 = vpack.c.bf16 %v382_v6, %v381_v4  ;;  %v578_v9 = vpack.c.bf16 %v390_v7, %v389_v5 }
 0x11b   :  { %582 = vst [vmem:[%s871_s3 + $0x18] sm:$0xff] %v558_v8   ;;  %586 = vst [vmem:[%s871_s3 + $0x38] sm:$0xff] %v578_v9  }

// kernel: _lambda_.10
= control target key start
LH: loop header
LB: loop body
LE: loop exit
PB: predicated region body
PF: predicated region fallthrough
CT: control target
= control target key end

     0   :  { %v601_v0 = vmov 0   ;;  %vm182_vm0 = vcmask 130048   ;;  %s750_s1 = inlined_call_operand.vmem [shape: bf16[144,128], index: 1, kind: input, shape index: {}]   ;;  %s751_s0 = inlined_call_operand.vmem [shape: bf16[128,144], index: 0, kind: input, shape index: {}]   ;;  %s752_s2 = inlined_call_operand.vmem [shape: f32[1,128], index: 2, kind: input, shape index: {}]   ;;  %s753_s3 = inlined_call_operand.vmem [shape: bf16[128,128], index: 3, kind: output, shape index: {}]  }
   0x1   :  { %207 = vmatprep.subr.bf16.mxu0 %v601_v0  ;;  %549 = vmatprep.subr.bf16.mxu1 %v601_v0  ;;  %v568_v1 = vld [vmem:[%s750_s1] sm:$0xff]   ;;  %v569_v2 = vld [vmem:[%s750_s1 + $0x8] sm:$0xff]   ;;  %v570_v3 = vld [vmem:[%s750_s1 + $0x10] sm:$0xff]  }
   0x2   :  { %208 = vmatpush1.bf16.msra.mxu0 %v568_v1  ;;  %558 = vmatpush1.bf16.msra.mxu1 %v568_v1  ;;  %v571_v4 = vld [vmem:[%s750_s1 + $0x18] sm:$0xff]   ;;  %v579_v5 = vld [vmem:[%s751_s0 + $0x4] ss:$8 sps:$4 sm:$0xff]   ;;  %v574_v9 = vld [vmem:[%s750_s1 + $0x30] sm:$0xff]  }
   0x3   :  { %209 = vmatprep.subr.bf16.mxu0 %v601_v0  ;;  %550 = vmatprep.subr.bf16.mxu1 %v601_v0  ;;  %v582_v6 = vld [vmem:[%s751_s0 + $0x44] ss:$8 sps:$4 sm:$0xff]   ;;  %v575_v10 = vld [vmem:[%s750_s1 + $0x38] sm:$0xff]   ;;  %v577_v12 = vld [vmem:[%s751_s0] ss:$8 sps:$4 sm:$0xff]  }
   0x4   :  { %462 = vmatprep.mubr.msk.bf16.mxu0 %vm182_vm0, %v579_v5  ;;  %466 = vmatprep.mubr.msk.bf16.mxu1 %vm182_vm0, %v582_v6  ;;  %v572_v7 = vld [vmem:[%s750_s1 + $0x20] sm:$0xff]   ;;  %v573_v8 = vld [vmem:[%s750_s1 + $0x28] sm:$0xff]   ;;  %v583_v14 = vld [vmem:[%s751_s0 + $0x14] ss:$8 sps:$4 sm:$0xff]  }
   0x5   :  { %v576_v11 = vld [vmem:[%s750_s1 + $0x40] sm:$0xff]   ;;  %v585_v15 = vld [vmem:[%s751_s0 + $0x54] ss:$8 sps:$4 sm:$0xff]   ;;  %v587_v16 = vld [vmem:[%s751_s0 + $0x10] ss:$8 sps:$4 sm:$0xff]  }
   0x6   :  { %210 = vmatpush1.bf16.msra.mxu0 %v569_v2  ;;  %559 = vmatpush1.bf16.msra.mxu1 %v569_v2  ;;  %v580_v13 = vld [vmem:[%s751_s0 + $0x40] ss:$8 sps:$4 sm:$0xff]   ;;  %v588_v17 = vld [vmem:[%s751_s0 + $0x50] ss:$8 sps:$4 sm:$0xff]   ;;  %v589_v18 = vld [vmem:[%s751_s0 + $0x24] ss:$8 sps:$4 sm:$0xff]  }
   0x7   :  { %211 = vmatprep.subr.bf16.mxu0 %v601_v0  ;;  %551 = vmatprep.subr.bf16.mxu1 %v601_v0  ;;  %v591_v19 = vld [vmem:[%s751_s0 + $0x64] ss:$8 sps:$4 sm:$0xff]   ;;  %v593_v20 = vld [vmem:[%s751_s0 + $0x20] ss:$8 sps:$4 sm:$0xff]   ;;  %v595_v22 = vld [vmem:[%s751_s0 + $0x34] ss:$8 sps:$4 sm:$0xff]  }
   0x8   :  { %v594_v21 = vld [vmem:[%s751_s0 + $0x60] ss:$8 sps:$4 sm:$0xff]   ;;  %v597_v23 = vld [vmem:[%s751_s0 + $0x74] ss:$8 sps:$4 sm:$0xff]   ;;  %v599_v24 = vld [vmem:[%s751_s0 + $0x30] ss:$8 sps:$4 sm:$0xff]  }
   0x9   :  { %v600_v25 = vld [vmem:[%s751_s0 + $0x70] ss:$8 sps:$4 sm:$0xff]   ;;  %v708_v26 = vld [vmem:[%s752_s2] ss:$0 sm:$0xff] }
   0xa   :  { %212 = vmatpush1.bf16.msra.mxu0 %v570_v3  ;;  %560 = vmatpush1.bf16.msra.mxu1 %v570_v3 }
   0xb   :  { %213 = vmatprep.subr.bf16.mxu0 %v601_v0  ;;  %552 = vmatprep.subr.bf16.mxu1 %v601_v0 }
   0xe   :  { %214 = vmatpush1.bf16.msra.mxu0 %v571_v4  ;;  %561 = vmatpush1.bf16.msra.mxu1 %v571_v4 }
   0xf   :  { %215 = vmatprep.subr.bf16.mxu0 %v601_v0  ;;  %553 = vmatprep.subr.bf16.mxu1 %v601_v0 }
  0x12   :  { %216 = vmatpush1.bf16.msra.mxu0 %v572_v7  ;;  %562 = vmatpush1.bf16.msra.mxu1 %v572_v7 }
  0x13   :  { %217 = vmatprep.subr.bf16.mxu0 %v601_v0  ;;  %554 = vmatprep.subr.bf16.mxu1 %v601_v0 }
  0x16   :  { %218 = vmatpush1.bf16.msra.mxu0 %v573_v8  ;;  %563 = vmatpush1.bf16.msra.mxu1 %v573_v8 }
  0x17   :  { %219 = vmatprep.subr.bf16.mxu0 %v601_v0  ;;  %555 = vmatprep.subr.bf16.mxu1 %v601_v0 }
  0x1a   :  { %220 = vmatpush1.bf16.msra.mxu0 %v574_v9  ;;  %564 = vmatpush1.bf16.msra.mxu1 %v574_v9 }
  0x1b   :  { %221 = vmatprep.subr.bf16.mxu0 %v601_v0  ;;  %556 = vmatprep.subr.bf16.mxu1 %v601_v0 }
  0x1e   :  { %222 = vmatpush1.bf16.msra.mxu0 %v575_v10  ;;  %565 = vmatpush1.bf16.msra.mxu1 %v575_v10 }
  0x1f   :  { %223 = vmatprep.subr.bf16.mxu0 %v601_v0  ;;  %557 = vmatprep.subr.bf16.mxu1 %v601_v0 }
  0x22   :  { %224 = vmatpush1.bf16.msra.mxu0 %v576_v11  ;;  %566 = vmatpush1.bf16.msra.mxu1 %v576_v11 }
  0x25   :  { %240 = vmatmul.mubr.bf16.vlgmr.msra.gmra.mrb[0].mxu0 %v577_v12  ;;  %272 = vmatmul.mubr.bf16.vlgmr.msra.gmra.mrb[0].mxu1 %v580_v13 }
  0x26   :  { %463 = vmatprep.mubr.msk.bf16.mxu0 %vm182_vm0, %v583_v14  ;;  %467 = vmatprep.mubr.msk.bf16.mxu1 %vm182_vm0, %v585_v15 }
  0x2d   :  { %248 = vmatmul.mubr.bf16.gmra.mrb[4].mxu0 %v587_v16  ;;  %280 = vmatmul.mubr.bf16.gmra.mrb[4].mxu1 %v588_v17 }
  0x2e   :  { %464 = vmatprep.mubr.msk.bf16.mxu0 %vm182_vm0, %v589_v18  ;;  %468 = vmatprep.mubr.msk.bf16.mxu1 %vm182_vm0, %v591_v19 }
  0x35   :  { %256 = vmatmul.mubr.bf16.gmra.mrb[8].mxu0 %v593_v20  ;;  %288 = vmatmul.mubr.bf16.gmra.mrb[8].mxu1 %v594_v21 }
  0x36   :  { %465 = vmatprep.mubr.msk.bf16.mxu0 %vm182_vm0, %v595_v22  ;;  %469 = vmatprep.mubr.msk.bf16.mxu1 %vm182_vm0, %v597_v23 }
  0x3d   :  { %264 = vmatmul.mubr.bf16.gmra.mrb[12].mxu0 %v599_v24  ;;  %296 = vmatmul.mubr.bf16.gmra.mrb[12].mxu1 %v600_v25 }
  0xf8   :  { %v241_v27 = vpop.f32.mrb[0].mxu0  ;;  %v273_v28 = vpop.f32.mrb[0].mxu1 }
  0xf9   :  { %v242_v29 = vadd.f32 %v708_v26, %v241_v27  ;;  %v274_v30 = vadd.f32 %v708_v26, %v273_v28  ;;  %v243_v31 = vpop.f32.mrb[1].mxu0  ;;  %v275_v32 = vpop.f32.mrb[1].mxu1 }
  0xfa   :  { %v244_v33 = vpop.f32.mrb[2].mxu0  ;;  %v276_v34 = vpop.f32.mrb[2].mxu1 }
  0xfb   :  { %v320_v35 = vmul.f32 0.2, %v242_v29  ;;  %v328_v36 = vmul.f32 0.2, %v274_v30  ;;  %v245_v37 = vadd.f32 %v708_v26, %v244_v33  ;;  %v277_v38 = vadd.f32 %v708_v26, %v276_v34  ;;  %v246_v39 = vpop.f32.mrb[3].mxu0  ;;  %v278_v40 = vpop.f32.mrb[3].mxu1 }
  0xfc   :  { %vm304_vm1 = vcmp.ge.f32.partialorder %v242_v29, 0.0  ;;  %vm312_vm2 = vcmp.ge.f32.partialorder %v274_v30, 0.0 }
  0xfd   :  { %vm305_vm3 = vcmp.ge.f32.partialorder %v245_v37, 0.0  ;;  %v321_v41 = vmul.f32 0.2, %v245_v37  ;;  %vm313_vm4 = vcmp.ge.f32.partialorder %v277_v38, 0.0  ;;  %v329_v42 = vmul.f32 0.2, %v277_v38 }
  0xfe   :  { %v336_v43 = vsel %vm304_vm1, %v242_v29, %v320_v35  ;;  %v344_v44 = vsel %vm312_vm2, %v274_v30, %v328_v36 }
  0xff   :  { %v337_v45 = vsel %vm305_vm3, %v245_v37, %v321_v41  ;;  %v345_v46 = vsel %vm313_vm4, %v277_v38, %v329_v42 }
 0x100   :  { %v249_v47 = vpop.f32.mrb[4].mxu0  ;;  %v281_v48 = vpop.f32.mrb[4].mxu1  ;;  %v505_v49 = vpack.c.bf16 %v337_v45, %v336_v43  ;;  %v525_v50 = vpack.c.bf16 %v345_v46, %v344_v44 }
 0x101   :  { %v250_v51 = vadd.f32 %v708_v26, %v249_v47  ;;  %v282_v52 = vadd.f32 %v708_v26, %v281_v48  ;;  %v251_v53 = vpop.f32.mrb[5].mxu0  ;;  %v283_v54 = vpop.f32.mrb[5].mxu1 }
 0x102   :  { %v252_v55 = vpop.f32.mrb[6].mxu0  ;;  %v284_v56 = vpop.f32.mrb[6].mxu1  ;;  %506 = vst [vmem:[%s753_s3] sm:$0xff] %v505_v49   ;;  %545 = vst [vmem:[%s753_s3 + $0x20] sm:$0xff] %v525_v50  }
 0x103   :  { %v322_v57 = vmul.f32 0.2, %v250_v51  ;;  %v330_v58 = vmul.f32 0.2, %v282_v52  ;;  %v253_v59 = vadd.f32 %v708_v26, %v252_v55  ;;  %v285_v60 = vadd.f32 %v708_v26, %v284_v56  ;;  %v254_v61 = vpop.f32.mrb[7].mxu0  ;;  %v286_v62 = vpop.f32.mrb[7].mxu1 }
 0x104   :  { %vm306_vm5 = vcmp.ge.f32.partialorder %v250_v51, 0.0  ;;  %vm314_vm6 = vcmp.ge.f32.partialorder %v282_v52, 0.0 }
 0x105   :  { %vm307_vm7 = vcmp.ge.f32.partialorder %v253_v59, 0.0  ;;  %v323_v63 = vmul.f32 0.2, %v253_v59  ;;  %vm315_vm8 = vcmp.ge.f32.partialorder %v285_v60, 0.0  ;;  %v331_v0 = vmul.f32 0.2, %v285_v60 }
 0x106   :  { %v338_v1 = vsel %vm306_vm5, %v250_v51, %v322_v57  ;;  %v346_v2 = vsel %vm314_vm6, %v282_v52, %v330_v58 }
 0x107   :  { %v339_v3 = vsel %vm307_vm7, %v253_v59, %v323_v63  ;;  %v347_v4 = vsel %vm315_vm8, %v285_v60, %v331_v0 }
 0x108   :  { %v257_v5 = vpop.f32.mrb[8].mxu0  ;;  %v289_v6 = vpop.f32.mrb[8].mxu1  ;;  %v510_v7 = vpack.c.bf16 %v339_v3, %v338_v1  ;;  %v530_v8 = vpack.c.bf16 %v347_v4, %v346_v2 }
 0x109   :  { %v258_v9 = vadd.f32 %v708_v26, %v257_v5  ;;  %v290_v10 = vadd.f32 %v708_v26, %v289_v6  ;;  %v259_v11 = vpop.f32.mrb[9].mxu0  ;;  %v291_v12 = vpop.f32.mrb[9].mxu1 }
 0x10a   :  { %v260_v13 = vpop.f32.mrb[10].mxu0  ;;  %v292_v14 = vpop.f32.mrb[10].mxu1  ;;  %542 = vst [vmem:[%s753_s3 + $0x8] sm:$0xff] %v510_v7   ;;  %546 = vst [vmem:[%s753_s3 + $0x28] sm:$0xff] %v530_v8  }
 0x10b   :  { %v324_v15 = vmul.f32 0.2, %v258_v9  ;;  %v332_v16 = vmul.f32 0.2, %v290_v10  ;;  %v261_v17 = vadd.f32 %v708_v26, %v260_v13  ;;  %v293_v18 = vadd.f32 %v708_v26, %v292_v14  ;;  %v262_v19 = vpop.f32.mrb[11].mxu0  ;;  %v294_v20 = vpop.f32.mrb[11].mxu1 }
 0x10c   :  { %vm308_vm9 = vcmp.ge.f32.partialorder %v258_v9, 0.0  ;;  %vm316_vm10 = vcmp.ge.f32.partialorder %v290_v10, 0.0 }
 0x10d   :  { %vm309_vm11 = vcmp.ge.f32.partialorder %v261_v17, 0.0  ;;  %v325_v21 = vmul.f32 0.2, %v261_v17  ;;  %vm317_vm12 = vcmp.ge.f32.partialorder %v293_v18, 0.0  ;;  %v333_v22 = vmul.f32 0.2, %v293_v18 }
 0x10e   :  { %v340_v23 = vsel %vm308_vm9, %v258_v9, %v324_v15  ;;  %v348_v24 = vsel %vm316_vm10, %v290_v10, %v332_v16 }
 0x10f   :  { %v341_v25 = vsel %vm309_vm11, %v261_v17, %v325_v21  ;;  %v349_v27 = vsel %vm317_vm12, %v293_v18, %v333_v22 }
 0x110   :  { %v265_v28 = vpop.f32.mrb[12].mxu0  ;;  %v297_v29 = vpop.f32.mrb[12].mxu1  ;;  %v515_v30 = vpack.c.bf16 %v341_v25, %v340_v23  ;;  %v535_v31 = vpack.c.bf16 %v349_v27, %v348_v24 }
 0x111   :  { %v266_v32 = vadd.f32 %v708_v26, %v265_v28  ;;  %v298_v33 = vadd.f32 %v708_v26, %v297_v29  ;;  %v267_v34 = vpop.f32.mrb[13].mxu0  ;;  %v299_v35 = vpop.f32.mrb[13].mxu1 }
 0x112   :  { %v268_v36 = vpop.f32.mrb[14].mxu0  ;;  %v300_v37 = vpop.f32.mrb[14].mxu1  ;;  %543 = vst [vmem:[%s753_s3 + $0x10] sm:$0xff] %v515_v30   ;;  %547 = vst [vmem:[%s753_s3 + $0x30] sm:$0xff] %v535_v31  }
 0x113   :  { %v326_v38 = vmul.f32 0.2, %v266_v32  ;;  %v334_v39 = vmul.f32 0.2, %v298_v33  ;;  %v269_v40 = vadd.f32 %v708_v26, %v268_v36  ;;  %v301_v41 = vadd.f32 %v708_v26, %v300_v37  ;;  %v270_v42 = vpop.f32.mrb[15].mxu0  ;;  %v302_v43 = vpop.f32.mrb[15].mxu1 }
 0x114   :  { %vm310_vm13 = vcmp.ge.f32.partialorder %v266_v32, 0.0  ;;  %vm318_vm14 = vcmp.ge.f32.partialorder %v298_v33, 0.0 }
 0x115   :  { %vm311_vm15 = vcmp.ge.f32.partialorder %v269_v40, 0.0  ;;  %v327_v44 = vmul.f32 0.2, %v269_v40  ;;  %vm319_vm0 = vcmp.ge.f32.partialorder %v301_v41, 0.0  ;;  %v335_v45 = vmul.f32 0.2, %v301_v41 }
 0x116   :  { %v342_v46 = vsel %vm310_vm13, %v266_v32, %v326_v38  ;;  %v350_v47 = vsel %vm318_vm14, %v298_v33, %v334_v39 }
 0x117   :  { %v343_v48 = vsel %vm311_vm15, %v269_v40, %v327_v44  ;;  %v351_v49 = vsel %vm319_vm0, %v301_v41, %v335_v45 }
 0x118   :  { %v520_v50 = vpack.c.bf16 %v343_v48, %v342_v46  ;;  %v540_v51 = vpack.c.bf16 %v351_v49, %v350_v47 }
 0x11a   :  { %544 = vst [vmem:[%s753_s3 + $0x18] sm:$0xff] %v520_v50   ;;  %548 = vst [vmem:[%s753_s3 + $0x38] sm:$0xff] %v540_v51  }

// kernel: _lambda_.11
= control target key start
LH: loop header
LB: loop body
LE: loop exit
PB: predicated region body
PF: predicated region fallthrough
CT: control target
= control target key end

     0   :  { %s13106_s1 = inlined_call_operand.vmem [shape: bf16[2048,512], index: 1, kind: input, shape index: {}]   ;;  %s13107_s0 = inlined_call_operand.vmem [shape: bf16[16,2048], index: 0, kind: input, shape index: {}]   ;;  %s13108_s3 = inlined_call_operand.vmem [shape: bf16[512,1024], index: 3, kind: input, shape index: {}]   ;;  %s13109_s2 = inlined_call_operand.vmem [shape: f32[1,512], index: 2, kind: input, shape index: {}]   ;;  %s13110_s5 = inlined_call_operand.vmem [shape: bf16[1024,256], index: 5, kind: input, shape index: {}]   ;;  %s13111_s4 = inlined_call_operand.vmem [shape: f32[1,1024], index: 4, kind: input, shape index: {}]   ;;  %s13112_s7 = inlined_call_operand.vmem [shape: bf16[256,256], index: 7, kind: input, shape index: {}]   ;;  %s13113_s9 = inlined_call_operand.vmem [shape: bf16[256,128], index: 9, kind: input, shape index: {}]   ;;  %s13114_s6 = inlined_call_operand.vmem [shape: f32[1,256], index: 6, kind: input, shape index: {}]   ;;  %s13115_s11 = inlined_call_operand.vmem [shape: bf16[128,128], index: 11, kind: input, shape index: {}]   ;;  %s13116_s8 = inlined_call_operand.vmem [shape: f32[1,256], index: 8, kind: input, shape index: {}]   ;;  %s13117_s13 = inlined_call_operand.vmem [shape: bf16[128,128], index: 13, kind: input, shape index: {}]   ;;  %s13118_s10 = inlined_call_operand.vmem [shape: f32[1,128], index: 10, kind: input, shape index: {}]   ;;  %s13119_s12 = inlined_call_operand.vmem [shape: f32[1,128], index: 12, kind: input, shape index: {}]   ;;  %s13120_s14 = inlined_call_operand.vmem [shape: f32[1,128], index: 14, kind: input, shape index: {}]   ;;  %s13121_s15 = inlined_call_operand.vmem [shape: f32[16,128], index: 15, kind: output, shape index: {}]  }
   0x1   :  { %v8755_v0 = vld [vmem:[%s13106_s1 + $0x4] ss:$16 sps:$4 sm:$0xff]   ;;  %v8759_v2 = vld [vmem:[%s13106_s1] ss:$16 sps:$4 sm:$0xff]   ;;  %v52_v50 = vld [vmem:[%s13107_s0 + $0x8] sm:$0xff] }
   0x2   :  { %v8757_v1 = vld [vmem:[%s13106_s1 + $0x204] ss:$16 sps:$4 sm:$0xff]   ;;  %3241 = vmatprep.subr.bf16.mxu1 %v8755_v0  ;;  %v8760_v3 = vld [vmem:[%s13106_s1 + $0x200] ss:$16 sps:$4 sm:$0xff]   ;;  %v60_v51 = vld [vmem:[%s13107_s0 + $0x48] sm:$0xff] }
   0x3   :  { %3284 = vmatprep.subr.bf16.mxu0 %v8757_v1  ;;  %v8761_v4 = vld [vmem:[%s13106_s1 + $0x24] ss:$16 sps:$4 sm:$0xff]   ;;  %3242 = vmatpush1.bf16.msra.mxu1 %v8759_v2  ;;  %v8765_v6 = vld [vmem:[%s13106_s1 + $0x20] ss:$16 sps:$4 sm:$0xff]   ;;  %v10039_v55 = vcombine.high %v52_v50, %v60_v51 }
   0x4   :  { %3285 = vmatpush1.bf16.msra.mxu0 %v8760_v3  ;;  %v8763_v5 = vld [vmem:[%s13106_s1 + $0x224] ss:$16 sps:$4 sm:$0xff]   ;;  %3243 = vmatprep.subr.bf16.mxu1 %v8761_v4  ;;  %v8766_v7 = vld [vmem:[%s13106_s1 + $0x220] ss:$16 sps:$4 sm:$0xff]  }
   0x5   :  { %3286 = vmatprep.subr.bf16.mxu0 %v8763_v5  ;;  %v8767_v8 = vld [vmem:[%s13106_s1 + $0x44] ss:$16 sps:$4 sm:$0xff]   ;;  %v8771_v10 = vld [vmem:[%s13106_s1 + $0x40] ss:$16 sps:$4 sm:$0xff]   ;;  %3316 = vmatprep.mubr.bf16.mxu0 %v10039_v55 }
   0x6   :  { %v8769_v9 = vld [vmem:[%s13106_s1 + $0x244] ss:$16 sps:$4 sm:$0xff]   ;;  %v8772_v11 = vld [vmem:[%s13106_s1 + $0x240] ss:$16 sps:$4 sm:$0xff]  }
   0x7   :  { %3244 = vmatpush1.bf16.msra.mxu1 %v8765_v6  ;;  %v8773_v12 = vld [vmem:[%s13106_s1 + $0x64] ss:$16 sps:$4 sm:$0xff]   ;;  %v8777_v14 = vld [vmem:[%s13106_s1 + $0x60] ss:$16 sps:$4 sm:$0xff]  }
   0x8   :  { %3287 = vmatpush1.bf16.msra.mxu0 %v8766_v7  ;;  %3245 = vmatprep.subr.bf16.mxu1 %v8767_v8  ;;  %v8775_v13 = vld [vmem:[%s13106_s1 + $0x264] ss:$16 sps:$4 sm:$0xff]   ;;  %v8778_v15 = vld [vmem:[%s13106_s1 + $0x260] ss:$16 sps:$4 sm:$0xff]   ;;  %v8856_v7 = vld [vmem:[%s13106_s1 + $0xc] ss:$16 sps:$4 sm:$0xff]  }
   0x9   :  { %3288 = vmatprep.subr.bf16.mxu0 %v8769_v9  ;;  %v8779_v16 = vld [vmem:[%s13106_s1 + $0x84] ss:$16 sps:$4 sm:$0xff]   ;;  %v8783_v18 = vld [vmem:[%s13106_s1 + $0x80] ss:$16 sps:$4 sm:$0xff]   ;;  %v10092_v9 = vcombine.low %v52_v50, %v60_v51  ;;  %v8908_v50 = vld [vmem:[%s13106_s1 + $0x128] ss:$16 sps:$4 sm:$0xff]  }
   0xa   :  { %v8781_v17 = vld [vmem:[%s13106_s1 + $0x284] ss:$16 sps:$4 sm:$0xff]   ;;  %v8784_v19 = vld [vmem:[%s13106_s1 + $0x280] ss:$16 sps:$4 sm:$0xff]  }
   0xb   :  { %3246 = vmatpush1.bf16.msra.mxu1 %v8771_v10  ;;  %v8785_v20 = vld [vmem:[%s13106_s1 + $0xa4] ss:$16 sps:$4 sm:$0xff]   ;;  %v8789_v22 = vld [vmem:[%s13106_s1 + $0xa0] ss:$16 sps:$4 sm:$0xff]  }
   0xc   :  { %3289 = vmatpush1.bf16.msra.mxu0 %v8772_v11  ;;  %3247 = vmatprep.subr.bf16.mxu1 %v8773_v12  ;;  %v8787_v21 = vld [vmem:[%s13106_s1 + $0x2a4] ss:$16 sps:$4 sm:$0xff]   ;;  %v8790_v23 = vld [vmem:[%s13106_s1 + $0x2a0] ss:$16 sps:$4 sm:$0xff]   ;;  %v8854_v11 = vld [vmem:[%s13106_s1 + $0x8] ss:$16 sps:$4 sm:$0xff]  }
   0xd   :  { %3290 = vmatprep.subr.bf16.mxu0 %v8775_v13  ;;  %v8791_v24 = vld [vmem:[%s13106_s1 + $0xc4] ss:$16 sps:$4 sm:$0xff]   ;;  %v8795_v26 = vld [vmem:[%s13106_s1 + $0xc0] ss:$16 sps:$4 sm:$0xff]   ;;  %v8862_v13 = vld [vmem:[%s13106_s1 + $0x2c] ss:$16 sps:$4 sm:$0xff]  }
   0xe   :  { %v8793_v25 = vld [vmem:[%s13106_s1 + $0x2c4] ss:$16 sps:$4 sm:$0xff]   ;;  %v8796_v27 = vld [vmem:[%s13106_s1 + $0x2c0] ss:$16 sps:$4 sm:$0xff]  }
   0xf   :  { %3248 = vmatpush1.bf16.msra.mxu1 %v8777_v14  ;;  %v8797_v28 = vld [vmem:[%s13106_s1 + $0xe4] ss:$16 sps:$4 sm:$0xff]   ;;  %v8801_v30 = vld [vmem:[%s13106_s1 + $0xe0] ss:$16 sps:$4 sm:$0xff]  }
  0x10   :  { %3291 = vmatpush1.bf16.msra.mxu0 %v8778_v15  ;;  %3249 = vmatprep.subr.bf16.mxu1 %v8779_v16  ;;  %v8799_v29 = vld [vmem:[%s13106_s1 + $0x2e4] ss:$16 sps:$4 sm:$0xff]   ;;  %v8802_v31 = vld [vmem:[%s13106_s1 + $0x2e0] ss:$16 sps:$4 sm:$0xff]   ;;  %v8860_v15 = vld [vmem:[%s13106_s1 + $0x28] ss:$16 sps:$4 sm:$0xff]  }
  0x11   :  { %3292 = vmatprep.subr.bf16.mxu0 %v8781_v17  ;;  %v8803_v32 = vld [vmem:[%s13106_s1 + $0x104] ss:$16 sps:$4 sm:$0xff]   ;;  %v8807_v34 = vld [vmem:[%s13106_s1 + $0x100] ss:$16 sps:$4 sm:$0xff]   ;;  %v8868_v17 = vld [vmem:[%s13106_s1 + $0x4c] ss:$16 sps:$4 sm:$0xff]  }
  0x12   :  { %v8805_v33 = vld [vmem:[%s13106_s1 + $0x304] ss:$16 sps:$4 sm:$0xff]   ;;  %v8808_v35 = vld [vmem:[%s13106_s1 + $0x300] ss:$16 sps:$4 sm:$0xff]  }
  0x13   :  { %3250 = vmatpush1.bf16.msra.mxu1 %v8783_v18  ;;  %v8809_v36 = vld [vmem:[%s13106_s1 + $0x124] ss:$16 sps:$4 sm:$0xff]   ;;  %v8813_v38 = vld [vmem:[%s13106_s1 + $0x120] ss:$16 sps:$4 sm:$0xff]  }
  0x14   :  { %3293 = vmatpush1.bf16.msra.mxu0 %v8784_v19  ;;  %3251 = vmatprep.subr.bf16.mxu1 %v8785_v20  ;;  %v8811_v37 = vld [vmem:[%s13106_s1 + $0x324] ss:$16 sps:$4 sm:$0xff]   ;;  %v8814_v39 = vld [vmem:[%s13106_s1 + $0x320] ss:$16 sps:$4 sm:$0xff]   ;;  %v8866_v19 = vld [vmem:[%s13106_s1 + $0x48] ss:$16 sps:$4 sm:$0xff]  }
  0x15   :  { %3294 = vmatprep.subr.bf16.mxu0 %v8787_v21  ;;  %v8815_v40 = vld [vmem:[%s13106_s1 + $0x144] ss:$16 sps:$4 sm:$0xff]   ;;  %v8819_v42 = vld [vmem:[%s13106_s1 + $0x140] ss:$16 sps:$4 sm:$0xff]   ;;  %v8874_v21 = vld [vmem:[%s13106_s1 + $0x6c] ss:$16 sps:$4 sm:$0xff]  }
  0x16   :  { %v8817_v41 = vld [vmem:[%s13106_s1 + $0x344] ss:$16 sps:$4 sm:$0xff]   ;;  %v8820_v43 = vld [vmem:[%s13106_s1 + $0x340] ss:$16 sps:$4 sm:$0xff]  }
  0x17   :  { %3252 = vmatpush1.bf16.msra.mxu1 %v8789_v22  ;;  %v8821_v44 = vld [vmem:[%s13106_s1 + $0x164] ss:$16 sps:$4 sm:$0xff]   ;;  %v8825_v46 = vld [vmem:[%s13106_s1 + $0x160] ss:$16 sps:$4 sm:$0xff]  }
  0x18   :  { %3295 = vmatpush1.bf16.msra.mxu0 %v8790_v23  ;;  %3253 = vmatprep.subr.bf16.mxu1 %v8791_v24  ;;  %v8823_v45 = vld [vmem:[%s13106_s1 + $0x364] ss:$16 sps:$4 sm:$0xff]   ;;  %v8826_v47 = vld [vmem:[%s13106_s1 + $0x360] ss:$16 sps:$4 sm:$0xff]   ;;  %v8872_v23 = vld [vmem:[%s13106_s1 + $0x68] ss:$16 sps:$4 sm:$0xff]  }
  0x19   :  { %3296 = vmatprep.subr.bf16.mxu0 %v8793_v25  ;;  %v51_v48 = vld [vmem:[%s13107_s0] sm:$0xff]  ;;  %v8880_v25 = vld [vmem:[%s13106_s1 + $0x8c] ss:$16 sps:$4 sm:$0xff]  }
  0x1a   :  { %v59_v49 = vld [vmem:[%s13107_s0 + $0x40] sm:$0xff] }
  0x1b   :  { %3254 = vmatpush1.bf16.msra.mxu1 %v8795_v26  ;;  %v8827_v52 = vld [vmem:[%s13106_s1 + $0x184] ss:$16 sps:$4 sm:$0xff]   ;;  %v7583_v53 = vcombine.high %v51_v48, %v59_v49  ;;  %v8831_v56 = vld [vmem:[%s13106_s1 + $0x180] ss:$16 sps:$4 sm:$0xff]   ;;  %v10090_v8 = vcombine.low %v51_v48, %v59_v49  ;;  %v8910_v48 = vld [vmem:[%s13106_s1 + $0x12c] ss:$16 sps:$4 sm:$0xff]  }
  0x1c   :  { %3297 = vmatpush1.bf16.msra.mxu0 %v8796_v27  ;;  %3255 = vmatprep.subr.bf16.mxu1 %v8797_v28  ;;  %v8829_v54 = vld [vmem:[%s13106_s1 + $0x384] ss:$16 sps:$4 sm:$0xff]   ;;  %v8832_v57 = vld [vmem:[%s13106_s1 + $0x380] ss:$16 sps:$4 sm:$0xff]   ;;  %v8878_v27 = vld [vmem:[%s13106_s1 + $0x88] ss:$16 sps:$4 sm:$0xff]  }
  0x1d   :  { %3298 = vmatprep.subr.bf16.mxu0 %v8799_v29  ;;  %3273 = vmatprep.mubr.bf16.mxu1 %v7583_v53  ;;  %v8833_v58 = vld [vmem:[%s13106_s1 + $0x1a4] ss:$16 sps:$4 sm:$0xff]   ;;  %v8837_v60 = vld [vmem:[%s13106_s1 + $0x1a0] ss:$16 sps:$4 sm:$0xff]   ;;  %v8886_v29 = vld [vmem:[%s13106_s1 + $0xac] ss:$16 sps:$4 sm:$0xff]  }
  0x1e   :  { %v8835_v59 = vld [vmem:[%s13106_s1 + $0x3a4] ss:$16 sps:$4 sm:$0xff]   ;;  %v8838_v61 = vld [vmem:[%s13106_s1 + $0x3a0] ss:$16 sps:$4 sm:$0xff]  }
  0x1f   :  { %3256 = vmatpush1.bf16.msra.mxu1 %v8801_v30  ;;  %v8839_v62 = vld [vmem:[%s13106_s1 + $0x1c4] ss:$16 sps:$4 sm:$0xff]   ;;  %v8843_v0 = vld [vmem:[%s13106_s1 + $0x1c0] ss:$16 sps:$4 sm:$0xff]  }
  0x20   :  { %3299 = vmatpush1.bf16.msra.mxu0 %v8802_v31  ;;  %3257 = vmatprep.subr.bf16.mxu1 %v8803_v32  ;;  %v8841_v63 = vld [vmem:[%s13106_s1 + $0x3c4] ss:$16 sps:$4 sm:$0xff]   ;;  %v8844_v1 = vld [vmem:[%s13106_s1 + $0x3c0] ss:$16 sps:$4 sm:$0xff]   ;;  %v8884_v31 = vld [vmem:[%s13106_s1 + $0xa8] ss:$16 sps:$4 sm:$0xff]  }
  0x21   :  { %3300 = vmatprep.subr.bf16.mxu0 %v8805_v33  ;;  %v8845_v2 = vld [vmem:[%s13106_s1 + $0x1e4] ss:$16 sps:$4 sm:$0xff]   ;;  %v8849_v4 = vld [vmem:[%s13106_s1 + $0x1e0] ss:$16 sps:$4 sm:$0xff]   ;;  %v8892_v33 = vld [vmem:[%s13106_s1 + $0xcc] ss:$16 sps:$4 sm:$0xff]  }
  0x22   :  { %v8847_v3 = vld [vmem:[%s13106_s1 + $0x3e4] ss:$16 sps:$4 sm:$0xff]   ;;  %v8850_v5 = vld [vmem:[%s13106_s1 + $0x3e0] ss:$16 sps:$4 sm:$0xff]  }
  0x23   :  { %3258 = vmatpush1.bf16.msra.mxu1 %v8807_v34  ;;  %v8853_v6 = vld [vmem:[%s13106_s1 + $0x404] ss:$16 sps:$4 sm:$0xff]   ;;  %v8851_v10 = vld [vmem:[%s13106_s1 + $0x400] ss:$16 sps:$4 sm:$0xff]  }
  0x24   :  { %3301 = vmatpush1.bf16.msra.mxu0 %v8808_v35  ;;  %3259 = vmatprep.subr.bf16.mxu1 %v8809_v36  ;;  %v8859_v12 = vld [vmem:[%s13106_s1 + $0x424] ss:$16 sps:$4 sm:$0xff]   ;;  %v8857_v14 = vld [vmem:[%s13106_s1 + $0x420] ss:$16 sps:$4 sm:$0xff]  }
  0x25   :  { %3302 = vmatprep.subr.bf16.mxu0 %v8811_v37  ;;  %v8865_v16 = vld [vmem:[%s13106_s1 + $0x444] ss:$16 sps:$4 sm:$0xff]   ;;  %v8863_v18 = vld [vmem:[%s13106_s1 + $0x440] ss:$16 sps:$4 sm:$0xff]   ;;  %v8890_v37 = vld [vmem:[%s13106_s1 + $0xc8] ss:$16 sps:$4 sm:$0xff]  }
  0x26   :  { %v8871_v20 = vld [vmem:[%s13106_s1 + $0x464] ss:$16 sps:$4 sm:$0xff]   ;;  %v8869_v22 = vld [vmem:[%s13106_s1 + $0x460] ss:$16 sps:$4 sm:$0xff]  }
  0x27   :  { %3260 = vmatpush1.bf16.msra.mxu1 %v8813_v38  ;;  %v8877_v24 = vld [vmem:[%s13106_s1 + $0x484] ss:$16 sps:$4 sm:$0xff]   ;;  %v8875_v26 = vld [vmem:[%s13106_s1 + $0x480] ss:$16 sps:$4 sm:$0xff]  }
  0x28   :  { %3303 = vmatpush1.bf16.msra.mxu0 %v8814_v39  ;;  %3261 = vmatprep.subr.bf16.mxu1 %v8815_v40  ;;  %v8883_v28 = vld [vmem:[%s13106_s1 + $0x4a4] ss:$16 sps:$4 sm:$0xff]   ;;  %v8881_v30 = vld [vmem:[%s13106_s1 + $0x4a0] ss:$16 sps:$4 sm:$0xff]   ;;  %v8898_v40 = vld [vmem:[%s13106_s1 + $0xec] ss:$16 sps:$4 sm:$0xff]  }
  0x29   :  { %3304 = vmatprep.subr.bf16.mxu0 %v8817_v41  ;;  %v8889_v32 = vld [vmem:[%s13106_s1 + $0x4c4] ss:$16 sps:$4 sm:$0xff]   ;;  %v8887_v36 = vld [vmem:[%s13106_s1 + $0x4c0] ss:$16 sps:$4 sm:$0xff]  }
  0x2a   :  { %v10171_v34 = vld [vmem:[%s13107_s0 + $0x10] sm:$0xff] }
  0x2b   :  { %3262 = vmatpush1.bf16.msra.mxu1 %v8819_v42  ;;  %v10176_v35 = vld [vmem:[%s13107_s0 + $0x50] sm:$0xff]  ;;  %v8896_v42 = vld [vmem:[%s13106_s1 + $0xe8] ss:$16 sps:$4 sm:$0xff]  }
  0x2c   :  { %3305 = vmatpush1.bf16.msra.mxu0 %v8820_v43  ;;  %3263 = vmatprep.subr.bf16.mxu1 %v8821_v44  ;;  %v10186_v38 = vcombine.high %v10171_v34, %v10176_v35  ;;  %v8895_v39 = vld [vmem:[%s13106_s1 + $0x4e4] ss:$16 sps:$4 sm:$0xff]   ;;  %v8893_v41 = vld [vmem:[%s13106_s1 + $0x4e0] ss:$16 sps:$4 sm:$0xff]   ;;  %v8904_v44 = vld [vmem:[%s13106_s1 + $0x10c] ss:$16 sps:$4 sm:$0xff]  }
  0x2d   :  { %3306 = vmatprep.subr.bf16.mxu0 %v8823_v45  ;;  %v8901_v43 = vld [vmem:[%s13106_s1 + $0x504] ss:$16 sps:$4 sm:$0xff]   ;;  %v8899_v45 = vld [vmem:[%s13106_s1 + $0x500] ss:$16 sps:$4 sm:$0xff]  }
  0x2e   :  { %v8905_v49 = vld [vmem:[%s13106_s1 + $0x520] ss:$16 sps:$4 sm:$0xff]   ;;  %v8913_v51 = vld [vmem:[%s13106_s1 + $0x544] ss:$16 sps:$4 sm:$0xff]  }
  0x2f   :  { %3264 = vmatpush1.bf16.msra.mxu1 %v8825_v46  ;;  %v8902_v46 = vld [vmem:[%s13106_s1 + $0x108] ss:$16 sps:$4 sm:$0xff]  }
  0x30   :  { %3307 = vmatpush1.bf16.msra.mxu0 %v8826_v47  ;;  %3265 = vmatprep.subr.bf16.mxu1 %v8827_v52  ;;  %v8907_v47 = vld [vmem:[%s13106_s1 + $0x524] ss:$16 sps:$4 sm:$0xff]   ;;  %v8916_v52 = vld [vmem:[%s13106_s1 + $0x14c] ss:$16 sps:$4 sm:$0xff]  }
  0x31   :  { %3308 = vmatprep.subr.bf16.mxu0 %v8829_v54  ;;  %v8914_v54 = vld [vmem:[%s13106_s1 + $0x148] ss:$16 sps:$4 sm:$0xff]  }
  0x33   :  { %3266 = vmatpush1.bf16.msra.mxu1 %v8831_v56  ;;  %v8919_v56 = vld [vmem:[%s13106_s1 + $0x564] ss:$16 sps:$4 sm:$0xff]  }
  0x34   :  { %3309 = vmatpush1.bf16.msra.mxu0 %v8832_v57  ;;  %3267 = vmatprep.subr.bf16.mxu1 %v8833_v58  ;;  %v8922_v57 = vld [vmem:[%s13106_s1 + $0x16c] ss:$16 sps:$4 sm:$0xff]   ;;  %v8917_v58 = vld [vmem:[%s13106_s1 + $0x560] ss:$16 sps:$4 sm:$0xff]  }
  0x35   :  { %3310 = vmatprep.subr.bf16.mxu0 %v8835_v59  ;;  %v8920_v59 = vld [vmem:[%s13106_s1 + $0x168] ss:$16 sps:$4 sm:$0xff]  }
  0x37   :  { %3268 = vmatpush1.bf16.msra.mxu1 %v8837_v60  ;;  %v8925_v60 = vld [vmem:[%s13106_s1 + $0x584] ss:$16 sps:$4 sm:$0xff]  }
  0x38   :  { %3311 = vmatpush1.bf16.msra.mxu0 %v8838_v61  ;;  %3269 = vmatprep.subr.bf16.mxu1 %v8839_v62  ;;  %v8928_v61 = vld [vmem:[%s13106_s1 + $0x18c] ss:$16 sps:$4 sm:$0xff]   ;;  %v8923_v62 = vld [vmem:[%s13106_s1 + $0x580] ss:$16 sps:$4 sm:$0xff]  }
  0x39   :  { %3312 = vmatprep.subr.bf16.mxu0 %v8841_v63  ;;  %v8926_v63 = vld [vmem:[%s13106_s1 + $0x188] ss:$16 sps:$4 sm:$0xff]  }
  0x3b   :  { %3270 = vmatpush1.bf16.msra.mxu1 %v8843_v0  ;;  %v8931_v0 = vld [vmem:[%s13106_s1 + $0x5a4] ss:$16 sps:$4 sm:$0xff]  }
  0x3c   :  { %3313 = vmatpush1.bf16.msra.mxu0 %v8844_v1  ;;  %3271 = vmatprep.subr.bf16.mxu1 %v8845_v2  ;;  %v8934_v1 = vld [vmem:[%s13106_s1 + $0x1ac] ss:$16 sps:$4 sm:$0xff]   ;;  %v8929_v2 = vld [vmem:[%s13106_s1 + $0x5a0] ss:$16 sps:$4 sm:$0xff]  }
  0x3d   :  { %3314 = vmatprep.subr.bf16.mxu0 %v8847_v3  ;;  %v8932_v3 = vld [vmem:[%s13106_s1 + $0x1a8] ss:$16 sps:$4 sm:$0xff]  }
  0x3f   :  { %3272 = vmatpush1.bf16.msra.mxu1 %v8849_v4  ;;  %v8937_v4 = vld [vmem:[%s13106_s1 + $0x5c4] ss:$16 sps:$4 sm:$0xff]  }
  0x40   :  { %3315 = vmatpush1.bf16.msra.mxu0 %v8850_v5  ;;  %3585 = vmatprep.subr.bf16.mxu1 %v8856_v7  ;;  %v8940_v5 = vld [vmem:[%s13106_s1 + $0x1cc] ss:$16 sps:$4 sm:$0xff]   ;;  %v8938_v7 = vld [vmem:[%s13106_s1 + $0x1c8] ss:$16 sps:$4 sm:$0xff]  }
  0x41   :  { %3327 = vmatprep.subr.bf16.mxu0 %v8853_v6  ;;  %v8935_v6 = vld [vmem:[%s13106_s1 + $0x5c0] ss:$16 sps:$4 sm:$0xff]  }
  0x42   :  { %3274 = vmatmul.mubr.bf16.vlgmr.msra.gmra.mrb[0].mxu1 %v10090_v8 }
  0x43   :  { %3317 = vmatmul.mubr.bf16.vlgmr.msra.gmra.mrb[0].mxu0 %v10092_v9  ;;  %3586 = vmatpush1.bf16.msra.mxu1 %v8854_v11  ;;  %v8946_v11 = vld [vmem:[%s13106_s1 + $0x1ec] ss:$16 sps:$4 sm:$0xff]  }
  0x44   :  { %3328 = vmatpush1.bf16.msra.mxu0 %v8851_v10  ;;  %3587 = vmatprep.subr.bf16.mxu1 %v8862_v13  ;;  %v8943_v10 = vld [vmem:[%s13106_s1 + $0x5e4] ss:$16 sps:$4 sm:$0xff]   ;;  %v8944_v13 = vld [vmem:[%s13106_s1 + $0x1e8] ss:$16 sps:$4 sm:$0xff]  }
  0x45   :  { %3329 = vmatprep.subr.bf16.mxu0 %v8859_v12  ;;  %3617 = vmatprep.mubr.bf16.mxu1 %v7583_v53  ;;  %v8911_v53 = vld [vmem:[%s13106_s1 + $0x540] ss:$16 sps:$4 sm:$0xff]  }
  0x46   :  { %3359 = vmatprep.mubr.bf16.mxu0 %v10186_v38  ;;  %v8941_v12 = vld [vmem:[%s13106_s1 + $0x5e0] ss:$16 sps:$4 sm:$0xff]  }
  0x47   :  { %3588 = vmatpush1.bf16.msra.mxu1 %v8860_v15  ;;  %v8952_v15 = vld [vmem:[%s13106_s1 + $0x20c] ss:$16 sps:$4 sm:$0xff]  }
  0x48   :  { %3330 = vmatpush1.bf16.msra.mxu0 %v8857_v14  ;;  %3589 = vmatprep.subr.bf16.mxu1 %v8868_v17  ;;  %v8949_v14 = vld [vmem:[%s13106_s1 + $0x604] ss:$16 sps:$4 sm:$0xff]   ;;  %v8947_v17 = vld [vmem:[%s13106_s1 + $0x600] ss:$16 sps:$4 sm:$0xff]  }
  0x49   :  { %3331 = vmatprep.subr.bf16.mxu0 %v8865_v16  ;;  %v10305_v16 = vcombine.low %v10171_v34, %v10176_v35  ;;  %v8971_v34 = vld [vmem:[%s13106_s1 + $0x680] ss:$16 sps:$4 sm:$0xff]   ;;  %v8974_v35 = vld [vmem:[%s13106_s1 + $0x288] ss:$16 sps:$4 sm:$0xff]  }
  0x4b   :  { %3590 = vmatpush1.bf16.msra.mxu1 %v8866_v19  ;;  %v8955_v19 = vld [vmem:[%s13106_s1 + $0x624] ss:$16 sps:$4 sm:$0xff]  }
  0x4c   :  { %3332 = vmatpush1.bf16.msra.mxu0 %v8863_v18  ;;  %3591 = vmatprep.subr.bf16.mxu1 %v8874_v21  ;;  %v8950_v18 = vld [vmem:[%s13106_s1 + $0x208] ss:$16 sps:$4 sm:$0xff]  }
  0x4d   :  { %3333 = vmatprep.subr.bf16.mxu0 %v8871_v20  ;;  %v8958_v20 = vld [vmem:[%s13106_s1 + $0x22c] ss:$16 sps:$4 sm:$0xff]  }
  0x4e   :  { %v10322_v21 = vld [vmem:[%s13107_s0 + $0x18] sm:$0xff] }
  0x4f   :  { %3592 = vmatpush1.bf16.msra.mxu1 %v8872_v23  ;;  %v8953_v23 = vld [vmem:[%s13106_s1 + $0x620] ss:$16 sps:$4 sm:$0xff]  }
  0x50   :  { %3334 = vmatpush1.bf16.msra.mxu0 %v8869_v22  ;;  %3593 = vmatprep.subr.bf16.mxu1 %v8880_v25  ;;  %v10327_v22 = vld [vmem:[%s13107_s0 + $0x58] sm:$0xff] }
  0x51   :  { %3335 = vmatprep.subr.bf16.mxu0 %v8877_v24  ;;  %v8956_v24 = vld [vmem:[%s13106_s1 + $0x228] ss:$16 sps:$4 sm:$0xff]   ;;  %v10339_v25 = vcombine.high %v10322_v21, %v10327_v22 }
  0x53   :  { %3594 = vmatpush1.bf16.msra.mxu1 %v8878_v27  ;;  %v8959_v27 = vld [vmem:[%s13106_s1 + $0x640] ss:$16 sps:$4 sm:$0xff]  }
  0x54   :  { %3336 = vmatpush1.bf16.msra.mxu0 %v8875_v26  ;;  %3595 = vmatprep.subr.bf16.mxu1 %v8886_v29  ;;  %v8961_v26 = vld [vmem:[%s13106_s1 + $0x644] ss:$16 sps:$4 sm:$0xff]  }
  0x55   :  { %3337 = vmatprep.subr.bf16.mxu0 %v8883_v28  ;;  %v8962_v28 = vld [vmem:[%s13106_s1 + $0x248] ss:$16 sps:$4 sm:$0xff]   ;;  %v8967_v29 = vld [vmem:[%s13106_s1 + $0x664] ss:$16 sps:$4 sm:$0xff]  }
  0x57   :  { %3596 = vmatpush1.bf16.msra.mxu1 %v8884_v31  ;;  %v8968_v31 = vld [vmem:[%s13106_s1 + $0x268] ss:$16 sps:$4 sm:$0xff]  }
  0x58   :  { %3338 = vmatpush1.bf16.msra.mxu0 %v8881_v30  ;;  %3597 = vmatprep.subr.bf16.mxu1 %v8892_v33  ;;  %v8965_v30 = vld [vmem:[%s13106_s1 + $0x660] ss:$16 sps:$4 sm:$0xff]   ;;  %v8976_v33 = vld [vmem:[%s13106_s1 + $0x28c] ss:$16 sps:$4 sm:$0xff]  }
  0x59   :  { %3339 = vmatprep.subr.bf16.mxu0 %v8889_v32  ;;  %v8973_v32 = vld [vmem:[%s13106_s1 + $0x684] ss:$16 sps:$4 sm:$0xff]  }
  0x5b   :  { %3598 = vmatpush1.bf16.msra.mxu1 %v8890_v37  ;;  %v8982_v37 = vld [vmem:[%s13106_s1 + $0x2ac] ss:$16 sps:$4 sm:$0xff]  }
  0x5c   :  { %3340 = vmatpush1.bf16.msra.mxu0 %v8887_v36  ;;  %3599 = vmatprep.subr.bf16.mxu1 %v8898_v40  ;;  %v8979_v36 = vld [vmem:[%s13106_s1 + $0x6a4] ss:$16 sps:$4 sm:$0xff]   ;;  %v8980_v40 = vld [vmem:[%s13106_s1 + $0x2a8] ss:$16 sps:$4 sm:$0xff]  }
  0x5d   :  { %3341 = vmatprep.subr.bf16.mxu0 %v8895_v39  ;;  %v8977_v39 = vld [vmem:[%s13106_s1 + $0x6a0] ss:$16 sps:$4 sm:$0xff]  }
  0x5f   :  { %3600 = vmatpush1.bf16.msra.mxu1 %v8896_v42  ;;  %v8988_v42 = vld [vmem:[%s13106_s1 + $0x2cc] ss:$16 sps:$4 sm:$0xff]  }
  0x60   :  { %3342 = vmatpush1.bf16.msra.mxu0 %v8893_v41  ;;  %3601 = vmatprep.subr.bf16.mxu1 %v8904_v44  ;;  %v8985_v41 = vld [vmem:[%s13106_s1 + $0x6c4] ss:$16 sps:$4 sm:$0xff]   ;;  %v8986_v44 = vld [vmem:[%s13106_s1 + $0x2c8] ss:$16 sps:$4 sm:$0xff]  }
  0x61   :  { %3343 = vmatprep.subr.bf16.mxu0 %v8901_v43  ;;  %v8983_v43 = vld [vmem:[%s13106_s1 + $0x6c0] ss:$16 sps:$4 sm:$0xff]  }
  0x63   :  { %3602 = vmatpush1.bf16.msra.mxu1 %v8902_v46  ;;  %v8994_v46 = vld [vmem:[%s13106_s1 + $0x2ec] ss:$16 sps:$4 sm:$0xff]  }
  0x64   :  { %3344 = vmatpush1.bf16.msra.mxu0 %v8899_v45  ;;  %3603 = vmatprep.subr.bf16.mxu1 %v8910_v48  ;;  %v8991_v45 = vld [vmem:[%s13106_s1 + $0x6e4] ss:$16 sps:$4 sm:$0xff]   ;;  %v8992_v48 = vld [vmem:[%s13106_s1 + $0x2e8] ss:$16 sps:$4 sm:$0xff]  }
  0x65   :  { %3345 = vmatprep.subr.bf16.mxu0 %v8907_v47  ;;  %v8989_v47 = vld [vmem:[%s13106_s1 + $0x6e0] ss:$16 sps:$4 sm:$0xff]  }
  0x67   :  { %3604 = vmatpush1.bf16.msra.mxu1 %v8908_v50  ;;  %v9000_v50 = vld [vmem:[%s13106_s1 + $0x30c] ss:$16 sps:$4 sm:$0xff]  }
  0x68   :  { %3346 = vmatpush1.bf16.msra.mxu0 %v8905_v49  ;;  %3605 = vmatprep.subr.bf16.mxu1 %v8916_v52  ;;  %v8997_v49 = vld [vmem:[%s13106_s1 + $0x704] ss:$16 sps:$4 sm:$0xff]   ;;  %v8998_v52 = vld [vmem:[%s13106_s1 + $0x308] ss:$16 sps:$4 sm:$0xff]  }
  0x69   :  { %3347 = vmatprep.subr.bf16.mxu0 %v8913_v51  ;;  %v8995_v51 = vld [vmem:[%s13106_s1 + $0x700] ss:$16 sps:$4 sm:$0xff]  }
  0x6b   :  { %3606 = vmatpush1.bf16.msra.mxu1 %v8914_v54  ;;  %v9006_v54 = vld [vmem:[%s13106_s1 + $0x32c] ss:$16 sps:$4 sm:$0xff]  }
  0x6c   :  { %3348 = vmatpush1.bf16.msra.mxu0 %v8911_v53  ;;  %3607 = vmatprep.subr.bf16.mxu1 %v8922_v57  ;;  %v9003_v53 = vld [vmem:[%s13106_s1 + $0x724] ss:$16 sps:$4 sm:$0xff]   ;;  %v9004_v57 = vld [vmem:[%s13106_s1 + $0x328] ss:$16 sps:$4 sm:$0xff]  }
  0x6d   :  { %3349 = vmatprep.subr.bf16.mxu0 %v8919_v56  ;;  %v9001_v56 = vld [vmem:[%s13106_s1 + $0x720] ss:$16 sps:$4 sm:$0xff]  }
  0x6f   :  { %3608 = vmatpush1.bf16.msra.mxu1 %v8920_v59  ;;  %v9012_v59 = vld [vmem:[%s13106_s1 + $0x34c] ss:$16 sps:$4 sm:$0xff]  }
  0x70   :  { %3350 = vmatpush1.bf16.msra.mxu0 %v8917_v58  ;;  %3609 = vmatprep.subr.bf16.mxu1 %v8928_v61  ;;  %v9009_v58 = vld [vmem:[%s13106_s1 + $0x744] ss:$16 sps:$4 sm:$0xff]   ;;  %v9010_v61 = vld [vmem:[%s13106_s1 + $0x348] ss:$16 sps:$4 sm:$0xff]  }
  0x71   :  { %3351 = vmatprep.subr.bf16.mxu0 %v8925_v60  ;;  %v9007_v60 = vld [vmem:[%s13106_s1 + $0x740] ss:$16 sps:$4 sm:$0xff]  }
  0x73   :  { %3610 = vmatpush1.bf16.msra.mxu1 %v8926_v63  ;;  %v9018_v63 = vld [vmem:[%s13106_s1 + $0x36c] ss:$16 sps:$4 sm:$0xff]  }
  0x74   :  { %3352 = vmatpush1.bf16.msra.mxu0 %v8923_v62  ;;  %3611 = vmatprep.subr.bf16.mxu1 %v8934_v1  ;;  %v9015_v62 = vld [vmem:[%s13106_s1 + $0x764] ss:$16 sps:$4 sm:$0xff]   ;;  %v9016_v1 = vld [vmem:[%s13106_s1 + $0x368] ss:$16 sps:$4 sm:$0xff]  }
  0x75   :  { %3353 = vmatprep.subr.bf16.mxu0 %v8931_v0  ;;  %v9013_v0 = vld [vmem:[%s13106_s1 + $0x760] ss:$16 sps:$4 sm:$0xff]  }
  0x77   :  { %3612 = vmatpush1.bf16.msra.mxu1 %v8932_v3  ;;  %v9024_v3 = vld [vmem:[%s13106_s1 + $0x38c] ss:$16 sps:$4 sm:$0xff]  }
  0x78   :  { %3354 = vmatpush1.bf16.msra.mxu0 %v8929_v2  ;;  %3613 = vmatprep.subr.bf16.mxu1 %v8940_v5  ;;  %v9021_v2 = vld [vmem:[%s13106_s1 + $0x784] ss:$16 sps:$4 sm:$0xff]   ;;  %v9022_v5 = vld [vmem:[%s13106_s1 + $0x388] ss:$16 sps:$4 sm:$0xff]  }
  0x79   :  { %3355 = vmatprep.subr.bf16.mxu0 %v8937_v4  ;;  %v9019_v4 = vld [vmem:[%s13106_s1 + $0x780] ss:$16 sps:$4 sm:$0xff]  }
  0x7b   :  { %3614 = vmatpush1.bf16.msra.mxu1 %v8938_v7  ;;  %v9030_v7 = vld [vmem:[%s13106_s1 + $0x3ac] ss:$16 sps:$4 sm:$0xff]  }
  0x7c   :  { %3356 = vmatpush1.bf16.msra.mxu0 %v8935_v6  ;;  %3615 = vmatprep.subr.bf16.mxu1 %v8946_v11  ;;  %v9027_v6 = vld [vmem:[%s13106_s1 + $0x7a4] ss:$16 sps:$4 sm:$0xff]   ;;  %v9028_v11 = vld [vmem:[%s13106_s1 + $0x3a8] ss:$16 sps:$4 sm:$0xff]  }
  0x7d   :  { %3357 = vmatprep.subr.bf16.mxu0 %v8943_v10  ;;  %v9025_v10 = vld [vmem:[%s13106_s1 + $0x7a0] ss:$16 sps:$4 sm:$0xff]  }
  0x7f   :  { %3616 = vmatpush1.bf16.msra.mxu1 %v8944_v13  ;;  %v9036_v13 = vld [vmem:[%s13106_s1 + $0x3cc] ss:$16 sps:$4 sm:$0xff]  }
  0x80   :  { %3358 = vmatpush1.bf16.msra.mxu0 %v8941_v12  ;;  %3628 = vmatprep.subr.bf16.mxu1 %v8952_v15  ;;  %v9033_v12 = vld [vmem:[%s13106_s1 + $0x7c4] ss:$16 sps:$4 sm:$0xff]   ;;  %v9034_v15 = vld [vmem:[%s13106_s1 + $0x3c8] ss:$16 sps:$4 sm:$0xff]  }
  0x81   :  { %3370 = vmatprep.subr.bf16.mxu0 %v8949_v14  ;;  %v9031_v14 = vld [vmem:[%s13106_s1 + $0x7c0] ss:$16 sps:$4 sm:$0xff]  }
  0x82   :  { %3618 = vmatmul.mubr.bf16.vlgmr.msra.gmra.mrb[4].mxu1 %v10090_v8  ;;  %v8964_v8 = vld [vmem:[%s13106_s1 + $0x24c] ss:$16 sps:$4 sm:$0xff]  }
  0x83   :  { %3360 = vmatmul.mubr.bf16.vlgmr.msra.gmra.mrb[0].mxu0 %v10305_v16  ;;  %3629 = vmatpush1.bf16.msra.mxu1 %v8950_v18  ;;  %v9042_v18 = vld [vmem:[%s13106_s1 + $0x3ec] ss:$16 sps:$4 sm:$0xff]  }
  0x84   :  { %3371 = vmatpush1.bf16.msra.mxu0 %v8947_v17  ;;  %3630 = vmatprep.subr.bf16.mxu1 %v8958_v20  ;;  %v9039_v17 = vld [vmem:[%s13106_s1 + $0x7e4] ss:$16 sps:$4 sm:$0xff]   ;;  %v9040_v20 = vld [vmem:[%s13106_s1 + $0x3e8] ss:$16 sps:$4 sm:$0xff]  }
  0x85   :  { %3372 = vmatprep.subr.bf16.mxu0 %v8955_v19  ;;  %3402 = vmatprep.mubr.bf16.mxu0 %v10339_v25  ;;  %v9037_v19 = vld [vmem:[%s13106_s1 + $0x7e0] ss:$16 sps:$4 sm:$0xff]  }
  0x86   :  { %3660 = vmatprep.mubr.bf16.mxu1 %v10039_v55  ;;  %v8970_v55 = vld [vmem:[%s13106_s1 + $0x26c] ss:$16 sps:$4 sm:$0xff]  }
  0x87   :  { %3631 = vmatpush1.bf16.msra.mxu1 %v8956_v24  ;;  %v9048_v24 = vld [vmem:[%s13106_s1 + $0x40c] ss:$16 sps:$4 sm:$0xff]  }
  0x88   :  { %3373 = vmatpush1.bf16.msra.mxu0 %v8953_v23  ;;  %3632 = vmatprep.subr.bf16.mxu1 %v8964_v8  ;;  %v9045_v23 = vld [vmem:[%s13106_s1 + $0x804] ss:$16 sps:$4 sm:$0xff]   ;;  %v10522_v8 = vcombine.low %v10322_v21, %v10327_v22  ;;  %v9054_v22 = vld [vmem:[%s13106_s1 + $0x42c] ss:$16 sps:$4 sm:$0xff]  }
  0x89   :  { %3374 = vmatprep.subr.bf16.mxu0 %v8961_v26  ;;  %v9043_v26 = vld [vmem:[%s13106_s1 + $0x800] ss:$16 sps:$4 sm:$0xff]   ;;  %v9051_v21 = vld [vmem:[%s13106_s1 + $0x824] ss:$16 sps:$4 sm:$0xff]  }
  0x8b   :  { %3633 = vmatpush1.bf16.msra.mxu1 %v8962_v28  ;;  %v10532_v28 = vld [vmem:[%s13107_s0 + $0x60] sm:$0xff] }
  0x8c   :  { %3375 = vmatpush1.bf16.msra.mxu0 %v8959_v27  ;;  %3634 = vmatprep.subr.bf16.mxu1 %v8970_v55  ;;  %v10527_v27 = vld [vmem:[%s13107_s0 + $0x20] sm:$0xff] }
  0x8d   :  { %3376 = vmatprep.subr.bf16.mxu0 %v8967_v29  ;;  %v9046_v29 = vld [vmem:[%s13106_s1 + $0x408] ss:$16 sps:$4 sm:$0xff]   ;;  %v10545_v55 = vcombine.high %v10527_v27, %v10532_v28 }
  0x8f   :  { %3635 = vmatpush1.bf16.msra.mxu1 %v8968_v31  ;;  %v9052_v31 = vld [vmem:[%s13106_s1 + $0x428] ss:$16 sps:$4 sm:$0xff]  }
  0x90   :  { %3377 = vmatpush1.bf16.msra.mxu0 %v8965_v30  ;;  %3636 = vmatprep.subr.bf16.mxu1 %v8976_v33  ;;  %v9049_v30 = vld [vmem:[%s13106_s1 + $0x820] ss:$16 sps:$4 sm:$0xff]  }
  0x91   :  { %3378 = vmatprep.subr.bf16.mxu0 %v8973_v32  ;;  %v9057_v32 = vld [vmem:[%s13106_s1 + $0x844] ss:$16 sps:$4 sm:$0xff]   ;;  %v9055_v33 = vld [vmem:[%s13106_s1 + $0x840] ss:$16 sps:$4 sm:$0xff]  }
  0x93   :  { %3637 = vmatpush1.bf16.msra.mxu1 %v8974_v35  ;;  %v9063_v35 = vld [vmem:[%s13106_s1 + $0x864] ss:$16 sps:$4 sm:$0xff]  }
  0x94   :  { %3379 = vmatpush1.bf16.msra.mxu0 %v8971_v34  ;;  %3638 = vmatprep.subr.bf16.mxu1 %v8982_v37  ;;  %v9058_v34 = vld [vmem:[%s13106_s1 + $0x448] ss:$16 sps:$4 sm:$0xff]  }
  0x95   :  { %3380 = vmatprep.subr.bf16.mxu0 %v8979_v36  ;;  %v9061_v36 = vld [vmem:[%s13106_s1 + $0x860] ss:$16 sps:$4 sm:$0xff]   ;;  %v9064_v37 = vld [vmem:[%s13106_s1 + $0x468] ss:$16 sps:$4 sm:$0xff]  }
  0x97   :  { %3639 = vmatpush1.bf16.msra.mxu1 %v8980_v40  ;;  %v9072_v40 = vld [vmem:[%s13106_s1 + $0x48c] ss:$16 sps:$4 sm:$0xff]  }
  0x98   :  { %3381 = vmatpush1.bf16.msra.mxu0 %v8977_v39  ;;  %3640 = vmatprep.subr.bf16.mxu1 %v8988_v42  ;;  %v9069_v39 = vld [vmem:[%s13106_s1 + $0x884] ss:$16 sps:$4 sm:$0xff]   ;;  %v9070_v42 = vld [vmem:[%s13106_s1 + $0x488] ss:$16 sps:$4 sm:$0xff]  }
  0x99   :  { %3382 = vmatprep.subr.bf16.mxu0 %v8985_v41  ;;  %v9067_v41 = vld [vmem:[%s13106_s1 + $0x880] ss:$16 sps:$4 sm:$0xff]  }
  0x9b   :  { %3641 = vmatpush1.bf16.msra.mxu1 %v8986_v44  ;;  %v9078_v44 = vld [vmem:[%s13106_s1 + $0x4ac] ss:$16 sps:$4 sm:$0xff]  }
  0x9c   :  { %3383 = vmatpush1.bf16.msra.mxu0 %v8983_v43  ;;  %3642 = vmatprep.subr.bf16.mxu1 %v8994_v46  ;;  %v9075_v43 = vld [vmem:[%s13106_s1 + $0x8a4] ss:$16 sps:$4 sm:$0xff]   ;;  %v9076_v46 = vld [vmem:[%s13106_s1 + $0x4a8] ss:$16 sps:$4 sm:$0xff]  }
  0x9d   :  { %3384 = vmatprep.subr.bf16.mxu0 %v8991_v45  ;;  %v9073_v45 = vld [vmem:[%s13106_s1 + $0x8a0] ss:$16 sps:$4 sm:$0xff]  }
  0x9f   :  { %3643 = vmatpush1.bf16.msra.mxu1 %v8992_v48  ;;  %v9084_v48 = vld [vmem:[%s13106_s1 + $0x4cc] ss:$16 sps:$4 sm:$0xff]  }
  0xa0   :  { %3385 = vmatpush1.bf16.msra.mxu0 %v8989_v47  ;;  %3644 = vmatprep.subr.bf16.mxu1 %v9000_v50  ;;  %v9081_v47 = vld [vmem:[%s13106_s1 + $0x8c4] ss:$16 sps:$4 sm:$0xff]   ;;  %v9082_v50 = vld [vmem:[%s13106_s1 + $0x4c8] ss:$16 sps:$4 sm:$0xff]  }
  0xa1   :  { %3386 = vmatprep.subr.bf16.mxu0 %v8997_v49  ;;  %v9079_v49 = vld [vmem:[%s13106_s1 + $0x8c0] ss:$16 sps:$4 sm:$0xff]  }
  0xa3   :  { %3645 = vmatpush1.bf16.msra.mxu1 %v8998_v52  ;;  %v9090_v52 = vld [vmem:[%s13106_s1 + $0x4ec] ss:$16 sps:$4 sm:$0xff]  }
  0xa4   :  { %3387 = vmatpush1.bf16.msra.mxu0 %v8995_v51  ;;  %3646 = vmatprep.subr.bf16.mxu1 %v9006_v54  ;;  %v9087_v51 = vld [vmem:[%s13106_s1 + $0x8e4] ss:$16 sps:$4 sm:$0xff]   ;;  %v9088_v54 = vld [vmem:[%s13106_s1 + $0x4e8] ss:$16 sps:$4 sm:$0xff]  }
  0xa5   :  { %3388 = vmatprep.subr.bf16.mxu0 %v9003_v53  ;;  %v9085_v53 = vld [vmem:[%s13106_s1 + $0x8e0] ss:$16 sps:$4 sm:$0xff]  }
  0xa7   :  { %3647 = vmatpush1.bf16.msra.mxu1 %v9004_v57  ;;  %v9096_v57 = vld [vmem:[%s13106_s1 + $0x50c] ss:$16 sps:$4 sm:$0xff]  }
  0xa8   :  { %3389 = vmatpush1.bf16.msra.mxu0 %v9001_v56  ;;  %3648 = vmatprep.subr.bf16.mxu1 %v9012_v59  ;;  %v9093_v56 = vld [vmem:[%s13106_s1 + $0x904] ss:$16 sps:$4 sm:$0xff]   ;;  %v9094_v59 = vld [vmem:[%s13106_s1 + $0x508] ss:$16 sps:$4 sm:$0xff]  }
  0xa9   :  { %3390 = vmatprep.subr.bf16.mxu0 %v9009_v58  ;;  %v9091_v58 = vld [vmem:[%s13106_s1 + $0x900] ss:$16 sps:$4 sm:$0xff]  }
  0xab   :  { %3649 = vmatpush1.bf16.msra.mxu1 %v9010_v61  ;;  %v9102_v61 = vld [vmem:[%s13106_s1 + $0x52c] ss:$16 sps:$4 sm:$0xff]  }
  0xac   :  { %3391 = vmatpush1.bf16.msra.mxu0 %v9007_v60  ;;  %3650 = vmatprep.subr.bf16.mxu1 %v9018_v63  ;;  %v9099_v60 = vld [vmem:[%s13106_s1 + $0x924] ss:$16 sps:$4 sm:$0xff]   ;;  %v9100_v63 = vld [vmem:[%s13106_s1 + $0x528] ss:$16 sps:$4 sm:$0xff]  }
  0xad   :  { %3392 = vmatprep.subr.bf16.mxu0 %v9015_v62  ;;  %v9097_v62 = vld [vmem:[%s13106_s1 + $0x920] ss:$16 sps:$4 sm:$0xff]  }
  0xaf   :  { %3651 = vmatpush1.bf16.msra.mxu1 %v9016_v1  ;;  %v9108_v1 = vld [vmem:[%s13106_s1 + $0x54c] ss:$16 sps:$4 sm:$0xff]  }
  0xb0   :  { %3393 = vmatpush1.bf16.msra.mxu0 %v9013_v0  ;;  %3652 = vmatprep.subr.bf16.mxu1 %v9024_v3  ;;  %v9105_v0 = vld [vmem:[%s13106_s1 + $0x944] ss:$16 sps:$4 sm:$0xff]   ;;  %v9106_v3 = vld [vmem:[%s13106_s1 + $0x548] ss:$16 sps:$4 sm:$0xff]  }
  0xb1   :  { %3394 = vmatprep.subr.bf16.mxu0 %v9021_v2  ;;  %v9103_v2 = vld [vmem:[%s13106_s1 + $0x940] ss:$16 sps:$4 sm:$0xff]  }
  0xb3   :  { %3653 = vmatpush1.bf16.msra.mxu1 %v9022_v5  ;;  %v9114_v5 = vld [vmem:[%s13106_s1 + $0x56c] ss:$16 sps:$4 sm:$0xff]  }
  0xb4   :  { %3395 = vmatpush1.bf16.msra.mxu0 %v9019_v4  ;;  %3654 = vmatprep.subr.bf16.mxu1 %v9030_v7  ;;  %v9111_v4 = vld [vmem:[%s13106_s1 + $0x964] ss:$16 sps:$4 sm:$0xff]   ;;  %v9112_v7 = vld [vmem:[%s13106_s1 + $0x568] ss:$16 sps:$4 sm:$0xff]  }
  0xb5   :  { %3396 = vmatprep.subr.bf16.mxu0 %v9027_v6  ;;  %v9109_v6 = vld [vmem:[%s13106_s1 + $0x960] ss:$16 sps:$4 sm:$0xff]  }
  0xb7   :  { %3655 = vmatpush1.bf16.msra.mxu1 %v9028_v11  ;;  %v9120_v11 = vld [vmem:[%s13106_s1 + $0x58c] ss:$16 sps:$4 sm:$0xff]  }
  0xb8   :  { %3397 = vmatpush1.bf16.msra.mxu0 %v9025_v10  ;;  %3656 = vmatprep.subr.bf16.mxu1 %v9036_v13  ;;  %v9117_v10 = vld [vmem:[%s13106_s1 + $0x984] ss:$16 sps:$4 sm:$0xff]   ;;  %v9118_v13 = vld [vmem:[%s13106_s1 + $0x588] ss:$16 sps:$4 sm:$0xff]  }
  0xb9   :  { %3398 = vmatprep.subr.bf16.mxu0 %v9033_v12  ;;  %v9115_v12 = vld [vmem:[%s13106_s1 + $0x980] ss:$16 sps:$4 sm:$0xff]  }
  0xbb   :  { %3657 = vmatpush1.bf16.msra.mxu1 %v9034_v15  ;;  %v9126_v15 = vld [vmem:[%s13106_s1 + $0x5ac] ss:$16 sps:$4 sm:$0xff]  }
  0xbc   :  { %3399 = vmatpush1.bf16.msra.mxu0 %v9031_v14  ;;  %3658 = vmatprep.subr.bf16.mxu1 %v9042_v18  ;;  %v9123_v14 = vld [vmem:[%s13106_s1 + $0x9a4] ss:$16 sps:$4 sm:$0xff]   ;;  %v9124_v18 = vld [vmem:[%s13106_s1 + $0x5a8] ss:$16 sps:$4 sm:$0xff]  }
  0xbd   :  { %3400 = vmatprep.subr.bf16.mxu0 %v9039_v17  ;;  %v9121_v17 = vld [vmem:[%s13106_s1 + $0x9a0] ss:$16 sps:$4 sm:$0xff]  }
  0xbf   :  { %3659 = vmatpush1.bf16.msra.mxu1 %v9040_v20  ;;  %v9132_v20 = vld [vmem:[%s13106_s1 + $0x5cc] ss:$16 sps:$4 sm:$0xff]  }
  0xc0   :  { %3401 = vmatpush1.bf16.msra.mxu0 %v9037_v19  ;;  %3671 = vmatprep.subr.bf16.mxu1 %v9048_v24  ;;  %v9129_v19 = vld [vmem:[%s13106_s1 + $0x9c4] ss:$16 sps:$4 sm:$0xff]   ;;  %v9130_v24 = vld [vmem:[%s13106_s1 + $0x5c8] ss:$16 sps:$4 sm:$0xff]  }
  0xc1   :  { %3413 = vmatprep.subr.bf16.mxu0 %v9045_v23  ;;  %v9127_v23 = vld [vmem:[%s13106_s1 + $0x9c0] ss:$16 sps:$4 sm:$0xff]  }
  0xc2   :  { %3661 = vmatmul.mubr.bf16.vlgmr.msra.gmra.mrb[4].mxu1 %v10092_v9  ;;  %v9060_v9 = vld [vmem:[%s13106_s1 + $0x44c] ss:$16 sps:$4 sm:$0xff]  }
  0xc3   :  { %3403 = vmatmul.mubr.bf16.vlgmr.msra.gmra.mrb[0].mxu0 %v10522_v8  ;;  %3672 = vmatpush1.bf16.msra.mxu1 %v9046_v29  ;;  %v9138_v29 = vld [vmem:[%s13106_s1 + $0x5ec] ss:$16 sps:$4 sm:$0xff]  }
  0xc4   :  { %3414 = vmatpush1.bf16.msra.mxu0 %v9043_v26  ;;  %3673 = vmatprep.subr.bf16.mxu1 %v9054_v22  ;;  %v9135_v26 = vld [vmem:[%s13106_s1 + $0x9e4] ss:$16 sps:$4 sm:$0xff]   ;;  %v9136_v22 = vld [vmem:[%s13106_s1 + $0x5e8] ss:$16 sps:$4 sm:$0xff]  }
  0xc5   :  { %3415 = vmatprep.subr.bf16.mxu0 %v9051_v21  ;;  %3445 = vmatprep.mubr.bf16.mxu0 %v10545_v55  ;;  %v9133_v21 = vld [vmem:[%s13106_s1 + $0x9e0] ss:$16 sps:$4 sm:$0xff]  }
  0xc6   :  { %3703 = vmatprep.mubr.bf16.mxu1 %v10186_v38  ;;  %v9066_v38 = vld [vmem:[%s13106_s1 + $0x46c] ss:$16 sps:$4 sm:$0xff]  }
  0xc7   :  { %3674 = vmatpush1.bf16.msra.mxu1 %v9052_v31  ;;  %v9144_v31 = vld [vmem:[%s13106_s1 + $0x60c] ss:$16 sps:$4 sm:$0xff]  }
  0xc8   :  { %3416 = vmatpush1.bf16.msra.mxu0 %v9049_v30  ;;  %3675 = vmatprep.subr.bf16.mxu1 %v9060_v9  ;;  %v9141_v30 = vld [vmem:[%s13106_s1 + $0xa04] ss:$16 sps:$4 sm:$0xff]   ;;  %v10737_v9 = vld [vmem:[%s13107_s0 + $0x28] sm:$0xff] }
  0xc9   :  { %3417 = vmatprep.subr.bf16.mxu0 %v9057_v32  ;;  %v9139_v32 = vld [vmem:[%s13106_s1 + $0xa00] ss:$16 sps:$4 sm:$0xff]  }
  0xcb   :  { %3676 = vmatpush1.bf16.msra.mxu1 %v9058_v34  ;;  %v10746_v34 = vld [vmem:[%s13107_s0 + $0x68] sm:$0xff] }
  0xcc   :  { %3418 = vmatpush1.bf16.msra.mxu0 %v9055_v33  ;;  %3677 = vmatprep.subr.bf16.mxu1 %v9066_v38  ;;  %v10741_v33 = vcombine.low %v10527_v27, %v10532_v28  ;;  %v9147_v38 = vld [vmem:[%s13106_s1 + $0xa24] ss:$16 sps:$4 sm:$0xff]   ;;  %v9150_v27 = vld [vmem:[%s13106_s1 + $0x62c] ss:$16 sps:$4 sm:$0xff]   ;;  %v10759_v28 = vcombine.high %v10737_v9, %v10746_v34 }
  0xcd   :  { %3419 = vmatprep.subr.bf16.mxu0 %v9063_v35  ;;  %v9142_v35 = vld [vmem:[%s13106_s1 + $0x608] ss:$16 sps:$4 sm:$0xff]  }
  0xcf   :  { %3678 = vmatpush1.bf16.msra.mxu1 %v9064_v37  ;;  %v9148_v37 = vld [vmem:[%s13106_s1 + $0x628] ss:$16 sps:$4 sm:$0xff]  }
  0xd0   :  { %3420 = vmatpush1.bf16.msra.mxu0 %v9061_v36  ;;  %3679 = vmatprep.subr.bf16.mxu1 %v9072_v40  ;;  %v9145_v36 = vld [vmem:[%s13106_s1 + $0xa20] ss:$16 sps:$4 sm:$0xff]  }
  0xd1   :  { %3421 = vmatprep.subr.bf16.mxu0 %v9069_v39  ;;  %v9153_v39 = vld [vmem:[%s13106_s1 + $0xa44] ss:$16 sps:$4 sm:$0xff]   ;;  %v9151_v40 = vld [vmem:[%s13106_s1 + $0xa40] ss:$16 sps:$4 sm:$0xff]  }
  0xd3   :  { %3680 = vmatpush1.bf16.msra.mxu1 %v9070_v42  ;;  %v9159_v42 = vld [vmem:[%s13106_s1 + $0xa64] ss:$16 sps:$4 sm:$0xff]  }
  0xd4   :  { %3422 = vmatpush1.bf16.msra.mxu0 %v9067_v41  ;;  %3681 = vmatprep.subr.bf16.mxu1 %v9078_v44  ;;  %v9154_v41 = vld [vmem:[%s13106_s1 + $0x648] ss:$16 sps:$4 sm:$0xff]  }
  0xd5   :  { %3423 = vmatprep.subr.bf16.mxu0 %v9075_v43  ;;  %v9157_v43 = vld [vmem:[%s13106_s1 + $0xa60] ss:$16 sps:$4 sm:$0xff]   ;;  %v9160_v44 = vld [vmem:[%s13106_s1 + $0x668] ss:$16 sps:$4 sm:$0xff]  }
  0xd7   :  { %3682 = vmatpush1.bf16.msra.mxu1 %v9076_v46  ;;  %v9168_v46 = vld [vmem:[%s13106_s1 + $0x68c] ss:$16 sps:$4 sm:$0xff]  }
  0xd8   :  { %3424 = vmatpush1.bf16.msra.mxu0 %v9073_v45  ;;  %3683 = vmatprep.subr.bf16.mxu1 %v9084_v48  ;;  %v9165_v45 = vld [vmem:[%s13106_s1 + $0xa84] ss:$16 sps:$4 sm:$0xff]   ;;  %v9166_v48 = vld [vmem:[%s13106_s1 + $0x688] ss:$16 sps:$4 sm:$0xff]  }
  0xd9   :  { %3425 = vmatprep.subr.bf16.mxu0 %v9081_v47  ;;  %v9163_v47 = vld [vmem:[%s13106_s1 + $0xa80] ss:$16 sps:$4 sm:$0xff]  }
  0xdb   :  { %3684 = vmatpush1.bf16.msra.mxu1 %v9082_v50  ;;  %v9174_v50 = vld [vmem:[%s13106_s1 + $0x6ac] ss:$16 sps:$4 sm:$0xff]  }
  0xdc   :  { %3426 = vmatpush1.bf16.msra.mxu0 %v9079_v49  ;;  %3685 = vmatprep.subr.bf16.mxu1 %v9090_v52  ;;  %v9171_v49 = vld [vmem:[%s13106_s1 + $0xaa4] ss:$16 sps:$4 sm:$0xff]   ;;  %v9172_v52 = vld [vmem:[%s13106_s1 + $0x6a8] ss:$16 sps:$4 sm:$0xff]  }
  0xdd   :  { %3427 = vmatprep.subr.bf16.mxu0 %v9087_v51  ;;  %v9169_v51 = vld [vmem:[%s13106_s1 + $0xaa0] ss:$16 sps:$4 sm:$0xff]  }
  0xdf   :  { %3686 = vmatpush1.bf16.msra.mxu1 %v9088_v54  ;;  %v9180_v54 = vld [vmem:[%s13106_s1 + $0x6cc] ss:$16 sps:$4 sm:$0xff]  }
  0xe0   :  { %3428 = vmatpush1.bf16.msra.mxu0 %v9085_v53  ;;  %3687 = vmatprep.subr.bf16.mxu1 %v9096_v57  ;;  %v9177_v53 = vld [vmem:[%s13106_s1 + $0xac4] ss:$16 sps:$4 sm:$0xff]  }
  0xe1   :  { %3429 = vmatprep.subr.bf16.mxu0 %v9093_v56 }
  0xe3   :  { %3688 = vmatpush1.bf16.msra.mxu1 %v9094_v59  ;;  %v9175_v59 = vld [vmem:[%s13106_s1 + $0xac0] ss:$16 sps:$4 sm:$0xff]  }
  0xe4   :  { %3430 = vmatpush1.bf16.msra.mxu0 %v9091_v58  ;;  %3689 = vmatprep.subr.bf16.mxu1 %v9102_v61 }
  0xe5   :  { %3431 = vmatprep.subr.bf16.mxu0 %v9099_v60  ;;  %v9178_v60 = vld [vmem:[%s13106_s1 + $0x6c8] ss:$16 sps:$4 sm:$0xff]  }
  0xe7   :  { %3690 = vmatpush1.bf16.msra.mxu1 %v9100_v63  ;;  %v9186_v63 = vld [vmem:[%s13106_s1 + $0x6ec] ss:$16 sps:$4 sm:$0xff]  }
  0xe8   :  { %3432 = vmatpush1.bf16.msra.mxu0 %v9097_v62  ;;  %3691 = vmatprep.subr.bf16.mxu1 %v9108_v1  ;;  %v9183_v62 = vld [vmem:[%s13106_s1 + $0xae4] ss:$16 sps:$4 sm:$0xff]   ;;  %v9184_v1 = vld [vmem:[%s13106_s1 + $0x6e8] ss:$16 sps:$4 sm:$0xff]  }
  0xe9   :  { %3433 = vmatprep.subr.bf16.mxu0 %v9105_v0  ;;  %v9181_v0 = vld [vmem:[%s13106_s1 + $0xae0] ss:$16 sps:$4 sm:$0xff]  }
  0xeb   :  { %3692 = vmatpush1.bf16.msra.mxu1 %v9106_v3  ;;  %v9192_v3 = vld [vmem:[%s13106_s1 + $0x70c] ss:$16 sps:$4 sm:$0xff]  }
  0xec   :  { %3434 = vmatpush1.bf16.msra.mxu0 %v9103_v2  ;;  %3693 = vmatprep.subr.bf16.mxu1 %v9114_v5  ;;  %v9189_v2 = vld [vmem:[%s13106_s1 + $0xb04] ss:$16 sps:$4 sm:$0xff]   ;;  %v9190_v5 = vld [vmem:[%s13106_s1 + $0x708] ss:$16 sps:$4 sm:$0xff]  }
  0xed   :  { %3435 = vmatprep.subr.bf16.mxu0 %v9111_v4  ;;  %v9187_v4 = vld [vmem:[%s13106_s1 + $0xb00] ss:$16 sps:$4 sm:$0xff]  }
  0xef   :  { %3694 = vmatpush1.bf16.msra.mxu1 %v9112_v7  ;;  %v9198_v7 = vld [vmem:[%s13106_s1 + $0x72c] ss:$16 sps:$4 sm:$0xff]  }
  0xf0   :  { %3436 = vmatpush1.bf16.msra.mxu0 %v9109_v6  ;;  %3695 = vmatprep.subr.bf16.mxu1 %v9120_v11  ;;  %v9195_v6 = vld [vmem:[%s13106_s1 + $0xb24] ss:$16 sps:$4 sm:$0xff]   ;;  %v9196_v11 = vld [vmem:[%s13106_s1 + $0x728] ss:$16 sps:$4 sm:$0xff]  }
  0xf1   :  { %3437 = vmatprep.subr.bf16.mxu0 %v9117_v10  ;;  %v9193_v10 = vld [vmem:[%s13106_s1 + $0xb20] ss:$16 sps:$4 sm:$0xff]  }
  0xf3   :  { %3696 = vmatpush1.bf16.msra.mxu1 %v9118_v13  ;;  %v9204_v13 = vld [vmem:[%s13106_s1 + $0x74c] ss:$16 sps:$4 sm:$0xff]  }
  0xf4   :  { %3438 = vmatpush1.bf16.msra.mxu0 %v9115_v12  ;;  %3697 = vmatprep.subr.bf16.mxu1 %v9126_v15  ;;  %v9201_v12 = vld [vmem:[%s13106_s1 + $0xb44] ss:$16 sps:$4 sm:$0xff]   ;;  %v9202_v15 = vld [vmem:[%s13106_s1 + $0x748] ss:$16 sps:$4 sm:$0xff]  }
  0xf5   :  { %3439 = vmatprep.subr.bf16.mxu0 %v9123_v14  ;;  %v9199_v14 = vld [vmem:[%s13106_s1 + $0xb40] ss:$16 sps:$4 sm:$0xff]  }
  0xf7   :  { %3698 = vmatpush1.bf16.msra.mxu1 %v9124_v18  ;;  %v9210_v18 = vld [vmem:[%s13106_s1 + $0x76c] ss:$16 sps:$4 sm:$0xff]  }
  0xf8   :  { %3440 = vmatpush1.bf16.msra.mxu0 %v9121_v17  ;;  %3699 = vmatprep.subr.bf16.mxu1 %v9132_v20  ;;  %v9207_v17 = vld [vmem:[%s13106_s1 + $0xb64] ss:$16 sps:$4 sm:$0xff]   ;;  %v9208_v20 = vld [vmem:[%s13106_s1 + $0x768] ss:$16 sps:$4 sm:$0xff]  }
  0xf9   :  { %3441 = vmatprep.subr.bf16.mxu0 %v9129_v19  ;;  %v9205_v19 = vld [vmem:[%s13106_s1 + $0xb60] ss:$16 sps:$4 sm:$0xff]  }
  0xfb   :  { %3700 = vmatpush1.bf16.msra.mxu1 %v9130_v24  ;;  %v9216_v24 = vld [vmem:[%s13106_s1 + $0x78c] ss:$16 sps:$4 sm:$0xff]  }
  0xfc   :  { %3442 = vmatpush1.bf16.msra.mxu0 %v9127_v23  ;;  %3701 = vmatprep.subr.bf16.mxu1 %v9138_v29  ;;  %v9213_v23 = vld [vmem:[%s13106_s1 + $0xb84] ss:$16 sps:$4 sm:$0xff]   ;;  %v9214_v29 = vld [vmem:[%s13106_s1 + $0x788] ss:$16 sps:$4 sm:$0xff]  }
  0xfd   :  { %3443 = vmatprep.subr.bf16.mxu0 %v9135_v26  ;;  %v9211_v26 = vld [vmem:[%s13106_s1 + $0xb80] ss:$16 sps:$4 sm:$0xff]  }
  0xff   :  { %3702 = vmatpush1.bf16.msra.mxu1 %v9136_v22  ;;  %v9222_v22 = vld [vmem:[%s13106_s1 + $0x7ac] ss:$16 sps:$4 sm:$0xff]  }
 0x100   :  { %3444 = vmatpush1.bf16.msra.mxu0 %v9133_v21  ;;  %3714 = vmatprep.subr.bf16.mxu1 %v9144_v31  ;;  %v9219_v21 = vld [vmem:[%s13106_s1 + $0xba4] ss:$16 sps:$4 sm:$0xff]   ;;  %v9220_v31 = vld [vmem:[%s13106_s1 + $0x7a8] ss:$16 sps:$4 sm:$0xff]  }
 0x101   :  { %3456 = vmatprep.subr.bf16.mxu0 %v9141_v30  ;;  %v9217_v30 = vld [vmem:[%s13106_s1 + $0xba0] ss:$16 sps:$4 sm:$0xff]  }
 0x102   :  { %3704 = vmatmul.mubr.bf16.vlgmr.msra.gmra.mrb[4].mxu1 %v10305_v16  ;;  %v9156_v16 = vld [vmem:[%s13106_s1 + $0x64c] ss:$16 sps:$4 sm:$0xff]  }
 0x103   :  { %3446 = vmatmul.mubr.bf16.vlgmr.msra.gmra.mrb[0].mxu0 %v10741_v33  ;;  %3715 = vmatpush1.bf16.msra.mxu1 %v9142_v35  ;;  %v9228_v35 = vld [vmem:[%s13106_s1 + $0x7cc] ss:$16 sps:$4 sm:$0xff]  }
 0x104   :  { %3457 = vmatpush1.bf16.msra.mxu0 %v9139_v32  ;;  %3716 = vmatprep.subr.bf16.mxu1 %v9150_v27  ;;  %v9225_v32 = vld [vmem:[%s13106_s1 + $0xbc4] ss:$16 sps:$4 sm:$0xff]   ;;  %v9226_v27 = vld [vmem:[%s13106_s1 + $0x7c8] ss:$16 sps:$4 sm:$0xff]  }
 0x105   :  { %3458 = vmatprep.subr.bf16.mxu0 %v9147_v38  ;;  %3488 = vmatprep.mubr.bf16.mxu0 %v10759_v28  ;;  %v9223_v38 = vld [vmem:[%s13106_s1 + $0xbc0] ss:$16 sps:$4 sm:$0xff]  }
 0x106   :  { %3746 = vmatprep.mubr.bf16.mxu1 %v10339_v25  ;;  %v9162_v25 = vld [vmem:[%s13106_s1 + $0x66c] ss:$16 sps:$4 sm:$0xff]  }
 0x107   :  { %3717 = vmatpush1.bf16.msra.mxu1 %v9148_v37  ;;  %v9234_v37 = vld [vmem:[%s13106_s1 + $0x7ec] ss:$16 sps:$4 sm:$0xff]  }
 0x108   :  { %3459 = vmatpush1.bf16.msra.mxu0 %v9145_v36  ;;  %3718 = vmatprep.subr.bf16.mxu1 %v9156_v16  ;;  %v9231_v36 = vld [vmem:[%s13106_s1 + $0xbe4] ss:$16 sps:$4 sm:$0xff]   ;;  %v9232_v16 = vld [vmem:[%s13106_s1 + $0x7e8] ss:$16 sps:$4 sm:$0xff]  }
 0x109   :  { %3460 = vmatprep.subr.bf16.mxu0 %v9153_v39  ;;  %v9229_v39 = vld [vmem:[%s13106_s1 + $0xbe0] ss:$16 sps:$4 sm:$0xff]  }
 0x10b   :  { %3719 = vmatpush1.bf16.msra.mxu1 %v9154_v41  ;;  %v9240_v41 = vld [vmem:[%s13106_s1 + $0x80c] ss:$16 sps:$4 sm:$0xff]  }
 0x10c   :  { %3461 = vmatpush1.bf16.msra.mxu0 %v9151_v40  ;;  %3720 = vmatprep.subr.bf16.mxu1 %v9162_v25  ;;  %v9237_v40 = vld [vmem:[%s13106_s1 + $0xc04] ss:$16 sps:$4 sm:$0xff]   ;;  %v9238_v25 = vld [vmem:[%s13106_s1 + $0x808] ss:$16 sps:$4 sm:$0xff]  }
 0x10d   :  { %3462 = vmatprep.subr.bf16.mxu0 %v9159_v42  ;;  %v9235_v42 = vld [vmem:[%s13106_s1 + $0xc00] ss:$16 sps:$4 sm:$0xff]  }
 0x10f   :  { %3721 = vmatpush1.bf16.msra.mxu1 %v9160_v44  ;;  %v9243_v44 = vld [vmem:[%s13106_s1 + $0xc24] ss:$16 sps:$4 sm:$0xff]  }
 0x110   :  { %3463 = vmatpush1.bf16.msra.mxu0 %v9157_v43  ;;  %3722 = vmatprep.subr.bf16.mxu1 %v9168_v46  ;;  %v10961_v43 = vcombine.low %v10737_v9, %v10746_v34  ;;  %v10974_v46 = vld [vmem:[%s13107_s0 + $0x70] sm:$0xff]  ;;  %v9246_v9 = vld [vmem:[%s13106_s1 + $0x82c] ss:$16 sps:$4 sm:$0xff]  }
 0x111   :  { %3464 = vmatprep.subr.bf16.mxu0 %v9165_v45  ;;  %v10969_v45 = vld [vmem:[%s13107_s0 + $0x30] sm:$0xff] }
 0x112   :  { %v9241_v34 = vld [vmem:[%s13106_s1 + $0xc20] ss:$16 sps:$4 sm:$0xff]  }
 0x113   :  { %3723 = vmatpush1.bf16.msra.mxu1 %v9166_v48  ;;  %v10987_v48 = vcombine.high %v10969_v45, %v10974_v46 }
 0x114   :  { %3465 = vmatpush1.bf16.msra.mxu0 %v9163_v47  ;;  %3724 = vmatprep.subr.bf16.mxu1 %v9174_v50  ;;  %v9244_v47 = vld [vmem:[%s13106_s1 + $0x828] ss:$16 sps:$4 sm:$0xff]   ;;  %v9252_v50 = vld [vmem:[%s13106_s1 + $0x84c] ss:$16 sps:$4 sm:$0xff]  }
 0x115   :  { %3466 = vmatprep.subr.bf16.mxu0 %v9171_v49  ;;  %v10825_v56 = vpop.f32.mrb[0].mxu1  ;;  %v9249_v49 = vld [vmem:[%s13106_s1 + $0xc44] ss:$16 sps:$4 sm:$0xff]  }
 0x116   :  { %v10827_v57 = vpop.f32.mrb[1].mxu1 }
 0x117   :  { %v10829_v58 = vpop.f32.mrb[2].mxu1  ;;  %3725 = vmatpush1.bf16.msra.mxu1 %v9172_v52  ;;  %v9255_v52 = vld [vmem:[%s13106_s1 + $0xc64] ss:$16 sps:$4 sm:$0xff]  }
 0x118   :  { %3467 = vmatpush1.bf16.msra.mxu0 %v9169_v51  ;;  %v10837_v61 = vpop.f32.mrb[3].mxu1  ;;  %3726 = vmatprep.subr.bf16.mxu1 %v9180_v54  ;;  %v9250_v51 = vld [vmem:[%s13106_s1 + $0x848] ss:$16 sps:$4 sm:$0xff]  }
 0x119   :  { %3468 = vmatprep.subr.bf16.mxu0 %v9177_v53  ;;  %v9253_v53 = vld [vmem:[%s13106_s1 + $0xc60] ss:$16 sps:$4 sm:$0xff]   ;;  %v9256_v54 = vld [vmem:[%s13106_s1 + $0x868] ss:$16 sps:$4 sm:$0xff]  }
 0x11b   :  { %3727 = vmatpush1.bf16.msra.mxu1 %v9178_v60  ;;  %v9264_v60 = vld [vmem:[%s13106_s1 + $0x88c] ss:$16 sps:$4 sm:$0xff]  }
 0x11c   :  { %3469 = vmatpush1.bf16.msra.mxu0 %v9175_v59  ;;  %3728 = vmatprep.subr.bf16.mxu1 %v9186_v63  ;;  %v9261_v59 = vld [vmem:[%s13106_s1 + $0xc84] ss:$16 sps:$4 sm:$0xff]   ;;  %v9262_v63 = vld [vmem:[%s13106_s1 + $0x888] ss:$16 sps:$4 sm:$0xff]  }
 0x11d   :  { %3470 = vmatprep.subr.bf16.mxu0 %v9183_v62  ;;  %v9259_v62 = vld [vmem:[%s13106_s1 + $0xc80] ss:$16 sps:$4 sm:$0xff]  }
 0x11f   :  { %3729 = vmatpush1.bf16.msra.mxu1 %v9184_v1  ;;  %v9270_v1 = vld [vmem:[%s13106_s1 + $0x8ac] ss:$16 sps:$4 sm:$0xff]  }
 0x120   :  { %3471 = vmatpush1.bf16.msra.mxu0 %v9181_v0  ;;  %3730 = vmatprep.subr.bf16.mxu1 %v9192_v3  ;;  %v9267_v0 = vld [vmem:[%s13106_s1 + $0xca4] ss:$16 sps:$4 sm:$0xff]   ;;  %v9268_v3 = vld [vmem:[%s13106_s1 + $0x8a8] ss:$16 sps:$4 sm:$0xff]  }
 0x121   :  { %3472 = vmatprep.subr.bf16.mxu0 %v9189_v2  ;;  %v9265_v2 = vld [vmem:[%s13106_s1 + $0xca0] ss:$16 sps:$4 sm:$0xff]  }
 0x123   :  { %3731 = vmatpush1.bf16.msra.mxu1 %v9190_v5  ;;  %v9276_v5 = vld [vmem:[%s13106_s1 + $0x8cc] ss:$16 sps:$4 sm:$0xff]  }
 0x124   :  { %3473 = vmatpush1.bf16.msra.mxu0 %v9187_v4  ;;  %3732 = vmatprep.subr.bf16.mxu1 %v9198_v7  ;;  %v9273_v4 = vld [vmem:[%s13106_s1 + $0xcc4] ss:$16 sps:$4 sm:$0xff]   ;;  %v9274_v7 = vld [vmem:[%s13106_s1 + $0x8c8] ss:$16 sps:$4 sm:$0xff]  }
 0x125   :  { %3474 = vmatprep.subr.bf16.mxu0 %v9195_v6  ;;  %v9271_v6 = vld [vmem:[%s13106_s1 + $0xcc0] ss:$16 sps:$4 sm:$0xff]  }
 0x127   :  { %3733 = vmatpush1.bf16.msra.mxu1 %v9196_v11  ;;  %v9282_v11 = vld [vmem:[%s13106_s1 + $0x8ec] ss:$16 sps:$4 sm:$0xff]  }
 0x128   :  { %3475 = vmatpush1.bf16.msra.mxu0 %v9193_v10  ;;  %3734 = vmatprep.subr.bf16.mxu1 %v9204_v13  ;;  %v9279_v10 = vld [vmem:[%s13106_s1 + $0xce4] ss:$16 sps:$4 sm:$0xff]   ;;  %v9280_v13 = vld [vmem:[%s13106_s1 + $0x8e8] ss:$16 sps:$4 sm:$0xff]  }
 0x129   :  { %3476 = vmatprep.subr.bf16.mxu0 %v9201_v12  ;;  %v9277_v12 = vld [vmem:[%s13106_s1 + $0xce0] ss:$16 sps:$4 sm:$0xff]  }
 0x12b   :  { %3735 = vmatpush1.bf16.msra.mxu1 %v9202_v15  ;;  %v9288_v15 = vld [vmem:[%s13106_s1 + $0x90c] ss:$16 sps:$4 sm:$0xff]  }
 0x12c   :  { %3477 = vmatpush1.bf16.msra.mxu0 %v9199_v14  ;;  %3736 = vmatprep.subr.bf16.mxu1 %v9210_v18  ;;  %v9285_v14 = vld [vmem:[%s13106_s1 + $0xd04] ss:$16 sps:$4 sm:$0xff]   ;;  %v9286_v18 = vld [vmem:[%s13106_s1 + $0x908] ss:$16 sps:$4 sm:$0xff]  }
 0x12d   :  { %3478 = vmatprep.subr.bf16.mxu0 %v9207_v17  ;;  %v9283_v17 = vld [vmem:[%s13106_s1 + $0xd00] ss:$16 sps:$4 sm:$0xff]  }
 0x12f   :  { %3737 = vmatpush1.bf16.msra.mxu1 %v9208_v20  ;;  %v9294_v20 = vld [vmem:[%s13106_s1 + $0x92c] ss:$16 sps:$4 sm:$0xff]  }
 0x130   :  { %3479 = vmatpush1.bf16.msra.mxu0 %v9205_v19  ;;  %3738 = vmatprep.subr.bf16.mxu1 %v9216_v24  ;;  %v9291_v19 = vld [vmem:[%s13106_s1 + $0xd24] ss:$16 sps:$4 sm:$0xff]   ;;  %v9292_v24 = vld [vmem:[%s13106_s1 + $0x928] ss:$16 sps:$4 sm:$0xff]  }
 0x131   :  { %3480 = vmatprep.subr.bf16.mxu0 %v9213_v23  ;;  %v9289_v23 = vld [vmem:[%s13106_s1 + $0xd20] ss:$16 sps:$4 sm:$0xff]  }
 0x133   :  { %3739 = vmatpush1.bf16.msra.mxu1 %v9214_v29  ;;  %v9300_v29 = vld [vmem:[%s13106_s1 + $0x94c] ss:$16 sps:$4 sm:$0xff]  }
 0x134   :  { %3481 = vmatpush1.bf16.msra.mxu0 %v9211_v26  ;;  %3740 = vmatprep.subr.bf16.mxu1 %v9222_v22  ;;  %v9297_v26 = vld [vmem:[%s13106_s1 + $0xd44] ss:$16 sps:$4 sm:$0xff]   ;;  %v9298_v22 = vld [vmem:[%s13106_s1 + $0x948] ss:$16 sps:$4 sm:$0xff]  }
 0x135   :  { %3482 = vmatprep.subr.bf16.mxu0 %v9219_v21  ;;  %v9295_v21 = vld [vmem:[%s13106_s1 + $0xd40] ss:$16 sps:$4 sm:$0xff]  }
 0x137   :  { %3741 = vmatpush1.bf16.msra.mxu1 %v9220_v31  ;;  %v9306_v31 = vld [vmem:[%s13106_s1 + $0x96c] ss:$16 sps:$4 sm:$0xff]  }
 0x138   :  { %3483 = vmatpush1.bf16.msra.mxu0 %v9217_v30  ;;  %3742 = vmatprep.subr.bf16.mxu1 %v9228_v35  ;;  %v9303_v30 = vld [vmem:[%s13106_s1 + $0xd64] ss:$16 sps:$4 sm:$0xff]   ;;  %v9304_v35 = vld [vmem:[%s13106_s1 + $0x968] ss:$16 sps:$4 sm:$0xff]  }
 0x139   :  { %3484 = vmatprep.subr.bf16.mxu0 %v9225_v32  ;;  %v9301_v32 = vld [vmem:[%s13106_s1 + $0xd60] ss:$16 sps:$4 sm:$0xff]  }
 0x13b   :  { %3743 = vmatpush1.bf16.msra.mxu1 %v9226_v27  ;;  %v9312_v27 = vld [vmem:[%s13106_s1 + $0x98c] ss:$16 sps:$4 sm:$0xff]  }
 0x13c   :  { %3485 = vmatpush1.bf16.msra.mxu0 %v9223_v38  ;;  %3744 = vmatprep.subr.bf16.mxu1 %v9234_v37  ;;  %v9309_v38 = vld [vmem:[%s13106_s1 + $0xd84] ss:$16 sps:$4 sm:$0xff]   ;;  %v9310_v37 = vld [vmem:[%s13106_s1 + $0x988] ss:$16 sps:$4 sm:$0xff]  }
 0x13d   :  { %3486 = vmatprep.subr.bf16.mxu0 %v9231_v36  ;;  %v9307_v36 = vld [vmem:[%s13106_s1 + $0xd80] ss:$16 sps:$4 sm:$0xff]  }
 0x13f   :  { %3745 = vmatpush1.bf16.msra.mxu1 %v9232_v16  ;;  %v9318_v16 = vld [vmem:[%s13106_s1 + $0x9ac] ss:$16 sps:$4 sm:$0xff]  }
 0x140   :  { %3487 = vmatpush1.bf16.msra.mxu0 %v9229_v39  ;;  %3757 = vmatprep.subr.bf16.mxu1 %v9240_v41  ;;  %v9315_v39 = vld [vmem:[%s13106_s1 + $0xda4] ss:$16 sps:$4 sm:$0xff]   ;;  %v9316_v41 = vld [vmem:[%s13106_s1 + $0x9a8] ss:$16 sps:$4 sm:$0xff]  }
 0x141   :  { %3499 = vmatprep.subr.bf16.mxu0 %v9237_v40  ;;  %v9313_v40 = vld [vmem:[%s13106_s1 + $0xda0] ss:$16 sps:$4 sm:$0xff]  }
 0x142   :  { %3747 = vmatmul.mubr.bf16.vlgmr.msra.gmra.mrb[4].mxu1 %v10522_v8  ;;  %v9247_v8 = vld [vmem:[%s13106_s1 + $0xc40] ss:$16 sps:$4 sm:$0xff]  }
 0x143   :  { %3489 = vmatmul.mubr.bf16.vlgmr.msra.gmra.mrb[0].mxu0 %v10961_v43  ;;  %3758 = vmatpush1.bf16.msra.mxu1 %v9238_v25  ;;  %v9324_v25 = vld [vmem:[%s13106_s1 + $0x9cc] ss:$16 sps:$4 sm:$0xff]  }
 0x144   :  { %3500 = vmatpush1.bf16.msra.mxu0 %v9235_v42  ;;  %3759 = vmatprep.subr.bf16.mxu1 %v9246_v9  ;;  %v9321_v42 = vld [vmem:[%s13106_s1 + $0xdc4] ss:$16 sps:$4 sm:$0xff]   ;;  %v9322_v9 = vld [vmem:[%s13106_s1 + $0x9c8] ss:$16 sps:$4 sm:$0xff]  }
 0x145   :  { %3501 = vmatprep.subr.bf16.mxu0 %v9243_v44  ;;  %3531 = vmatprep.mubr.bf16.mxu0 %v10987_v48  ;;  %v9319_v44 = vld [vmem:[%s13106_s1 + $0xdc0] ss:$16 sps:$4 sm:$0xff]  }
 0x146   :  { %3789 = vmatprep.mubr.bf16.mxu1 %v10545_v55  ;;  %v9258_v55 = vld [vmem:[%s13106_s1 + $0x86c] ss:$16 sps:$4 sm:$0xff]  }
 0x147   :  { %3760 = vmatpush1.bf16.msra.mxu1 %v9244_v47  ;;  %v9330_v47 = vld [vmem:[%s13106_s1 + $0x9ec] ss:$16 sps:$4 sm:$0xff]  }
 0x148   :  { %3502 = vmatpush1.bf16.msra.mxu0 %v9241_v34  ;;  %3761 = vmatprep.subr.bf16.mxu1 %v9252_v50  ;;  %v9327_v34 = vld [vmem:[%s13106_s1 + $0xde4] ss:$16 sps:$4 sm:$0xff]   ;;  %v9328_v50 = vld [vmem:[%s13106_s1 + $0x9e8] ss:$16 sps:$4 sm:$0xff]  }
 0x149   :  { %3503 = vmatprep.subr.bf16.mxu0 %v9249_v49  ;;  %v9325_v49 = vld [vmem:[%s13106_s1 + $0xde0] ss:$16 sps:$4 sm:$0xff]  }
 0x14b   :  { %3762 = vmatpush1.bf16.msra.mxu1 %v9250_v51  ;;  %v9336_v51 = vld [vmem:[%s13106_s1 + $0xa0c] ss:$16 sps:$4 sm:$0xff]  }
 0x14c   :  { %3504 = vmatpush1.bf16.msra.mxu0 %v9247_v8  ;;  %3763 = vmatprep.subr.bf16.mxu1 %v9258_v55  ;;  %v9333_v8 = vld [vmem:[%s13106_s1 + $0xe04] ss:$16 sps:$4 sm:$0xff]   ;;  %v11174_v55 = vld [vmem:[%s13107_s0 + $0x38] sm:$0xff] }
 0x14d   :  { %3505 = vmatprep.subr.bf16.mxu0 %v9255_v52  ;;  %v11169_v52 = vcombine.low %v10969_v45, %v10974_v46  ;;  %v9334_v45 = vld [vmem:[%s13106_s1 + $0xa08] ss:$16 sps:$4 sm:$0xff]   ;;  %v9339_v46 = vld [vmem:[%s13106_s1 + $0xe24] ss:$16 sps:$4 sm:$0xff]  }
 0x14f   :  { %3764 = vmatpush1.bf16.msra.mxu1 %v9256_v54  ;;  %v9331_v54 = vld [vmem:[%s13106_s1 + $0xe00] ss:$16 sps:$4 sm:$0xff]  }
 0x150   :  { %3506 = vmatpush1.bf16.msra.mxu0 %v9253_v53  ;;  %3765 = vmatprep.subr.bf16.mxu1 %v9264_v60  ;;  %v11179_v53 = vld [vmem:[%s13107_s0 + $0x78] sm:$0xff] }
 0x151   :  { %3507 = vmatprep.subr.bf16.mxu0 %v9261_v59  ;;  %v9342_v59 = vld [vmem:[%s13106_s1 + $0xa2c] ss:$16 sps:$4 sm:$0xff]   ;;  %v11195_v60 = vcombine.high %v11174_v55, %v11179_v53 }
 0x153   :  { %3766 = vmatpush1.bf16.msra.mxu1 %v9262_v63  ;;  %v9340_v63 = vld [vmem:[%s13106_s1 + $0xa28] ss:$16 sps:$4 sm:$0xff]  }
 0x154   :  { %3508 = vmatpush1.bf16.msra.mxu0 %v9259_v62  ;;  %3767 = vmatprep.subr.bf16.mxu1 %v9270_v1  ;;  %v9337_v62 = vld [vmem:[%s13106_s1 + $0xe20] ss:$16 sps:$4 sm:$0xff]  }
 0x155   :  { %3509 = vmatprep.subr.bf16.mxu0 %v9267_v0  ;;  %v9345_v0 = vld [vmem:[%s13106_s1 + $0xe44] ss:$16 sps:$4 sm:$0xff]   ;;  %v9343_v1 = vld [vmem:[%s13106_s1 + $0xe40] ss:$16 sps:$4 sm:$0xff]  }
 0x157   :  { %3768 = vmatpush1.bf16.msra.mxu1 %v9268_v3  ;;  %v9351_v3 = vld [vmem:[%s13106_s1 + $0xe64] ss:$16 sps:$4 sm:$0xff]  }
 0x158   :  { %3510 = vmatpush1.bf16.msra.mxu0 %v9265_v2  ;;  %3769 = vmatprep.subr.bf16.mxu1 %v9276_v5  ;;  %v9346_v2 = vld [vmem:[%s13106_s1 + $0xa48] ss:$16 sps:$4 sm:$0xff]  }
 0x159   :  { %3511 = vmatprep.subr.bf16.mxu0 %v9273_v4  ;;  %v9349_v4 = vld [vmem:[%s13106_s1 + $0xe60] ss:$16 sps:$4 sm:$0xff]   ;;  %v9352_v5 = vld [vmem:[%s13106_s1 + $0xa68] ss:$16 sps:$4 sm:$0xff]  }
 0x15b   :  { %3770 = vmatpush1.bf16.msra.mxu1 %v9274_v7  ;;  %v9360_v7 = vld [vmem:[%s13106_s1 + $0xa8c] ss:$16 sps:$4 sm:$0xff]  }
 0x15c   :  { %3512 = vmatpush1.bf16.msra.mxu0 %v9271_v6  ;;  %3771 = vmatprep.subr.bf16.mxu1 %v9282_v11  ;;  %v9357_v6 = vld [vmem:[%s13106_s1 + $0xe84] ss:$16 sps:$4 sm:$0xff]   ;;  %v9358_v11 = vld [vmem:[%s13106_s1 + $0xa88] ss:$16 sps:$4 sm:$0xff]  }
 0x15d   :  { %3513 = vmatprep.subr.bf16.mxu0 %v9279_v10  ;;  %v9355_v10 = vld [vmem:[%s13106_s1 + $0xe80] ss:$16 sps:$4 sm:$0xff]  }
 0x15f   :  { %3772 = vmatpush1.bf16.msra.mxu1 %v9280_v13  ;;  %v9366_v13 = vld [vmem:[%s13106_s1 + $0xaac] ss:$16 sps:$4 sm:$0xff]  }
 0x160   :  { %3514 = vmatpush1.bf16.msra.mxu0 %v9277_v12  ;;  %3773 = vmatprep.subr.bf16.mxu1 %v9288_v15  ;;  %v9363_v12 = vld [vmem:[%s13106_s1 + $0xea4] ss:$16 sps:$4 sm:$0xff]   ;;  %v9364_v15 = vld [vmem:[%s13106_s1 + $0xaa8] ss:$16 sps:$4 sm:$0xff]  }
 0x161   :  { %3515 = vmatprep.subr.bf16.mxu0 %v9285_v14  ;;  %v9361_v14 = vld [vmem:[%s13106_s1 + $0xea0] ss:$16 sps:$4 sm:$0xff]  }
 0x163   :  { %3774 = vmatpush1.bf16.msra.mxu1 %v9286_v18  ;;  %v9372_v18 = vld [vmem:[%s13106_s1 + $0xacc] ss:$16 sps:$4 sm:$0xff]  }
 0x164   :  { %3516 = vmatpush1.bf16.msra.mxu0 %v9283_v17  ;;  %3775 = vmatprep.subr.bf16.mxu1 %v9294_v20  ;;  %v9369_v17 = vld [vmem:[%s13106_s1 + $0xec4] ss:$16 sps:$4 sm:$0xff]   ;;  %v9370_v20 = vld [vmem:[%s13106_s1 + $0xac8] ss:$16 sps:$4 sm:$0xff]  }
 0x165   :  { %3517 = vmatprep.subr.bf16.mxu0 %v9291_v19  ;;  %v9367_v19 = vld [vmem:[%s13106_s1 + $0xec0] ss:$16 sps:$4 sm:$0xff]  }
 0x167   :  { %3776 = vmatpush1.bf16.msra.mxu1 %v9292_v24  ;;  %v9378_v24 = vld [vmem:[%s13106_s1 + $0xaec] ss:$16 sps:$4 sm:$0xff]  }
 0x168   :  { %3518 = vmatpush1.bf16.msra.mxu0 %v9289_v23  ;;  %3777 = vmatprep.subr.bf16.mxu1 %v9300_v29  ;;  %v9375_v23 = vld [vmem:[%s13106_s1 + $0xee4] ss:$16 sps:$4 sm:$0xff]   ;;  %v9376_v29 = vld [vmem:[%s13106_s1 + $0xae8] ss:$16 sps:$4 sm:$0xff]  }
 0x169   :  { %3519 = vmatprep.subr.bf16.mxu0 %v9297_v26  ;;  %v9373_v26 = vld [vmem:[%s13106_s1 + $0xee0] ss:$16 sps:$4 sm:$0xff]  }
 0x16b   :  { %3778 = vmatpush1.bf16.msra.mxu1 %v9298_v22  ;;  %v9384_v22 = vld [vmem:[%s13106_s1 + $0xb0c] ss:$16 sps:$4 sm:$0xff]  }
 0x16c   :  { %3520 = vmatpush1.bf16.msra.mxu0 %v9295_v21  ;;  %3779 = vmatprep.subr.bf16.mxu1 %v9306_v31  ;;  %v9381_v21 = vld [vmem:[%s13106_s1 + $0xf04] ss:$16 sps:$4 sm:$0xff]   ;;  %v9382_v31 = vld [vmem:[%s13106_s1 + $0xb08] ss:$16 sps:$4 sm:$0xff]  }
 0x16d   :  { %3521 = vmatprep.subr.bf16.mxu0 %v9303_v30  ;;  %v9379_v30 = vld [vmem:[%s13106_s1 + $0xf00] ss:$16 sps:$4 sm:$0xff]  }
 0x16f   :  { %3780 = vmatpush1.bf16.msra.mxu1 %v9304_v35  ;;  %v9390_v35 = vld [vmem:[%s13106_s1 + $0xb2c] ss:$16 sps:$4 sm:$0xff]  }
 0x170   :  { %3522 = vmatpush1.bf16.msra.mxu0 %v9301_v32  ;;  %3781 = vmatprep.subr.bf16.mxu1 %v9312_v27  ;;  %v9387_v32 = vld [vmem:[%s13106_s1 + $0xf24] ss:$16 sps:$4 sm:$0xff]   ;;  %v9388_v27 = vld [vmem:[%s13106_s1 + $0xb28] ss:$16 sps:$4 sm:$0xff]  }
 0x171   :  { %3523 = vmatprep.subr.bf16.mxu0 %v9309_v38  ;;  %v9385_v38 = vld [vmem:[%s13106_s1 + $0xf20] ss:$16 sps:$4 sm:$0xff]  }
 0x173   :  { %3782 = vmatpush1.bf16.msra.mxu1 %v9310_v37  ;;  %v9396_v37 = vld [vmem:[%s13106_s1 + $0xb4c] ss:$16 sps:$4 sm:$0xff]  }
 0x174   :  { %3524 = vmatpush1.bf16.msra.mxu0 %v9307_v36  ;;  %3783 = vmatprep.subr.bf16.mxu1 %v9318_v16  ;;  %v9393_v36 = vld [vmem:[%s13106_s1 + $0xf44] ss:$16 sps:$4 sm:$0xff]   ;;  %v9394_v16 = vld [vmem:[%s13106_s1 + $0xb48] ss:$16 sps:$4 sm:$0xff]  }
 0x175   :  { %3525 = vmatprep.subr.bf16.mxu0 %v9315_v39  ;;  %v9391_v39 = vld [vmem:[%s13106_s1 + $0xf40] ss:$16 sps:$4 sm:$0xff]  }
 0x177   :  { %3784 = vmatpush1.bf16.msra.mxu1 %v9316_v41  ;;  %v9402_v41 = vld [vmem:[%s13106_s1 + $0xb6c] ss:$16 sps:$4 sm:$0xff]  }
 0x178   :  { %3526 = vmatpush1.bf16.msra.mxu0 %v9313_v40  ;;  %3785 = vmatprep.subr.bf16.mxu1 %v9324_v25  ;;  %v9399_v40 = vld [vmem:[%s13106_s1 + $0xf64] ss:$16 sps:$4 sm:$0xff]   ;;  %v9400_v25 = vld [vmem:[%s13106_s1 + $0xb68] ss:$16 sps:$4 sm:$0xff]  }
 0x179   :  { %3527 = vmatprep.subr.bf16.mxu0 %v9321_v42  ;;  %v9397_v42 = vld [vmem:[%s13106_s1 + $0xf60] ss:$16 sps:$4 sm:$0xff]  }
 0x17b   :  { %3786 = vmatpush1.bf16.msra.mxu1 %v9322_v9  ;;  %v9408_v9 = vld [vmem:[%s13106_s1 + $0xb8c] ss:$16 sps:$4 sm:$0xff]  }
 0x17c   :  { %3528 = vmatpush1.bf16.msra.mxu0 %v9319_v44  ;;  %3787 = vmatprep.subr.bf16.mxu1 %v9330_v47  ;;  %v9405_v44 = vld [vmem:[%s13106_s1 + $0xf84] ss:$16 sps:$4 sm:$0xff]   ;;  %v9406_v47 = vld [vmem:[%s13106_s1 + $0xb88] ss:$16 sps:$4 sm:$0xff]  }
 0x17d   :  { %3529 = vmatprep.subr.bf16.mxu0 %v9327_v34  ;;  %v9403_v34 = vld [vmem:[%s13106_s1 + $0xf80] ss:$16 sps:$4 sm:$0xff]  }
 0x17f   :  { %3788 = vmatpush1.bf16.msra.mxu1 %v9328_v50  ;;  %v9414_v50 = vld [vmem:[%s13106_s1 + $0xbac] ss:$16 sps:$4 sm:$0xff]  }
 0x180   :  { %3530 = vmatpush1.bf16.msra.mxu0 %v9325_v49  ;;  %3800 = vmatprep.subr.bf16.mxu1 %v9336_v51  ;;  %v9411_v49 = vld [vmem:[%s13106_s1 + $0xfa4] ss:$16 sps:$4 sm:$0xff]   ;;  %v9412_v51 = vld [vmem:[%s13106_s1 + $0xba8] ss:$16 sps:$4 sm:$0xff]  }
 0x181   :  { %3542 = vmatprep.subr.bf16.mxu0 %v9333_v8  ;;  %v9409_v8 = vld [vmem:[%s13106_s1 + $0xfa0] ss:$16 sps:$4 sm:$0xff]  }
 0x182   :  { %3790 = vmatmul.mubr.bf16.vlgmr.msra.gmra.mrb[4].mxu1 %v10741_v33  ;;  %v9348_v33 = vld [vmem:[%s13106_s1 + $0xa4c] ss:$16 sps:$4 sm:$0xff]  }
 0x183   :  { %3532 = vmatmul.mubr.bf16.vlgmr.msra.gmra.mrb[0].mxu0 %v11169_v52  ;;  %3801 = vmatpush1.bf16.msra.mxu1 %v9334_v45  ;;  %v9420_v45 = vld [vmem:[%s13106_s1 + $0xbcc] ss:$16 sps:$4 sm:$0xff]  }
 0x184   :  { %3543 = vmatpush1.bf16.msra.mxu0 %v9331_v54  ;;  %3802 = vmatprep.subr.bf16.mxu1 %v9342_v59  ;;  %v9417_v54 = vld [vmem:[%s13106_s1 + $0xfc4] ss:$16 sps:$4 sm:$0xff]   ;;  %v9418_v59 = vld [vmem:[%s13106_s1 + $0xbc8] ss:$16 sps:$4 sm:$0xff]  }
 0x185   :  { %3544 = vmatprep.subr.bf16.mxu0 %v9339_v46  ;;  %3574 = vmatprep.mubr.bf16.mxu0 %v11195_v60  ;;  %v9415_v46 = vld [vmem:[%s13106_s1 + $0xfc0] ss:$16 sps:$4 sm:$0xff]  }
 0x186   :  { %3832 = vmatprep.mubr.bf16.mxu1 %v10759_v28  ;;  %v9354_v28 = vld [vmem:[%s13106_s1 + $0xa6c] ss:$16 sps:$4 sm:$0xff]  }
 0x187   :  { %3803 = vmatpush1.bf16.msra.mxu1 %v9340_v63  ;;  %v9426_v63 = vld [vmem:[%s13106_s1 + $0xbec] ss:$16 sps:$4 sm:$0xff]  }
 0x188   :  { %3545 = vmatpush1.bf16.msra.mxu0 %v9337_v62  ;;  %3804 = vmatprep.subr.bf16.mxu1 %v9348_v33  ;;  %v9423_v62 = vld [vmem:[%s13106_s1 + $0xfe4] ss:$16 sps:$4 sm:$0xff]   ;;  %v9424_v33 = vld [vmem:[%s13106_s1 + $0xbe8] ss:$16 sps:$4 sm:$0xff]  }
 0x189   :  { %3546 = vmatprep.subr.bf16.mxu0 %v9345_v0  ;;  %v9421_v0 = vld [vmem:[%s13106_s1 + $0xfe0] ss:$16 sps:$4 sm:$0xff]  }
 0x18b   :  { %3805 = vmatpush1.bf16.msra.mxu1 %v9346_v2  ;;  %v11380_v2 = vcombine.low %v11174_v55, %v11179_v53  ;;  %v9430_v55 = vld [vmem:[%s13106_s1 + $0xc28] ss:$16 sps:$4 sm:$0xff]   ;;  %v3957_v53 = vld [vmem:[%s13108_s3] sm:$0xff] }
 0x18c   :  { %3547 = vmatpush1.bf16.msra.mxu0 %v9343_v1  ;;  %3806 = vmatprep.subr.bf16.mxu1 %v9354_v28  ;;  %v9429_v1 = vld [vmem:[%s13106_s1 + $0xc0c] ss:$16 sps:$4 sm:$0xff]  }
 0x18d   :  { %3548 = vmatprep.subr.bf16.mxu0 %v9351_v3  ;;  %v9427_v3 = vld [vmem:[%s13106_s1 + $0xc08] ss:$16 sps:$4 sm:$0xff]   ;;  %v9432_v28 = vld [vmem:[%s13106_s1 + $0xc2c] ss:$16 sps:$4 sm:$0xff]  }
 0x18f   :  { %3807 = vmatpush1.bf16.msra.mxu1 %v9352_v5 }
 0x190   :  { %3549 = vmatpush1.bf16.msra.mxu0 %v9349_v4  ;;  %3808 = vmatprep.subr.bf16.mxu1 %v9360_v7  ;;  %v3961_v4 = vld [vmem:[%s13108_s3 + $0x20] sm:$0xff] }
 0x191   :  { %3550 = vmatprep.subr.bf16.mxu0 %v9357_v6  ;;  %v8110_v5 = vcombine.low %v3957_v53, %v3961_v4  ;;  %v8111_v6 = vcombine.high %v3957_v53, %v3961_v4  ;;  %v3965_v7 = vld [vmem:[%s13108_s3 + $0x40] sm:$0xff] }
 0x192   :  { %v4037_v4 = vld [vmem:[%s13108_s3 + $0x280] sm:$0xff] }
 0x193   :  { %3809 = vmatpush1.bf16.msra.mxu1 %v9358_v11  ;;  %v9433_v11 = vld [vmem:[%s13106_s1 + $0xc48] ss:$16 sps:$4 sm:$0xff]  }
 0x194   :  { %3551 = vmatpush1.bf16.msra.mxu0 %v9355_v10  ;;  %3810 = vmatprep.subr.bf16.mxu1 %v9366_v13  ;;  %v3973_v13 = vld [vmem:[%s13108_s3 + $0x80] sm:$0xff] }
 0x195   :  { %3552 = vmatprep.subr.bf16.mxu0 %v9363_v12 }
 0x197   :  { %3811 = vmatpush1.bf16.msra.mxu1 %v9364_v15  ;;  %v9438_v15 = vld [vmem:[%s13106_s1 + $0xc6c] ss:$16 sps:$4 sm:$0xff]  }
 0x198   :  { %3553 = vmatpush1.bf16.msra.mxu0 %v9361_v14  ;;  %3812 = vmatprep.subr.bf16.mxu1 %v9372_v18  ;;  %v3977_v14 = vld [vmem:[%s13108_s3 + $0xa0] sm:$0xff]  ;;  %v9436_v18 = vld [vmem:[%s13106_s1 + $0xc68] ss:$16 sps:$4 sm:$0xff]  }
 0x199   :  { %3554 = vmatprep.subr.bf16.mxu0 %v9369_v17  ;;  %v8127_v17 = vcombine.high %v3973_v13, %v3977_v14 }
 0x19b   :  { %3813 = vmatpush1.bf16.msra.mxu1 %v9370_v20  ;;  %v3981_v20 = vld [vmem:[%s13108_s3 + $0xc0] sm:$0xff] }
 0x19c   :  { %3555 = vmatpush1.bf16.msra.mxu0 %v9367_v19  ;;  %3814 = vmatprep.subr.bf16.mxu1 %v9378_v24  ;;  %v8126_v19 = vcombine.low %v3973_v13, %v3977_v14  ;;  %v9441_v24 = vld [vmem:[%s13106_s1 + $0xc8c] ss:$16 sps:$4 sm:$0xff]   ;;  %v9463_v14 = vld [vmem:[%s13106_s1 + $0xd88] ss:$16 sps:$4 sm:$0xff]  }
 0x19d   :  { %3556 = vmatprep.subr.bf16.mxu0 %v9375_v23  ;;  %v3985_v23 = vld [vmem:[%s13108_s3 + $0xe0] sm:$0xff] }
 0x19f   :  { %3815 = vmatpush1.bf16.msra.mxu1 %v9376_v29  ;;  %v9439_v29 = vld [vmem:[%s13106_s1 + $0xc88] ss:$16 sps:$4 sm:$0xff]  }
 0x1a0   :  { %3557 = vmatpush1.bf16.msra.mxu0 %v9373_v26  ;;  %3816 = vmatprep.subr.bf16.mxu1 %v9384_v22  ;;  %v8135_v26 = vcombine.high %v3981_v20, %v3985_v23  ;;  %v3989_v22 = vld [vmem:[%s13108_s3 + $0x100] sm:$0xff] }
 0x1a1   :  { %3558 = vmatprep.subr.bf16.mxu0 %v9381_v21  ;;  %v8134_v21 = vcombine.low %v3981_v20, %v3985_v23  ;;  %v9466_v23 = vld [vmem:[%s13106_s1 + $0xda8] ss:$16 sps:$4 sm:$0xff]  }
 0x1a3   :  { %3817 = vmatpush1.bf16.msra.mxu1 %v9382_v31  ;;  %v9444_v31 = vld [vmem:[%s13106_s1 + $0xcac] ss:$16 sps:$4 sm:$0xff]  }
 0x1a4   :  { %3559 = vmatpush1.bf16.msra.mxu0 %v9379_v30  ;;  %3818 = vmatprep.subr.bf16.mxu1 %v9390_v35  ;;  %v3993_v30 = vld [vmem:[%s13108_s3 + $0x120] sm:$0xff]  ;;  %v9442_v35 = vld [vmem:[%s13106_s1 + $0xca8] ss:$16 sps:$4 sm:$0xff]  }
 0x1a5   :  { %3560 = vmatprep.subr.bf16.mxu0 %v9387_v32  ;;  %v8143_v32 = vcombine.high %v3989_v22, %v3993_v30 }
 0x1a7   :  { %3819 = vmatpush1.bf16.msra.mxu1 %v9388_v27  ;;  %v3997_v27 = vld [vmem:[%s13108_s3 + $0x140] sm:$0xff] }
 0x1a8   :  { %3561 = vmatpush1.bf16.msra.mxu0 %v9385_v38  ;;  %3820 = vmatprep.subr.bf16.mxu1 %v9396_v37  ;;  %v8142_v38 = vcombine.low %v3989_v22, %v3993_v30  ;;  %v9447_v37 = vld [vmem:[%s13106_s1 + $0xccc] ss:$16 sps:$4 sm:$0xff]   ;;  %v9472_v22 = vld [vmem:[%s13106_s1 + $0xde8] ss:$16 sps:$4 sm:$0xff]  }
 0x1a9   :  { %3562 = vmatprep.subr.bf16.mxu0 %v9393_v36  ;;  %v4001_v36 = vld [vmem:[%s13108_s3 + $0x160] sm:$0xff]  ;;  %v9477_v30 = vld [vmem:[%s13106_s1 + $0xe0c] ss:$16 sps:$4 sm:$0xff]  }
 0x1ab   :  { %3821 = vmatpush1.bf16.msra.mxu1 %v9394_v16  ;;  %v9445_v16 = vld [vmem:[%s13106_s1 + $0xcc8] ss:$16 sps:$4 sm:$0xff]  }
 0x1ac   :  { %3563 = vmatpush1.bf16.msra.mxu0 %v9391_v39  ;;  %3822 = vmatprep.subr.bf16.mxu1 %v9402_v41  ;;  %v8151_v39 = vcombine.high %v3997_v27, %v4001_v36  ;;  %v4005_v41 = vld [vmem:[%s13108_s3 + $0x180] sm:$0xff] }
 0x1ad   :  { %3564 = vmatprep.subr.bf16.mxu0 %v9399_v40  ;;  %v8150_v40 = vcombine.low %v3997_v27, %v4001_v36  ;;  %v9481_v27 = vld [vmem:[%s13106_s1 + $0xe48] ss:$16 sps:$4 sm:$0xff]   ;;  %v9489_v36 = vld [vmem:[%s13106_s1 + $0xe8c] ss:$16 sps:$4 sm:$0xff]  }
 0x1af   :  { %3823 = vmatpush1.bf16.msra.mxu1 %v9400_v25  ;;  %v9450_v25 = vld [vmem:[%s13106_s1 + $0xcec] ss:$16 sps:$4 sm:$0xff]  }
 0x1b0   :  { %3565 = vmatpush1.bf16.msra.mxu0 %v9397_v42  ;;  %3824 = vmatprep.subr.bf16.mxu1 %v9408_v9  ;;  %v4009_v42 = vld [vmem:[%s13108_s3 + $0x1a0] sm:$0xff]  ;;  %v9448_v9 = vld [vmem:[%s13106_s1 + $0xce8] ss:$16 sps:$4 sm:$0xff]  }
 0x1b1   :  { %3566 = vmatprep.subr.bf16.mxu0 %v9405_v44  ;;  %v8159_v44 = vcombine.high %v4005_v41, %v4009_v42 }
 0x1b3   :  { %3825 = vmatpush1.bf16.msra.mxu1 %v9406_v47  ;;  %v4013_v47 = vld [vmem:[%s13108_s3 + $0x1c0] sm:$0xff] }
 0x1b4   :  { %3567 = vmatpush1.bf16.msra.mxu0 %v9403_v34  ;;  %3826 = vmatprep.subr.bf16.mxu1 %v9414_v50  ;;  %v8158_v34 = vcombine.low %v4005_v41, %v4009_v42  ;;  %v9453_v50 = vld [vmem:[%s13106_s1 + $0xd0c] ss:$16 sps:$4 sm:$0xff]   ;;  %v9490_v41 = vld [vmem:[%s13106_s1 + $0xea8] ss:$16 sps:$4 sm:$0xff]  }
 0x1b5   :  { %3568 = vmatprep.subr.bf16.mxu0 %v9411_v49  ;;  %v4017_v49 = vld [vmem:[%s13108_s3 + $0x1e0] sm:$0xff] }
 0x1b7   :  { %3827 = vmatpush1.bf16.msra.mxu1 %v9412_v51  ;;  %v9451_v51 = vld [vmem:[%s13106_s1 + $0xd08] ss:$16 sps:$4 sm:$0xff]  }
 0x1b8   :  { %3569 = vmatpush1.bf16.msra.mxu0 %v9409_v8  ;;  %3828 = vmatprep.subr.bf16.mxu1 %v9420_v45  ;;  %v8167_v8 = vcombine.high %v4013_v47, %v4017_v49  ;;  %v4021_v45 = vld [vmem:[%s13108_s3 + $0x200] sm:$0xff] }
 0x1b9   :  { %3570 = vmatprep.subr.bf16.mxu0 %v9417_v54  ;;  %v8166_v54 = vcombine.low %v4013_v47, %v4017_v49  ;;  %v9493_v47 = vld [vmem:[%s13106_s1 + $0xec8] ss:$16 sps:$4 sm:$0xff]  }
 0x1bb   :  { %3829 = vmatpush1.bf16.msra.mxu1 %v9418_v59  ;;  %v9456_v59 = vld [vmem:[%s13106_s1 + $0xd2c] ss:$16 sps:$4 sm:$0xff]  }
 0x1bc   :  { %3571 = vmatpush1.bf16.msra.mxu0 %v9415_v46  ;;  %3830 = vmatprep.subr.bf16.mxu1 %v9426_v63  ;;  %v4025_v46 = vld [vmem:[%s13108_s3 + $0x220] sm:$0xff]  ;;  %v9454_v63 = vld [vmem:[%s13106_s1 + $0xd28] ss:$16 sps:$4 sm:$0xff]  }
 0x1bd   :  { %3572 = vmatprep.subr.bf16.mxu0 %v9423_v62  ;;  %v8175_v62 = vcombine.high %v4021_v45, %v4025_v46 }
 0x1bf   :  { %3831 = vmatpush1.bf16.msra.mxu1 %v9424_v33  ;;  %v4029_v33 = vld [vmem:[%s13108_s3 + $0x240] sm:$0xff] }
 0x1c0   :  { %3573 = vmatpush1.bf16.msra.mxu0 %v9421_v0  ;;  %3843 = vmatprep.subr.bf16.mxu1 %v9429_v1  ;;  %v8174_v0 = vcombine.low %v4021_v45, %v4025_v46  ;;  %v4033_v1 = vld [vmem:[%s13108_s3 + $0x260] sm:$0xff]  ;;  %v9496_v45 = vld [vmem:[%s13106_s1 + $0xee8] ss:$16 sps:$4 sm:$0xff]  }
 0x1c1   :  { %5535 = vmatprep.subr.bf16.mxu0 %v8111_v6  ;;  %v8182_v53 = vcombine.low %v4029_v33, %v4033_v1 }
 0x1c2   :  { %3833 = vmatmul.mubr.bf16.vlgmr.msra.gmra.mrb[4].mxu1 %v10961_v43  ;;  %v9435_v43 = vld [vmem:[%s13106_s1 + $0xc4c] ss:$16 sps:$4 sm:$0xff]  }
 0x1c3   :  { %3575 = vmatmul.mubr.bf16.vlgmr.msra.gmra.mrb[0].mxu0 %v11380_v2  ;;  %3844 = vmatpush1.bf16.msra.mxu1 %v9427_v3  ;;  %v9459_v3 = vld [vmem:[%s13106_s1 + $0xd4c] ss:$16 sps:$4 sm:$0xff]  }
 0x1c4   :  { %3875 = vmatprep.mubr.bf16.mxu1 %v10987_v48  ;;  %3845 = vmatprep.subr.bf16.mxu1 %v9432_v28  ;;  %v3969_v48 = vld [vmem:[%s13108_s3 + $0x60] sm:$0xff]  ;;  %v8183_v28 = vcombine.high %v4029_v33, %v4033_v1 }
 0x1c5   :  { %v8119_v10 = vcombine.high %v3965_v7, %v3969_v48  ;;  %5536 = vmatpush1.bf16.msra.mxu0 %v8110_v5  ;;  %v8118_v12 = vcombine.low %v3965_v7, %v3969_v48  ;;  %v9462_v5 = vld [vmem:[%s13106_s1 + $0xd6c] ss:$16 sps:$4 sm:$0xff]   ;;  %v9460_v7 = vld [vmem:[%s13106_s1 + $0xd68] ss:$16 sps:$4 sm:$0xff]   ;;  %v11636_v33 = vld [vmem:[%s13108_s3 + $0x400] sm:$0xff] }
 0x1c6   :  { %v11641_v1 = vld [vmem:[%s13108_s3 + $0x420] sm:$0xff] }
 0x1c7   :  { %3846 = vmatpush1.bf16.msra.mxu1 %v9430_v55  ;;  %5537 = vmatprep.subr.bf16.mxu0 %v8119_v10  ;;  %v9457_v55 = vld [vmem:[%s13106_s1 + $0xd48] ss:$16 sps:$4 sm:$0xff]   ;;  %v4045_v10 = vld [vmem:[%s13108_s3 + $0x2c0] sm:$0xff] }
 0x1c8   :  { %3847 = vmatprep.subr.bf16.mxu1 %v9435_v43  ;;  %v4041_v43 = vld [vmem:[%s13108_s3 + $0x2a0] sm:$0xff] }
 0x1c9   :  { %5538 = vmatpush1.bf16.msra.mxu0 %v8118_v12  ;;  %v8191_v6 = vcombine.high %v4037_v4, %v4041_v43  ;;  %v8190_v48 = vcombine.low %v4037_v4, %v4041_v43  ;;  %v9465_v12 = vld [vmem:[%s13106_s1 + $0xd8c] ss:$16 sps:$4 sm:$0xff]   ;;  %v9505_v4 = vld [vmem:[%s13106_s1 + $0xf48] ss:$16 sps:$4 sm:$0xff]  }
 0x1ca   :  { %5539 = vmatprep.subr.bf16.mxu0 %v8127_v17  ;;  %v4053_v17 = vld [vmem:[%s13108_s3 + $0x300] sm:$0xff]  ;;  %v9510_v43 = vld [vmem:[%s13106_s1 + $0xf6c] ss:$16 sps:$4 sm:$0xff]  }
 0x1cb   :  { %3848 = vmatpush1.bf16.msra.mxu1 %v9433_v11  ;;  %v4049_v11 = vld [vmem:[%s13108_s3 + $0x2e0] sm:$0xff] }
 0x1cc   :  { %3849 = vmatprep.subr.bf16.mxu1 %v9438_v15  ;;  %v8199_v13 = vcombine.high %v4045_v10, %v4049_v11  ;;  %v8198_v15 = vcombine.low %v4045_v10, %v4049_v11  ;;  %v9514_v10 = vld [vmem:[%s13106_s1 + $0xfa8] ss:$16 sps:$4 sm:$0xff]   ;;  %v9519_v11 = vld [vmem:[%s13106_s1 + $0xfcc] ss:$16 sps:$4 sm:$0xff]  }
 0x1cd   :  { %5540 = vmatpush1.bf16.msra.mxu0 %v8126_v19  ;;  %v9468_v19 = vld [vmem:[%s13106_s1 + $0xdac] ss:$16 sps:$4 sm:$0xff]  }
 0x1ce   :  { %5541 = vmatprep.subr.bf16.mxu0 %v8135_v26  ;;  %v9471_v26 = vld [vmem:[%s13106_s1 + $0xdcc] ss:$16 sps:$4 sm:$0xff]  }
 0x1cf   :  { %3850 = vmatpush1.bf16.msra.mxu1 %v9436_v18  ;;  %v4057_v18 = vld [vmem:[%s13108_s3 + $0x320] sm:$0xff] }
 0x1d0   :  { %3851 = vmatprep.subr.bf16.mxu1 %v9441_v24  ;;  %v8207_v20 = vcombine.high %v4053_v17, %v4057_v18  ;;  %v8206_v24 = vcombine.low %v4053_v17, %v4057_v18  ;;  %v9520_v17 = vld [vmem:[%s13106_s1 + $0xfe8] ss:$16 sps:$4 sm:$0xff]  }
 0x1d1   :  { %5542 = vmatpush1.bf16.msra.mxu0 %v8134_v21  ;;  %v9474_v21 = vld [vmem:[%s13106_s1 + $0xdec] ss:$16 sps:$4 sm:$0xff]  }
 0x1d2   :  { %5543 = vmatprep.subr.bf16.mxu0 %v8143_v32  ;;  %v9480_v32 = vld [vmem:[%s13106_s1 + $0xe2c] ss:$16 sps:$4 sm:$0xff]  }
 0x1d3   :  { %3852 = vmatpush1.bf16.msra.mxu1 %v9439_v29  ;;  %v9469_v29 = vld [vmem:[%s13106_s1 + $0xdc8] ss:$16 sps:$4 sm:$0xff]  }
 0x1d4   :  { %3853 = vmatprep.subr.bf16.mxu1 %v9444_v31  ;;  %v9475_v31 = vld [vmem:[%s13106_s1 + $0xe08] ss:$16 sps:$4 sm:$0xff]  }
 0x1d5   :  { %5544 = vmatpush1.bf16.msra.mxu0 %v8142_v38  ;;  %v9483_v38 = vld [vmem:[%s13106_s1 + $0xe4c] ss:$16 sps:$4 sm:$0xff]  }
 0x1d6   :  { %5545 = vmatprep.subr.bf16.mxu0 %v8151_v39  ;;  %v9492_v39 = vld [vmem:[%s13106_s1 + $0xeac] ss:$16 sps:$4 sm:$0xff]  }
 0x1d7   :  { %3854 = vmatpush1.bf16.msra.mxu1 %v9442_v35  ;;  %v9478_v35 = vld [vmem:[%s13106_s1 + $0xe28] ss:$16 sps:$4 sm:$0xff]  }
 0x1d8   :  { %3855 = vmatprep.subr.bf16.mxu1 %v9447_v37  ;;  %v9487_v37 = vld [vmem:[%s13106_s1 + $0xe88] ss:$16 sps:$4 sm:$0xff]  }
 0x1d9   :  { %5546 = vmatpush1.bf16.msra.mxu0 %v8150_v40  ;;  %v4065_v40 = vld [vmem:[%s13108_s3 + $0x360] sm:$0xff] }
 0x1da   :  { %5547 = vmatprep.subr.bf16.mxu0 %v8159_v44 }
 0x1db   :  { %3856 = vmatpush1.bf16.msra.mxu1 %v9445_v16  ;;  %v4061_v16 = vld [vmem:[%s13108_s3 + $0x340] sm:$0xff] }
 0x1dc   :  { %3857 = vmatprep.subr.bf16.mxu1 %v9450_v25  ;;  %v8215_v42 = vcombine.high %v4061_v16, %v4065_v40  ;;  %v9495_v25 = vld [vmem:[%s13106_s1 + $0xecc] ss:$16 sps:$4 sm:$0xff]   ;;  %v8214_v44 = vcombine.low %v4061_v16, %v4065_v40 }
 0x1dd   :  { %5548 = vmatpush1.bf16.msra.mxu0 %v8158_v34  ;;  %v4073_v34 = vld [vmem:[%s13108_s3 + $0x3a0] sm:$0xff]  ;;  %v4006_v16 = vld [vmem:[%s13108_s3 + $0x188] sm:$0xff] }
 0x1de   :  { %5549 = vmatprep.subr.bf16.mxu0 %v8167_v8  ;;  %v4010_v40 = vld [vmem:[%s13108_s3 + $0x1a8] sm:$0xff] }
 0x1df   :  { %3858 = vmatpush1.bf16.msra.mxu1 %v9448_v9  ;;  %v4069_v9 = vld [vmem:[%s13108_s3 + $0x380] sm:$0xff] }
 0x1e0   :  { %3859 = vmatprep.subr.bf16.mxu1 %v9453_v50  ;;  %v8223_v49 = vcombine.high %v4069_v9, %v4073_v34  ;;  %v9498_v50 = vld [vmem:[%s13106_s1 + $0xeec] ss:$16 sps:$4 sm:$0xff]   ;;  %v8222_v8 = vcombine.low %v4069_v9, %v4073_v34  ;;  %v8160_v9 = vcombine.low %v4006_v16, %v4010_v40 }
 0x1e1   :  { %5550 = vmatpush1.bf16.msra.mxu0 %v8166_v54  ;;  %v4081_v54 = vld [vmem:[%s13108_s3 + $0x3e0] sm:$0xff] }
 0x1e2   :  { %5551 = vmatprep.subr.bf16.mxu0 %v8175_v62 }
 0x1e3   :  { %3860 = vmatpush1.bf16.msra.mxu1 %v9451_v51  ;;  %v4077_v51 = vld [vmem:[%s13108_s3 + $0x3c0] sm:$0xff] }
 0x1e4   :  { %3861 = vmatprep.subr.bf16.mxu1 %v9456_v59  ;;  %v8231_v46 = vcombine.high %v4077_v51, %v4081_v54  ;;  %v9501_v59 = vld [vmem:[%s13106_s1 + $0xf0c] ss:$16 sps:$4 sm:$0xff]   ;;  %v8230_v62 = vcombine.low %v4077_v51, %v4081_v54 }
 0x1e5   :  { %5552 = vmatpush1.bf16.msra.mxu0 %v8174_v0  ;;  %v9504_v0 = vld [vmem:[%s13106_s1 + $0xf2c] ss:$16 sps:$4 sm:$0xff]  }
 0x1e6   :  { %5553 = vmatprep.subr.bf16.mxu0 %v8183_v28  ;;  %v8239_v28 = vcombine.high %v11636_v33, %v11641_v1  ;;  %v4030_v51 = vld [vmem:[%s13108_s3 + $0x248] sm:$0xff] }
 0x1e7   :  { %3862 = vmatpush1.bf16.msra.mxu1 %v9454_v63  ;;  %v9499_v63 = vld [vmem:[%s13106_s1 + $0xf08] ss:$16 sps:$4 sm:$0xff]  }
 0x1e8   :  { %3863 = vmatprep.subr.bf16.mxu1 %v9459_v3  ;;  %v8238_v3 = vcombine.low %v11636_v33, %v11641_v1  ;;  %v4034_v54 = vld [vmem:[%s13108_s3 + $0x268] sm:$0xff] }
 0x1e9   :  { %5554 = vmatpush1.bf16.msra.mxu0 %v8182_v53  ;;  %v9507_v53 = vld [vmem:[%s13106_s1 + $0xf4c] ss:$16 sps:$4 sm:$0xff]  }
 0x1ea   :  { %5555 = vmatprep.subr.bf16.mxu0 %v8191_v6  ;;  %v9513_v6 = vld [vmem:[%s13106_s1 + $0xf8c] ss:$16 sps:$4 sm:$0xff]  }
 0x1eb   :  { %3864 = vmatpush1.bf16.msra.mxu1 %v9457_v55  ;;  %v9502_v55 = vld [vmem:[%s13106_s1 + $0xf28] ss:$16 sps:$4 sm:$0xff]  }
 0x1ec   :  { %3865 = vmatprep.subr.bf16.mxu1 %v9462_v5  ;;  %v9508_v5 = vld [vmem:[%s13106_s1 + $0xf68] ss:$16 sps:$4 sm:$0xff]  }
 0x1ed   :  { %5556 = vmatpush1.bf16.msra.mxu0 %v8190_v48  ;;  %v9516_v48 = vld [vmem:[%s13106_s1 + $0xfac] ss:$16 sps:$4 sm:$0xff]  }
 0x1ee   :  { %5557 = vmatprep.subr.bf16.mxu0 %v8199_v13  ;;  %v9522_v13 = vld [vmem:[%s13106_s1 + $0xfec] ss:$16 sps:$4 sm:$0xff]  }
 0x1ef   :  { %3866 = vmatpush1.bf16.msra.mxu1 %v9460_v7  ;;  %v9511_v7 = vld [vmem:[%s13106_s1 + $0xf88] ss:$16 sps:$4 sm:$0xff]  }
 0x1f0   :  { %3867 = vmatprep.subr.bf16.mxu1 %v9465_v12  ;;  %v9517_v12 = vld [vmem:[%s13106_s1 + $0xfc8] ss:$16 sps:$4 sm:$0xff]  }
 0x1f1   :  { %5558 = vmatpush1.bf16.msra.mxu0 %v8198_v15  ;;  %v3962_v15 = vld [vmem:[%s13108_s3 + $0x28] sm:$0xff] }
 0x1f2   :  { %5559 = vmatprep.subr.bf16.mxu0 %v8207_v20  ;;  %v3970_v20 = vld [vmem:[%s13108_s3 + $0x68] sm:$0xff] }
 0x1f3   :  { %3868 = vmatpush1.bf16.msra.mxu1 %v9463_v14  ;;  %v3958_v14 = vld [vmem:[%s13108_s3 + $0x8] sm:$0xff] }
 0x1f4   :  { %3869 = vmatprep.subr.bf16.mxu1 %v9468_v19  ;;  %v8113_v18 = vcombine.high %v3958_v14, %v3962_v15  ;;  %v3966_v19 = vld [vmem:[%s13108_s3 + $0x48] sm:$0xff] }
 0x1f5   :  { %5560 = vmatpush1.bf16.msra.mxu0 %v8206_v24  ;;  %v8121_v24 = vcombine.high %v3966_v19, %v3970_v20  ;;  %v4110_v33 = vld [vmem:[%s13108_s3 + $0x4c8] sm:$0xff] }
 0x1f6   :  { %5561 = vmatprep.subr.bf16.mxu0 %v8215_v42  ;;  %v8161_v42 = vcombine.high %v4006_v16, %v4010_v40  ;;  %v4114_v1 = vld [vmem:[%s13108_s3 + $0x4e8] sm:$0xff] }
 0x1f7   :  { %3870 = vmatpush1.bf16.msra.mxu1 %v9466_v23  ;;  %v8112_v23 = vcombine.low %v3958_v14, %v3962_v15  ;;  %v4074_v14 = vld [vmem:[%s13108_s3 + $0x3a8] sm:$0xff] }
 0x1f8   :  { %3871 = vmatprep.subr.bf16.mxu1 %v9471_v26  ;;  %v3974_v26 = vld [vmem:[%s13108_s3 + $0x88] sm:$0xff] }
 0x1f9   :  { %5562 = vmatpush1.bf16.msra.mxu0 %v8214_v44  ;;  %v4018_v44 = vld [vmem:[%s13108_s3 + $0x1e8] sm:$0xff] }
 0x1fa   :  { %5563 = vmatprep.subr.bf16.mxu0 %v8223_v49  ;;  %v4026_v49 = vld [vmem:[%s13108_s3 + $0x228] sm:$0xff] }
 0x1fb   :  { %3872 = vmatpush1.bf16.msra.mxu1 %v9469_v29  ;;  %v3978_v29 = vld [vmem:[%s13108_s3 + $0xa8] sm:$0xff] }
 0x1fc   :  { %3873 = vmatprep.subr.bf16.mxu1 %v9474_v21  ;;  %v8120_v21 = vcombine.low %v3966_v19, %v3970_v20  ;;  %v4082_v19 = vld [vmem:[%s13108_s3 + $0x3e8] sm:$0xff] }
 0x1fd   :  { %5564 = vmatpush1.bf16.msra.mxu0 %v8222_v8 }
 0x1fe   :  { %5565 = vmatprep.subr.bf16.mxu0 %v8231_v46  ;;  %v8185_v46 = vcombine.high %v4030_v51, %v4034_v54 }
 0x1ff   :  { %3874 = vmatpush1.bf16.msra.mxu1 %v9472_v22  ;;  %v8129_v22 = vcombine.high %v3974_v26, %v3978_v29 }
 0x200   :  { %3886 = vmatprep.subr.bf16.mxu1 %v9477_v30  ;;  %v3982_v30 = vld [vmem:[%s13108_s3 + $0xc8] sm:$0xff] }
 0x201   :  { %5566 = vmatpush1.bf16.msra.mxu0 %v8230_v62  ;;  %v4042_v62 = vld [vmem:[%s13108_s3 + $0x2a8] sm:$0xff] }
 0x202   :  { %3876 = vmatmul.mubr.bf16.vlgmr.msra.gmra.mrb[4].mxu1 %v11169_v52  ;;  %v9486_v52 = vld [vmem:[%s13106_s1 + $0xe6c] ss:$16 sps:$4 sm:$0xff]   ;;  %5578 = vmatprep.subr.bf16.mxu0 %v8239_v28 }
 0x203   :  { %3887 = vmatpush1.bf16.msra.mxu1 %v9475_v31  ;;  %3918 = vmatprep.mubr.bf16.mxu1 %v11195_v60  ;;  %v9484_v60 = vld [vmem:[%s13106_s1 + $0xe68] ss:$16 sps:$4 sm:$0xff]  }
 0x204   :  { %3888 = vmatprep.subr.bf16.mxu1 %v9480_v32  ;;  %v3986_v31 = vld [vmem:[%s13108_s3 + $0xe8] sm:$0xff]  ;;  %v8128_v32 = vcombine.low %v3974_v26, %v3978_v29 }
 0x205   :  { %v4046_v28 = vld [vmem:[%s13108_s3 + $0x2c8] sm:$0xff] }
 0x206   :  { %v11791_v26 = vld [vmem:[%s13108_s3 + $0x428] sm:$0xff] }
 0x207   :  { %3889 = vmatpush1.bf16.msra.mxu1 %v9478_v35  ;;  %v8137_v35 = vcombine.high %v3982_v30, %v3986_v31 }
 0x208   :  { %3890 = vmatprep.subr.bf16.mxu1 %v9483_v38  ;;  %v3994_v38 = vld [vmem:[%s13108_s3 + $0x128] sm:$0xff] }
 0x20b   :  { %3891 = vmatpush1.bf16.msra.mxu1 %v9481_v27  ;;  %v8136_v27 = vcombine.low %v3982_v30, %v3986_v31 }
 0x20c   :  { %3892 = vmatprep.subr.bf16.mxu1 %v9486_v52 }
 0x20f   :  { %3893 = vmatpush1.bf16.msra.mxu1 %v9484_v60  ;;  %v3998_v60 = vld [vmem:[%s13108_s3 + $0x148] sm:$0xff] }
 0x210   :  { %3894 = vmatprep.subr.bf16.mxu1 %v9489_v36  ;;  %v4002_v36 = vld [vmem:[%s13108_s3 + $0x168] sm:$0xff] }
 0x213   :  { %3895 = vmatpush1.bf16.msra.mxu1 %v9487_v37 }
 0x214   :  { %3896 = vmatprep.subr.bf16.mxu1 %v9492_v39  ;;  %v8153_v39 = vcombine.high %v3998_v60, %v4002_v36 }
 0x217   :  { %3897 = vmatpush1.bf16.msra.mxu1 %v9490_v41  ;;  %v8152_v41 = vcombine.low %v3998_v60, %v4002_v36 }
 0x218   :  { %3898 = vmatprep.subr.bf16.mxu1 %v9495_v25  ;;  %v4014_v25 = vld [vmem:[%s13108_s3 + $0x1c8] sm:$0xff] }
 0x219   :  { %v8169_v34 = vcombine.high %v4014_v25, %v4018_v44 }
 0x21b   :  { %3899 = vmatpush1.bf16.msra.mxu1 %v9493_v47  ;;  %v4022_v47 = vld [vmem:[%s13108_s3 + $0x208] sm:$0xff] }
 0x21c   :  { %3900 = vmatprep.subr.bf16.mxu1 %v9498_v50  ;;  %v8168_v50 = vcombine.low %v4014_v25, %v4018_v44  ;;  %v8177_v8 = vcombine.high %v4022_v47, %v4026_v49 }
 0x21f   :  { %3901 = vmatpush1.bf16.msra.mxu1 %v9496_v45  ;;  %v8176_v45 = vcombine.low %v4022_v47, %v4026_v49 }
 0x220   :  { %3902 = vmatprep.subr.bf16.mxu1 %v9501_v59  ;;  %v4038_v59 = vld [vmem:[%s13108_s3 + $0x288] sm:$0xff] }
 0x223   :  { %3903 = vmatpush1.bf16.msra.mxu1 %v9499_v63  ;;  %v8184_v63 = vcombine.low %v4030_v51, %v4034_v54 }
 0x224   :  { %3904 = vmatprep.subr.bf16.mxu1 %v9504_v0  ;;  %v8193_v0 = vcombine.high %v4038_v59, %v4042_v62 }
 0x227   :  { %3905 = vmatpush1.bf16.msra.mxu1 %v9502_v55  ;;  %v4050_v55 = vld [vmem:[%s13108_s3 + $0x2e8] sm:$0xff] }
 0x228   :  { %3906 = vmatprep.subr.bf16.mxu1 %v9507_v53  ;;  %v8192_v53 = vcombine.low %v4038_v59, %v4042_v62  ;;  %v11838_v59 = vld [vmem:[%s13108_s3 + $0x30] sm:$0xff]  ;;  %v11843_v62 = vld [vmem:[%s13108_s3 + $0x18] sm:$0xff] }
 0x22b   :  { %3907 = vmatpush1.bf16.msra.mxu1 %v9505_v4  ;;  %v8201_v4 = vcombine.high %v4046_v28, %v4050_v55 }
 0x22c   :  { %3908 = vmatprep.subr.bf16.mxu1 %v9510_v43  ;;  %v4054_v43 = vld [vmem:[%s13108_s3 + $0x308] sm:$0xff] }
 0x22f   :  { %3909 = vmatpush1.bf16.msra.mxu1 %v9508_v5  ;;  %v4058_v5 = vld [vmem:[%s13108_s3 + $0x328] sm:$0xff] }
 0x230   :  { %3910 = vmatprep.subr.bf16.mxu1 %v9513_v6  ;;  %v8200_v6 = vcombine.low %v4046_v28, %v4050_v55  ;;  %v11852_v28 = vld [vmem:[%s13108_s3 + $0x38] sm:$0xff] }
 0x233   :  { %3911 = vmatpush1.bf16.msra.mxu1 %v9511_v7  ;;  %v8209_v7 = vcombine.high %v4054_v43, %v4058_v5 }
 0x234   :  { %3912 = vmatprep.subr.bf16.mxu1 %v9516_v48  ;;  %v4062_v48 = vld [vmem:[%s13108_s3 + $0x348] sm:$0xff] }
 0x237   :  { %3913 = vmatpush1.bf16.msra.mxu1 %v9514_v10  ;;  %v4066_v10 = vld [vmem:[%s13108_s3 + $0x368] sm:$0xff] }
 0x238   :  { %3914 = vmatprep.subr.bf16.mxu1 %v9519_v11  ;;  %v8208_v11 = vcombine.low %v4054_v43, %v4058_v5  ;;  %v8216_v15 = vcombine.low %v4062_v48, %v4066_v10  ;;  %v8116_v5 = vcombine.low %v11843_v62, %v11852_v28 }
 0x23b   :  { %3915 = vmatpush1.bf16.msra.mxu1 %v9517_v12  ;;  %v8217_v12 = vcombine.high %v4062_v48, %v4066_v10  ;;  %v4106_v48 = vld [vmem:[%s13108_s3 + $0x4a8] sm:$0xff] }
 0x23c   :  { %3916 = vmatprep.subr.bf16.mxu1 %v9522_v13  ;;  %v4070_v13 = vld [vmem:[%s13108_s3 + $0x388] sm:$0xff] }
 0x23d   :  { %v8224_v20 = vcombine.low %v4070_v13, %v4074_v14 }
 0x23f   :  { %3917 = vmatpush1.bf16.msra.mxu1 %v9520_v17  ;;  %v8225_v17 = vcombine.high %v4070_v13, %v4074_v14  ;;  %v4109_v14 = vld [vmem:[%s13108_s3 + $0x4c0] sm:$0xff] }
 0x240   :  { %5621 = vmatprep.subr.bf16.mxu1 %v8113_v18  ;;  %v4078_v18 = vld [vmem:[%s13108_s3 + $0x3c8] sm:$0xff] }
 0x241   :  { %v8232_v29 = vcombine.low %v4078_v18, %v4082_v19 }
 0x242   :  { %3919 = vmatmul.mubr.bf16.vlgmr.msra.gmra.mrb[4].mxu1 %v11380_v2  ;;  %v3990_v2 = vld [vmem:[%s13108_s3 + $0x108] sm:$0xff] }
 0x243   :  { %5622 = vmatpush1.bf16.msra.mxu1 %v8112_v23  ;;  %v8145_v52 = vcombine.high %v3990_v2, %v3994_v38  ;;  %v8144_v37 = vcombine.low %v3990_v2, %v3994_v38  ;;  %v8233_v23 = vcombine.high %v4078_v18, %v4082_v19  ;;  %v8265_v19 = vcombine.high %v4110_v33, %v4114_v1 }
 0x244   :  { %5623 = vmatprep.subr.bf16.mxu1 %v8121_v24  ;;  %v11786_v24 = vld [vmem:[%s13108_s3 + $0x408] sm:$0xff] }
 0x247   :  { %5624 = vmatpush1.bf16.msra.mxu1 %v8120_v21  ;;  %v8241_v21 = vcombine.high %v11786_v24, %v11791_v26 }
 0x248   :  { %5625 = vmatprep.subr.bf16.mxu1 %v8129_v22  ;;  %v581_v22 = vlaneseq }
 0x24a   :  { %v11795_v30 = vshrl.u32 %v581_v22, 7 }
 0x24b   :  { %5626 = vmatpush1.bf16.msra.mxu1 %v8128_v32  ;;  %v11803_v32 = vld [vmem:[%s13109_s2] sm:$0xf] }
 0x24c   :  { %5627 = vmatprep.subr.bf16.mxu1 %v8137_v35  ;;  %v11798_v31 = vsub.s32 0, %v11795_v30  ;;  %v11806_v35 = vsub.s32 1, %v11795_v30 }
 0x24e   :  { %v584_v2 = vrot.slane %v11803_v32, %v11798_v31  ;;  %v588_v38 = vrot.slane %v11803_v32, %v11806_v35 }
 0x24f   :  { %5628 = vmatpush1.bf16.msra.mxu1 %v8136_v27 }
 0x250   :  { %5629 = vmatprep.subr.bf16.mxu1 %v8145_v52  ;;  %v3276_v27 = vadd.f32 %v10825_v56, %v584_v2  ;;  %v3278_v52 = vadd.f32 %v10827_v57, %v588_v38  ;;  %v3280_v36 = vadd.f32 %v10829_v58, %v584_v2  ;;  %v3282_v16 = vadd.f32 %v10837_v61, %v588_v38  ;;  %v4093_v58 = vld [vmem:[%s13108_s3 + $0x440] sm:$0xff] }
 0x251   :  { %v4097_v61 = vld [vmem:[%s13108_s3 + $0x460] sm:$0xff] }
 0x252   :  { %v8247_v55 = vcombine.high %v4093_v58, %v4097_v61  ;;  %v8246_v10 = vcombine.low %v4093_v58, %v4097_v61  ;;  %v4125_v38 = vld [vmem:[%s13108_s3 + $0x540] sm:$0xff] }
 0x253   :  { %5630 = vmatpush1.bf16.msra.mxu1 %v8144_v37  ;;  %v4145_v58 = vld [vmem:[%s13108_s3 + $0x5e0] sm:$0xff] }
 0x254   :  { %5631 = vmatprep.subr.bf16.mxu1 %v8153_v39 }
 0x257   :  { %5632 = vmatpush1.bf16.msra.mxu1 %v8152_v41 }
 0x258   :  { %5633 = vmatprep.subr.bf16.mxu1 %v8161_v42 }
 0x25b   :  { %5634 = vmatpush1.bf16.msra.mxu1 %v8160_v9 }
 0x25c   :  { %5635 = vmatprep.subr.bf16.mxu1 %v8169_v34 }
 0x25f   :  { %5636 = vmatpush1.bf16.msra.mxu1 %v8168_v50  ;;  %v4094_v50 = vld [vmem:[%s13108_s3 + $0x448] sm:$0xff] }
 0x260   :  { %5637 = vmatprep.subr.bf16.mxu1 %v8177_v8  ;;  %v4098_v8 = vld [vmem:[%s13108_s3 + $0x468] sm:$0xff] }
 0x263   :  { %5638 = vmatpush1.bf16.msra.mxu1 %v8176_v45 }
 0x264   :  { %5639 = vmatprep.subr.bf16.mxu1 %v8185_v46  ;;  %v11833_v46 = vld [vmem:[%s13108_s3 + $0x10] sm:$0xff] }
 0x265   :  { %v8114_v43 = vcombine.low %v11833_v46, %v11838_v59 }
 0x267   :  { %5640 = vmatpush1.bf16.msra.mxu1 %v8184_v63 }
 0x268   :  { %5641 = vmatprep.subr.bf16.mxu1 %v8193_v0  ;;  %v8240_v0 = vcombine.low %v11786_v24, %v11791_v26  ;;  %v4118_v24 = vld [vmem:[%s13108_s3 + $0x508] sm:$0xff] }
 0x269   :  { %v4122_v26 = vld [vmem:[%s13108_s3 + $0x528] sm:$0xff] }
 0x26a   :  { %v8273_v2 = vcombine.high %v4118_v24, %v4122_v26 }
 0x26b   :  { %5642 = vmatpush1.bf16.msra.mxu1 %v8192_v53  ;;  %v8249_v53 = vcombine.high %v4094_v50, %v4098_v8 }
 0x26c   :  { %5643 = vmatprep.subr.bf16.mxu1 %v8201_v4  ;;  %v4101_v4 = vld [vmem:[%s13108_s3 + $0x480] sm:$0xff] }
 0x26f   :  { %5644 = vmatpush1.bf16.msra.mxu1 %v8200_v6  ;;  %v4105_v6 = vld [vmem:[%s13108_s3 + $0x4a0] sm:$0xff] }
 0x270   :  { %5645 = vmatprep.subr.bf16.mxu1 %v8209_v7  ;;  %v4102_v7 = vld [vmem:[%s13108_s3 + $0x488] sm:$0xff] }
 0x271   :  { %v8257_v13 = vcombine.high %v4102_v7, %v4106_v48 }
 0x273   :  { %5646 = vmatpush1.bf16.msra.mxu1 %v8208_v11  ;;  %v8248_v11 = vcombine.low %v4094_v50, %v4098_v8 }
 0x274   :  { %5647 = vmatprep.subr.bf16.mxu1 %v8217_v12  ;;  %v8255_v12 = vcombine.high %v4101_v4, %v4105_v6 }
 0x277   :  { %5648 = vmatpush1.bf16.msra.mxu1 %v8216_v15  ;;  %v4113_v15 = vld [vmem:[%s13108_s3 + $0x4e0] sm:$0xff] }
 0x278   :  { %5649 = vmatprep.subr.bf16.mxu1 %v8225_v17  ;;  %v8256_v17 = vcombine.low %v4102_v7, %v4106_v48  ;;  %v8263_v18 = vcombine.high %v4109_v14, %v4113_v15 }
 0x27b   :  { %5650 = vmatpush1.bf16.msra.mxu1 %v8224_v20  ;;  %v4117_v20 = vld [vmem:[%s13108_s3 + $0x500] sm:$0xff] }
 0x27c   :  { %5651 = vmatprep.subr.bf16.mxu1 %v8233_v23  ;;  %v4121_v23 = vld [vmem:[%s13108_s3 + $0x520] sm:$0xff] }
 0x27d   :  { %v8271_v22 = vcombine.high %v4117_v20, %v4121_v23 }
 0x27f   :  { %5652 = vmatpush1.bf16.msra.mxu1 %v8232_v29  ;;  %v8262_v29 = vcombine.low %v4109_v14, %v4113_v15 }
 0x280   :  { %5664 = vmatprep.subr.bf16.mxu1 %v8241_v21  ;;  %v8264_v21 = vcombine.low %v4110_v33, %v4114_v1 }
 0x296   :  { %v3576_v60 = vpop.f32.mrb[0].mxu0 }
 0x297   :  { %v8642_v37 = vadd.f32 %v3576_v60, %v3276_v27  ;;  %v3578_v39 = vpop.f32.mrb[1].mxu0  ;;  %v4129_v27 = vld [vmem:[%s13108_s3 + $0x560] sm:$0xff]  ;;  %v4130_v60 = vld [vmem:[%s13108_s3 + $0x568] sm:$0xff] }
 0x298   :  { %v8644_v40 = vadd.f32 %v3578_v39, %v3278_v52  ;;  %v3580_v41 = vpop.f32.mrb[2].mxu0  ;;  %v4126_v52 = vld [vmem:[%s13108_s3 + $0x548] sm:$0xff]  ;;  %v8279_v39 = vcombine.high %v4125_v38, %v4129_v27 }
 0x299   :  { %v3937_v42 = vmul.f32 0.2, %v8642_v37  ;;  %v8646_v25 = vadd.f32 %v3580_v41, %v3280_v36  ;;  %v3582_v44 = vpop.f32.mrb[3].mxu0  ;;  %vm3929_vm0 = vcmp.ge.f32.partialorder %v8642_v37, 0.0  ;;  %v8270_v36 = vcombine.low %v4117_v20, %v4121_v23  ;;  %v4137_v41 = vld [vmem:[%s13108_s3 + $0x5a0] sm:$0xff] }
 0x29a   :  { %v3938_v9 = vmul.f32 0.2, %v8644_v40  ;;  %v8648_v34 = vadd.f32 %v3582_v44, %v3282_v16  ;;  %vm3930_vm1 = vcmp.ge.f32.partialorder %v8644_v40, 0.0  ;;  %v8281_v16 = vcombine.high %v4126_v52, %v4130_v60 }
 0x29b   :  { %vm3933_vm2 = vcmp.ge.f32.partialorder %v8646_v25, 0.0  ;;  %v3941_v56 = vmul.f32 0.2, %v8646_v25  ;;  %v3945_v47 = vsel %vm3929_vm0, %v8642_v37, %v3937_v42  ;;  %v8272_v37 = vcombine.low %v4118_v24, %v4122_v26  ;;  %v4134_v42 = vld [vmem:[%s13108_s3 + $0x588] sm:$0xff] }
 0x29c   :  { %vm3934_vm3 = vcmp.ge.f32.partialorder %v8648_v34, 0.0  ;;  %v3942_v57 = vmul.f32 0.2, %v8648_v34  ;;  %v3946_v51 = vsel %vm3930_vm1, %v8644_v40, %v3938_v9  ;;  %v4133_v40 = vld [vmem:[%s13108_s3 + $0x580] sm:$0xff]  ;;  %v8278_v44 = vcombine.low %v4125_v38, %v4129_v27 }
 0x29d   :  { %v3949_v49 = vsel %vm3933_vm2, %v8646_v25, %v3941_v56  ;;  %v4138_v25 = vld [vmem:[%s13108_s3 + $0x5a8] sm:$0xff]  ;;  %v8280_v9 = vcombine.low %v4126_v52, %v4130_v60  ;;  %v8286_v61 = vcombine.low %v4133_v40, %v4137_v41 }
 0x29e   :  { %v11828_v54 = vpack.c.bf16 %v3949_v49, %v3945_v47  ;;  %v3950_v45 = vsel %vm3934_vm3, %v8648_v34, %v3942_v57  ;;  %v8287_v34 = vcombine.high %v4133_v40, %v4137_v41  ;;  %v8289_v56 = vcombine.high %v4134_v42, %v4138_v25  ;;  %v4141_v57 = vld [vmem:[%s13108_s3 + $0x5c0] sm:$0xff]  ;;  %v4142_v47 = vld [vmem:[%s13108_s3 + $0x5c8] sm:$0xff] }
 0x29f   :  { %v11845_v63 = vpack.c.bf16 %v3950_v45, %v3946_v51  ;;  %v4146_v49 = vld [vmem:[%s13108_s3 + $0x5e8] sm:$0xff]  ;;  %v8288_v50 = vcombine.low %v4134_v42, %v4138_v25  ;;  %v8295_v8 = vcombine.high %v4141_v57, %v4145_v58  ;;  %v4149_v45 = vld [vmem:[%s13108_s3 + $0x600] sm:$0xff] }
 0x2a0   :  { %v8297_v51 = vcombine.high %v4142_v47, %v4146_v49 }
 0x2a1   :  { %5567 = vmatprep.mubr.bf16.mxu0 %v11845_v63  ;;  %5653 = vmatprep.mubr.bf16.mxu1 %v11845_v63 }
 0x2a2   :  { %5568 = vmatmul.mubr.bf16.vlgmr.msra.gmra.mrb[4].mxu0 %v11828_v54  ;;  %5654 = vmatmul.mubr.bf16.vlgmr.msra.gmra.mrb[8].mxu1 %v11828_v54 }
 0x2a3   :  { %5579 = vmatpush1.bf16.msra.mxu0 %v8238_v3  ;;  %5665 = vmatpush1.bf16.msra.mxu1 %v8240_v0  ;;  %v8254_v3 = vcombine.low %v4101_v4, %v4105_v6  ;;  %v4153_v0 = vld [vmem:[%s13108_s3 + $0x620] sm:$0xff]  ;;  %v8294_v4 = vcombine.low %v4141_v57, %v4145_v58  ;;  %v8296_v6 = vcombine.low %v4142_v47, %v4146_v49 }
 0x2a4   :  { %5580 = vmatprep.subr.bf16.mxu0 %v8247_v55  ;;  %5666 = vmatprep.subr.bf16.mxu1 %v8249_v53  ;;  %v4150_v55 = vld [vmem:[%s13108_s3 + $0x608] sm:$0xff]  ;;  %v8303_v7 = vcombine.high %v4149_v45, %v4153_v0  ;;  %v8302_v14 = vcombine.low %v4149_v45, %v4153_v0 }
 0x2a5   :  { %v4154_v53 = vld [vmem:[%s13108_s3 + $0x628] sm:$0xff] }
 0x2a6   :  { %v8305_v48 = vcombine.high %v4150_v55, %v4154_v53  ;;  %v8304_v15 = vcombine.low %v4150_v55, %v4154_v53 }
 0x2a7   :  { %5581 = vmatpush1.bf16.msra.mxu0 %v8246_v10  ;;  %5667 = vmatpush1.bf16.msra.mxu1 %v8248_v11  ;;  %v4157_v10 = vld [vmem:[%s13108_s3 + $0x640] sm:$0xff] }
 0x2a8   :  { %5582 = vmatprep.subr.bf16.mxu0 %v8255_v12  ;;  %5668 = vmatprep.subr.bf16.mxu1 %v8257_v13  ;;  %v4161_v11 = vld [vmem:[%s13108_s3 + $0x660] sm:$0xff]  ;;  %v4158_v12 = vld [vmem:[%s13108_s3 + $0x648] sm:$0xff] }
 0x2a9   :  { %v4162_v13 = vld [vmem:[%s13108_s3 + $0x668] sm:$0xff]  ;;  %v8311_v33 = vcombine.high %v4157_v10, %v4161_v11  ;;  %v8310_v20 = vcombine.low %v4157_v10, %v4161_v11 }
 0x2aa   :  { %v8313_v1 = vcombine.high %v4158_v12, %v4162_v13  ;;  %v8312_v23 = vcombine.low %v4158_v12, %v4162_v13 }
 0x2ab   :  { %5583 = vmatpush1.bf16.msra.mxu0 %v8254_v3  ;;  %5669 = vmatpush1.bf16.msra.mxu1 %v8256_v17  ;;  %v4165_v3 = vld [vmem:[%s13108_s3 + $0x680] sm:$0xff] }
 0x2ac   :  { %5584 = vmatprep.subr.bf16.mxu0 %v8263_v18  ;;  %5670 = vmatprep.subr.bf16.mxu1 %v8265_v19  ;;  %v4169_v17 = vld [vmem:[%s13108_s3 + $0x6a0] sm:$0xff]  ;;  %v4166_v18 = vld [vmem:[%s13108_s3 + $0x688] sm:$0xff] }
 0x2ad   :  { %v4170_v19 = vld [vmem:[%s13108_s3 + $0x6a8] sm:$0xff]  ;;  %v8319_v24 = vcombine.high %v4165_v3, %v4169_v17  ;;  %v8318_v38 = vcombine.low %v4165_v3, %v4169_v17  ;;  %v591_v3 = vsub.s32 2, %v11795_v30  ;;  %v595_v17 = vsub.s32 3, %v11795_v30 }
 0x2ae   :  { %v8321_v26 = vcombine.high %v4166_v18, %v4170_v19  ;;  %v8320_v27 = vcombine.low %v4166_v18, %v4170_v19 }
 0x2af   :  { %5585 = vmatpush1.bf16.msra.mxu0 %v8262_v29  ;;  %5671 = vmatpush1.bf16.msra.mxu1 %v8264_v21  ;;  %v4173_v29 = vld [vmem:[%s13108_s3 + $0x6c0] sm:$0xff]  ;;  %v592_v18 = vrot.slane %v11803_v32, %v591_v3  ;;  %v596_v19 = vrot.slane %v11803_v32, %v595_v17  ;;  %v3967_v32 = vld [vmem:[%s13108_s3 + $0x50] sm:$0xff] }
 0x2b0   :  { %5586 = vmatprep.subr.bf16.mxu0 %v8271_v22  ;;  %5672 = vmatprep.subr.bf16.mxu1 %v8273_v2  ;;  %v4177_v21 = vld [vmem:[%s13108_s3 + $0x6e0] sm:$0xff]  ;;  %v4174_v22 = vld [vmem:[%s13108_s3 + $0x6c8] sm:$0xff] }
 0x2b1   :  { %v4178_v2 = vld [vmem:[%s13108_s3 + $0x6e8] sm:$0xff]  ;;  %v8327_v52 = vcombine.high %v4173_v29, %v4177_v21  ;;  %v8326_v40 = vcombine.low %v4173_v29, %v4177_v21 }
 0x2b2   :  { %v8329_v60 = vcombine.high %v4174_v22, %v4178_v2  ;;  %v8328_v41 = vcombine.low %v4174_v22, %v4178_v2 }
 0x2b3   :  { %5587 = vmatpush1.bf16.msra.mxu0 %v8270_v36  ;;  %5673 = vmatpush1.bf16.msra.mxu1 %v8272_v37  ;;  %v4181_v36 = vld [vmem:[%s13108_s3 + $0x700] sm:$0xff] }
 0x2b4   :  { %5588 = vmatprep.subr.bf16.mxu0 %v8279_v39  ;;  %5674 = vmatprep.subr.bf16.mxu1 %v8281_v16  ;;  %v4185_v37 = vld [vmem:[%s13108_s3 + $0x720] sm:$0xff]  ;;  %v4182_v39 = vld [vmem:[%s13108_s3 + $0x708] sm:$0xff] }
 0x2b5   :  { %v4186_v16 = vld [vmem:[%s13108_s3 + $0x728] sm:$0xff]  ;;  %v8335_v42 = vcombine.high %v4181_v36, %v4185_v37  ;;  %v8334_v57 = vcombine.low %v4181_v36, %v4185_v37 }
 0x2b6   :  { %v8337_v25 = vcombine.high %v4182_v39, %v4186_v16  ;;  %v8336_v58 = vcombine.low %v4182_v39, %v4186_v16 }
 0x2b7   :  { %5589 = vmatpush1.bf16.msra.mxu0 %v8278_v44  ;;  %5675 = vmatpush1.bf16.msra.mxu1 %v8280_v9  ;;  %v4189_v44 = vld [vmem:[%s13108_s3 + $0x740] sm:$0xff] }
 0x2b8   :  { %5590 = vmatprep.subr.bf16.mxu0 %v8287_v34  ;;  %5676 = vmatprep.subr.bf16.mxu1 %v8289_v56  ;;  %v4193_v9 = vld [vmem:[%s13108_s3 + $0x760] sm:$0xff]  ;;  %v4190_v34 = vld [vmem:[%s13108_s3 + $0x748] sm:$0xff] }
 0x2b9   :  { %v4194_v56 = vld [vmem:[%s13108_s3 + $0x768] sm:$0xff]  ;;  %v8343_v47 = vcombine.high %v4189_v44, %v4193_v9  ;;  %v8342_v45 = vcombine.low %v4189_v44, %v4193_v9  ;;  %v3975_v9 = vld [vmem:[%s13108_s3 + $0x90] sm:$0xff] }
 0x2ba   :  { %v8345_v49 = vcombine.high %v4190_v34, %v4194_v56  ;;  %v8344_v0 = vcombine.low %v4190_v34, %v4194_v56 }
 0x2bb   :  { %5591 = vmatpush1.bf16.msra.mxu0 %v8286_v61  ;;  %5677 = vmatpush1.bf16.msra.mxu1 %v8288_v50  ;;  %v4197_v61 = vld [vmem:[%s13108_s3 + $0x780] sm:$0xff] }
 0x2bc   :  { %5592 = vmatprep.subr.bf16.mxu0 %v8295_v8  ;;  %5678 = vmatprep.subr.bf16.mxu1 %v8297_v51  ;;  %v4201_v50 = vld [vmem:[%s13108_s3 + $0x7a0] sm:$0xff]  ;;  %v4198_v8 = vld [vmem:[%s13108_s3 + $0x788] sm:$0xff] }
 0x2bd   :  { %v4202_v51 = vld [vmem:[%s13108_s3 + $0x7a8] sm:$0xff]  ;;  %v8351_v55 = vcombine.high %v4197_v61, %v4201_v50  ;;  %v8350_v10 = vcombine.low %v4197_v61, %v4201_v50  ;;  %v3983_v50 = vld [vmem:[%s13108_s3 + $0xd0] sm:$0xff] }
 0x2be   :  { %v8353_v53 = vcombine.high %v4198_v8, %v4202_v51  ;;  %v8352_v11 = vcombine.low %v4198_v8, %v4202_v51  ;;  %v3987_v8 = vld [vmem:[%s13108_s3 + $0xf0] sm:$0xff] }
 0x2bf   :  { %5593 = vmatpush1.bf16.msra.mxu0 %v8294_v4  ;;  %5679 = vmatpush1.bf16.msra.mxu1 %v8296_v6  ;;  %v4205_v4 = vld [vmem:[%s13108_s3 + $0x7c0] sm:$0xff]  ;;  %v3995_v51 = vld [vmem:[%s13108_s3 + $0x130] sm:$0xff] }
 0x2c0   :  { %5594 = vmatprep.subr.bf16.mxu0 %v8303_v7  ;;  %5680 = vmatprep.subr.bf16.mxu1 %v8305_v48  ;;  %v4209_v6 = vld [vmem:[%s13108_s3 + $0x7e0] sm:$0xff]  ;;  %v4206_v7 = vld [vmem:[%s13108_s3 + $0x7c8] sm:$0xff] }
 0x2c1   :  { %v4210_v48 = vld [vmem:[%s13108_s3 + $0x7e8] sm:$0xff]  ;;  %v8359_v12 = vcombine.high %v4205_v4, %v4209_v6 }
 0x2c2   :  { %v8361_v13 = vcombine.high %v4206_v7, %v4210_v48 }
 0x2c3   :  { %5595 = vmatpush1.bf16.msra.mxu0 %v8302_v14  ;;  %5681 = vmatpush1.bf16.msra.mxu1 %v8304_v15  ;;  %v8358_v14 = vcombine.low %v4205_v4, %v4209_v6  ;;  %v8360_v15 = vcombine.low %v4206_v7, %v4210_v48  ;;  %v8138_v4 = vcombine.low %v3983_v50, %v3987_v8  ;;  %v3999_v7 = vld [vmem:[%s13108_s3 + $0x150] sm:$0xff] }
 0x2c4   :  { %5596 = vmatprep.subr.bf16.mxu0 %v8311_v33  ;;  %5682 = vmatprep.subr.bf16.mxu1 %v8313_v1  ;;  %v8115_v33 = vcombine.high %v11833_v46, %v11838_v59  ;;  %v8117_v1 = vcombine.high %v11843_v62, %v11852_v28  ;;  %v3984_v62 = vld [vmem:[%s13108_s3 + $0xd8] sm:$0xff]  ;;  %v4003_v48 = vld [vmem:[%s13108_s3 + $0x170] sm:$0xff] }
 0x2c5   :  { %v3988_v28 = vld [vmem:[%s13108_s3 + $0xf8] sm:$0xff] }
 0x2c6   :  { %v8140_v6 = vcombine.low %v3984_v62, %v3988_v28 }
 0x2c7   :  { %5597 = vmatpush1.bf16.msra.mxu0 %v8310_v20  ;;  %5683 = vmatpush1.bf16.msra.mxu1 %v8312_v23 }
 0x2c8   :  { %5598 = vmatprep.subr.bf16.mxu0 %v8319_v24  ;;  %5684 = vmatprep.subr.bf16.mxu1 %v8321_v26 }
 0x2cb   :  { %5599 = vmatpush1.bf16.msra.mxu0 %v8318_v38  ;;  %5685 = vmatpush1.bf16.msra.mxu1 %v8320_v27 }
 0x2cc   :  { %5600 = vmatprep.subr.bf16.mxu0 %v8327_v52  ;;  %5686 = vmatprep.subr.bf16.mxu1 %v8329_v60 }
 0x2cf   :  { %5601 = vmatpush1.bf16.msra.mxu0 %v8326_v40  ;;  %5687 = vmatpush1.bf16.msra.mxu1 %v8328_v41  ;;  %v3971_v41 = vld [vmem:[%s13108_s3 + $0x70] sm:$0xff] }
 0x2d0   :  { %5602 = vmatprep.subr.bf16.mxu0 %v8335_v42  ;;  %5688 = vmatprep.subr.bf16.mxu1 %v8337_v25  ;;  %v3968_v42 = vld [vmem:[%s13108_s3 + $0x58] sm:$0xff]  ;;  %v8123_v34 = vcombine.high %v3967_v32, %v3971_v41 }
 0x2d1   :  { %v3972_v25 = vld [vmem:[%s13108_s3 + $0x78] sm:$0xff] }
 0x2d2   :  { %v8125_v56 = vcombine.high %v3968_v42, %v3972_v25  ;;  %v8124_v61 = vcombine.low %v3968_v42, %v3972_v25 }
 0x2d3   :  { %5603 = vmatpush1.bf16.msra.mxu0 %v8334_v57  ;;  %5689 = vmatpush1.bf16.msra.mxu1 %v8336_v58  ;;  %v3979_v57 = vld [vmem:[%s13108_s3 + $0xb0] sm:$0xff]  ;;  %v3976_v58 = vld [vmem:[%s13108_s3 + $0x98] sm:$0xff] }
 0x2d4   :  { %5604 = vmatprep.subr.bf16.mxu0 %v8343_v47  ;;  %5690 = vmatprep.subr.bf16.mxu1 %v8345_v49  ;;  %v3980_v47 = vld [vmem:[%s13108_s3 + $0xb8] sm:$0xff]  ;;  %v8122_v49 = vcombine.low %v3967_v32, %v3971_v41  ;;  %v8131_v46 = vcombine.high %v3975_v9, %v3979_v57 }
 0x2d5   :  { %v8133_v59 = vcombine.high %v3976_v58, %v3980_v47  ;;  %v4024_v32 = vld [vmem:[%s13108_s3 + $0x218] sm:$0xff] }
 0x2d7   :  { %5605 = vmatpush1.bf16.msra.mxu0 %v8342_v45  ;;  %5691 = vmatpush1.bf16.msra.mxu1 %v8344_v0  ;;  %v3992_v45 = vld [vmem:[%s13108_s3 + $0x118] sm:$0xff] }
 0x2d8   :  { %5606 = vmatprep.subr.bf16.mxu0 %v8351_v55  ;;  %5692 = vmatprep.subr.bf16.mxu1 %v8353_v53  ;;  %v3996_v0 = vld [vmem:[%s13108_s3 + $0x138] sm:$0xff]  ;;  %v8139_v55 = vcombine.high %v3983_v50, %v3987_v8  ;;  %v8141_v53 = vcombine.high %v3984_v62, %v3988_v28  ;;  %v4039_v50 = vld [vmem:[%s13108_s3 + $0x290] sm:$0xff] }
 0x2d9   :  { %v4043_v8 = vld [vmem:[%s13108_s3 + $0x2b0] sm:$0xff] }
 0x2db   :  { %5607 = vmatpush1.bf16.msra.mxu0 %v8350_v10  ;;  %5693 = vmatpush1.bf16.msra.mxu1 %v8352_v11  ;;  %v4000_v10 = vld [vmem:[%s13108_s3 + $0x158] sm:$0xff] }
 0x2dc   :  { %5608 = vmatprep.subr.bf16.mxu0 %v8359_v12  ;;  %5694 = vmatprep.subr.bf16.mxu1 %v8361_v13  ;;  %v4004_v11 = vld [vmem:[%s13108_s3 + $0x178] sm:$0xff]  ;;  %v8149_v13 = vcombine.high %v3992_v45, %v3996_v0 }
 0x2df   :  { %5609 = vmatpush1.bf16.msra.mxu0 %v8358_v14  ;;  %5695 = vmatpush1.bf16.msra.mxu1 %v8360_v15  ;;  %v8148_v15 = vcombine.low %v3992_v45, %v3996_v0  ;;  %v4048_v45 = vld [vmem:[%s13108_s3 + $0x2d8] sm:$0xff] }
 0x2e0   :  { %5707 = vmatprep.subr.bf16.mxu0 %v8115_v33  ;;  %5793 = vmatprep.subr.bf16.mxu1 %v8117_v1  ;;  %v4007_v33 = vld [vmem:[%s13108_s3 + $0x190] sm:$0xff]  ;;  %v4052_v0 = vld [vmem:[%s13108_s3 + $0x2f8] sm:$0xff] }
 0x2e1   :  { %v4011_v1 = vld [vmem:[%s13108_s3 + $0x1b0] sm:$0xff] }
 0x315   :  { %v3920_v20 = vpop.f32.mrb[4].mxu1 }
 0x316   :  { %v8649_v23 = vadd.f32 %v3920_v20, %v592_v18  ;;  %v3922_v24 = vpop.f32.mrb[5].mxu1  ;;  %v8155_v20 = vcombine.high %v3999_v7, %v4003_v48 }
 0x317   :  { %v8650_v26 = vadd.f32 %v3922_v24, %v596_v19  ;;  %v3924_v29 = vpop.f32.mrb[6].mxu1  ;;  %v8154_v24 = vcombine.low %v3999_v7, %v4003_v48  ;;  %v4055_v7 = vld [vmem:[%s13108_s3 + $0x310] sm:$0xff] }
 0x318   :  { %v3939_v21 = vmul.f32 0.2, %v8649_v23  ;;  %v8651_v22 = vadd.f32 %v3924_v29, %v592_v18  ;;  %v3926_v2 = vpop.f32.mrb[7].mxu1  ;;  %vm3931_vm4 = vcmp.ge.f32.partialorder %v8649_v23, 0.0  ;;  %v4008_v18 = vld [vmem:[%s13108_s3 + $0x198] sm:$0xff]  ;;  %v4015_v29 = vld [vmem:[%s13108_s3 + $0x1d0] sm:$0xff] }
 0x319   :  { %v3940_v38 = vmul.f32 0.2, %v8650_v26  ;;  %v8652_v27 = vadd.f32 %v3926_v2, %v596_v19  ;;  %vm3932_vm5 = vcmp.ge.f32.partialorder %v8650_v26, 0.0  ;;  %v4012_v19 = vld [vmem:[%s13108_s3 + $0x1b8] sm:$0xff]  ;;  %v4059_v48 = vld [vmem:[%s13108_s3 + $0x330] sm:$0xff] }
 0x31a   :  { %vm3935_vm6 = vcmp.ge.f32.partialorder %v8651_v22, 0.0  ;;  %v3943_v52 = vmul.f32 0.2, %v8651_v22  ;;  %v3947_v36 = vsel %vm3931_vm4, %v8649_v23, %v3939_v21  ;;  %v8157_v23 = vcombine.high %v4000_v10, %v4004_v11  ;;  %v4019_v21 = vld [vmem:[%s13108_s3 + $0x1f0] sm:$0xff]  ;;  %v4020_v2 = vld [vmem:[%s13108_s3 + $0x1f8] sm:$0xff] }
 0x31b   :  { %vm3936_vm7 = vcmp.ge.f32.partialorder %v8652_v27, 0.0  ;;  %v3944_v60 = vmul.f32 0.2, %v8652_v27  ;;  %v3948_v39 = vsel %vm3932_vm5, %v8650_v26, %v3940_v38  ;;  %v8156_v26 = vcombine.low %v4000_v10, %v4004_v11  ;;  %v4056_v10 = vld [vmem:[%s13108_s3 + $0x318] sm:$0xff] }
 0x31c   :  { %v3951_v37 = vsel %vm3935_vm6, %v8651_v22, %v3943_v52  ;;  %v4016_v22 = vld [vmem:[%s13108_s3 + $0x1d8] sm:$0xff]  ;;  %v8163_v38 = vcombine.high %v4007_v33, %v4011_v1  ;;  %v8162_v52 = vcombine.low %v4007_v33, %v4011_v1  ;;  %v8170_v42 = vcombine.low %v4015_v29, %v4019_v21  ;;  %v4063_v33 = vld [vmem:[%s13108_s3 + $0x350] sm:$0xff] }
 0x31d   :  { %v12048_v16 = vpack.c.bf16 %v3951_v37, %v3947_v36  ;;  %v3952_v40 = vsel %vm3936_vm7, %v8652_v27, %v3944_v60  ;;  %v8165_v27 = vcombine.high %v4008_v18, %v4012_v19  ;;  %v8164_v60 = vcombine.low %v4008_v18, %v4012_v19  ;;  %v4023_v36 = vld [vmem:[%s13108_s3 + $0x210] sm:$0xff]  ;;  %v4060_v11 = vld [vmem:[%s13108_s3 + $0x338] sm:$0xff] }
 0x31e   :  { %v12059_v44 = vpack.c.bf16 %v3952_v40, %v3948_v39  ;;  %v4027_v37 = vld [vmem:[%s13108_s3 + $0x230] sm:$0xff]  ;;  %v4028_v39 = vld [vmem:[%s13108_s3 + $0x238] sm:$0xff]  ;;  %v8171_v40 = vcombine.high %v4015_v29, %v4019_v21  ;;  %v8173_v41 = vcombine.high %v4016_v22, %v4020_v2  ;;  %v8172_v25 = vcombine.low %v4016_v22, %v4020_v2 }
 0x31f   :  { %v4067_v1 = vld [vmem:[%s13108_s3 + $0x370] sm:$0xff]  ;;  %v4064_v18 = vld [vmem:[%s13108_s3 + $0x358] sm:$0xff] }
 0x320   :  { %5610 = vmatprep.mubr.bf16.mxu0 %v12059_v44  ;;  %5696 = vmatprep.mubr.bf16.mxu1 %v12059_v44  ;;  %v4068_v19 = vld [vmem:[%s13108_s3 + $0x378] sm:$0xff]  ;;  %v4071_v29 = vld [vmem:[%s13108_s3 + $0x390] sm:$0xff] }
 0x321   :  { %5611 = vmatmul.mubr.bf16.vlgmr.msra.gmra.mrb[4].mxu0 %v12048_v16  ;;  %5697 = vmatmul.mubr.bf16.vlgmr.msra.gmra.mrb[8].mxu1 %v12048_v16  ;;  %v4075_v21 = vld [vmem:[%s13108_s3 + $0x3b0] sm:$0xff]  ;;  %v4072_v22 = vld [vmem:[%s13108_s3 + $0x398] sm:$0xff] }
 0x322   :  { %5708 = vmatpush1.bf16.msra.mxu0 %v8114_v43  ;;  %5794 = vmatpush1.bf16.msra.mxu1 %v8116_v5  ;;  %v8130_v43 = vcombine.low %v3975_v9, %v3979_v57  ;;  %v8132_v5 = vcombine.low %v3976_v58, %v3980_v47  ;;  %v4031_v9 = vld [vmem:[%s13108_s3 + $0x250] sm:$0xff]  ;;  %v4036_v57 = vld [vmem:[%s13108_s3 + $0x278] sm:$0xff]  ;;  %v8179_v58 = vcombine.high %v4023_v36, %v4027_v37 }
 0x323   :  { %5739 = vmatprep.mubr.bf16.mxu0 %v11845_v63  ;;  %5825 = vmatprep.mubr.bf16.mxu1 %v11845_v63  ;;  %v3991_v63 = vld [vmem:[%s13108_s3 + $0x110] sm:$0xff]  ;;  %v8181_v47 = vcombine.high %v4024_v32, %v4028_v39  ;;  %v4076_v2 = vld [vmem:[%s13108_s3 + $0x3b8] sm:$0xff] }
 0x324   :  { %5709 = vmatprep.subr.bf16.mxu0 %v8123_v34  ;;  %5795 = vmatprep.subr.bf16.mxu1 %v8125_v56  ;;  %v8147_v12 = vcombine.high %v3991_v63, %v3995_v51  ;;  %v8146_v14 = vcombine.low %v3991_v63, %v3995_v51  ;;  %v4035_v34 = vld [vmem:[%s13108_s3 + $0x270] sm:$0xff]  ;;  %v4032_v56 = vld [vmem:[%s13108_s3 + $0x258] sm:$0xff] }
 0x325   :  { %v8187_v62 = vcombine.high %v4031_v9, %v4035_v34  ;;  %v8189_v28 = vcombine.high %v4032_v56, %v4036_v57  ;;  %v4047_v63 = vld [vmem:[%s13108_s3 + $0x2d0] sm:$0xff] }
 0x326   :  { %5710 = vmatpush1.bf16.msra.mxu0 %v8122_v49  ;;  %5796 = vmatpush1.bf16.msra.mxu1 %v8124_v61  ;;  %v8178_v49 = vcombine.low %v4023_v36, %v4027_v37  ;;  %v8180_v61 = vcombine.low %v4024_v32, %v4028_v39  ;;  %v4051_v51 = vld [vmem:[%s13108_s3 + $0x2f0] sm:$0xff]  ;;  %v4080_v32 = vld [vmem:[%s13108_s3 + $0x3d8] sm:$0xff]  ;;  %v8227_v39 = vcombine.high %v4071_v29, %v4075_v21 }
 0x327   :  { %5711 = vmatprep.subr.bf16.mxu0 %v8131_v46  ;;  %5797 = vmatprep.subr.bf16.mxu1 %v8133_v59  ;;  %v4040_v46 = vld [vmem:[%s13108_s3 + $0x298] sm:$0xff]  ;;  %v4079_v36 = vld [vmem:[%s13108_s3 + $0x3d0] sm:$0xff] }
 0x328   :  { %v4044_v59 = vld [vmem:[%s13108_s3 + $0x2b8] sm:$0xff]  ;;  %v4083_v37 = vld [vmem:[%s13108_s3 + $0x3f0] sm:$0xff] }
 0x32a   :  { %5712 = vmatpush1.bf16.msra.mxu0 %v8130_v43  ;;  %5798 = vmatpush1.bf16.msra.mxu1 %v8132_v5  ;;  %v8186_v43 = vcombine.low %v4031_v9, %v4035_v34  ;;  %v8188_v5 = vcombine.low %v4032_v56, %v4036_v57  ;;  %v8235_v9 = vcombine.high %v4079_v36, %v4083_v37  ;;  %v4087_v56 = vld [vmem:[%s13108_s3 + $0x410] sm:$0xff] }
 0x32b   :  { %5713 = vmatprep.subr.bf16.mxu0 %v8139_v55  ;;  %5799 = vmatprep.subr.bf16.mxu1 %v8141_v53  ;;  %v8195_v55 = vcombine.high %v4039_v50, %v4043_v8  ;;  %v8197_v53 = vcombine.high %v4040_v46, %v4044_v59  ;;  %v4091_v57 = vld [vmem:[%s13108_s3 + $0x430] sm:$0xff] }
 0x32e   :  { %5714 = vmatpush1.bf16.msra.mxu0 %v8138_v4  ;;  %5800 = vmatpush1.bf16.msra.mxu1 %v8140_v6  ;;  %v8194_v4 = vcombine.low %v4039_v50, %v4043_v8  ;;  %v8196_v6 = vcombine.low %v4040_v46, %v4044_v59  ;;  %v8243_v50 = vcombine.high %v4087_v56, %v4091_v57  ;;  %v4095_v46 = vld [vmem:[%s13108_s3 + $0x450] sm:$0xff] }
 0x32f   :  { %5715 = vmatprep.subr.bf16.mxu0 %v8147_v12  ;;  %5801 = vmatprep.subr.bf16.mxu1 %v8149_v13  ;;  %v8203_v12 = vcombine.high %v4047_v63, %v4051_v51  ;;  %v8205_v13 = vcombine.high %v4048_v45, %v4052_v0  ;;  %v4099_v59 = vld [vmem:[%s13108_s3 + $0x470] sm:$0xff] }
 0x332   :  { %5716 = vmatpush1.bf16.msra.mxu0 %v8146_v14  ;;  %5802 = vmatpush1.bf16.msra.mxu1 %v8148_v15  ;;  %v8202_v14 = vcombine.low %v4047_v63, %v4051_v51  ;;  %v8204_v15 = vcombine.low %v4048_v45, %v4052_v0  ;;  %v8251_v63 = vcombine.high %v4095_v46, %v4099_v59  ;;  %v4103_v45 = vld [vmem:[%s13108_s3 + $0x490] sm:$0xff] }
 0x333   :  { %5717 = vmatprep.subr.bf16.mxu0 %v8155_v20  ;;  %5803 = vmatprep.subr.bf16.mxu1 %v8157_v23  ;;  %v8211_v20 = vcombine.high %v4055_v7, %v4059_v48  ;;  %v8213_v23 = vcombine.high %v4056_v10, %v4060_v11  ;;  %v4107_v0 = vld [vmem:[%s13108_s3 + $0x4b0] sm:$0xff] }
 0x336   :  { %5718 = vmatpush1.bf16.msra.mxu0 %v8154_v24  ;;  %5804 = vmatpush1.bf16.msra.mxu1 %v8156_v26  ;;  %v8210_v24 = vcombine.low %v4055_v7, %v4059_v48  ;;  %v8212_v26 = vcombine.low %v4056_v10, %v4060_v11  ;;  %v8259_v7 = vcombine.high %v4103_v45, %v4107_v0  ;;  %v4111_v48 = vld [vmem:[%s13108_s3 + $0x4d0] sm:$0xff]  ;;  %v4112_v11 = vld [vmem:[%s13108_s3 + $0x4d8] sm:$0xff] }
 0x337   :  { %5719 = vmatprep.subr.bf16.mxu0 %v8163_v38  ;;  %5805 = vmatprep.subr.bf16.mxu1 %v8165_v27  ;;  %v8219_v38 = vcombine.high %v4063_v33, %v4067_v1  ;;  %v8221_v27 = vcombine.high %v4064_v18, %v4068_v19  ;;  %v4115_v10 = vld [vmem:[%s13108_s3 + $0x4f0] sm:$0xff] }
 0x33a   :  { %5720 = vmatpush1.bf16.msra.mxu0 %v8162_v52  ;;  %5806 = vmatpush1.bf16.msra.mxu1 %v8164_v60  ;;  %v8218_v52 = vcombine.low %v4063_v33, %v4067_v1  ;;  %v8220_v60 = vcombine.low %v4064_v18, %v4068_v19  ;;  %v4119_v33 = vld [vmem:[%s13108_s3 + $0x510] sm:$0xff]  ;;  %v4120_v18 = vld [vmem:[%s13108_s3 + $0x518] sm:$0xff] }
 0x33b   :  { %5721 = vmatprep.subr.bf16.mxu0 %v8171_v40  ;;  %5807 = vmatprep.subr.bf16.mxu1 %v8173_v41  ;;  %v8229_v40 = vcombine.high %v4072_v22, %v4076_v2  ;;  %v4084_v41 = vld [vmem:[%s13108_s3 + $0x3f8] sm:$0xff]  ;;  %v4123_v1 = vld [vmem:[%s13108_s3 + $0x530] sm:$0xff] }
 0x33c   :  { %v8237_v34 = vcombine.high %v4080_v32, %v4084_v41  ;;  %v4124_v19 = vld [vmem:[%s13108_s3 + $0x538] sm:$0xff] }
 0x33e   :  { %5722 = vmatpush1.bf16.msra.mxu0 %v8170_v42  ;;  %5808 = vmatpush1.bf16.msra.mxu1 %v8172_v25  ;;  %v8226_v42 = vcombine.low %v4071_v29, %v4075_v21  ;;  %v8228_v25 = vcombine.low %v4072_v22, %v4076_v2  ;;  %v4127_v29 = vld [vmem:[%s13108_s3 + $0x550] sm:$0xff]  ;;  %v4128_v22 = vld [vmem:[%s13108_s3 + $0x558] sm:$0xff] }
 0x33f   :  { %5723 = vmatprep.subr.bf16.mxu0 %v8179_v58  ;;  %5809 = vmatprep.subr.bf16.mxu1 %v8181_v47  ;;  %v4088_v58 = vld [vmem:[%s13108_s3 + $0x418] sm:$0xff]  ;;  %v4131_v21 = vld [vmem:[%s13108_s3 + $0x570] sm:$0xff] }
 0x340   :  { %v4092_v47 = vld [vmem:[%s13108_s3 + $0x438] sm:$0xff] }
 0x341   :  { %v8245_v8 = vcombine.high %v4088_v58, %v4092_v47  ;;  %v4132_v2 = vld [vmem:[%s13108_s3 + $0x578] sm:$0xff] }
 0x342   :  { %5724 = vmatpush1.bf16.msra.mxu0 %v8178_v49  ;;  %5810 = vmatpush1.bf16.msra.mxu1 %v8180_v61  ;;  %v8234_v49 = vcombine.low %v4079_v36, %v4083_v37  ;;  %v8236_v61 = vcombine.low %v4080_v32, %v4084_v41  ;;  %v4135_v36 = vld [vmem:[%s13108_s3 + $0x590] sm:$0xff]  ;;  %v4136_v32 = vld [vmem:[%s13108_s3 + $0x598] sm:$0xff]  ;;  %v8284_v41 = vcombine.low %v4128_v22, %v4132_v2 }
 0x343   :  { %5725 = vmatprep.subr.bf16.mxu0 %v8187_v62  ;;  %5811 = vmatprep.subr.bf16.mxu1 %v8189_v28  ;;  %v4096_v62 = vld [vmem:[%s13108_s3 + $0x458] sm:$0xff]  ;;  %v4139_v37 = vld [vmem:[%s13108_s3 + $0x5b0] sm:$0xff] }
 0x344   :  { %v4100_v28 = vld [vmem:[%s13108_s3 + $0x478] sm:$0xff] }
 0x345   :  { %v8253_v51 = vcombine.high %v4096_v62, %v4100_v28 }
 0x346   :  { %5726 = vmatpush1.bf16.msra.mxu0 %v8186_v43  ;;  %5812 = vmatpush1.bf16.msra.mxu1 %v8188_v5  ;;  %v8242_v43 = vcombine.low %v4087_v56, %v4091_v57  ;;  %v8244_v5 = vcombine.low %v4088_v58, %v4092_v47  ;;  %v4144_v56 = vld [vmem:[%s13108_s3 + $0x5d8] sm:$0xff]  ;;  %v8290_v58 = vcombine.low %v4135_v36, %v4139_v37 }
 0x347   :  { %5727 = vmatprep.subr.bf16.mxu0 %v8195_v55  ;;  %5813 = vmatprep.subr.bf16.mxu1 %v8197_v53  ;;  %v4104_v55 = vld [vmem:[%s13108_s3 + $0x498] sm:$0xff] }
 0x348   :  { %v4108_v53 = vld [vmem:[%s13108_s3 + $0x4b8] sm:$0xff] }
 0x349   :  { %v4148_v57 = vld [vmem:[%s13108_s3 + $0x5f8] sm:$0xff] }
 0x34a   :  { %5728 = vmatpush1.bf16.msra.mxu0 %v8194_v4  ;;  %5814 = vmatpush1.bf16.msra.mxu1 %v8196_v6  ;;  %v8250_v4 = vcombine.low %v4095_v46, %v4099_v59  ;;  %v8252_v6 = vcombine.low %v4096_v62, %v4100_v28  ;;  %v4152_v46 = vld [vmem:[%s13108_s3 + $0x618] sm:$0xff]  ;;  %v8300_v28 = vcombine.low %v4144_v56, %v4148_v57 }
 0x34b   :  { %5729 = vmatprep.subr.bf16.mxu0 %v8203_v12  ;;  %5815 = vmatprep.subr.bf16.mxu1 %v8205_v13  ;;  %v8258_v12 = vcombine.low %v4103_v45, %v4107_v0  ;;  %v8260_v13 = vcombine.low %v4104_v55, %v4108_v53  ;;  %v4156_v59 = vld [vmem:[%s13108_s3 + $0x638] sm:$0xff] }
 0x34c   :  { %v4160_v45 = vld [vmem:[%s13108_s3 + $0x658] sm:$0xff] }
 0x34d   :  { %v4164_v0 = vld [vmem:[%s13108_s3 + $0x678] sm:$0xff] }
 0x34e   :  { %5730 = vmatpush1.bf16.msra.mxu0 %v8202_v14  ;;  %5816 = vmatpush1.bf16.msra.mxu1 %v8204_v15  ;;  %v8267_v14 = vcombine.high %v4111_v48, %v4115_v10 }
 0x34f   :  { %5731 = vmatprep.subr.bf16.mxu0 %v8211_v20  ;;  %5817 = vmatprep.subr.bf16.mxu1 %v8213_v23  ;;  %v8266_v20 = vcombine.low %v4111_v48, %v4115_v10  ;;  %v4168_v48 = vld [vmem:[%s13108_s3 + $0x698] sm:$0xff] }
 0x350   :  { %v4172_v10 = vld [vmem:[%s13108_s3 + $0x6b8] sm:$0xff] }
 0x352   :  { %5732 = vmatpush1.bf16.msra.mxu0 %v8210_v24  ;;  %5818 = vmatpush1.bf16.msra.mxu1 %v8212_v26  ;;  %v8275_v24 = vcombine.high %v4119_v33, %v4123_v1  ;;  %v8277_v26 = vcombine.high %v4120_v18, %v4124_v19 }
 0x353   :  { %5733 = vmatprep.subr.bf16.mxu0 %v8219_v38  ;;  %5819 = vmatprep.subr.bf16.mxu1 %v8221_v27  ;;  %v8274_v38 = vcombine.low %v4119_v33, %v4123_v1  ;;  %v8276_v27 = vcombine.low %v4120_v18, %v4124_v19  ;;  %v4176_v33 = vld [vmem:[%s13108_s3 + $0x6d8] sm:$0xff]  ;;  %v8324_v19 = vcombine.low %v4168_v48, %v4172_v10 }
 0x354   :  { %v4180_v1 = vld [vmem:[%s13108_s3 + $0x6f8] sm:$0xff] }
 0x356   :  { %5734 = vmatpush1.bf16.msra.mxu0 %v8218_v52  ;;  %5820 = vmatpush1.bf16.msra.mxu1 %v8220_v60  ;;  %v8283_v52 = vcombine.high %v4127_v29, %v4131_v21  ;;  %v8285_v60 = vcombine.high %v4128_v22, %v4132_v2  ;;  %v8332_v2 = vcombine.low %v4176_v33, %v4180_v1 }
 0x357   :  { %5735 = vmatprep.subr.bf16.mxu0 %v8227_v39  ;;  %5821 = vmatprep.subr.bf16.mxu1 %v8229_v40  ;;  %v4140_v39 = vld [vmem:[%s13108_s3 + $0x5b8] sm:$0xff]  ;;  %v8282_v40 = vcombine.low %v4127_v29, %v4131_v21 }
 0x358   :  { %v8292_v47 = vcombine.low %v4136_v32, %v4140_v39  ;;  %v4184_v29 = vld [vmem:[%s13108_s3 + $0x718] sm:$0xff] }
 0x359   :  { %v4188_v21 = vld [vmem:[%s13108_s3 + $0x738] sm:$0xff] }
 0x35a   :  { %5736 = vmatpush1.bf16.msra.mxu0 %v8226_v42  ;;  %5822 = vmatpush1.bf16.msra.mxu1 %v8228_v25  ;;  %v8291_v42 = vcombine.high %v4135_v36, %v4139_v37  ;;  %v8293_v25 = vcombine.high %v4136_v32, %v4140_v39  ;;  %v4192_v36 = vld [vmem:[%s13108_s3 + $0x758] sm:$0xff]  ;;  %v8340_v39 = vcombine.low %v4184_v29, %v4188_v21 }
 0x35b   :  { %5737 = vmatprep.subr.bf16.mxu0 %v8235_v9  ;;  %5823 = vmatprep.subr.bf16.mxu1 %v8237_v34  ;;  %v4143_v9 = vld [vmem:[%s13108_s3 + $0x5d0] sm:$0xff]  ;;  %v4196_v37 = vld [vmem:[%s13108_s3 + $0x778] sm:$0xff] }
 0x35c   :  { %v4147_v34 = vld [vmem:[%s13108_s3 + $0x5f0] sm:$0xff] }
 0x35d   :  { %v8298_v62 = vcombine.low %v4143_v9, %v4147_v34 }
 0x35e   :  { %5738 = vmatpush1.bf16.msra.mxu0 %v8234_v49  ;;  %5824 = vmatpush1.bf16.msra.mxu1 %v8236_v61  ;;  %v8299_v49 = vcombine.high %v4143_v9, %v4147_v34  ;;  %v8301_v61 = vcombine.high %v4144_v56, %v4148_v57  ;;  %v4200_v9 = vld [vmem:[%s13108_s3 + $0x798] sm:$0xff]  ;;  %v8348_v57 = vcombine.low %v4192_v36, %v4196_v37 }
 0x35f   :  { %5750 = vmatprep.subr.bf16.mxu0 %v8243_v50  ;;  %5836 = vmatprep.subr.bf16.mxu1 %v8245_v8  ;;  %v4151_v50 = vld [vmem:[%s13108_s3 + $0x610] sm:$0xff]  ;;  %v4204_v34 = vld [vmem:[%s13108_s3 + $0x7b8] sm:$0xff] }
 0x360   :  { %v4155_v8 = vld [vmem:[%s13108_s3 + $0x630] sm:$0xff] }
 0x361   :  { %5740 = vmatmul.mubr.bf16.vlgmr.msra.gmra.mrb[8].mxu0 %v11828_v54  ;;  %5826 = vmatmul.mubr.bf16.vlgmr.msra.gmra.mrb[12].mxu1 %v11828_v54  ;;  %v8261_v54 = vcombine.high %v4104_v55, %v4108_v53  ;;  %v8306_v55 = vcombine.low %v4151_v50, %v4155_v8  ;;  %v8308_v53 = vcombine.low %v4152_v46, %v4156_v59 }
 0x362   :  { %5751 = vmatpush1.bf16.msra.mxu0 %v8242_v43  ;;  %5782 = vmatprep.mubr.bf16.mxu0 %v12059_v44  ;;  %v8307_v43 = vcombine.high %v4151_v50, %v4155_v8  ;;  %v4208_v50 = vld [vmem:[%s13108_s3 + $0x7d8] sm:$0xff] }
 0x363   :  { %5837 = vmatpush1.bf16.msra.mxu1 %v8244_v5  ;;  %5868 = vmatprep.mubr.bf16.mxu1 %v12059_v44  ;;  %v4116_v44 = vld [vmem:[%s13108_s3 + $0x4f8] sm:$0xff]  ;;  %v8309_v5 = vcombine.high %v4152_v46, %v4156_v59  ;;  %v8356_v59 = vcombine.low %v4200_v9, %v4204_v34 }
 0x364   :  { %5752 = vmatprep.subr.bf16.mxu0 %v8251_v63  ;;  %5838 = vmatprep.subr.bf16.mxu1 %v8253_v51  ;;  %v8269_v15 = vcombine.high %v4112_v11, %v4116_v44  ;;  %v8268_v23 = vcombine.low %v4112_v11, %v4116_v44  ;;  %v4159_v63 = vld [vmem:[%s13108_s3 + $0x650] sm:$0xff]  ;;  %v8316_v44 = vcombine.low %v4160_v45, %v4164_v0  ;;  %v4212_v8 = vld [vmem:[%s13108_s3 + $0x7f8] sm:$0xff] }
 0x365   :  { %v4163_v51 = vld [vmem:[%s13108_s3 + $0x670] sm:$0xff] }
 0x366   :  { %5753 = vmatpush1.bf16.msra.mxu0 %v8250_v4  ;;  %v8315_v4 = vcombine.high %v4159_v63, %v4163_v51  ;;  %v8314_v11 = vcombine.low %v4159_v63, %v4163_v51  ;;  %v9525_v63 = vld [vmem:[%s13110_s5 + $0x4] ss:$8 sps:$4 sm:$0xff]   ;;  %v9523_v51 = vld [vmem:[%s13110_s5] ss:$8 sps:$4 sm:$0xff]  }
 0x367   :  { %5839 = vmatpush1.bf16.msra.mxu1 %v8252_v6  ;;  %5754 = vmatprep.subr.bf16.mxu0 %v8259_v7  ;;  %v8317_v6 = vcombine.high %v4160_v45, %v4164_v0  ;;  %v4167_v7 = vld [vmem:[%s13108_s3 + $0x690] sm:$0xff] }
 0x368   :  { %5840 = vmatprep.subr.bf16.mxu1 %v8261_v54  ;;  %v4171_v54 = vld [vmem:[%s13108_s3 + $0x6b0] sm:$0xff] }
 0x369   :  { %v8322_v18 = vcombine.low %v4167_v7, %v4171_v54  ;;  %v9528_v45 = vld [vmem:[%s13110_s5 + $0x14] ss:$8 sps:$4 sm:$0xff]   ;;  %v9526_v0 = vld [vmem:[%s13110_s5 + $0x10] ss:$8 sps:$4 sm:$0xff]  }
 0x36a   :  { %5755 = vmatpush1.bf16.msra.mxu0 %v8258_v12  ;;  %v8323_v12 = vcombine.high %v4167_v7, %v4171_v54  ;;  %v9535_v7 = vld [vmem:[%s13110_s5 + $0x40] ss:$8 sps:$4 sm:$0xff]   ;;  %v9540_v54 = vld [vmem:[%s13110_s5 + $0x54] ss:$8 sps:$4 sm:$0xff]  }
 0x36b   :  { %5841 = vmatpush1.bf16.msra.mxu1 %v8260_v13  ;;  %5756 = vmatprep.subr.bf16.mxu0 %v8267_v14  ;;  %v8325_v13 = vcombine.high %v4168_v48, %v4172_v10  ;;  %v4175_v14 = vld [vmem:[%s13108_s3 + $0x6d0] sm:$0xff]  ;;  %v9543_v10 = vld [vmem:[%s13110_s5 + $0x64] ss:$8 sps:$4 sm:$0xff]  }
 0x36c   :  { %5842 = vmatprep.subr.bf16.mxu1 %v8269_v15  ;;  %v4179_v15 = vld [vmem:[%s13108_s3 + $0x6f0] sm:$0xff] }
 0x36d   :  { %v8330_v22 = vcombine.low %v4175_v14, %v4179_v15  ;;  %v9538_v48 = vld [vmem:[%s13110_s5 + $0x50] ss:$8 sps:$4 sm:$0xff]  }
 0x36e   :  { %5757 = vmatpush1.bf16.msra.mxu0 %v8266_v20  ;;  %v8331_v20 = vcombine.high %v4175_v14, %v4179_v15  ;;  %v9547_v14 = vld [vmem:[%s13110_s5 + $0x80] ss:$8 sps:$4 sm:$0xff]   ;;  %v9552_v15 = vld [vmem:[%s13110_s5 + $0x94] ss:$8 sps:$4 sm:$0xff]  }
 0x36f   :  { %5843 = vmatpush1.bf16.msra.mxu1 %v8268_v23  ;;  %5758 = vmatprep.subr.bf16.mxu0 %v8275_v24  ;;  %v8333_v23 = vcombine.high %v4176_v33, %v4180_v1  ;;  %v4183_v24 = vld [vmem:[%s13108_s3 + $0x710] sm:$0xff]  ;;  %v9555_v1 = vld [vmem:[%s13110_s5 + $0xa4] ss:$8 sps:$4 sm:$0xff]  }
 0x370   :  { %5844 = vmatprep.subr.bf16.mxu1 %v8277_v26  ;;  %v4187_v26 = vld [vmem:[%s13108_s3 + $0x730] sm:$0xff] }
 0x371   :  { %v8338_v32 = vcombine.low %v4183_v24, %v4187_v26  ;;  %v9550_v33 = vld [vmem:[%s13110_s5 + $0x90] ss:$8 sps:$4 sm:$0xff]  }
 0x372   :  { %5759 = vmatpush1.bf16.msra.mxu0 %v8274_v38  ;;  %v8339_v38 = vcombine.high %v4183_v24, %v4187_v26  ;;  %v9559_v24 = vld [vmem:[%s13110_s5 + $0xc0] ss:$8 sps:$4 sm:$0xff]   ;;  %v9564_v26 = vld [vmem:[%s13110_s5 + $0xd4] ss:$8 sps:$4 sm:$0xff]  }
 0x373   :  { %5845 = vmatpush1.bf16.msra.mxu1 %v8276_v27  ;;  %5760 = vmatprep.subr.bf16.mxu0 %v8283_v52  ;;  %v8341_v27 = vcombine.high %v4184_v29, %v4188_v21  ;;  %v4191_v52 = vld [vmem:[%s13108_s3 + $0x750] sm:$0xff]  ;;  %v9567_v21 = vld [vmem:[%s13110_s5 + $0xe4] ss:$8 sps:$4 sm:$0xff]  }
 0x374   :  { %5846 = vmatprep.subr.bf16.mxu1 %v8285_v60  ;;  %v4195_v60 = vld [vmem:[%s13108_s3 + $0x770] sm:$0xff] }
 0x375   :  { %v8346_v56 = vcombine.low %v4191_v52, %v4195_v60  ;;  %v9562_v29 = vld [vmem:[%s13110_s5 + $0xd0] ss:$8 sps:$4 sm:$0xff]  }
 0x376   :  { %5761 = vmatpush1.bf16.msra.mxu0 %v8282_v40  ;;  %v8347_v40 = vcombine.high %v4191_v52, %v4195_v60  ;;  %v12541_v52 = vld [vmem:[%s13111_s4] sm:$0xff] }
 0x377   :  { %5847 = vmatpush1.bf16.msra.mxu1 %v8284_v41  ;;  %5762 = vmatprep.subr.bf16.mxu0 %v8291_v42  ;;  %v8349_v41 = vcombine.high %v4192_v36, %v4196_v37  ;;  %v4199_v42 = vld [vmem:[%s13108_s3 + $0x790] sm:$0xff]  ;;  %v4218_v60 = vrot.slane %v12541_v52, %v11798_v31  ;;  %v4226_v36 = vrot.slane %v12541_v52, %v591_v3 }
 0x378   :  { %5848 = vmatprep.subr.bf16.mxu1 %v8293_v25  ;;  %v4203_v25 = vld [vmem:[%s13108_s3 + $0x7b0] sm:$0xff]  ;;  %v4222_v37 = vrot.slane %v12541_v52, %v11806_v35 }
 0x379   :  { %v8354_v46 = vcombine.low %v4199_v42, %v4203_v25 }
 0x37a   :  { %5763 = vmatpush1.bf16.msra.mxu0 %v8290_v58  ;;  %v8355_v58 = vcombine.high %v4199_v42, %v4203_v25 }
 0x37b   :  { %5849 = vmatpush1.bf16.msra.mxu1 %v8292_v47  ;;  %5764 = vmatprep.subr.bf16.mxu0 %v8299_v49  ;;  %v8357_v47 = vcombine.high %v4200_v9, %v4204_v34  ;;  %v4207_v49 = vld [vmem:[%s13108_s3 + $0x7d0] sm:$0xff] }
 0x37c   :  { %5850 = vmatprep.subr.bf16.mxu1 %v8301_v61  ;;  %v4211_v61 = vld [vmem:[%s13108_s3 + $0x7f0] sm:$0xff] }
 0x37e   :  { %5765 = vmatpush1.bf16.msra.mxu0 %v8298_v62  ;;  %v8363_v62 = vcombine.high %v4207_v49, %v4211_v61 }
 0x37f   :  { %5851 = vmatpush1.bf16.msra.mxu1 %v8300_v28  ;;  %5766 = vmatprep.subr.bf16.mxu0 %v8307_v43  ;;  %v8365_v28 = vcombine.high %v4208_v50, %v4212_v8  ;;  %v8362_v43 = vcombine.low %v4207_v49, %v4211_v61 }
 0x380   :  { %5852 = vmatprep.subr.bf16.mxu1 %v8309_v5  ;;  %v8364_v5 = vcombine.low %v4208_v50, %v4212_v8 }
 0x382   :  { %5767 = vmatpush1.bf16.msra.mxu0 %v8306_v55  ;;  %v9531_v55 = vld [vmem:[%s13110_s5 + $0x24] ss:$8 sps:$4 sm:$0xff]  }
 0x383   :  { %5853 = vmatpush1.bf16.msra.mxu1 %v8308_v53  ;;  %5768 = vmatprep.subr.bf16.mxu0 %v8315_v4  ;;  %v9529_v53 = vld [vmem:[%s13110_s5 + $0x20] ss:$8 sps:$4 sm:$0xff]   ;;  %v9532_v4 = vld [vmem:[%s13110_s5 + $0x30] ss:$8 sps:$4 sm:$0xff]  }
 0x384   :  { %5854 = vmatprep.subr.bf16.mxu1 %v8317_v6  ;;  %v9537_v6 = vld [vmem:[%s13110_s5 + $0x44] ss:$8 sps:$4 sm:$0xff]  }
 0x386   :  { %5769 = vmatpush1.bf16.msra.mxu0 %v8314_v11  ;;  %v9541_v11 = vld [vmem:[%s13110_s5 + $0x60] ss:$8 sps:$4 sm:$0xff]  }
 0x387   :  { %5855 = vmatpush1.bf16.msra.mxu1 %v8316_v44  ;;  %5770 = vmatprep.subr.bf16.mxu0 %v8323_v12  ;;  %v9546_v44 = vld [vmem:[%s13110_s5 + $0x74] ss:$8 sps:$4 sm:$0xff]   ;;  %v9544_v12 = vld [vmem:[%s13110_s5 + $0x70] ss:$8 sps:$4 sm:$0xff]  }
 0x388   :  { %5856 = vmatprep.subr.bf16.mxu1 %v8325_v13  ;;  %v9549_v13 = vld [vmem:[%s13110_s5 + $0x84] ss:$8 sps:$4 sm:$0xff]  }
 0x38a   :  { %5771 = vmatpush1.bf16.msra.mxu0 %v8322_v18  ;;  %v9553_v18 = vld [vmem:[%s13110_s5 + $0xa0] ss:$8 sps:$4 sm:$0xff]  }
 0x38b   :  { %5857 = vmatpush1.bf16.msra.mxu1 %v8324_v19  ;;  %5772 = vmatprep.subr.bf16.mxu0 %v8331_v20  ;;  %v9558_v19 = vld [vmem:[%s13110_s5 + $0xb4] ss:$8 sps:$4 sm:$0xff]   ;;  %v9556_v20 = vld [vmem:[%s13110_s5 + $0xb0] ss:$8 sps:$4 sm:$0xff]  }
 0x38c   :  { %5858 = vmatprep.subr.bf16.mxu1 %v8333_v23  ;;  %v9561_v23 = vld [vmem:[%s13110_s5 + $0xc4] ss:$8 sps:$4 sm:$0xff]  }
 0x38e   :  { %5773 = vmatpush1.bf16.msra.mxu0 %v8330_v22  ;;  %v9565_v22 = vld [vmem:[%s13110_s5 + $0xe0] ss:$8 sps:$4 sm:$0xff]  }
 0x38f   :  { %5859 = vmatpush1.bf16.msra.mxu1 %v8332_v2  ;;  %5774 = vmatprep.subr.bf16.mxu0 %v8339_v38  ;;  %v9570_v2 = vld [vmem:[%s13110_s5 + $0xf4] ss:$8 sps:$4 sm:$0xff]   ;;  %v9568_v38 = vld [vmem:[%s13110_s5 + $0xf0] ss:$8 sps:$4 sm:$0xff]  }
 0x390   :  { %5860 = vmatprep.subr.bf16.mxu1 %v8341_v27  ;;  %v9573_v27 = vld [vmem:[%s13110_s5 + $0x104] ss:$8 sps:$4 sm:$0xff]  }
 0x392   :  { %5775 = vmatpush1.bf16.msra.mxu0 %v8338_v32  ;;  %v4230_v32 = vrot.slane %v12541_v52, %v595_v17 }
 0x393   :  { %5861 = vmatpush1.bf16.msra.mxu1 %v8340_v39  ;;  %5776 = vmatprep.subr.bf16.mxu0 %v8347_v40 }
 0x394   :  { %5862 = vmatprep.subr.bf16.mxu1 %v8349_v41 }
 0x396   :  { %5777 = vmatpush1.bf16.msra.mxu0 %v8346_v56 }
 0x397   :  { %5863 = vmatpush1.bf16.msra.mxu1 %v8348_v57  ;;  %5778 = vmatprep.subr.bf16.mxu0 %v8355_v58 }
 0x398   :  { %5864 = vmatprep.subr.bf16.mxu1 %v8357_v47 }
 0x39a   :  { %5779 = vmatpush1.bf16.msra.mxu0 %v8354_v46 }
 0x39b   :  { %5865 = vmatpush1.bf16.msra.mxu1 %v8356_v59  ;;  %5780 = vmatprep.subr.bf16.mxu0 %v8363_v62 }
 0x39c   :  { %5866 = vmatprep.subr.bf16.mxu1 %v8365_v28 }
 0x39e   :  { %5781 = vmatpush1.bf16.msra.mxu0 %v8362_v43 }
 0x39f   :  { %5867 = vmatpush1.bf16.msra.mxu1 %v8364_v5  ;;  %6715 = vmatprep.subr.bf16.mxu0 %v9525_v63 }
 0x3a1   :  { %5783 = vmatmul.mubr.bf16.vlgmr.msra.gmra.mrb[8].mxu0 %v12048_v16 }
 0x3a2   :  { %5869 = vmatmul.mubr.bf16.vlgmr.msra.gmra.mrb[12].mxu1 %v12048_v16  ;;  %6716 = vmatpush1.bf16.msra.mxu0 %v9523_v51  ;;  %v9534_v16 = vld [vmem:[%s13110_s5 + $0x34] ss:$8 sps:$4 sm:$0xff]  }
 0x3a3   :  { %6717 = vmatprep.subr.bf16.mxu0 %v9528_v45 }
 0x3a6   :  { %6718 = vmatpush1.bf16.msra.mxu0 %v9526_v0 }
 0x3a7   :  { %6719 = vmatprep.subr.bf16.mxu0 %v9531_v55 }
 0x3aa   :  { %6720 = vmatpush1.bf16.msra.mxu0 %v9529_v53 }
 0x3ab   :  { %6721 = vmatprep.subr.bf16.mxu0 %v9534_v16 }
 0x3ae   :  { %6722 = vmatpush1.bf16.msra.mxu0 %v9532_v4 }
 0x3af   :  { %6723 = vmatprep.subr.bf16.mxu0 %v9537_v6 }
 0x3b2   :  { %6724 = vmatpush1.bf16.msra.mxu0 %v9535_v7 }
 0x3b3   :  { %6725 = vmatprep.subr.bf16.mxu0 %v9540_v54 }
 0x3b6   :  { %6726 = vmatpush1.bf16.msra.mxu0 %v9538_v48 }
 0x3b7   :  { %6727 = vmatprep.subr.bf16.mxu0 %v9543_v10  ;;  %v9571_v10 = vld [vmem:[%s13110_s5 + $0x100] ss:$8 sps:$4 sm:$0xff]  }
 0x3ba   :  { %6728 = vmatpush1.bf16.msra.mxu0 %v9541_v11 }
 0x3bb   :  { %6729 = vmatprep.subr.bf16.mxu0 %v9546_v44  ;;  %v9576_v44 = vld [vmem:[%s13110_s5 + $0x114] ss:$8 sps:$4 sm:$0xff]  }
 0x3be   :  { %6730 = vmatpush1.bf16.msra.mxu0 %v9544_v12  ;;  %v9574_v12 = vld [vmem:[%s13110_s5 + $0x110] ss:$8 sps:$4 sm:$0xff]  }
 0x3bf   :  { %6731 = vmatprep.subr.bf16.mxu0 %v9549_v13  ;;  %v9579_v13 = vld [vmem:[%s13110_s5 + $0x124] ss:$8 sps:$4 sm:$0xff]  }
 0x3c2   :  { %6732 = vmatpush1.bf16.msra.mxu0 %v9547_v14  ;;  %v9577_v14 = vld [vmem:[%s13110_s5 + $0x120] ss:$8 sps:$4 sm:$0xff]  }
 0x3c3   :  { %6733 = vmatprep.subr.bf16.mxu0 %v9552_v15  ;;  %v9582_v15 = vld [vmem:[%s13110_s5 + $0x134] ss:$8 sps:$4 sm:$0xff]  }
 0x3c6   :  { %6734 = vmatpush1.bf16.msra.mxu0 %v9550_v33  ;;  %v9580_v33 = vld [vmem:[%s13110_s5 + $0x130] ss:$8 sps:$4 sm:$0xff]  }
 0x3c7   :  { %6735 = vmatprep.subr.bf16.mxu0 %v9555_v1  ;;  %v9585_v1 = vld [vmem:[%s13110_s5 + $0x144] ss:$8 sps:$4 sm:$0xff]  }
 0x3ca   :  { %6736 = vmatpush1.bf16.msra.mxu0 %v9553_v18  ;;  %v9583_v18 = vld [vmem:[%s13110_s5 + $0x140] ss:$8 sps:$4 sm:$0xff]  }
 0x3cb   :  { %6737 = vmatprep.subr.bf16.mxu0 %v9558_v19  ;;  %v9588_v19 = vld [vmem:[%s13110_s5 + $0x154] ss:$8 sps:$4 sm:$0xff]  }
 0x3ce   :  { %6738 = vmatpush1.bf16.msra.mxu0 %v9556_v20  ;;  %v9586_v20 = vld [vmem:[%s13110_s5 + $0x150] ss:$8 sps:$4 sm:$0xff]  }
 0x3cf   :  { %6739 = vmatprep.subr.bf16.mxu0 %v9561_v23  ;;  %v9591_v23 = vld [vmem:[%s13110_s5 + $0x164] ss:$8 sps:$4 sm:$0xff]  }
 0x3d2   :  { %6740 = vmatpush1.bf16.msra.mxu0 %v9559_v24  ;;  %v9589_v24 = vld [vmem:[%s13110_s5 + $0x160] ss:$8 sps:$4 sm:$0xff]  }
 0x3d3   :  { %6741 = vmatprep.subr.bf16.mxu0 %v9564_v26  ;;  %v9594_v26 = vld [vmem:[%s13110_s5 + $0x174] ss:$8 sps:$4 sm:$0xff]  }
 0x3d6   :  { %6742 = vmatpush1.bf16.msra.mxu0 %v9562_v29  ;;  %v9592_v29 = vld [vmem:[%s13110_s5 + $0x170] ss:$8 sps:$4 sm:$0xff]  }
 0x3d7   :  { %6743 = vmatprep.subr.bf16.mxu0 %v9567_v21  ;;  %v9597_v21 = vld [vmem:[%s13110_s5 + $0x184] ss:$8 sps:$4 sm:$0xff]  }
 0x3da   :  { %6744 = vmatpush1.bf16.msra.mxu0 %v9565_v22  ;;  %v9595_v22 = vld [vmem:[%s13110_s5 + $0x180] ss:$8 sps:$4 sm:$0xff]  }
 0x3db   :  { %6745 = vmatprep.subr.bf16.mxu0 %v9570_v2  ;;  %v9600_v2 = vld [vmem:[%s13110_s5 + $0x194] ss:$8 sps:$4 sm:$0xff]  }
 0x3de   :  { %6746 = vmatpush1.bf16.msra.mxu0 %v9568_v38  ;;  %v9598_v38 = vld [vmem:[%s13110_s5 + $0x190] ss:$8 sps:$4 sm:$0xff]  }
 0x3df   :  { %6758 = vmatprep.subr.bf16.mxu0 %v9573_v27  ;;  %v9603_v27 = vld [vmem:[%s13110_s5 + $0x1a4] ss:$8 sps:$4 sm:$0xff]  }
 0x3f4   :  { %v5612_v39 = vpop.f32.mrb[4].mxu0  ;;  %v5698_v40 = vpop.f32.mrb[8].mxu1 }
 0x3f5   :  { %v8653_v41 = vadd.f32 %v5612_v39, %v4218_v60  ;;  %v8657_v42 = vadd.f32 %v5698_v40, %v4226_v36  ;;  %v5614_v25 = vpop.f32.mrb[5].mxu0  ;;  %v5700_v9 = vpop.f32.mrb[9].mxu1  ;;  %v9607_v39 = vld [vmem:[%s13110_s5 + $0x1c0] ss:$8 sps:$4 sm:$0xff]   ;;  %v9612_v40 = vld [vmem:[%s13110_s5 + $0x1d4] ss:$8 sps:$4 sm:$0xff]  }
 0x3f6   :  { %v8654_v34 = vadd.f32 %v5614_v25, %v4222_v37  ;;  %v8658_v56 = vadd.f32 %v5700_v9, %v4230_v32  ;;  %v5616_v57 = vpop.f32.mrb[6].mxu0  ;;  %v5702_v58 = vpop.f32.mrb[10].mxu1  ;;  %v9613_v25 = vld [vmem:[%s13110_s5 + $0x1e0] ss:$8 sps:$4 sm:$0xff]   ;;  %v9618_v9 = vld [vmem:[%s13110_s5 + $0x1f4] ss:$8 sps:$4 sm:$0xff]  }
 0x3f7   :  { %vm5879_vm8 = vcmp.ge.f32.partialorder %v8653_v41, 0.0  ;;  %v5895_v47 = vmul.f32 0.2, %v8653_v41  ;;  %vm5881_vm9 = vcmp.ge.f32.partialorder %v8657_v42, 0.0  ;;  %v5897_v3 = vmul.f32 0.2, %v8657_v42 }
 0x3f8   :  { %vm5880_vm10 = vcmp.ge.f32.partialorder %v8654_v34, 0.0  ;;  %v5896_v49 = vmul.f32 0.2, %v8654_v34  ;;  %vm5882_vm11 = vcmp.ge.f32.partialorder %v8658_v56, 0.0  ;;  %v5898_v61 = vmul.f32 0.2, %v8658_v56 }
 0x3f9   :  { %v8655_v50 = vadd.f32 %v5616_v57, %v4218_v60  ;;  %v8659_v17 = vadd.f32 %v5702_v58, %v4226_v36  ;;  %v5618_v8 = vpop.f32.mrb[7].mxu0  ;;  %v5704_v46 = vpop.f32.mrb[11].mxu1  ;;  %v5911_v59 = vsel %vm5879_vm8, %v8653_v41, %v5895_v47  ;;  %v12553_v62 = vsel %vm5881_vm9, %v8657_v42, %v5897_v3  ;;  %v9601_v60 = vld [vmem:[%s13110_s5 + $0x1a0] ss:$8 sps:$4 sm:$0xff]   ;;  %v9606_v36 = vld [vmem:[%s13110_s5 + $0x1b4] ss:$8 sps:$4 sm:$0xff]  }
 0x3fa   :  { %v8656_v28 = vadd.f32 %v5618_v8, %v4222_v37  ;;  %v8660_v43 = vadd.f32 %v5704_v46, %v4230_v32  ;;  %v5912_v53 = vsel %vm5880_vm10, %v8654_v34, %v5896_v49  ;;  %v5914_v16 = vsel %vm5882_vm11, %v8658_v56, %v5898_v61  ;;  %v9604_v37 = vld [vmem:[%s13110_s5 + $0x1b0] ss:$8 sps:$4 sm:$0xff]   ;;  %v9609_v32 = vld [vmem:[%s13110_s5 + $0x1c4] ss:$8 sps:$4 sm:$0xff]   ;;  %v9619_v57 = vld [vmem:[%s13110_s5 + $0x200] ss:$8 sps:$4 sm:$0xff]  }
 0x3fb   :  { %vm5887_vm12 = vcmp.ge.f32.partialorder %v8655_v50, 0.0  ;;  %v5903_v5 = vmul.f32 0.2, %v8655_v50  ;;  %vm5889_vm13 = vcmp.ge.f32.partialorder %v8659_v17, 0.0  ;;  %v5905_v63 = vmul.f32 0.2, %v8659_v17 }
 0x3fc   :  { %vm5888_vm14 = vcmp.ge.f32.partialorder %v8656_v28, 0.0  ;;  %v5904_v51 = vmul.f32 0.2, %v8656_v28  ;;  %vm5890_vm15 = vcmp.ge.f32.partialorder %v8660_v43, 0.0  ;;  %v5906_v45 = vmul.f32 0.2, %v8660_v43 }
 0x3fd   :  { %v5919_v0 = vsel %vm5887_vm12, %v8655_v50, %v5903_v5  ;;  %v12555_v55 = vsel %vm5889_vm13, %v8659_v17, %v5905_v63  ;;  %v9610_v41 = vld [vmem:[%s13110_s5 + $0x1d0] ss:$8 sps:$4 sm:$0xff]   ;;  %v9615_v42 = vld [vmem:[%s13110_s5 + $0x1e4] ss:$8 sps:$4 sm:$0xff]   ;;  %v9624_v58 = vld [vmem:[%s13110_s5 + $0x214] ss:$8 sps:$4 sm:$0xff]  }
 0x3fe   :  { %v5927_v4 = vpack.c.bf16 %v5919_v0, %v5911_v59  ;;  %v5929_v6 = vpack.c.bf16 %v12555_v55, %v12553_v62  ;;  %v5920_v7 = vsel %vm5888_vm14, %v8656_v28, %v5904_v51  ;;  %v5922_v54 = vsel %vm5890_vm15, %v8660_v43, %v5906_v45  ;;  %v9616_v34 = vld [vmem:[%s13110_s5 + $0x1f0] ss:$8 sps:$4 sm:$0xff]   ;;  %v9621_v56 = vld [vmem:[%s13110_s5 + $0x204] ss:$8 sps:$4 sm:$0xff]   ;;  %v9715_v49 = vld [vmem:[%s13112_s7] ss:$8 sps:$4 sm:$0xff]  }
 0x3ff   :  { %v5928_v48 = vpack.c.bf16 %v5920_v7, %v5912_v53  ;;  %v5930_v11 = vpack.c.bf16 %v5922_v54, %v5914_v16  ;;  %v9622_v47 = vld [vmem:[%s13110_s5 + $0x210] ss:$8 sps:$4 sm:$0xff]   ;;  %v9627_v3 = vld [vmem:[%s13110_s5 + $0x224] ss:$8 sps:$4 sm:$0xff]   ;;  %v9720_v50 = vld [vmem:[%s13112_s7 + $0x14] ss:$8 sps:$4 sm:$0xff]  }
 0x400   :  { %v9717_v61 = vld [vmem:[%s13112_s7 + $0x4] ss:$8 sps:$4 sm:$0xff]   ;;  %v9625_v17 = vld [vmem:[%s13110_s5 + $0x220] ss:$8 sps:$4 sm:$0xff]   ;;  %v9630_v8 = vld [vmem:[%s13110_s5 + $0x234] ss:$8 sps:$4 sm:$0xff]  }
 0x401   :  { %6747 = vmatprep.mubr.bf16.mxu0 %v5928_v48  ;;  %7105 = vmatprep.subr.bf16.mxu1 %v9717_v61  ;;  %v9718_v46 = vld [vmem:[%s13112_s7 + $0x10] ss:$8 sps:$4 sm:$0xff]   ;;  %v9723_v59 = vld [vmem:[%s13112_s7 + $0x24] ss:$8 sps:$4 sm:$0xff]   ;;  %v9721_v43 = vld [vmem:[%s13112_s7 + $0x20] ss:$8 sps:$4 sm:$0xff]  }
 0x402   :  { %6748 = vmatmul.mubr.bf16.vlgmr.msra.gmra.mrb[12].mxu0 %v5927_v4  ;;  %7106 = vmatpush1.bf16.msra.mxu1 %v9715_v49  ;;  %v9628_v62 = vld [vmem:[%s13110_s5 + $0x230] ss:$8 sps:$4 sm:$0xff]   ;;  %v9633_v28 = vld [vmem:[%s13110_s5 + $0x244] ss:$8 sps:$4 sm:$0xff]   ;;  %v9726_v5 = vld [vmem:[%s13112_s7 + $0x34] ss:$8 sps:$4 sm:$0xff]  }
 0x403   :  { %6759 = vmatpush1.bf16.msra.mxu0 %v9571_v10  ;;  %6790 = vmatprep.mubr.bf16.mxu0 %v5930_v11  ;;  %v9631_v63 = vld [vmem:[%s13110_s5 + $0x240] ss:$8 sps:$4 sm:$0xff]   ;;  %v9636_v51 = vld [vmem:[%s13110_s5 + $0x254] ss:$8 sps:$4 sm:$0xff]   ;;  %v9724_v45 = vld [vmem:[%s13112_s7 + $0x30] ss:$8 sps:$4 sm:$0xff]  }
 0x404   :  { %6760 = vmatprep.subr.bf16.mxu0 %v9576_v44  ;;  %7107 = vmatprep.subr.bf16.mxu1 %v9720_v50  ;;  %v9729_v0 = vld [vmem:[%s13112_s7 + $0x44] ss:$8 sps:$4 sm:$0xff]   ;;  %v9634_v55 = vld [vmem:[%s13110_s5 + $0x250] ss:$8 sps:$4 sm:$0xff]   ;;  %v9727_v16 = vld [vmem:[%s13112_s7 + $0x40] ss:$8 sps:$4 sm:$0xff]  }
 0x405   :  { %v9639_v53 = vld [vmem:[%s13110_s5 + $0x264] ss:$8 sps:$4 sm:$0xff]   ;;  %v9732_v4 = vld [vmem:[%s13112_s7 + $0x54] ss:$8 sps:$4 sm:$0xff]   ;;  %v9730_v54 = vld [vmem:[%s13112_s7 + $0x50] ss:$8 sps:$4 sm:$0xff]  }
 0x406   :  { %7108 = vmatpush1.bf16.msra.mxu1 %v9718_v46  ;;  %v9642_v7 = vld [vmem:[%s13110_s5 + $0x274] ss:$8 sps:$4 sm:$0xff]   ;;  %v9735_v48 = vld [vmem:[%s13112_s7 + $0x64] ss:$8 sps:$4 sm:$0xff]   ;;  %v9640_v10 = vld [vmem:[%s13110_s5 + $0x270] ss:$8 sps:$4 sm:$0xff]  }
 0x407   :  { %6761 = vmatpush1.bf16.msra.mxu0 %v9574_v12  ;;  %7109 = vmatprep.subr.bf16.mxu1 %v9723_v59  ;;  %v9645_v11 = vld [vmem:[%s13110_s5 + $0x284] ss:$8 sps:$4 sm:$0xff]   ;;  %v9733_v44 = vld [vmem:[%s13112_s7 + $0x60] ss:$8 sps:$4 sm:$0xff]   ;;  %v9738_v12 = vld [vmem:[%s13112_s7 + $0x74] ss:$8 sps:$4 sm:$0xff]  }
 0x408   :  { %6762 = vmatprep.subr.bf16.mxu0 %v9579_v13  ;;  %v9643_v13 = vld [vmem:[%s13110_s5 + $0x280] ss:$8 sps:$4 sm:$0xff]  }
 0x40a   :  { %7110 = vmatpush1.bf16.msra.mxu1 %v9721_v43  ;;  %v9661_v43 = vld [vmem:[%s13110_s5 + $0x2e0] ss:$8 sps:$4 sm:$0xff]  }
 0x40b   :  { %6763 = vmatpush1.bf16.msra.mxu0 %v9577_v14  ;;  %7111 = vmatprep.subr.bf16.mxu1 %v9726_v5  ;;  %v9648_v14 = vld [vmem:[%s13110_s5 + $0x294] ss:$8 sps:$4 sm:$0xff]  }
 0x40c   :  { %6764 = vmatprep.subr.bf16.mxu0 %v9582_v15  ;;  %v9736_v15 = vld [vmem:[%s13112_s7 + $0x70] ss:$8 sps:$4 sm:$0xff]   ;;  %v9666_v5 = vld [vmem:[%s13110_s5 + $0x2f4] ss:$8 sps:$4 sm:$0xff]  }
 0x40e   :  { %7112 = vmatpush1.bf16.msra.mxu1 %v9724_v45 }
 0x40f   :  { %6765 = vmatpush1.bf16.msra.mxu0 %v9580_v33  ;;  %7113 = vmatprep.subr.bf16.mxu1 %v9729_v0  ;;  %v9741_v33 = vld [vmem:[%s13112_s7 + $0x84] ss:$8 sps:$4 sm:$0xff]  }
 0x410   :  { %6766 = vmatprep.subr.bf16.mxu0 %v9585_v1  ;;  %v9646_v1 = vld [vmem:[%s13110_s5 + $0x290] ss:$8 sps:$4 sm:$0xff]  }
 0x412   :  { %7114 = vmatpush1.bf16.msra.mxu1 %v9727_v16 }
 0x413   :  { %6767 = vmatpush1.bf16.msra.mxu0 %v9583_v18  ;;  %7115 = vmatprep.subr.bf16.mxu1 %v9732_v4  ;;  %v9651_v18 = vld [vmem:[%s13110_s5 + $0x2a4] ss:$8 sps:$4 sm:$0xff]  }
 0x414   :  { %6768 = vmatprep.subr.bf16.mxu0 %v9588_v19  ;;  %v9739_v19 = vld [vmem:[%s13112_s7 + $0x80] ss:$8 sps:$4 sm:$0xff]  }
 0x416   :  { %7116 = vmatpush1.bf16.msra.mxu1 %v9730_v54 }
 0x417   :  { %6769 = vmatpush1.bf16.msra.mxu0 %v9586_v20  ;;  %7117 = vmatprep.subr.bf16.mxu1 %v9735_v48  ;;  %v9744_v20 = vld [vmem:[%s13112_s7 + $0x94] ss:$8 sps:$4 sm:$0xff]  }
 0x418   :  { %6770 = vmatprep.subr.bf16.mxu0 %v9591_v23  ;;  %v9649_v23 = vld [vmem:[%s13110_s5 + $0x2a0] ss:$8 sps:$4 sm:$0xff]  }
 0x41a   :  { %7118 = vmatpush1.bf16.msra.mxu1 %v9733_v44 }
 0x41b   :  { %6771 = vmatpush1.bf16.msra.mxu0 %v9589_v24  ;;  %7119 = vmatprep.subr.bf16.mxu1 %v9738_v12  ;;  %v9654_v24 = vld [vmem:[%s13110_s5 + $0x2b4] ss:$8 sps:$4 sm:$0xff]  }
 0x41c   :  { %6772 = vmatprep.subr.bf16.mxu0 %v9594_v26  ;;  %v9742_v26 = vld [vmem:[%s13112_s7 + $0x90] ss:$8 sps:$4 sm:$0xff]  }
 0x41e   :  { %7120 = vmatpush1.bf16.msra.mxu1 %v9736_v15 }
 0x41f   :  { %6773 = vmatpush1.bf16.msra.mxu0 %v9592_v29  ;;  %7121 = vmatprep.subr.bf16.mxu1 %v9741_v33  ;;  %v9747_v29 = vld [vmem:[%s13112_s7 + $0xa4] ss:$8 sps:$4 sm:$0xff]  }
 0x420   :  { %6774 = vmatprep.subr.bf16.mxu0 %v9597_v21  ;;  %v9652_v21 = vld [vmem:[%s13110_s5 + $0x2b0] ss:$8 sps:$4 sm:$0xff]  }
 0x422   :  { %7122 = vmatpush1.bf16.msra.mxu1 %v9739_v19 }
 0x423   :  { %6775 = vmatpush1.bf16.msra.mxu0 %v9595_v22  ;;  %7123 = vmatprep.subr.bf16.mxu1 %v9744_v20  ;;  %v9657_v22 = vld [vmem:[%s13110_s5 + $0x2c4] ss:$8 sps:$4 sm:$0xff]  }
 0x424   :  { %6776 = vmatprep.subr.bf16.mxu0 %v9600_v2  ;;  %v9745_v2 = vld [vmem:[%s13112_s7 + $0xa0] ss:$8 sps:$4 sm:$0xff]  }
 0x426   :  { %7124 = vmatpush1.bf16.msra.mxu1 %v9742_v26  ;;  %v9672_v26 = vld [vmem:[%s13110_s5 + $0x314] ss:$8 sps:$4 sm:$0xff]  }
 0x427   :  { %6777 = vmatpush1.bf16.msra.mxu0 %v9598_v38  ;;  %v4233_v38 = vsub.s32 4, %v11795_v30  ;;  %7125 = vmatprep.subr.bf16.mxu1 %v9747_v29  ;;  %v9670_v29 = vld [vmem:[%s13110_s5 + $0x310] ss:$8 sps:$4 sm:$0xff]  }
 0x428   :  { %6778 = vmatprep.subr.bf16.mxu0 %v9603_v27  ;;  %v9750_v27 = vld [vmem:[%s13112_s7 + $0xb4] ss:$8 sps:$4 sm:$0xff]  }
 0x42a   :  { %7126 = vmatpush1.bf16.msra.mxu1 %v9745_v2  ;;  %v9678_v2 = vld [vmem:[%s13110_s5 + $0x334] ss:$8 sps:$4 sm:$0xff]  }
 0x42b   :  { %6779 = vmatpush1.bf16.msra.mxu0 %v9601_v60  ;;  %v4241_v60 = vsub.s32 6, %v11795_v30  ;;  %7127 = vmatprep.subr.bf16.mxu1 %v9750_v27  ;;  %v9681_v27 = vld [vmem:[%s13110_s5 + $0x344] ss:$8 sps:$4 sm:$0xff]  }
 0x42c   :  { %6780 = vmatprep.subr.bf16.mxu0 %v9606_v36  ;;  %v4237_v36 = vsub.s32 5, %v11795_v30 }
 0x42f   :  { %6781 = vmatpush1.bf16.msra.mxu0 %v9604_v37  ;;  %v9655_v37 = vld [vmem:[%s13110_s5 + $0x2c0] ss:$8 sps:$4 sm:$0xff]  }
 0x430   :  { %6782 = vmatprep.subr.bf16.mxu0 %v9609_v32  ;;  %v4245_v32 = vsub.s32 7, %v11795_v30  ;;  %v4238_v30 = vrot.slane %v12541_v52, %v4237_v36  ;;  %v9684_v36 = vld [vmem:[%s13110_s5 + $0x354] ss:$8 sps:$4 sm:$0xff]  }
 0x433   :  { %6783 = vmatpush1.bf16.msra.mxu0 %v9607_v39  ;;  %v9660_v39 = vld [vmem:[%s13110_s5 + $0x2d4] ss:$8 sps:$4 sm:$0xff]  }
 0x434   :  { %6784 = vmatprep.subr.bf16.mxu0 %v9612_v40  ;;  %v9748_v40 = vld [vmem:[%s13112_s7 + $0xb0] ss:$8 sps:$4 sm:$0xff]  }
 0x435   :  { %7128 = vmatpush1.bf16.msra.mxu1 %v9748_v40  ;;  %v9690_v40 = vld [vmem:[%s13110_s5 + $0x374] ss:$8 sps:$4 sm:$0xff]  }
 0x437   :  { %6785 = vmatpush1.bf16.msra.mxu0 %v9610_v41  ;;  %v4234_v41 = vrot.slane %v12541_v52, %v4233_v38  ;;  %v9676_v38 = vld [vmem:[%s13110_s5 + $0x330] ss:$8 sps:$4 sm:$0xff]  }
 0x438   :  { %6786 = vmatprep.subr.bf16.mxu0 %v9615_v42  ;;  %v9753_v42 = vld [vmem:[%s13112_s7 + $0xc4] ss:$8 sps:$4 sm:$0xff]  }
 0x439   :  { %7129 = vmatprep.subr.bf16.mxu1 %v9753_v42  ;;  %v9693_v42 = vld [vmem:[%s13110_s5 + $0x384] ss:$8 sps:$4 sm:$0xff]  }
 0x43b   :  { %6787 = vmatpush1.bf16.msra.mxu0 %v9613_v25  ;;  %v4242_v25 = vrot.slane %v12541_v52, %v4241_v60  ;;  %v9679_v60 = vld [vmem:[%s13110_s5 + $0x340] ss:$8 sps:$4 sm:$0xff]  }
 0x43c   :  { %6788 = vmatprep.subr.bf16.mxu0 %v9618_v9  ;;  %v9658_v9 = vld [vmem:[%s13110_s5 + $0x2d0] ss:$8 sps:$4 sm:$0xff]  }
 0x43f   :  { %6789 = vmatpush1.bf16.msra.mxu0 %v9616_v34  ;;  %v4246_v34 = vrot.slane %v12541_v52, %v4245_v32  ;;  %v9687_v32 = vld [vmem:[%s13110_s5 + $0x364] ss:$8 sps:$4 sm:$0xff]  }
 0x440   :  { %6801 = vmatprep.subr.bf16.mxu0 %v9621_v56 }
 0x442   :  { %6791 = vmatmul.mubr.bf16.vlgmr.msra.gmra.mrb[12].mxu0 %v5929_v6  ;;  %v9637_v6 = vld [vmem:[%s13110_s5 + $0x260] ss:$8 sps:$4 sm:$0xff]  }
 0x443   :  { %6802 = vmatpush1.bf16.msra.mxu0 %v9619_v57  ;;  %v9663_v57 = vld [vmem:[%s13110_s5 + $0x2e4] ss:$8 sps:$4 sm:$0xff]  }
 0x444   :  { %6803 = vmatprep.subr.bf16.mxu0 %v9624_v58  ;;  %v9751_v58 = vld [vmem:[%s13112_s7 + $0xc0] ss:$8 sps:$4 sm:$0xff]  }
 0x445   :  { %7130 = vmatpush1.bf16.msra.mxu1 %v9751_v58  ;;  %v9700_v58 = vld [vmem:[%s13110_s5 + $0x3b0] ss:$8 sps:$4 sm:$0xff]  }
 0x447   :  { %6804 = vmatpush1.bf16.msra.mxu0 %v9622_v47 }
 0x448   :  { %6805 = vmatprep.subr.bf16.mxu0 %v9627_v3 }
 0x44b   :  { %6806 = vmatpush1.bf16.msra.mxu0 %v9625_v17 }
 0x44c   :  { %6807 = vmatprep.subr.bf16.mxu0 %v9630_v8 }
 0x44f   :  { %6808 = vmatpush1.bf16.msra.mxu0 %v9628_v62 }
 0x450   :  { %6809 = vmatprep.subr.bf16.mxu0 %v9633_v28 }
 0x453   :  { %6810 = vmatpush1.bf16.msra.mxu0 %v9631_v63 }
 0x454   :  { %6811 = vmatprep.subr.bf16.mxu0 %v9636_v51 }
 0x457   :  { %6812 = vmatpush1.bf16.msra.mxu0 %v9634_v55 }
 0x458   :  { %6813 = vmatprep.subr.bf16.mxu0 %v9639_v53 }
 0x45b   :  { %6814 = vmatpush1.bf16.msra.mxu0 %v9637_v6 }
 0x45c   :  { %6815 = vmatprep.subr.bf16.mxu0 %v9642_v7  ;;  %v9664_v7 = vld [vmem:[%s13110_s5 + $0x2f0] ss:$8 sps:$4 sm:$0xff]  }
 0x45f   :  { %6816 = vmatpush1.bf16.msra.mxu0 %v9640_v10  ;;  %v9669_v10 = vld [vmem:[%s13110_s5 + $0x304] ss:$8 sps:$4 sm:$0xff]  }
 0x460   :  { %6817 = vmatprep.subr.bf16.mxu0 %v9645_v11 }
 0x463   :  { %6818 = vmatpush1.bf16.msra.mxu0 %v9643_v13 }
 0x464   :  { %6819 = vmatprep.subr.bf16.mxu0 %v9648_v14 }
 0x467   :  { %6820 = vmatpush1.bf16.msra.mxu0 %v9646_v1 }
 0x468   :  { %6821 = vmatprep.subr.bf16.mxu0 %v9651_v18 }
 0x46b   :  { %6822 = vmatpush1.bf16.msra.mxu0 %v9649_v23  ;;  %v9667_v23 = vld [vmem:[%s13110_s5 + $0x300] ss:$8 sps:$4 sm:$0xff]  }
 0x46c   :  { %6823 = vmatprep.subr.bf16.mxu0 %v9654_v24 }
 0x46f   :  { %6824 = vmatpush1.bf16.msra.mxu0 %v9652_v21  ;;  %v9675_v21 = vld [vmem:[%s13110_s5 + $0x324] ss:$8 sps:$4 sm:$0xff]  }
 0x470   :  { %6825 = vmatprep.subr.bf16.mxu0 %v9657_v22  ;;  %v9673_v22 = vld [vmem:[%s13110_s5 + $0x320] ss:$8 sps:$4 sm:$0xff]  }
 0x473   :  { %6826 = vmatpush1.bf16.msra.mxu0 %v9655_v37  ;;  %v9682_v37 = vld [vmem:[%s13110_s5 + $0x350] ss:$8 sps:$4 sm:$0xff]  }
 0x474   :  { %v5784_v56 = vpop.f32.mrb[8].mxu0  ;;  %6827 = vmatprep.subr.bf16.mxu0 %v9660_v39  ;;  %v9685_v39 = vld [vmem:[%s13110_s5 + $0x360] ss:$8 sps:$4 sm:$0xff]  }
 0x475   :  { %v8661_v47 = vadd.f32 %v5784_v56, %v4234_v41  ;;  %v5870_v3 = vpop.f32.mrb[12].mxu1  ;;  %v5786_v49 = vpop.f32.mrb[9].mxu0  ;;  %v9697_v56 = vld [vmem:[%s13110_s5 + $0x3a0] ss:$8 sps:$4 sm:$0xff]  }
 0x476   :  { %v8665_v61 = vadd.f32 %v5870_v3, %v4242_v25  ;;  %v8662_v50 = vadd.f32 %v5786_v49, %v4238_v30  ;;  %v5872_v17 = vpop.f32.mrb[13].mxu1  ;;  %v5788_v8 = vpop.f32.mrb[10].mxu0  ;;  %v9703_v3 = vld [vmem:[%s13110_s5 + $0x3c0] ss:$8 sps:$4 sm:$0xff]   ;;  %v9708_v49 = vld [vmem:[%s13110_s5 + $0x3d4] ss:$8 sps:$4 sm:$0xff]  }
 0x477   :  { %v5899_v52 = vmul.f32 0.2, %v8661_v47  ;;  %v8666_v46 = vadd.f32 %v5872_v17, %v4246_v34  ;;  %6828 = vmatpush1.bf16.msra.mxu0 %v9658_v9  ;;  %v8663_v59 = vadd.f32 %v5788_v8, %v4234_v41  ;;  %v5874_v62 = vpop.f32.mrb[14].mxu1  ;;  %v5790_v28 = vpop.f32.mrb[11].mxu0  ;;  %vm5883_vm0 = vcmp.ge.f32.partialorder %v8661_v47, 0.0 }
 0x478   :  { %6829 = vmatprep.subr.bf16.mxu0 %v9663_v57  ;;  %vm5885_vm1 = vcmp.ge.f32.partialorder %v8665_v61, 0.0  ;;  %v5901_v63 = vmul.f32 0.2, %v8665_v61  ;;  %vm5884_vm2 = vcmp.ge.f32.partialorder %v8662_v50, 0.0  ;;  %v5876_v51 = vpop.f32.mrb[15].mxu1  ;;  %v8667_v55 = vadd.f32 %v5874_v62, %v4242_v25 }
 0x479   :  { %vm5891_vm3 = vcmp.ge.f32.partialorder %v8663_v59, 0.0  ;;  %v5900_v45 = vmul.f32 0.2, %v8662_v50  ;;  %v5907_v0 = vmul.f32 0.2, %v8663_v59  ;;  %v8664_v53 = vadd.f32 %v5790_v28, %v4238_v30 }
 0x47a   :  { %v5915_v16 = vsel %vm5883_vm0, %v8661_v47, %v5899_v52  ;;  %vm5886_vm4 = vcmp.ge.f32.partialorder %v8666_v46, 0.0  ;;  %v5902_v4 = vmul.f32 0.2, %v8666_v46  ;;  %v8668_v6 = vadd.f32 %v5876_v51, %v4246_v34  ;;  %v9688_v41 = vld [vmem:[%s13110_s5 + $0x370] ss:$8 sps:$4 sm:$0xff]  }
 0x47b   :  { %6830 = vmatpush1.bf16.msra.mxu0 %v9661_v43  ;;  %v5923_v54 = vsel %vm5891_vm3, %v8663_v59, %v5907_v0  ;;  %vm5893_vm5 = vcmp.ge.f32.partialorder %v8667_v55, 0.0  ;;  %v5909_v48 = vmul.f32 0.2, %v8667_v55  ;;  %vm5892_vm6 = vcmp.ge.f32.partialorder %v8664_v53, 0.0  ;;  %v9691_v25 = vld [vmem:[%s13110_s5 + $0x380] ss:$8 sps:$4 sm:$0xff]  }
 0x47c   :  { %6831 = vmatprep.subr.bf16.mxu0 %v9666_v5  ;;  %v5931_v11 = vpack.c.bf16 %v5923_v54, %v5915_v16  ;;  %v5908_v44 = vmul.f32 0.2, %v8664_v53  ;;  %vm5894_vm7 = vcmp.ge.f32.partialorder %v8668_v6, 0.0  ;;  %v5910_v12 = vmul.f32 0.2, %v8668_v6 }
 0x47d   :  { %v12843_v13 = vsel %vm5885_vm1, %v8665_v61, %v5901_v63  ;;  %v12845_v14 = vsel %vm5893_vm5, %v8667_v55, %v5909_v48  ;;  %v5916_v15 = vsel %vm5884_vm2, %v8662_v50, %v5900_v45  ;;  %v5918_v18 = vsel %vm5886_vm4, %v8666_v46, %v5902_v4  ;;  %v9696_v30 = vld [vmem:[%s13110_s5 + $0x394] ss:$8 sps:$4 sm:$0xff]   ;;  %v9694_v9 = vld [vmem:[%s13110_s5 + $0x390] ss:$8 sps:$4 sm:$0xff]   ;;  %v9699_v34 = vld [vmem:[%s13110_s5 + $0x3a4] ss:$8 sps:$4 sm:$0xff]  }
 0x47e   :  { %v5933_v33 = vpack.c.bf16 %v12845_v14, %v12843_v13  ;;  %v5924_v1 = vsel %vm5892_vm6, %v8664_v53, %v5908_v44  ;;  %v5926_v19 = vsel %vm5894_vm7, %v8668_v6, %v5910_v12  ;;  %v9702_v57 = vld [vmem:[%s13110_s5 + $0x3b4] ss:$8 sps:$4 sm:$0xff]   ;;  %v9705_v47 = vld [vmem:[%s13110_s5 + $0x3c4] ss:$8 sps:$4 sm:$0xff]   ;;  %v9706_v61 = vld [vmem:[%s13110_s5 + $0x3d0] ss:$8 sps:$4 sm:$0xff]  }
 0x47f   :  { %6832 = vmatpush1.bf16.msra.mxu0 %v9664_v7  ;;  %v5932_v20 = vpack.c.bf16 %v5924_v1, %v5916_v15  ;;  %v5934_v24 = vpack.c.bf16 %v5926_v19, %v5918_v18  ;;  %v9711_v50 = vld [vmem:[%s13110_s5 + $0x3e4] ss:$8 sps:$4 sm:$0xff]   ;;  %v9709_v17 = vld [vmem:[%s13110_s5 + $0x3e0] ss:$8 sps:$4 sm:$0xff]   ;;  %v9714_v8 = vld [vmem:[%s13110_s5 + $0x3f4] ss:$8 sps:$4 sm:$0xff]  }
 0x480   :  { %6844 = vmatprep.subr.bf16.mxu0 %v9669_v10  ;;  %v9712_v52 = vld [vmem:[%s13110_s5 + $0x3f0] ss:$8 sps:$4 sm:$0xff]   ;;  %v9756_v46 = vld [vmem:[%s13112_s7 + $0xd4] ss:$8 sps:$4 sm:$0xff]   ;;  %v9759_v62 = vld [vmem:[%s13112_s7 + $0xe4] ss:$8 sps:$4 sm:$0xff]  }
 0x481   :  { %6833 = vmatprep.mubr.bf16.mxu0 %v5932_v20  ;;  %v9754_v59 = vld [vmem:[%s13112_s7 + $0xd0] ss:$8 sps:$4 sm:$0xff]   ;;  %7131 = vmatprep.subr.bf16.mxu1 %v9756_v46  ;;  %v9757_v28 = vld [vmem:[%s13112_s7 + $0xe0] ss:$8 sps:$4 sm:$0xff]   ;;  %v9762_v43 = vld [vmem:[%s13112_s7 + $0xf4] ss:$8 sps:$4 sm:$0xff]  }
 0x482   :  { %6834 = vmatmul.mubr.bf16.vlgmr.msra.gmra.mrb[12].mxu0 %v5931_v11  ;;  %7132 = vmatpush1.bf16.msra.mxu1 %v9754_v59  ;;  %v9760_v5 = vld [vmem:[%s13112_s7 + $0xf0] ss:$8 sps:$4 sm:$0xff]   ;;  %v9763_v63 = vld [vmem:[%s13113_s9 + $0x40] sm:$0xff]   ;;  %v9765_v20 = vld [vmem:[%s13113_s9 + $0x48] sm:$0xff]   ;;  %vm9796_vm0 = vmmov 0  }
 0x483   :  { %6845 = vmatpush1.bf16.msra.mxu0 %v9667_v23  ;;  %6876 = vmatprep.mubr.bf16.mxu0 %v5934_v24  ;;  %v6063_v51 = vld [vmem:[%s13114_s6] sm:$0x3]  ;;  %v9766_v23 = vld [vmem:[%s13113_s9 + $0x8] sm:$0xff]   ;;  %v9767_v24 = vld [vmem:[%s13113_s9 + $0x50] sm:$0xff]  }
 0x484   :  { %6846 = vmatprep.subr.bf16.mxu0 %v9672_v26  ;;  %7133 = vmatprep.subr.bf16.mxu1 %v9759_v62  ;;  %v6068_v45 = vrot.slane %v6063_v51, %v11798_v31  ;;  %v6072_v0 = vrot.slane %v6063_v51, %v11806_v35  ;;  %v9764_v19 = vld [vmem:[%s13113_s9] sm:$0xff]   ;;  %v9768_v26 = vld [vmem:[%s13113_s9 + $0x10] sm:$0xff]   ;;  %v9780_v62 = vld [vmem:[%s13115_s11 + $0x8] sm:$0xff]  }
 0x485   :  { %v9779_v59 = vld [vmem:[%s13115_s11] sm:$0xff]   ;;  %v9785_v51 = vld [vmem:[%s13115_s11 + $0x30] sm:$0xff]  }
 0x486   :  { %7134 = vmatpush1.bf16.msra.mxu1 %v9757_v28  ;;  %v9781_v28 = vld [vmem:[%s13115_s11 + $0x10] sm:$0xff]  }
 0x487   :  { %6847 = vmatpush1.bf16.msra.mxu0 %v9670_v29  ;;  %7135 = vmatprep.subr.bf16.mxu1 %v9762_v43  ;;  %v9769_v29 = vld [vmem:[%s13113_s9 + $0x58] sm:$0xff]  }
 0x488   :  { %6848 = vmatprep.subr.bf16.mxu0 %v9675_v21  ;;  %v9770_v21 = vld [vmem:[%s13113_s9 + $0x18] sm:$0xff]  }
 0x489   :  { %v9782_v43 = vld [vmem:[%s13115_s11 + $0x18] sm:$0xff]  }
 0x48a   :  { %7136 = vmatpush1.bf16.msra.mxu1 %v9760_v5  ;;  %v9783_v5 = vld [vmem:[%s13115_s11 + $0x20] sm:$0xff]  }
 0x48b   :  { %6849 = vmatpush1.bf16.msra.mxu0 %v9673_v22  ;;  %8561 = vmatprep.subr.bf16.mxu1 %v9763_v63  ;;  %v9771_v22 = vld [vmem:[%s13113_s9 + $0x60] sm:$0xff]   ;;  %v9784_v63 = vld [vmem:[%s13115_s11 + $0x28] sm:$0xff]  }
 0x48c   :  { %6850 = vmatprep.subr.bf16.mxu0 %v9678_v2  ;;  %v9772_v2 = vld [vmem:[%s13113_s9 + $0x20] sm:$0xff]  }
 0x48f   :  { %6851 = vmatpush1.bf16.msra.mxu0 %v9676_v38  ;;  %v9773_v38 = vld [vmem:[%s13113_s9 + $0x68] sm:$0xff]  }
 0x490   :  { %6852 = vmatprep.subr.bf16.mxu0 %v9681_v27  ;;  %v9774_v27 = vld [vmem:[%s13113_s9 + $0x28] sm:$0xff]  }
 0x493   :  { %6853 = vmatpush1.bf16.msra.mxu0 %v9679_v60  ;;  %v9775_v60 = vld [vmem:[%s13113_s9 + $0x70] sm:$0xff]  }
 0x494   :  { %6854 = vmatprep.subr.bf16.mxu0 %v9684_v36  ;;  %v9776_v36 = vld [vmem:[%s13113_s9 + $0x30] sm:$0xff]  }
 0x497   :  { %6855 = vmatpush1.bf16.msra.mxu0 %v9682_v37  ;;  %v9777_v37 = vld [vmem:[%s13113_s9 + $0x78] sm:$0xff]  }
 0x498   :  { %6856 = vmatprep.subr.bf16.mxu0 %v9687_v32  ;;  %v9778_v32 = vld [vmem:[%s13113_s9 + $0x38] sm:$0xff]  }
 0x49b   :  { %6857 = vmatpush1.bf16.msra.mxu0 %v9685_v39  ;;  %v9795_v39 = vmov 0.0  }
 0x49c   :  { %6858 = vmatprep.subr.bf16.mxu0 %v9690_v40  ;;  %v6933_v40 = vld [vmem:[%s13116_s8] sm:$0x3] }
 0x49f   :  { %6859 = vmatpush1.bf16.msra.mxu0 %v9688_v41  ;;  %v6938_v41 = vrot.slane %v6933_v40, %v11798_v31 }
 0x4a0   :  { %6860 = vmatprep.subr.bf16.mxu0 %v9693_v42  ;;  %v6942_v42 = vrot.slane %v6933_v40, %v11806_v35 }
 0x4a3   :  { %6861 = vmatpush1.bf16.msra.mxu0 %v9691_v25 }
 0x4a4   :  { %6862 = vmatprep.subr.bf16.mxu0 %v9696_v30 }
 0x4a7   :  { %6863 = vmatpush1.bf16.msra.mxu0 %v9694_v9 }
 0x4a8   :  { %6864 = vmatprep.subr.bf16.mxu0 %v9699_v34 }
 0x4ab   :  { %6865 = vmatpush1.bf16.msra.mxu0 %v9697_v56 }
 0x4ac   :  { %6866 = vmatprep.subr.bf16.mxu0 %v9702_v57 }
 0x4af   :  { %6867 = vmatpush1.bf16.msra.mxu0 %v9700_v58 }
 0x4b0   :  { %6868 = vmatprep.subr.bf16.mxu0 %v9705_v47 }
 0x4b3   :  { %6869 = vmatpush1.bf16.msra.mxu0 %v9703_v3 }
 0x4b4   :  { %6870 = vmatprep.subr.bf16.mxu0 %v9708_v49 }
 0x4b7   :  { %6871 = vmatpush1.bf16.msra.mxu0 %v9706_v61 }
 0x4b8   :  { %6872 = vmatprep.subr.bf16.mxu0 %v9711_v50 }
 0x4bb   :  { %6873 = vmatpush1.bf16.msra.mxu0 %v9709_v17 }
 0x4bc   :  { %6874 = vmatprep.subr.bf16.mxu0 %v9714_v8 }
 0x4bf   :  { %6875 = vmatpush1.bf16.msra.mxu0 %v9712_v52 }
 0x4c2   :  { %6877 = vmatmul.mubr.bf16.vlgmr.msra.gmra.mrb[12].mxu0 %v5933_v33 }
 0x595   :  { %v6878_v55 = vpop.f32.mrb[12].mxu0 }
 0x596   :  { %v8669_v53 = vadd.f32 %v6878_v55, %v6068_v45  ;;  %v6880_v16 = vpop.f32.mrb[13].mxu0  ;;  %v8526_v55 = vld [vmem:[%s13118_s10] ss:$0 sm:$0xff] }
 0x597   :  { %v8670_v4 = vadd.f32 %v6880_v16, %v6072_v0  ;;  %v6882_v6 = vpop.f32.mrb[14].mxu0 }
 0x598   :  { %v6891_v7 = vmul.f32 0.2, %v8669_v53  ;;  %v8671_v54 = vadd.f32 %v6882_v6, %v6068_v45  ;;  %v6884_v48 = vpop.f32.mrb[15].mxu0  ;;  %vm6887_vm8 = vcmp.ge.f32.partialorder %v8669_v53, 0.0  ;;  %v9786_v45 = vld [vmem:[%s13115_s11 + $0x38] sm:$0xff]  }
 0x599   :  { %v6892_v10 = vmul.f32 0.2, %v8670_v4  ;;  %v8672_v11 = vadd.f32 %v6884_v48, %v6072_v0  ;;  %vm6888_vm9 = vcmp.ge.f32.partialorder %v8670_v4, 0.0 }
 0x59a   :  { %vm6889_vm10 = vcmp.ge.f32.partialorder %v8671_v54, 0.0  ;;  %v6893_v44 = vmul.f32 0.2, %v8671_v54  ;;  %v6895_v13 = vsel %vm6887_vm8, %v8669_v53, %v6891_v7 }
 0x59b   :  { %vm6890_vm11 = vcmp.ge.f32.partialorder %v8672_v11, 0.0  ;;  %v6894_v12 = vmul.f32 0.2, %v8672_v11  ;;  %v6896_v33 = vsel %vm6888_vm9, %v8670_v4, %v6892_v10 }
 0x59c   :  { %v6897_v14 = vsel %vm6889_vm10, %v8671_v54, %v6893_v44 }
 0x59d   :  { %v6899_v15 = vpack.c.bf16 %v6897_v14, %v6895_v13  ;;  %v6898_v1 = vsel %vm6890_vm11, %v8672_v11, %v6894_v12  ;;  %v9787_v13 = vld [vmem:[%s13117_s13] sm:$0xff]  }
 0x59e   :  { %v6900_v18 = vpack.c.bf16 %v6898_v1, %v6896_v33  ;;  %v9789_v33 = vld [vmem:[%s13117_s13 + $0x10] sm:$0xff]   ;;  %v9790_v1 = vld [vmem:[%s13117_s13 + $0x18] sm:$0xff]  }
 0x5a0   :  { %7137 = vmatprep.mubr.bf16.mxu1 %v6900_v18  ;;  %v9791_v18 = vld [vmem:[%s13117_s13 + $0x20] sm:$0xff]  }
 0x5a1   :  { %7138 = vmatmul.mubr.bf16.vlgmr.msra.gmra.mrb[16].mxu1 %v6899_v15  ;;  %v9788_v15 = vld [vmem:[%s13117_s13 + $0x8] sm:$0xff]  }
 0x5a2   :  { %8562 = vmatpush3.bf16.msra.mxu1 %v9764_v19  ;;  %v9792_v19 = vld [vmem:[%s13117_s13 + $0x28] sm:$0xff]  }
 0x5a3   :  { %8563 = vmatprep.subr.bf16.mxu1 %v9765_v20  ;;  %v9793_v20 = vld [vmem:[%s13117_s13 + $0x30] sm:$0xff]  }
 0x5a6   :  { %8564 = vmatpush3.bf16.msra.mxu1 %v9766_v23  ;;  %v9794_v23 = vld [vmem:[%s13117_s13 + $0x38] sm:$0xff]  }
 0x5a7   :  { %8565 = vmatprep.subr.bf16.mxu1 %v9767_v24  ;;  %v8543_v24 = vld [vmem:[%s13119_s12] ss:$0 sm:$0xff] }
 0x5aa   :  { %8566 = vmatpush3.bf16.msra.mxu1 %v9768_v26 }
 0x5ab   :  { %8567 = vmatprep.subr.bf16.mxu1 %v9769_v29 }
 0x5ae   :  { %8568 = vmatpush3.bf16.msra.mxu1 %v9770_v21 }
 0x5af   :  { %8569 = vmatprep.subr.bf16.mxu1 %v9771_v22 }
 0x5b2   :  { %8570 = vmatpush3.bf16.msra.mxu1 %v9772_v2 }
 0x5b3   :  { %8571 = vmatprep.subr.bf16.mxu1 %v9773_v38 }
 0x5b6   :  { %8572 = vmatpush3.bf16.msra.mxu1 %v9774_v27 }
 0x5b7   :  { %8573 = vmatprep.subr.bf16.mxu1 %v9775_v60 }
 0x5ba   :  { %8574 = vmatpush3.bf16.msra.mxu1 %v9776_v36 }
 0x5bb   :  { %8575 = vmatprep.subr.bf16.mxu1 %v9777_v37 }
 0x5be   :  { %8576 = vmatpush3.bf16.msra.mxu1 %v9778_v32 }
 0x5bf   :  { %8601 = vmatprep.subr.bf16.mxu1 %v9795_v39 }
 0x674   :  { %v7139_v25 = vpop.f32.mrb[16].mxu1 }
 0x675   :  { %v7140_v30 = vadd.f32 %v7139_v25, %v6938_v41  ;;  %v7141_v9 = vpop.f32.mrb[17].mxu1 }
 0x676   :  { %v7142_v34 = vadd.f32 %v7141_v9, %v6942_v42  ;;  %v7143_v56 = vpop.f32.mrb[18].mxu1 }
 0x677   :  { %v7152_v57 = vmul.f32 0.2, %v7140_v30  ;;  %v7144_v58 = vadd.f32 %v7143_v56, %v6938_v41  ;;  %v7145_v47 = vpop.f32.mrb[19].mxu1  ;;  %vm7148_vm12 = vcmp.ge.f32.partialorder %v7140_v30, 0.0 }
 0x678   :  { %v7153_v3 = vmul.f32 0.2, %v7142_v34  ;;  %v7146_v49 = vadd.f32 %v7145_v47, %v6942_v42  ;;  %vm7149_vm13 = vcmp.ge.f32.partialorder %v7142_v34, 0.0 }
 0x679   :  { %vm7150_vm14 = vcmp.ge.f32.partialorder %v7144_v58, 0.0  ;;  %v7154_v61 = vmul.f32 0.2, %v7144_v58  ;;  %v7156_v17 = vsel %vm7148_vm12, %v7140_v30, %v7152_v57 }
 0x67a   :  { %vm7151_vm15 = vcmp.ge.f32.partialorder %v7146_v49, 0.0  ;;  %v7155_v50 = vmul.f32 0.2, %v7146_v49  ;;  %v7157_v35 = vsel %vm7149_vm13, %v7142_v34, %v7153_v3 }
 0x67b   :  { %v7158_v31 = vsel %vm7150_vm14, %v7144_v58, %v7154_v61 }
 0x67c   :  { %v7160_v8 = vpack.c.bf16 %v7158_v31, %v7156_v17  ;;  %v7159_v52 = vsel %vm7151_vm15, %v7146_v49, %v7155_v50 }
 0x67d   :  { %v7161_v46 = vpack.c.bf16 %v7159_v52, %v7157_v35 }
 0x67f   :  { %7329 = vmatprep.mubr.bf16.mxu1 %v7161_v46 }
 0x680   :  { %7330 = vmatmul.mubr.bf16.vlgmr.msra.gmra.mrb[20].mxu1 %v7160_v8 }
 0x681   :  { %8602 = vmatpush3.bf16.msra.mxu1 %v9779_v59  ;;  %8617 = vmatprep.mubr.msk.bf16.mxu1 %vm9796_vm0, %v9795_v39 }
 0x682   :  { %8603 = vmatprep.subr.bf16.mxu1 %v9795_v39 }
 0x685   :  { %8604 = vmatpush3.bf16.msra.mxu1 %v9780_v62 }
 0x686   :  { %8605 = vmatprep.subr.bf16.mxu1 %v9795_v39 }
 0x689   :  { %8606 = vmatpush3.bf16.msra.mxu1 %v9781_v28 }
 0x68a   :  { %8607 = vmatprep.subr.bf16.mxu1 %v9795_v39 }
 0x68d   :  { %8608 = vmatpush3.bf16.msra.mxu1 %v9782_v43 }
 0x68e   :  { %8609 = vmatprep.subr.bf16.mxu1 %v9795_v39 }
 0x691   :  { %8610 = vmatpush3.bf16.msra.mxu1 %v9783_v5 }
 0x692   :  { %8611 = vmatprep.subr.bf16.mxu1 %v9795_v39 }
 0x695   :  { %8612 = vmatpush3.bf16.msra.mxu1 %v9784_v63 }
 0x696   :  { %8613 = vmatprep.subr.bf16.mxu1 %v9795_v39 }
 0x699   :  { %8614 = vmatpush3.bf16.msra.mxu1 %v9785_v51 }
 0x69a   :  { %8615 = vmatprep.subr.bf16.mxu1 %v9795_v39 }
 0x69d   :  { %8616 = vmatpush3.bf16.msra.mxu1 %v9786_v45 }
 0x69e   :  { %8621 = vmatprep.subr.bf16.mxu1 %v9795_v39 }
 0x753   :  { %v8577_v0 = vpop.f32.mrb[20].mxu1 }
 0x754   :  { %v8578_v53 = vpop.f32.mrb[21].mxu1 }
 0x755   :  { %v8579_v16 = vadd.f32 %v8578_v53, %v8577_v0  ;;  %v8580_v4 = vpop.f32.mrb[22].mxu1 }
 0x756   :  { %v8581_v6 = vpop.f32.mrb[23].mxu1 }
 0x757   :  { %v7332_v7 = vadd.f32 %v8579_v16, %v8526_v55  ;;  %v8582_v54 = vadd.f32 %v8581_v6, %v8580_v4 }
 0x759   :  { %v7340_v48 = vmul.f32 0.2, %v7332_v7  ;;  %v7335_v10 = vadd.f32 %v8582_v54, %v8526_v55  ;;  %vm7338_vm1 = vcmp.ge.f32.partialorder %v7332_v7, 0.0 }
 0x75b   :  { %vm7339_vm2 = vcmp.ge.f32.partialorder %v7335_v10, 0.0  ;;  %v7341_v11 = vmul.f32 0.2, %v7335_v10  ;;  %v7342_v44 = vsel %vm7338_vm1, %v7332_v7, %v7340_v48 }
 0x75d   :  { %v7343_v12 = vsel %vm7339_vm2, %v7335_v10, %v7341_v11 }
 0x75e   :  { %v7344_v14 = vpack.c.bf16 %v7343_v12, %v7342_v44 }
 0x760   :  { %8618 = vmatmul.mubr.bf16.vlgmr.msra.gmra.mrb[24].mxu1 %v7344_v14 }
 0x761   :  { %8622 = vmatpush3.bf16.msra.mxu1 %v9787_v13  ;;  %8637 = vmatprep.mubr.msk.bf16.mxu1 %vm9796_vm0, %v9795_v39 }
 0x762   :  { %8623 = vmatprep.subr.bf16.mxu1 %v9795_v39 }
 0x765   :  { %8624 = vmatpush3.bf16.msra.mxu1 %v9788_v15 }
 0x766   :  { %8625 = vmatprep.subr.bf16.mxu1 %v9795_v39 }
 0x769   :  { %8626 = vmatpush3.bf16.msra.mxu1 %v9789_v33 }
 0x76a   :  { %8627 = vmatprep.subr.bf16.mxu1 %v9795_v39 }
 0x76d   :  { %8628 = vmatpush3.bf16.msra.mxu1 %v9790_v1 }
 0x76e   :  { %8629 = vmatprep.subr.bf16.mxu1 %v9795_v39 }
 0x771   :  { %8630 = vmatpush3.bf16.msra.mxu1 %v9791_v18 }
 0x772   :  { %8631 = vmatprep.subr.bf16.mxu1 %v9795_v39 }
 0x775   :  { %8632 = vmatpush3.bf16.msra.mxu1 %v9792_v19 }
 0x776   :  { %8633 = vmatprep.subr.bf16.mxu1 %v9795_v39 }
 0x779   :  { %8634 = vmatpush3.bf16.msra.mxu1 %v9793_v20 }
 0x77a   :  { %8635 = vmatprep.subr.bf16.mxu1 %v9795_v39  ;;  %v8552_v39 = vld [vmem:[%s13120_s14] ss:$0 sm:$0xff] }
 0x77d   :  { %8636 = vmatpush3.bf16.msra.mxu1 %v9794_v23 }
 0x833   :  { %v7450_v26 = vpop.f32.mrb[24].mxu1 }
 0x834   :  { %v7451_v29 = vadd.f32 %v8543_v24, %v7450_v26  ;;  %v8619_v21 = vpop.f32.mrb[25].mxu1 }
 0x835   :  { %v7453_v22 = vpop.f32.mrb[26].mxu1 }
 0x836   :  { %v7459_v2 = vmul.f32 0.2, %v7451_v29  ;;  %v7454_v38 = vadd.f32 %v8543_v24, %v7453_v22  ;;  %v8620_v27 = vpop.f32.mrb[27].mxu1  ;;  %vm7457_vm3 = vcmp.ge.f32.partialorder %v7451_v29, 0.0 }
 0x838   :  { %vm7458_vm4 = vcmp.ge.f32.partialorder %v7454_v38, 0.0  ;;  %v7460_v60 = vmul.f32 0.2, %v7454_v38  ;;  %v7461_v36 = vsel %vm7457_vm3, %v7451_v29, %v7459_v2 }
 0x83a   :  { %v7462_v37 = vsel %vm7458_vm4, %v7454_v38, %v7460_v60 }
 0x83b   :  { %v7463_v32 = vpack.c.bf16 %v7462_v37, %v7461_v36 }
 0x83d   :  { %8638 = vmatmul.mubr.bf16.vlgmr.msra.gmra.mrb[28].mxu1 %v7463_v32 }
 0x910   :  { %v7569_v40 = vpop.f32.mrb[28].mxu1 }
 0x911   :  { %v7570_v41 = vadd.f32 %v8552_v39, %v7569_v40  ;;  %v8639_v42 = vpop.f32.mrb[29].mxu1 }
 0x912   :  { %v7572_v25 = vpop.f32.mrb[30].mxu1 }
 0x913   :  { %7576 = vst [vmem:[%s13121_s15] sm:$0xff] %v7570_v41  ;;  %v7573_v30 = vadd.f32 %v8552_v39, %v7572_v25  ;;  %v8640_v9 = vpop.f32.mrb[31].mxu1 }
 0x915   :  { %7577 = vst [vmem:[%s13121_s15 + $0x8] sm:$0xff] %v7573_v30 }

</bundles_post_ra>
